<compile_context>
chip_gen: v7x
topology: tpu7x:2x2x1
jax: 0.10.0
libtpu: 0.0.40
codegen_flags: <defaults>
</compile_context>

<pallas_src>
import math
import functools

import jax
import jax.numpy as jnp
from jax import lax
from jax.experimental import pallas as pl
from jax.experimental.pallas import tpu as pltpu


# ---------------------------------------------------------------------------
# In-kernel building blocks (pure value functions on VMEM-resident data)
# ---------------------------------------------------------------------------

def _dotf(x, w):
    """x @ w with f32 accumulation; x cast to the (possibly bf16) weight dtype."""
    return jnp.dot(x.astype(w.dtype), w, preferred_element_type=jnp.float32)


def _layer_norm(x, a, b, eps=1e-6):
    """Annotated-Transformer LayerNorm: a*(x-mean)/(std+eps)+b (unbiased std).
    x: (R, D); a, b: (1, D)."""
    mean = jnp.mean(x, axis=-1, keepdims=True)
    var = jnp.sum((x - mean) ** 2, axis=-1, keepdims=True) / (x.shape[-1] - 1)
    return a * (x - mean) / (jnp.sqrt(var) + eps) + b


def _mha(xq, xkv, amask, wq, bq, wk, bk, wv, bv, wo, bo,
         *, n_heads, batch, tq, tk):
    """Multi-head attention with merged-head projections.
    xq: (B*Tq, D), xkv: (B*Tk, D); amask: (B, 1|Tq, Tk) additive f32 mask.
    wq/wk/wv/wo: (D, D) (1/sqrt(dk) already baked into wq/bq)."""
    d = xq.shape[-1]
    dk = d // n_heads
    q = _dotf(xq, wq) + bq            # (B*Tq, D)
    k = _dotf(xkv, wk) + bk           # (B*Tk, D)
    v = _dotf(xkv, wv) + bv           # (B*Tk, D)

    ctx_rows = []
    for b in range(batch):            # static unroll; only tiny dots live here
        qb = q[b * tq:(b + 1) * tq]   # (Tq, D)
        kb = k[b * tk:(b + 1) * tk]   # (Tk, D)
        vb = v[b * tk:(b + 1) * tk]
        am = amask[b]                 # (1|Tq, Tk)
        heads = []
        for hh in range(n_heads):
            qh = qb[:, hh * dk:(hh + 1) * dk]
            kh = kb[:, hh * dk:(hh + 1) * dk]
            vh = vb[:, hh * dk:(hh + 1) * dk]
            # scores = q @ k.T (contract minor dims; no transpose materialized)
            s = lax.dot_general(qh, kh, (((1,), (1,)), ((), ())),
                                preferred_element_type=jnp.float32)
            s = s + am                                       # additive mask
            s = s - jnp.max(s, axis=-1, keepdims=True)
            p = jnp.exp(s)
            p = p / jnp.sum(p, axis=-1, keepdims=True)       # exact softmax
            heads.append(jnp.dot(p, vh,
                                 preferred_element_type=jnp.float32))
        ctx_rows.append(jnp.concatenate(heads, axis=-1))     # (Tq, D)
    ctx = jnp.concatenate(ctx_rows, axis=0)                  # (B*Tq, D)
    return _dotf(ctx, wo) + bo


def _ffn(x, w1, b1, w2, b2):
    """w2(relu(w1 x + b1)) + b2 — d_ff intermediate never leaves vregs/VMEM."""
    hmid = jnp.maximum(_dotf(x, w1) + b1, 0.0)
    return _dotf(hmid, w2) + b2


# ---------------------------------------------------------------------------
# Fused whole-model kernel (single invocation; layer loop is in-kernel)
# ---------------------------------------------------------------------------

def _individual_tf_kernel(
        src_ref, tgt_ref, amask_src_ref, amask_tgt_ref, pe_src_ref, pe_tgt_ref,
        semb_w_ref, semb_b_ref, temb_w_ref, temb_b_ref,
        # encoder stacked params (leading N axis)
        e_ln1a_ref, e_ln1b_ref, e_wq_ref, e_bq_ref, e_wk_ref, e_bk_ref,
        e_wv_ref, e_bv_ref, e_wo_ref, e_bo_ref, e_ln2a_ref, e_ln2b_ref,
        e_w1_ref, e_b1_ref, e_w2_ref, e_b2_ref,
        enc_fa_ref, enc_fb_ref,
        # decoder stacked params
        d_ln1a_ref, d_ln1b_ref, d_wq1_ref, d_bq1_ref, d_wk1_ref, d_bk1_ref,
        d_wv1_ref, d_bv1_ref, d_wo1_ref, d_bo1_ref, d_ln2a_ref, d_ln2b_ref,
        d_wq2_ref, d_bq2_ref, d_wk2_ref, d_bk2_ref, d_wv2_ref, d_bv2_ref,
        d_wo2_ref, d_bo2_ref, d_ln3a_ref, d_ln3b_ref, d_w1_ref, d_b1_ref,
        d_w2_ref, d_b2_ref,
        dec_fa_ref, dec_fb_ref, gen_w_ref, gen_b_ref,
        out_ref,
        *, n_heads, n_layers, batch, ts, tt):

    amask_src = amask_src_ref[...]    # (B, 1, Ts)   additive f32
    amask_tgt = amask_tgt_ref[...]    # (B, Tt, Tt)  additive f32

    # ------------------------ Encoder ------------------------
    # LinearEmbedding * sqrt(d_model) (scale baked into weights) + PE.
    x = _dotf(src_ref[...], semb_w_ref[...]) + semb_b_ref[...]
    x = x + pe_src_ref[...]                               # (B*Ts, D)

    for l in range(n_layers):
        nx = _layer_norm(x, e_ln1a_ref[l], e_ln1b_ref[l])
        x = x + _mha(nx, nx, amask_src,
                     e_wq_ref[l], e_bq_ref[l], e_wk_ref[l], e_bk_ref[l],
                     e_wv_ref[l], e_bv_ref[l], e_wo_ref[l], e_bo_ref[l],
                     n_heads=n_heads, batch=batch, tq=ts, tk=ts)
        nx = _layer_norm(x, e_ln2a_ref[l], e_ln2b_ref[l])
        x = x + _ffn(nx, e_w1_ref[l], e_b1_ref[l], e_w2_ref[l], e_b2_ref[l])

    memory = _layer_norm(x, enc_fa_ref[...], enc_fb_ref[...])   # stays in VMEM

    # ------------------------ Decoder ------------------------
    y = _dotf(tgt_ref[...], temb_w_ref[...]) + temb_b_ref[...]
    y = y + pe_tgt_ref[...]                               # (B*Tt, D)

    for l in range(n_layers):
        ny = _layer_norm(y, d_ln1a_ref[l], d_ln1b_ref[l])
        y = y + _mha(ny, ny, amask_tgt,
                     d_wq1_ref[l], d_bq1_ref[l], d_wk1_ref[l], d_bk1_ref[l],
                     d_wv1_ref[l], d_bv1_ref[l], d_wo1_ref[l], d_bo1_ref[l],
                     n_heads=n_heads, batch=batch, tq=tt, tk=tt)
        ny = _layer_norm(y, d_ln2a_ref[l], d_ln2b_ref[l])
        y = y + _mha(ny, memory, amask_src,
                     d_wq2_ref[l], d_bq2_ref[l], d_wk2_ref[l], d_bk2_ref[l],
                     d_wv2_ref[l], d_bv2_ref[l], d_wo2_ref[l], d_bo2_ref[l],
                     n_heads=n_heads, batch=batch, tq=tt, tk=ts)
        ny = _layer_norm(y, d_ln3a_ref[l], d_ln3b_ref[l])
        y = y + _ffn(ny, d_w1_ref[l], d_b1_ref[l], d_w2_ref[l], d_b2_ref[l])

    # Final LayerNorm + lane-padded generator projection (dense 128-lane store).
    yn = _layer_norm(y, dec_fa_ref[...], dec_fb_ref[...])
    out_ref[...] = _dotf(yn, gen_w_ref[...]) + gen_b_ref[...]


# ---------------------------------------------------------------------------
# pallas_call wrapper
# ---------------------------------------------------------------------------

_ENC_KEYS = ('ln1_a', 'ln1_b',
             'wq', 'bq', 'wk', 'bk', 'wv', 'bv', 'wo', 'bo',
             'ln2_a', 'ln2_b',
             'w1', 'b1', 'w2', 'b2')

_DEC_KEYS = ('ln1_a', 'ln1_b',
             'wq1', 'bq1', 'wk1', 'bk1', 'wv1', 'bv1', 'wo1', 'bo1',
             'ln2_a', 'ln2_b',
             'wq2', 'bq2', 'wk2', 'bk2', 'wv2', 'bv2', 'wo2', 'bo2',
             'ln3_a', 'ln3_b',
             'w1', 'b1', 'w2', 'b2')


def _whole_spec(arr):
    """Full-array block, constant block index (fetched once)."""
    nd = arr.ndim
    return pl.BlockSpec(arr.shape, lambda i, _nd=nd: (0,) * _nd)


def individual_tf_forward(params, src, tgt, src_mask, tgt_mask,
                          *, h, d_model, dec_out):
    B, Ts, _ = src.shape
    _, Tt, _ = tgt.shape
    n_layers = params['encoder']['wq'].shape[0]
    out_pad = params['generator']['w'].shape[-1]

    # Batch folded into the sublane dim: activations are (B*T, D).
    src_flat = src.reshape(B * Ts, -1)
    tgt_flat = tgt.reshape(B * Tt, -1)
    pe = params['pe']
    pe_src = jnp.tile(pe[:Ts], (B, 1))            # (B*Ts, D)
    pe_tgt = jnp.tile(pe[:Tt], (B, 1))            # (B*Tt, D)

    # Additive masks (0 / -1e9), computed once in the wrapper.
    amask_src = jnp.where(src_mask == 0, -1e9, 0.0).astype(jnp.float32)
    amask_tgt = jnp.where(tgt_mask == 0, -1e9, 0.0).astype(jnp.float32)

    args = [src_flat, tgt_flat, amask_src, amask_tgt, pe_src, pe_tgt,
            params['src_embed']['w'], params['src_embed']['b'],
            params['tgt_embed']['w'], params['tgt_embed']['b']]
    args += [params['encoder'][k] for k in _ENC_KEYS]
    args += [params['enc_norm']['a'], params['enc_norm']['b']]
    args += [params['decoder'][k] for k in _DEC_KEYS]
    args += [params['dec_norm']['a'], params['dec_norm']['b'],
             params['generator']['w'], params['generator']['b']]

    kern = functools.partial(_individual_tf_kernel, n_heads=h,
                             n_layers=n_layers, batch=B, ts=Ts, tt=Tt)

    out = pl.pallas_call(
        kern,
        out_shape=jax.ShapeDtypeStruct((B * Tt, out_pad), jnp.float32),
        grid=(1,),
        in_specs=[_whole_spec(a) for a in args],
        out_specs=pl.BlockSpec((B * Tt, out_pad), lambda i: (0, 0)),
        compiler_params=pltpu.CompilerParams(
            dimension_semantics=("arbitrary",)),
    )(*args)

    # Strip the generator lane padding and restore (B, Tt, dec_out).
    return out.reshape(B, Tt, out_pad)[..., :dec_out]


# ---------------------------------------------------------------------------
# Deterministic parameter construction (torch-equivalent synthetic init)
# ---------------------------------------------------------------------------

def positional_encoding(max_len, d_model):
    pos = jnp.arange(max_len, dtype=jnp.float32)[:, None]
    div = jnp.exp(jnp.arange(0, d_model, 2, dtype=jnp.float32)
                  * -(math.log(10000.0) / d_model))
    pe = jnp.zeros((max_len, d_model), jnp.float32)
    pe = pe.at[:, 0::2].set(jnp.sin(pos * div))
    pe = pe.at[:, 1::2].set(jnp.cos(pos * div))
    return pe


def init_params(key, enc_inp, dec_inp, dec_out, d_model, d_ff, h, N,
                max_len=64, out_pad=128):
    keys = iter(jax.random.split(key, 256))
    dk = d_model // h

    def xavier(fan_in, fan_out):
        bound = math.sqrt(6.0 / (fan_in + fan_out))
        w = jax.random.uniform(next(keys), (fan_out, fan_in), jnp.float32,
                               -bound, bound)
        return w.T                                  # stored (in, out) for x @ w

    def stacked(fan_in, fan_out, scale=1.0):
        # Projection weights in bf16 (MXU-native); biases stay f32.
        w = jnp.stack([xavier(fan_in, fan_out) for _ in range(N)]) * scale
        b = jnp.zeros((N, 1, fan_out), jnp.float32)   # bias scale folded too (zero)
        return w.astype(jnp.bfloat16), b

    def stacked_ln():
        return (jnp.ones((N, 1, d_model), jnp.float32),
                jnp.zeros((N, 1, d_model), jnp.float32))

    q_scale = 1.0 / math.sqrt(dk)       # bake attention scale into Wq / bq

    enc = {}
    enc['ln1_a'], enc['ln1_b'] = stacked_ln()
    enc['wq'], enc['bq'] = stacked(d_model, d_model, scale=q_scale)
    enc['wk'], enc['bk'] = stacked(d_model, d_model)
    enc['wv'], enc['bv'] = stacked(d_model, d_model)
    enc['wo'], enc['bo'] = stacked(d_model, d_model)
    enc['ln2_a'], enc['ln2_b'] = stacked_ln()
    enc['w1'], enc['b1'] = stacked(d_model, d_ff)
    enc['w2'], enc['b2'] = stacked(d_ff, d_model)

    dec = {}
    dec['ln1_a'], dec['ln1_b'] = stacked_ln()
    dec['wq1'], dec['bq1'] = stacked(d_model, d_model, scale=q_scale)
    dec['wk1'], dec['bk1'] = stacked(d_model, d_model)
    dec['wv1'], dec['bv1'] = stacked(d_model, d_model)
    dec['wo1'], dec['bo1'] = stacked(d_model, d_model)
    dec['ln2_a'], dec['ln2_b'] = stacked_ln()
    dec['wq2'], dec['bq2'] = stacked(d_model, d_model, scale=q_scale)
    dec['wk2'], dec['bk2'] = stacked(d_model, d_model)
    dec['wv2'], dec['bv2'] = stacked(d_model, d_model)
    dec['wo2'], dec['bo2'] = stacked(d_model, d_model)
    dec['ln3_a'], dec['ln3_b'] = stacked_ln()
    dec['w1'], dec['b1'] = stacked(d_model, d_ff)
    dec['w2'], dec['b2'] = stacked(d_ff, d_model)

    # Generator: lane-padded to out_pad (>=128) for dense stores; sliced in wrapper.
    gw = xavier(d_model, dec_out)
    gen_w = jnp.zeros((d_model, out_pad), jnp.float32).at[:, :dec_out].set(gw)
    gen = {'w': gen_w.astype(jnp.bfloat16),
           'b': jnp.zeros((1, out_pad), jnp.float32)}

    def embed(inp_size):
        # LinearEmbedding: sqrt(d_model) baked into W and b (b is zero anyway).
        w = xavier(inp_size, d_model) * math.sqrt(d_model)
        return {'w': w,                                   # f32 (tiny K dim)
                'b': jnp.zeros((1, d_model), jnp.float32)}

    def unit_ln():
        return {'a': jnp.ones((1, d_model), jnp.float32),
                'b': jnp.zeros((1, d_model), jnp.float32)}

    return {
        'src_embed': embed(enc_inp),
        'tgt_embed': embed(dec_inp),
        'encoder': enc,
        'enc_norm': unit_ln(),
        'decoder': dec,
        'dec_norm': unit_ln(),
        'generator': gen,
        'pe': positional_encoding(max_len, d_model),
    }


# ---------------------------------------------------------------------------
# Main
# ---------------------------------------------------------------------------

if __name__ == "__main__":
    # Small shapes consistent with IndividualTF(enc_inp_size=2, dec_inp_size=3, dec_out_size=3)
    B, S_src, S_tgt = 2, 8, 8
    enc_inp, dec_inp, dec_out = 2, 3, 3
    d_model, d_ff, h, N = 32, 64, 4, 2
    OUT_PAD = 128

    key = jax.random.PRNGKey(0)
    k_params, k_src, k_tgt = jax.random.split(key, 3)
    params = init_params(k_params, enc_inp, dec_inp, dec_out,
                         d_model, d_ff, h, N, out_pad=OUT_PAD)

    src = jax.random.normal(k_src, (B, S_src, enc_inp), jnp.float32)
    tgt = jax.random.normal(k_tgt, (B, S_tgt, dec_inp), jnp.float32)
    src_mask = jnp.ones((B, 1, S_src), jnp.int32)
    tgt_mask = jnp.broadcast_to(
        jnp.tril(jnp.ones((S_tgt, S_tgt), jnp.int32))[None], (B, S_tgt, S_tgt))

    fwd = jax.jit(functools.partial(individual_tf_forward,
                                    h=h, d_model=d_model, dec_out=dec_out))
    out = fwd(params, src, tgt, src_mask, tgt_mask)
    out = jax.block_until_ready(out)
    assert out.shape == (B, S_tgt, dec_out), out.shape
    assert bool(jnp.all(jnp.isfinite(out)))
    print("KERNEL_OK")
</pallas_src>

<mosaic_0001>
module attributes {stable_mosaic.version = 11 : i64} {
  func.func @_individual_tf_kernel(%arg0: i32, %arg1: memref<16x2xf32, #tpu.memory_space<vmem>>, %arg2: memref<16x3xf32, #tpu.memory_space<vmem>>, %arg3: memref<2x1x8xf32, #tpu.memory_space<vmem>>, %arg4: memref<2x8x8xf32, #tpu.memory_space<vmem>>, %arg5: memref<16x32xf32, #tpu.memory_space<vmem>>, %arg6: memref<16x32xf32, #tpu.memory_space<vmem>>, %arg7: memref<2x32xf32, #tpu.memory_space<vmem>>, %arg8: memref<1x32xf32, #tpu.memory_space<vmem>>, %arg9: memref<3x32xf32, #tpu.memory_space<vmem>>, %arg10: memref<1x32xf32, #tpu.memory_space<vmem>>, %arg11: memref<2x1x32xf32, #tpu.memory_space<vmem>>, %arg12: memref<2x1x32xf32, #tpu.memory_space<vmem>>, %arg13: memref<2x32x32xbf16, #tpu.memory_space<vmem>>, %arg14: memref<2x1x32xf32, #tpu.memory_space<vmem>>, %arg15: memref<2x32x32xbf16, #tpu.memory_space<vmem>>, %arg16: memref<2x1x32xf32, #tpu.memory_space<vmem>>, %arg17: memref<2x32x32xbf16, #tpu.memory_space<vmem>>, %arg18: memref<2x1x32xf32, #tpu.memory_space<vmem>>, %arg19: memref<2x32x32xbf16, #tpu.memory_space<vmem>>, %arg20: memref<2x1x32xf32, #tpu.memory_space<vmem>>, %arg21: memref<2x1x32xf32, #tpu.memory_space<vmem>>, %arg22: memref<2x1x32xf32, #tpu.memory_space<vmem>>, %arg23: memref<2x32x64xbf16, #tpu.memory_space<vmem>>, %arg24: memref<2x1x64xf32, #tpu.memory_space<vmem>>, %arg25: memref<2x64x32xbf16, #tpu.memory_space<vmem>>, %arg26: memref<2x1x32xf32, #tpu.memory_space<vmem>>, %arg27: memref<1x32xf32, #tpu.memory_space<vmem>>, %arg28: memref<1x32xf32, #tpu.memory_space<vmem>>, %arg29: memref<2x1x32xf32, #tpu.memory_space<vmem>>, %arg30: memref<2x1x32xf32, #tpu.memory_space<vmem>>, %arg31: memref<2x32x32xbf16, #tpu.memory_space<vmem>>, %arg32: memref<2x1x32xf32, #tpu.memory_space<vmem>>, %arg33: memref<2x32x32xbf16, #tpu.memory_space<vmem>>, %arg34: memref<2x1x32xf32, #tpu.memory_space<vmem>>, %arg35: memref<2x32x32xbf16, #tpu.memory_space<vmem>>, %arg36: memref<2x1x32xf32, #tpu.memory_space<vmem>>, %arg37: memref<2x32x32xbf16, #tpu.memory_space<vmem>>, %arg38: memref<2x1x32xf32, #tpu.memory_space<vmem>>, %arg39: memref<2x1x32xf32, #tpu.memory_space<vmem>>, %arg40: memref<2x1x32xf32, #tpu.memory_space<vmem>>, %arg41: memref<2x32x32xbf16, #tpu.memory_space<vmem>>, %arg42: memref<2x1x32xf32, #tpu.memory_space<vmem>>, %arg43: memref<2x32x32xbf16, #tpu.memory_space<vmem>>, %arg44: memref<2x1x32xf32, #tpu.memory_space<vmem>>, %arg45: memref<2x32x32xbf16, #tpu.memory_space<vmem>>, %arg46: memref<2x1x32xf32, #tpu.memory_space<vmem>>, %arg47: memref<2x32x32xbf16, #tpu.memory_space<vmem>>, %arg48: memref<2x1x32xf32, #tpu.memory_space<vmem>>, %arg49: memref<2x1x32xf32, #tpu.memory_space<vmem>>, %arg50: memref<2x1x32xf32, #tpu.memory_space<vmem>>, %arg51: memref<2x32x64xbf16, #tpu.memory_space<vmem>>, %arg52: memref<2x1x64xf32, #tpu.memory_space<vmem>>, %arg53: memref<2x64x32xbf16, #tpu.memory_space<vmem>>, %arg54: memref<2x1x32xf32, #tpu.memory_space<vmem>>, %arg55: memref<1x32xf32, #tpu.memory_space<vmem>>, %arg56: memref<1x32xf32, #tpu.memory_space<vmem>>, %arg57: memref<32x128xbf16, #tpu.memory_space<vmem>>, %arg58: memref<1x128xf32, #tpu.memory_space<vmem>>, %arg59: memref<16x128xf32, #tpu.memory_space<vmem>>) attributes {dimension_semantics = [#tpu.dimension_semantics<arbitrary>], iteration_bounds = array<i64: 1>, scalar_prefetch = 0 : i64, scratch_operands = 0 : i64, tpu.core_type = #tpu.core_type<tc>, window_params = [{pipeline_mode = #tpu.pipeline_mode<synchronous>, transform_indices = @transform_0, window_bounds = array<i64: 16, 2>}, {pipeline_mode = #tpu.pipeline_mode<synchronous>, transform_indices = @transform_1, window_bounds = array<i64: 16, 3>}, {pipeline_mode = #tpu.pipeline_mode<synchronous>, transform_indices = @transform_2, window_bounds = array<i64: 2, 1, 8>}, {pipeline_mode = #tpu.pipeline_mode<synchronous>, transform_indices = @transform_3, window_bounds = array<i64: 2, 8, 8>}, {pipeline_mode = #tpu.pipeline_mode<synchronous>, transform_indices = @transform_4, window_bounds = array<i64: 16, 32>}, {pipeline_mode = #tpu.pipeline_mode<synchronous>, transform_indices = @transform_5, window_bounds = array<i64: 16, 32>}, {pipeline_mode = #tpu.pipeline_mode<synchronous>, transform_indices = @transform_6, window_bounds = array<i64: 2, 32>}, {pipeline_mode = #tpu.pipeline_mode<synchronous>, transform_indices = @transform_7, window_bounds = array<i64: 1, 32>}, {pipeline_mode = #tpu.pipeline_mode<synchronous>, transform_indices = @transform_8, window_bounds = array<i64: 3, 32>}, {pipeline_mode = #tpu.pipeline_mode<synchronous>, transform_indices = @transform_9, window_bounds = array<i64: 1, 32>}, {pipeline_mode = #tpu.pipeline_mode<synchronous>, transform_indices = @transform_10, window_bounds = array<i64: 2, 1, 32>}, {pipeline_mode = #tpu.pipeline_mode<synchronous>, transform_indices = @transform_11, window_bounds = array<i64: 2, 1, 32>}, {pipeline_mode = #tpu.pipeline_mode<synchronous>, transform_indices = @transform_12, window_bounds = array<i64: 2, 32, 32>}, {pipeline_mode = #tpu.pipeline_mode<synchronous>, transform_indices = @transform_13, window_bounds = array<i64: 2, 1, 32>}, {pipeline_mode = #tpu.pipeline_mode<synchronous>, transform_indices = @transform_14, window_bounds = array<i64: 2, 32, 32>}, {pipeline_mode = #tpu.pipeline_mode<synchronous>, transform_indices = @transform_15, window_bounds = array<i64: 2, 1, 32>}, {pipeline_mode = #tpu.pipeline_mode<synchronous>, transform_indices = @transform_16, window_bounds = array<i64: 2, 32, 32>}, {pipeline_mode = #tpu.pipeline_mode<synchronous>, transform_indices = @transform_17, window_bounds = array<i64: 2, 1, 32>}, {pipeline_mode = #tpu.pipeline_mode<synchronous>, transform_indices = @transform_18, window_bounds = array<i64: 2, 32, 32>}, {pipeline_mode = #tpu.pipeline_mode<synchronous>, transform_indices = @transform_19, window_bounds = array<i64: 2, 1, 32>}, {pipeline_mode = #tpu.pipeline_mode<synchronous>, transform_indices = @transform_20, window_bounds = array<i64: 2, 1, 32>}, {pipeline_mode = #tpu.pipeline_mode<synchronous>, transform_indices = @transform_21, window_bounds = array<i64: 2, 1, 32>}, {pipeline_mode = #tpu.pipeline_mode<synchronous>, transform_indices = @transform_22, window_bounds = array<i64: 2, 32, 64>}, {pipeline_mode = #tpu.pipeline_mode<synchronous>, transform_indices = @transform_23, window_bounds = array<i64: 2, 1, 64>}, {pipeline_mode = #tpu.pipeline_mode<synchronous>, transform_indices = @transform_24, window_bounds = array<i64: 2, 64, 32>}, {pipeline_mode = #tpu.pipeline_mode<synchronous>, transform_indices = @transform_25, window_bounds = array<i64: 2, 1, 32>}, {pipeline_mode = #tpu.pipeline_mode<synchronous>, transform_indices = @transform_26, window_bounds = array<i64: 1, 32>}, {pipeline_mode = #tpu.pipeline_mode<synchronous>, transform_indices = @transform_27, window_bounds = array<i64: 1, 32>}, {pipeline_mode = #tpu.pipeline_mode<synchronous>, transform_indices = @transform_28, window_bounds = array<i64: 2, 1, 32>}, {pipeline_mode = #tpu.pipeline_mode<synchronous>, transform_indices = @transform_29, window_bounds = array<i64: 2, 1, 32>}, {pipeline_mode = #tpu.pipeline_mode<synchronous>, transform_indices = @transform_30, window_bounds = array<i64: 2, 32, 32>}, {pipeline_mode = #tpu.pipeline_mode<synchronous>, transform_indices = @transform_31, window_bounds = array<i64: 2, 1, 32>}, {pipeline_mode = #tpu.pipeline_mode<synchronous>, transform_indices = @transform_32, window_bounds = array<i64: 2, 32, 32>}, {pipeline_mode = #tpu.pipeline_mode<synchronous>, transform_indices = @transform_33, window_bounds = array<i64: 2, 1, 32>}, {pipeline_mode = #tpu.pipeline_mode<synchronous>, transform_indices = @transform_34, window_bounds = array<i64: 2, 32, 32>}, {pipeline_mode = #tpu.pipeline_mode<synchronous>, transform_indices = @transform_35, window_bounds = array<i64: 2, 1, 32>}, {pipeline_mode = #tpu.pipeline_mode<synchronous>, transform_indices = @transform_36, window_bounds = array<i64: 2, 32, 32>}, {pipeline_mode = #tpu.pipeline_mode<synchronous>, transform_indices = @transform_37, window_bounds = array<i64: 2, 1, 32>}, {pipeline_mode = #tpu.pipeline_mode<synchronous>, transform_indices = @transform_38, window_bounds = array<i64: 2, 1, 32>}, {pipeline_mode = #tpu.pipeline_mode<synchronous>, transform_indices = @transform_39, window_bounds = array<i64: 2, 1, 32>}, {pipeline_mode = #tpu.pipeline_mode<synchronous>, transform_indices = @transform_40, window_bounds = array<i64: 2, 32, 32>}, {pipeline_mode = #tpu.pipeline_mode<synchronous>, transform_indices = @transform_41, window_bounds = array<i64: 2, 1, 32>}, {pipeline_mode = #tpu.pipeline_mode<synchronous>, transform_indices = @transform_42, window_bounds = array<i64: 2, 32, 32>}, {pipeline_mode = #tpu.pipeline_mode<synchronous>, transform_indices = @transform_43, window_bounds = array<i64: 2, 1, 32>}, {pipeline_mode = #tpu.pipeline_mode<synchronous>, transform_indices = @transform_44, window_bounds = array<i64: 2, 32, 32>}, {pipeline_mode = #tpu.pipeline_mode<synchronous>, transform_indices = @transform_45, window_bounds = array<i64: 2, 1, 32>}, {pipeline_mode = #tpu.pipeline_mode<synchronous>, transform_indices = @transform_46, window_bounds = array<i64: 2, 32, 32>}, {pipeline_mode = #tpu.pipeline_mode<synchronous>, transform_indices = @transform_47, window_bounds = array<i64: 2, 1, 32>}, {pipeline_mode = #tpu.pipeline_mode<synchronous>, transform_indices = @transform_48, window_bounds = array<i64: 2, 1, 32>}, {pipeline_mode = #tpu.pipeline_mode<synchronous>, transform_indices = @transform_49, window_bounds = array<i64: 2, 1, 32>}, {pipeline_mode = #tpu.pipeline_mode<synchronous>, transform_indices = @transform_50, window_bounds = array<i64: 2, 32, 64>}, {pipeline_mode = #tpu.pipeline_mode<synchronous>, transform_indices = @transform_51, window_bounds = array<i64: 2, 1, 64>}, {pipeline_mode = #tpu.pipeline_mode<synchronous>, transform_indices = @transform_52, window_bounds = array<i64: 2, 64, 32>}, {pipeline_mode = #tpu.pipeline_mode<synchronous>, transform_indices = @transform_53, window_bounds = array<i64: 2, 1, 32>}, {pipeline_mode = #tpu.pipeline_mode<synchronous>, transform_indices = @transform_54, window_bounds = array<i64: 1, 32>}, {pipeline_mode = #tpu.pipeline_mode<synchronous>, transform_indices = @transform_55, window_bounds = array<i64: 1, 32>}, {pipeline_mode = #tpu.pipeline_mode<synchronous>, transform_indices = @transform_56, window_bounds = array<i64: 32, 128>}, {pipeline_mode = #tpu.pipeline_mode<synchronous>, transform_indices = @transform_57, window_bounds = array<i64: 1, 128>}, {pipeline_mode = #tpu.pipeline_mode<synchronous>, transform_indices = @transform_58, window_bounds = array<i64: 16, 128>}]} {
    %c0 = arith.constant 0 : index
    %c0_0 = arith.constant 0 : index
    %c0_1 = arith.constant 0 : index
    %0 = vector.load %arg3[%c0, %c0_0, %c0_1] : memref<2x1x8xf32, #tpu.memory_space<vmem>>, vector<2x1x8xf32>
    %c0_2 = arith.constant 0 : index
    %c0_3 = arith.constant 0 : index
    %c0_4 = arith.constant 0 : index
    %1 = vector.load %arg4[%c0_2, %c0_3, %c0_4] : memref<2x8x8xf32, #tpu.memory_space<vmem>>, vector<2x8x8xf32>
    %c0_5 = arith.constant 0 : index
    %c0_6 = arith.constant 0 : index
    %2 = vector.load %arg1[%c0_5, %c0_6] : memref<16x2xf32, #tpu.memory_space<vmem>>, vector<16x2xf32>
    %c0_7 = arith.constant 0 : index
    %c0_8 = arith.constant 0 : index
    %3 = vector.load %arg7[%c0_7, %c0_8] : memref<2x32xf32, #tpu.memory_space<vmem>>, vector<2x32xf32>
    %cst = arith.constant dense<0.000000e+00> : vector<16x32xf32>
    %4 = tpu.matmul %2, %3, %cst {dimension_numbers = #tpu.dot_dimension_numbers<[1], [0], [0], [1], [0, 0, 1, 1], [], []>} : vector<16x2xf32>, vector<2x32xf32>, vector<16x32xf32> -> vector<16x32xf32>
    %c0_9 = arith.constant 0 : index
    %c0_10 = arith.constant 0 : index
    %5 = vector.load %arg8[%c0_9, %c0_10] : memref<1x32xf32, #tpu.memory_space<vmem>>, vector<1x32xf32>
    %6 = vector.broadcast %5 : vector<1x32xf32> to vector<16x32xf32>
    %7 = arith.addf %4, %6 : vector<16x32xf32>
    %c0_11 = arith.constant 0 : index
    %c0_12 = arith.constant 0 : index
    %8 = vector.load %arg5[%c0_11, %c0_12] : memref<16x32xf32, #tpu.memory_space<vmem>>, vector<16x32xf32>
    %9 = arith.addf %7, %8 : vector<16x32xf32>
    %c0_13 = arith.constant 0 : index
    %c0_14 = arith.constant 0 : index
    %c0_15 = arith.constant 0 : index
    %10 = vector.load %arg11[%c0_13, %c0_14, %c0_15] : memref<2x1x32xf32, #tpu.memory_space<vmem>>, vector<1x1x32xf32>
    %11 = vector.shape_cast %10 : vector<1x1x32xf32> to vector<1x32xf32>
    %c0_16 = arith.constant 0 : index
    %c0_17 = arith.constant 0 : index
    %c0_18 = arith.constant 0 : index
    %12 = vector.load %arg12[%c0_16, %c0_17, %c0_18] : memref<2x1x32xf32, #tpu.memory_space<vmem>>, vector<1x1x32xf32>
    %13 = vector.shape_cast %12 : vector<1x1x32xf32> to vector<1x32xf32>
    %cst_19 = arith.constant dense<0.000000e+00> : vector<16xf32>
    %14 = vector.multi_reduction <add>, %9, %cst_19 [1] : vector<16x32xf32> to vector<16xf32>
    %15 = vector.shape_cast %14 : vector<16xf32> to vector<16x1xf32>
    %cst_20 = arith.constant 3.200000e+01 : f32
    %16 = vector.broadcast %cst_20 : f32 to vector<16x1xf32>
    %17 = arith.divf %15, %16 : vector<16x1xf32>
    %18 = vector.broadcast %17 : vector<16x1xf32> to vector<16x32xf32>
    %19 = arith.subf %9, %18 : vector<16x32xf32>
    %20 = arith.mulf %19, %19 : vector<16x32xf32>
    %cst_21 = arith.constant dense<0.000000e+00> : vector<16xf32>
    %21 = vector.multi_reduction <add>, %20, %cst_21 [1] : vector<16x32xf32> to vector<16xf32>
    %22 = vector.shape_cast %21 : vector<16xf32> to vector<16x1xf32>
    %cst_22 = arith.constant 3.100000e+01 : f32
    %23 = vector.broadcast %cst_22 : f32 to vector<16x1xf32>
    %24 = arith.divf %22, %23 : vector<16x1xf32>
    %25 = vector.broadcast %17 : vector<16x1xf32> to vector<16x32xf32>
    %26 = arith.subf %9, %25 : vector<16x32xf32>
    %27 = vector.broadcast %11 : vector<1x32xf32> to vector<16x32xf32>
    %28 = arith.mulf %27, %26 : vector<16x32xf32>
    %29 = math.sqrt %24 : vector<16x1xf32>
    %cst_23 = arith.constant 9.99999997E-7 : f32
    %30 = vector.broadcast %cst_23 : f32 to vector<16x1xf32>
    %31 = arith.addf %29, %30 : vector<16x1xf32>
    %32 = vector.broadcast %31 : vector<16x1xf32> to vector<16x32xf32>
    %33 = arith.divf %28, %32 : vector<16x32xf32>
    %34 = vector.broadcast %13 : vector<1x32xf32> to vector<16x32xf32>
    %35 = arith.addf %33, %34 : vector<16x32xf32>
    %c0_24 = arith.constant 0 : index
    %c0_25 = arith.constant 0 : index
    %c0_26 = arith.constant 0 : index
    %36 = vector.load %arg13[%c0_24, %c0_25, %c0_26] : memref<2x32x32xbf16, #tpu.memory_space<vmem>>, vector<1x32x32xbf16>
    %37 = vector.shape_cast %36 : vector<1x32x32xbf16> to vector<32x32xbf16>
    %c0_27 = arith.constant 0 : index
    %c0_28 = arith.constant 0 : index
    %c0_29 = arith.constant 0 : index
    %38 = vector.load %arg14[%c0_27, %c0_28, %c0_29] : memref<2x1x32xf32, #tpu.memory_space<vmem>>, vector<1x1x32xf32>
    %39 = vector.shape_cast %38 : vector<1x1x32xf32> to vector<1x32xf32>
    %c0_30 = arith.constant 0 : index
    %c0_31 = arith.constant 0 : index
    %c0_32 = arith.constant 0 : index
    %40 = vector.load %arg15[%c0_30, %c0_31, %c0_32] : memref<2x32x32xbf16, #tpu.memory_space<vmem>>, vector<1x32x32xbf16>
    %41 = vector.shape_cast %40 : vector<1x32x32xbf16> to vector<32x32xbf16>
    %c0_33 = arith.constant 0 : index
    %c0_34 = arith.constant 0 : index
    %c0_35 = arith.constant 0 : index
    %42 = vector.load %arg16[%c0_33, %c0_34, %c0_35] : memref<2x1x32xf32, #tpu.memory_space<vmem>>, vector<1x1x32xf32>
    %43 = vector.shape_cast %42 : vector<1x1x32xf32> to vector<1x32xf32>
    %c0_36 = arith.constant 0 : index
    %c0_37 = arith.constant 0 : index
    %c0_38 = arith.constant 0 : index
    %44 = vector.load %arg17[%c0_36, %c0_37, %c0_38] : memref<2x32x32xbf16, #tpu.memory_space<vmem>>, vector<1x32x32xbf16>
    %45 = vector.shape_cast %44 : vector<1x32x32xbf16> to vector<32x32xbf16>
    %c0_39 = arith.constant 0 : index
    %c0_40 = arith.constant 0 : index
    %c0_41 = arith.constant 0 : index
    %46 = vector.load %arg18[%c0_39, %c0_40, %c0_41] : memref<2x1x32xf32, #tpu.memory_space<vmem>>, vector<1x1x32xf32>
    %47 = vector.shape_cast %46 : vector<1x1x32xf32> to vector<1x32xf32>
    %c0_42 = arith.constant 0 : index
    %c0_43 = arith.constant 0 : index
    %c0_44 = arith.constant 0 : index
    %48 = vector.load %arg19[%c0_42, %c0_43, %c0_44] : memref<2x32x32xbf16, #tpu.memory_space<vmem>>, vector<1x32x32xbf16>
    %49 = vector.shape_cast %48 : vector<1x32x32xbf16> to vector<32x32xbf16>
    %c0_45 = arith.constant 0 : index
    %c0_46 = arith.constant 0 : index
    %c0_47 = arith.constant 0 : index
    %50 = vector.load %arg20[%c0_45, %c0_46, %c0_47] : memref<2x1x32xf32, #tpu.memory_space<vmem>>, vector<1x1x32xf32>
    %51 = vector.shape_cast %50 : vector<1x1x32xf32> to vector<1x32xf32>
    %52 = arith.truncf %35 : vector<16x32xf32> to vector<16x32xbf16>
    %cst_48 = arith.constant dense<0.000000e+00> : vector<16x32xf32>
    %53 = tpu.matmul %52, %37, %cst_48 {dimension_numbers = #tpu.dot_dimension_numbers<[1], [0], [0], [1], [0, 0, 1, 1], [], []>} : vector<16x32xbf16>, vector<32x32xbf16>, vector<16x32xf32> -> vector<16x32xf32>
    %54 = vector.broadcast %39 : vector<1x32xf32> to vector<16x32xf32>
    %55 = arith.addf %53, %54 : vector<16x32xf32>
    %56 = arith.truncf %35 : vector<16x32xf32> to vector<16x32xbf16>
    %cst_49 = arith.constant dense<0.000000e+00> : vector<16x32xf32>
    %57 = tpu.matmul %56, %41, %cst_49 {dimension_numbers = #tpu.dot_dimension_numbers<[1], [0], [0], [1], [0, 0, 1, 1], [], []>} : vector<16x32xbf16>, vector<32x32xbf16>, vector<16x32xf32> -> vector<16x32xf32>
    %58 = vector.broadcast %43 : vector<1x32xf32> to vector<16x32xf32>
    %59 = arith.addf %57, %58 : vector<16x32xf32>
    %60 = arith.truncf %35 : vector<16x32xf32> to vector<16x32xbf16>
    %cst_50 = arith.constant dense<0.000000e+00> : vector<16x32xf32>
    %61 = tpu.matmul %60, %45, %cst_50 {dimension_numbers = #tpu.dot_dimension_numbers<[1], [0], [0], [1], [0, 0, 1, 1], [], []>} : vector<16x32xbf16>, vector<32x32xbf16>, vector<16x32xf32> -> vector<16x32xf32>
    %62 = vector.broadcast %47 : vector<1x32xf32> to vector<16x32xf32>
    %63 = arith.addf %61, %62 : vector<16x32xf32>
    %64 = vector.extract_strided_slice %55 {offsets = [0, 0], sizes = [8, 32], strides = [1, 1]} : vector<16x32xf32> to vector<8x32xf32>
    %65 = vector.extract_strided_slice %59 {offsets = [0, 0], sizes = [8, 32], strides = [1, 1]} : vector<16x32xf32> to vector<8x32xf32>
    %66 = vector.extract_strided_slice %63 {offsets = [0, 0], sizes = [8, 32], strides = [1, 1]} : vector<16x32xf32> to vector<8x32xf32>
    %67 = vector.extract_strided_slice %0 {offsets = [0, 0, 0], sizes = [1, 1, 8], strides = [1, 1, 1]} : vector<2x1x8xf32> to vector<1x1x8xf32>
    %68 = vector.shape_cast %67 : vector<1x1x8xf32> to vector<1x8xf32>
    %69 = vector.extract_strided_slice %64 {offsets = [0, 0], sizes = [8, 8], strides = [1, 1]} : vector<8x32xf32> to vector<8x8xf32>
    %70 = vector.extract_strided_slice %65 {offsets = [0, 0], sizes = [8, 8], strides = [1, 1]} : vector<8x32xf32> to vector<8x8xf32>
    %71 = vector.extract_strided_slice %66 {offsets = [0, 0], sizes = [8, 8], strides = [1, 1]} : vector<8x32xf32> to vector<8x8xf32>
    %cst_51 = arith.constant dense<0.000000e+00> : vector<8x8xf32>
    %72 = tpu.matmul %69, %70, %cst_51 {dimension_numbers = #tpu.dot_dimension_numbers<[1], [1], [0], [0], [0, 0, 1, 0], [], []>} : vector<8x8xf32>, vector<8x8xf32>, vector<8x8xf32> -> vector<8x8xf32>
    %73 = vector.broadcast %68 : vector<1x8xf32> to vector<8x8xf32>
    %74 = arith.addf %72, %73 : vector<8x8xf32>
    %cst_52 = arith.constant dense<0xFF800000> : vector<8xf32>
    %75 = vector.multi_reduction <maximumf>, %74, %cst_52 [1] : vector<8x8xf32> to vector<8xf32>
    %76 = vector.shape_cast %75 : vector<8xf32> to vector<8x1xf32>
    %77 = vector.broadcast %76 : vector<8x1xf32> to vector<8x8xf32>
    %78 = arith.subf %74, %77 : vector<8x8xf32>
    %79 = math.exp %78 : vector<8x8xf32>
    %cst_53 = arith.constant dense<0.000000e+00> : vector<8xf32>
    %80 = vector.multi_reduction <add>, %79, %cst_53 [1] : vector<8x8xf32> to vector<8xf32>
    %81 = vector.shape_cast %80 : vector<8xf32> to vector<8x1xf32>
    %82 = vector.broadcast %81 : vector<8x1xf32> to vector<8x8xf32>
    %83 = arith.divf %79, %82 : vector<8x8xf32>
    %cst_54 = arith.constant dense<0.000000e+00> : vector<8x8xf32>
    %84 = tpu.matmul %83, %71, %cst_54 {dimension_numbers = #tpu.dot_dimension_numbers<[1], [0], [0], [1], [0, 0, 1, 1], [], []>} : vector<8x8xf32>, vector<8x8xf32>, vector<8x8xf32> -> vector<8x8xf32>
    %85 = vector.extract_strided_slice %64 {offsets = [0, 8], sizes = [8, 8], strides = [1, 1]} : vector<8x32xf32> to vector<8x8xf32>
    %86 = vector.extract_strided_slice %65 {offsets = [0, 8], sizes = [8, 8], strides = [1, 1]} : vector<8x32xf32> to vector<8x8xf32>
    %87 = vector.extract_strided_slice %66 {offsets = [0, 8], sizes = [8, 8], strides = [1, 1]} : vector<8x32xf32> to vector<8x8xf32>
    %cst_55 = arith.constant dense<0.000000e+00> : vector<8x8xf32>
    %88 = tpu.matmul %85, %86, %cst_55 {dimension_numbers = #tpu.dot_dimension_numbers<[1], [1], [0], [0], [0, 0, 1, 0], [], []>} : vector<8x8xf32>, vector<8x8xf32>, vector<8x8xf32> -> vector<8x8xf32>
    %89 = vector.broadcast %68 : vector<1x8xf32> to vector<8x8xf32>
    %90 = arith.addf %88, %89 : vector<8x8xf32>
    %cst_56 = arith.constant dense<0xFF800000> : vector<8xf32>
    %91 = vector.multi_reduction <maximumf>, %90, %cst_56 [1] : vector<8x8xf32> to vector<8xf32>
    %92 = vector.shape_cast %91 : vector<8xf32> to vector<8x1xf32>
    %93 = vector.broadcast %92 : vector<8x1xf32> to vector<8x8xf32>
    %94 = arith.subf %90, %93 : vector<8x8xf32>
    %95 = math.exp %94 : vector<8x8xf32>
    %cst_57 = arith.constant dense<0.000000e+00> : vector<8xf32>
    %96 = vector.multi_reduction <add>, %95, %cst_57 [1] : vector<8x8xf32> to vector<8xf32>
    %97 = vector.shape_cast %96 : vector<8xf32> to vector<8x1xf32>
    %98 = vector.broadcast %97 : vector<8x1xf32> to vector<8x8xf32>
    %99 = arith.divf %95, %98 : vector<8x8xf32>
    %cst_58 = arith.constant dense<0.000000e+00> : vector<8x8xf32>
    %100 = tpu.matmul %99, %87, %cst_58 {dimension_numbers = #tpu.dot_dimension_numbers<[1], [0], [0], [1], [0, 0, 1, 1], [], []>} : vector<8x8xf32>, vector<8x8xf32>, vector<8x8xf32> -> vector<8x8xf32>
    %101 = vector.extract_strided_slice %64 {offsets = [0, 16], sizes = [8, 8], strides = [1, 1]} : vector<8x32xf32> to vector<8x8xf32>
    %102 = vector.extract_strided_slice %65 {offsets = [0, 16], sizes = [8, 8], strides = [1, 1]} : vector<8x32xf32> to vector<8x8xf32>
    %103 = vector.extract_strided_slice %66 {offsets = [0, 16], sizes = [8, 8], strides = [1, 1]} : vector<8x32xf32> to vector<8x8xf32>
    %cst_59 = arith.constant dense<0.000000e+00> : vector<8x8xf32>
    %104 = tpu.matmul %101, %102, %cst_59 {dimension_numbers = #tpu.dot_dimension_numbers<[1], [1], [0], [0], [0, 0, 1, 0], [], []>} : vector<8x8xf32>, vector<8x8xf32>, vector<8x8xf32> -> vector<8x8xf32>
    %105 = vector.broadcast %68 : vector<1x8xf32> to vector<8x8xf32>
    %106 = arith.addf %104, %105 : vector<8x8xf32>
    %cst_60 = arith.constant dense<0xFF800000> : vector<8xf32>
    %107 = vector.multi_reduction <maximumf>, %106, %cst_60 [1] : vector<8x8xf32> to vector<8xf32>
    %108 = vector.shape_cast %107 : vector<8xf32> to vector<8x1xf32>
    %109 = vector.broadcast %108 : vector<8x1xf32> to vector<8x8xf32>
    %110 = arith.subf %106, %109 : vector<8x8xf32>
    %111 = math.exp %110 : vector<8x8xf32>
    %cst_61 = arith.constant dense<0.000000e+00> : vector<8xf32>
    %112 = vector.multi_reduction <add>, %111, %cst_61 [1] : vector<8x8xf32> to vector<8xf32>
    %113 = vector.shape_cast %112 : vector<8xf32> to vector<8x1xf32>
    %114 = vector.broadcast %113 : vector<8x1xf32> to vector<8x8xf32>
    %115 = arith.divf %111, %114 : vector<8x8xf32>
    %cst_62 = arith.constant dense<0.000000e+00> : vector<8x8xf32>
    %116 = tpu.matmul %115, %103, %cst_62 {dimension_numbers = #tpu.dot_dimension_numbers<[1], [0], [0], [1], [0, 0, 1, 1], [], []>} : vector<8x8xf32>, vector<8x8xf32>, vector<8x8xf32> -> vector<8x8xf32>
    %117 = vector.extract_strided_slice %64 {offsets = [0, 24], sizes = [8, 8], strides = [1, 1]} : vector<8x32xf32> to vector<8x8xf32>
    %118 = vector.extract_strided_slice %65 {offsets = [0, 24], sizes = [8, 8], strides = [1, 1]} : vector<8x32xf32> to vector<8x8xf32>
    %119 = vector.extract_strided_slice %66 {offsets = [0, 24], sizes = [8, 8], strides = [1, 1]} : vector<8x32xf32> to vector<8x8xf32>
    %cst_63 = arith.constant dense<0.000000e+00> : vector<8x8xf32>
    %120 = tpu.matmul %117, %118, %cst_63 {dimension_numbers = #tpu.dot_dimension_numbers<[1], [1], [0], [0], [0, 0, 1, 0], [], []>} : vector<8x8xf32>, vector<8x8xf32>, vector<8x8xf32> -> vector<8x8xf32>
    %121 = vector.broadcast %68 : vector<1x8xf32> to vector<8x8xf32>
    %122 = arith.addf %120, %121 : vector<8x8xf32>
    %cst_64 = arith.constant dense<0xFF800000> : vector<8xf32>
    %123 = vector.multi_reduction <maximumf>, %122, %cst_64 [1] : vector<8x8xf32> to vector<8xf32>
    %124 = vector.shape_cast %123 : vector<8xf32> to vector<8x1xf32>
    %125 = vector.broadcast %124 : vector<8x1xf32> to vector<8x8xf32>
    %126 = arith.subf %122, %125 : vector<8x8xf32>
    %127 = math.exp %126 : vector<8x8xf32>
    %cst_65 = arith.constant dense<0.000000e+00> : vector<8xf32>
    %128 = vector.multi_reduction <add>, %127, %cst_65 [1] : vector<8x8xf32> to vector<8xf32>
    %129 = vector.shape_cast %128 : vector<8xf32> to vector<8x1xf32>
    %130 = vector.broadcast %129 : vector<8x1xf32> to vector<8x8xf32>
    %131 = arith.divf %127, %130 : vector<8x8xf32>
    %cst_66 = arith.constant dense<0.000000e+00> : vector<8x8xf32>
    %132 = tpu.matmul %131, %119, %cst_66 {dimension_numbers = #tpu.dot_dimension_numbers<[1], [0], [0], [1], [0, 0, 1, 1], [], []>} : vector<8x8xf32>, vector<8x8xf32>, vector<8x8xf32> -> vector<8x8xf32>
    %133 = tpu.concatenate %84, %100, %116, %132 in 1 : vector<8x8xf32>, vector<8x8xf32>, vector<8x8xf32>, vector<8x8xf32> -> vector<8x32xf32>
    %134 = vector.extract_strided_slice %55 {offsets = [8, 0], sizes = [8, 32], strides = [1, 1]} : vector<16x32xf32> to vector<8x32xf32>
    %135 = vector.extract_strided_slice %59 {offsets = [8, 0], sizes = [8, 32], strides = [1, 1]} : vector<16x32xf32> to vector<8x32xf32>
    %136 = vector.extract_strided_slice %63 {offsets = [8, 0], sizes = [8, 32], strides = [1, 1]} : vector<16x32xf32> to vector<8x32xf32>
    %137 = vector.extract_strided_slice %0 {offsets = [1, 0, 0], sizes = [1, 1, 8], strides = [1, 1, 1]} : vector<2x1x8xf32> to vector<1x1x8xf32>
    %138 = vector.shape_cast %137 : vector<1x1x8xf32> to vector<1x8xf32>
    %139 = vector.extract_strided_slice %134 {offsets = [0, 0], sizes = [8, 8], strides = [1, 1]} : vector<8x32xf32> to vector<8x8xf32>
    %140 = vector.extract_strided_slice %135 {offsets = [0, 0], sizes = [8, 8], strides = [1, 1]} : vector<8x32xf32> to vector<8x8xf32>
    %141 = vector.extract_strided_slice %136 {offsets = [0, 0], sizes = [8, 8], strides = [1, 1]} : vector<8x32xf32> to vector<8x8xf32>
    %cst_67 = arith.constant dense<0.000000e+00> : vector<8x8xf32>
    %142 = tpu.matmul %139, %140, %cst_67 {dimension_numbers = #tpu.dot_dimension_numbers<[1], [1], [0], [0], [0, 0, 1, 0], [], []>} : vector<8x8xf32>, vector<8x8xf32>, vector<8x8xf32> -> vector<8x8xf32>
    %143 = vector.broadcast %138 : vector<1x8xf32> to vector<8x8xf32>
    %144 = arith.addf %142, %143 : vector<8x8xf32>
    %cst_68 = arith.constant dense<0xFF800000> : vector<8xf32>
    %145 = vector.multi_reduction <maximumf>, %144, %cst_68 [1] : vector<8x8xf32> to vector<8xf32>
    %146 = vector.shape_cast %145 : vector<8xf32> to vector<8x1xf32>
    %147 = vector.broadcast %146 : vector<8x1xf32> to vector<8x8xf32>
    %148 = arith.subf %144, %147 : vector<8x8xf32>
    %149 = math.exp %148 : vector<8x8xf32>
    %cst_69 = arith.constant dense<0.000000e+00> : vector<8xf32>
    %150 = vector.multi_reduction <add>, %149, %cst_69 [1] : vector<8x8xf32> to vector<8xf32>
    %151 = vector.shape_cast %150 : vector<8xf32> to vector<8x1xf32>
    %152 = vector.broadcast %151 : vector<8x1xf32> to vector<8x8xf32>
    %153 = arith.divf %149, %152 : vector<8x8xf32>
    %cst_70 = arith.constant dense<0.000000e+00> : vector<8x8xf32>
    %154 = tpu.matmul %153, %141, %cst_70 {dimension_numbers = #tpu.dot_dimension_numbers<[1], [0], [0], [1], [0, 0, 1, 1], [], []>} : vector<8x8xf32>, vector<8x8xf32>, vector<8x8xf32> -> vector<8x8xf32>
    %155 = vector.extract_strided_slice %134 {offsets = [0, 8], sizes = [8, 8], strides = [1, 1]} : vector<8x32xf32> to vector<8x8xf32>
    %156 = vector.extract_strided_slice %135 {offsets = [0, 8], sizes = [8, 8], strides = [1, 1]} : vector<8x32xf32> to vector<8x8xf32>
    %157 = vector.extract_strided_slice %136 {offsets = [0, 8], sizes = [8, 8], strides = [1, 1]} : vector<8x32xf32> to vector<8x8xf32>
    %cst_71 = arith.constant dense<0.000000e+00> : vector<8x8xf32>
    %158 = tpu.matmul %155, %156, %cst_71 {dimension_numbers = #tpu.dot_dimension_numbers<[1], [1], [0], [0], [0, 0, 1, 0], [], []>} : vector<8x8xf32>, vector<8x8xf32>, vector<8x8xf32> -> vector<8x8xf32>
    %159 = vector.broadcast %138 : vector<1x8xf32> to vector<8x8xf32>
    %160 = arith.addf %158, %159 : vector<8x8xf32>
    %cst_72 = arith.constant dense<0xFF800000> : vector<8xf32>
    %161 = vector.multi_reduction <maximumf>, %160, %cst_72 [1] : vector<8x8xf32> to vector<8xf32>
    %162 = vector.shape_cast %161 : vector<8xf32> to vector<8x1xf32>
    %163 = vector.broadcast %162 : vector<8x1xf32> to vector<8x8xf32>
    %164 = arith.subf %160, %163 : vector<8x8xf32>
    %165 = math.exp %164 : vector<8x8xf32>
    %cst_73 = arith.constant dense<0.000000e+00> : vector<8xf32>
    %166 = vector.multi_reduction <add>, %165, %cst_73 [1] : vector<8x8xf32> to vector<8xf32>
    %167 = vector.shape_cast %166 : vector<8xf32> to vector<8x1xf32>
    %168 = vector.broadcast %167 : vector<8x1xf32> to vector<8x8xf32>
    %169 = arith.divf %165, %168 : vector<8x8xf32>
    %cst_74 = arith.constant dense<0.000000e+00> : vector<8x8xf32>
    %170 = tpu.matmul %169, %157, %cst_74 {dimension_numbers = #tpu.dot_dimension_numbers<[1], [0], [0], [1], [0, 0, 1, 1], [], []>} : vector<8x8xf32>, vector<8x8xf32>, vector<8x8xf32> -> vector<8x8xf32>
    %171 = vector.extract_strided_slice %134 {offsets = [0, 16], sizes = [8, 8], strides = [1, 1]} : vector<8x32xf32> to vector<8x8xf32>
    %172 = vector.extract_strided_slice %135 {offsets = [0, 16], sizes = [8, 8], strides = [1, 1]} : vector<8x32xf32> to vector<8x8xf32>
    %173 = vector.extract_strided_slice %136 {offsets = [0, 16], sizes = [8, 8], strides = [1, 1]} : vector<8x32xf32> to vector<8x8xf32>
    %cst_75 = arith.constant dense<0.000000e+00> : vector<8x8xf32>
    %174 = tpu.matmul %171, %172, %cst_75 {dimension_numbers = #tpu.dot_dimension_numbers<[1], [1], [0], [0], [0, 0, 1, 0], [], []>} : vector<8x8xf32>, vector<8x8xf32>, vector<8x8xf32> -> vector<8x8xf32>
    %175 = vector.broadcast %138 : vector<1x8xf32> to vector<8x8xf32>
    %176 = arith.addf %174, %175 : vector<8x8xf32>
    %cst_76 = arith.constant dense<0xFF800000> : vector<8xf32>
    %177 = vector.multi_reduction <maximumf>, %176, %cst_76 [1] : vector<8x8xf32> to vector<8xf32>
    %178 = vector.shape_cast %177 : vector<8xf32> to vector<8x1xf32>
    %179 = vector.broadcast %178 : vector<8x1xf32> to vector<8x8xf32>
    %180 = arith.subf %176, %179 : vector<8x8xf32>
    %181 = math.exp %180 : vector<8x8xf32>
    %cst_77 = arith.constant dense<0.000000e+00> : vector<8xf32>
    %182 = vector.multi_reduction <add>, %181, %cst_77 [1] : vector<8x8xf32> to vector<8xf32>
    %183 = vector.shape_cast %182 : vector<8xf32> to vector<8x1xf32>
    %184 = vector.broadcast %183 : vector<8x1xf32> to vector<8x8xf32>
    %185 = arith.divf %181, %184 : vector<8x8xf32>
    %cst_78 = arith.constant dense<0.000000e+00> : vector<8x8xf32>
    %186 = tpu.matmul %185, %173, %cst_78 {dimension_numbers = #tpu.dot_dimension_numbers<[1], [0], [0], [1], [0, 0, 1, 1], [], []>} : vector<8x8xf32>, vector<8x8xf32>, vector<8x8xf32> -> vector<8x8xf32>
    %187 = vector.extract_strided_slice %134 {offsets = [0, 24], sizes = [8, 8], strides = [1, 1]} : vector<8x32xf32> to vector<8x8xf32>
    %188 = vector.extract_strided_slice %135 {offsets = [0, 24], sizes = [8, 8], strides = [1, 1]} : vector<8x32xf32> to vector<8x8xf32>
    %189 = vector.extract_strided_slice %136 {offsets = [0, 24], sizes = [8, 8], strides = [1, 1]} : vector<8x32xf32> to vector<8x8xf32>
    %cst_79 = arith.constant dense<0.000000e+00> : vector<8x8xf32>
    %190 = tpu.matmul %187, %188, %cst_79 {dimension_numbers = #tpu.dot_dimension_numbers<[1], [1], [0], [0], [0, 0, 1, 0], [], []>} : vector<8x8xf32>, vector<8x8xf32>, vector<8x8xf32> -> vector<8x8xf32>
    %191 = vector.broadcast %138 : vector<1x8xf32> to vector<8x8xf32>
    %192 = arith.addf %190, %191 : vector<8x8xf32>
    %cst_80 = arith.constant dense<0xFF800000> : vector<8xf32>
    %193 = vector.multi_reduction <maximumf>, %192, %cst_80 [1] : vector<8x8xf32> to vector<8xf32>
    %194 = vector.shape_cast %193 : vector<8xf32> to vector<8x1xf32>
    %195 = vector.broadcast %194 : vector<8x1xf32> to vector<8x8xf32>
    %196 = arith.subf %192, %195 : vector<8x8xf32>
    %197 = math.exp %196 : vector<8x8xf32>
    %cst_81 = arith.constant dense<0.000000e+00> : vector<8xf32>
    %198 = vector.multi_reduction <add>, %197, %cst_81 [1] : vector<8x8xf32> to vector<8xf32>
    %199 = vector.shape_cast %198 : vector<8xf32> to vector<8x1xf32>
    %200 = vector.broadcast %199 : vector<8x1xf32> to vector<8x8xf32>
    %201 = arith.divf %197, %200 : vector<8x8xf32>
    %cst_82 = arith.constant dense<0.000000e+00> : vector<8x8xf32>
    %202 = tpu.matmul %201, %189, %cst_82 {dimension_numbers = #tpu.dot_dimension_numbers<[1], [0], [0], [1], [0, 0, 1, 1], [], []>} : vector<8x8xf32>, vector<8x8xf32>, vector<8x8xf32> -> vector<8x8xf32>
    %203 = tpu.concatenate %154, %170, %186, %202 in 1 : vector<8x8xf32>, vector<8x8xf32>, vector<8x8xf32>, vector<8x8xf32> -> vector<8x32xf32>
    %204 = tpu.concatenate %133, %203 in 0 : vector<8x32xf32>, vector<8x32xf32> -> vector<16x32xf32>
    %205 = arith.truncf %204 : vector<16x32xf32> to vector<16x32xbf16>
    %cst_83 = arith.constant dense<0.000000e+00> : vector<16x32xf32>
    %206 = tpu.matmul %205, %49, %cst_83 {dimension_numbers = #tpu.dot_dimension_numbers<[1], [0], [0], [1], [0, 0, 1, 1], [], []>} : vector<16x32xbf16>, vector<32x32xbf16>, vector<16x32xf32> -> vector<16x32xf32>
    %207 = vector.broadcast %51 : vector<1x32xf32> to vector<16x32xf32>
    %208 = arith.addf %206, %207 : vector<16x32xf32>
    %209 = arith.addf %9, %208 : vector<16x32xf32>
    %c0_84 = arith.constant 0 : index
    %c0_85 = arith.constant 0 : index
    %c0_86 = arith.constant 0 : index
    %210 = vector.load %arg21[%c0_84, %c0_85, %c0_86] : memref<2x1x32xf32, #tpu.memory_space<vmem>>, vector<1x1x32xf32>
    %211 = vector.shape_cast %210 : vector<1x1x32xf32> to vector<1x32xf32>
    %c0_87 = arith.constant 0 : index
    %c0_88 = arith.constant 0 : index
    %c0_89 = arith.constant 0 : index
    %212 = vector.load %arg22[%c0_87, %c0_88, %c0_89] : memref<2x1x32xf32, #tpu.memory_space<vmem>>, vector<1x1x32xf32>
    %213 = vector.shape_cast %212 : vector<1x1x32xf32> to vector<1x32xf32>
    %cst_90 = arith.constant dense<0.000000e+00> : vector<16xf32>
    %214 = vector.multi_reduction <add>, %209, %cst_90 [1] : vector<16x32xf32> to vector<16xf32>
    %215 = vector.shape_cast %214 : vector<16xf32> to vector<16x1xf32>
    %cst_91 = arith.constant 3.200000e+01 : f32
    %216 = vector.broadcast %cst_91 : f32 to vector<16x1xf32>
    %217 = arith.divf %215, %216 : vector<16x1xf32>
    %218 = vector.broadcast %217 : vector<16x1xf32> to vector<16x32xf32>
    %219 = arith.subf %209, %218 : vector<16x32xf32>
    %220 = arith.mulf %219, %219 : vector<16x32xf32>
    %cst_92 = arith.constant dense<0.000000e+00> : vector<16xf32>
    %221 = vector.multi_reduction <add>, %220, %cst_92 [1] : vector<16x32xf32> to vector<16xf32>
    %222 = vector.shape_cast %221 : vector<16xf32> to vector<16x1xf32>
    %cst_93 = arith.constant 3.100000e+01 : f32
    %223 = vector.broadcast %cst_93 : f32 to vector<16x1xf32>
    %224 = arith.divf %222, %223 : vector<16x1xf32>
    %225 = vector.broadcast %217 : vector<16x1xf32> to vector<16x32xf32>
    %226 = arith.subf %209, %225 : vector<16x32xf32>
    %227 = vector.broadcast %211 : vector<1x32xf32> to vector<16x32xf32>
    %228 = arith.mulf %227, %226 : vector<16x32xf32>
    %229 = math.sqrt %224 : vector<16x1xf32>
    %cst_94 = arith.constant 9.99999997E-7 : f32
    %230 = vector.broadcast %cst_94 : f32 to vector<16x1xf32>
    %231 = arith.addf %229, %230 : vector<16x1xf32>
    %232 = vector.broadcast %231 : vector<16x1xf32> to vector<16x32xf32>
    %233 = arith.divf %228, %232 : vector<16x32xf32>
    %234 = vector.broadcast %213 : vector<1x32xf32> to vector<16x32xf32>
    %235 = arith.addf %233, %234 : vector<16x32xf32>
    %c0_95 = arith.constant 0 : index
    %c0_96 = arith.constant 0 : index
    %c0_97 = arith.constant 0 : index
    %236 = vector.load %arg23[%c0_95, %c0_96, %c0_97] : memref<2x32x64xbf16, #tpu.memory_space<vmem>>, vector<1x32x64xbf16>
    %237 = vector.shape_cast %236 : vector<1x32x64xbf16> to vector<32x64xbf16>
    %c0_98 = arith.constant 0 : index
    %c0_99 = arith.constant 0 : index
    %c0_100 = arith.constant 0 : index
    %238 = vector.load %arg24[%c0_98, %c0_99, %c0_100] : memref<2x1x64xf32, #tpu.memory_space<vmem>>, vector<1x1x64xf32>
    %239 = vector.shape_cast %238 : vector<1x1x64xf32> to vector<1x64xf32>
    %c0_101 = arith.constant 0 : index
    %c0_102 = arith.constant 0 : index
    %c0_103 = arith.constant 0 : index
    %240 = vector.load %arg25[%c0_101, %c0_102, %c0_103] : memref<2x64x32xbf16, #tpu.memory_space<vmem>>, vector<1x64x32xbf16>
    %241 = vector.shape_cast %240 : vector<1x64x32xbf16> to vector<64x32xbf16>
    %c0_104 = arith.constant 0 : index
    %c0_105 = arith.constant 0 : index
    %c0_106 = arith.constant 0 : index
    %242 = vector.load %arg26[%c0_104, %c0_105, %c0_106] : memref<2x1x32xf32, #tpu.memory_space<vmem>>, vector<1x1x32xf32>
    %243 = vector.shape_cast %242 : vector<1x1x32xf32> to vector<1x32xf32>
    %244 = arith.truncf %235 : vector<16x32xf32> to vector<16x32xbf16>
    %cst_107 = arith.constant dense<0.000000e+00> : vector<16x64xf32>
    %245 = tpu.matmul %244, %237, %cst_107 {dimension_numbers = #tpu.dot_dimension_numbers<[1], [0], [0], [1], [0, 0, 1, 1], [], []>} : vector<16x32xbf16>, vector<32x64xbf16>, vector<16x64xf32> -> vector<16x64xf32>
    %246 = vector.broadcast %239 : vector<1x64xf32> to vector<16x64xf32>
    %247 = arith.addf %245, %246 : vector<16x64xf32>
    %cst_108 = arith.constant 0.000000e+00 : f32
    %248 = vector.broadcast %cst_108 : f32 to vector<16x64xf32>
    %249 = arith.maximumf %247, %248 : vector<16x64xf32>
    %250 = arith.truncf %249 : vector<16x64xf32> to vector<16x64xbf16>
    %cst_109 = arith.constant dense<0.000000e+00> : vector<16x32xf32>
    %251 = tpu.matmul %250, %241, %cst_109 {dimension_numbers = #tpu.dot_dimension_numbers<[1], [0], [0], [1], [0, 0, 1, 1], [], []>} : vector<16x64xbf16>, vector<64x32xbf16>, vector<16x32xf32> -> vector<16x32xf32>
    %252 = vector.broadcast %243 : vector<1x32xf32> to vector<16x32xf32>
    %253 = arith.addf %251, %252 : vector<16x32xf32>
    %254 = arith.addf %209, %253 : vector<16x32xf32>
    %c1 = arith.constant 1 : index
    %c0_110 = arith.constant 0 : index
    %c0_111 = arith.constant 0 : index
    %255 = vector.load %arg11[%c1, %c0_110, %c0_111] : memref<2x1x32xf32, #tpu.memory_space<vmem>>, vector<1x1x32xf32>
    %256 = vector.shape_cast %255 : vector<1x1x32xf32> to vector<1x32xf32>
    %c1_112 = arith.constant 1 : index
    %c0_113 = arith.constant 0 : index
    %c0_114 = arith.constant 0 : index
    %257 = vector.load %arg12[%c1_112, %c0_113, %c0_114] : memref<2x1x32xf32, #tpu.memory_space<vmem>>, vector<1x1x32xf32>
    %258 = vector.shape_cast %257 : vector<1x1x32xf32> to vector<1x32xf32>
    %cst_115 = arith.constant dense<0.000000e+00> : vector<16xf32>
    %259 = vector.multi_reduction <add>, %254, %cst_115 [1] : vector<16x32xf32> to vector<16xf32>
    %260 = vector.shape_cast %259 : vector<16xf32> to vector<16x1xf32>
    %cst_116 = arith.constant 3.200000e+01 : f32
    %261 = vector.broadcast %cst_116 : f32 to vector<16x1xf32>
    %262 = arith.divf %260, %261 : vector<16x1xf32>
    %263 = vector.broadcast %262 : vector<16x1xf32> to vector<16x32xf32>
    %264 = arith.subf %254, %263 : vector<16x32xf32>
    %265 = arith.mulf %264, %264 : vector<16x32xf32>
    %cst_117 = arith.constant dense<0.000000e+00> : vector<16xf32>
    %266 = vector.multi_reduction <add>, %265, %cst_117 [1] : vector<16x32xf32> to vector<16xf32>
    %267 = vector.shape_cast %266 : vector<16xf32> to vector<16x1xf32>
    %cst_118 = arith.constant 3.100000e+01 : f32
    %268 = vector.broadcast %cst_118 : f32 to vector<16x1xf32>
    %269 = arith.divf %267, %268 : vector<16x1xf32>
    %270 = vector.broadcast %262 : vector<16x1xf32> to vector<16x32xf32>
    %271 = arith.subf %254, %270 : vector<16x32xf32>
    %272 = vector.broadcast %256 : vector<1x32xf32> to vector<16x32xf32>
    %273 = arith.mulf %272, %271 : vector<16x32xf32>
    %274 = math.sqrt %269 : vector<16x1xf32>
    %cst_119 = arith.constant 9.99999997E-7 : f32
    %275 = vector.broadcast %cst_119 : f32 to vector<16x1xf32>
    %276 = arith.addf %274, %275 : vector<16x1xf32>
    %277 = vector.broadcast %276 : vector<16x1xf32> to vector<16x32xf32>
    %278 = arith.divf %273, %277 : vector<16x32xf32>
    %279 = vector.broadcast %258 : vector<1x32xf32> to vector<16x32xf32>
    %280 = arith.addf %278, %279 : vector<16x32xf32>
    %c1_120 = arith.constant 1 : index
    %c0_121 = arith.constant 0 : index
    %c0_122 = arith.constant 0 : index
    %281 = vector.load %arg13[%c1_120, %c0_121, %c0_122] : memref<2x32x32xbf16, #tpu.memory_space<vmem>>, vector<1x32x32xbf16>
    %282 = vector.shape_cast %281 : vector<1x32x32xbf16> to vector<32x32xbf16>
    %c1_123 = arith.constant 1 : index
    %c0_124 = arith.constant 0 : index
    %c0_125 = arith.constant 0 : index
    %283 = vector.load %arg14[%c1_123, %c0_124, %c0_125] : memref<2x1x32xf32, #tpu.memory_space<vmem>>, vector<1x1x32xf32>
    %284 = vector.shape_cast %283 : vector<1x1x32xf32> to vector<1x32xf32>
    %c1_126 = arith.constant 1 : index
    %c0_127 = arith.constant 0 : index
    %c0_128 = arith.constant 0 : index
    %285 = vector.load %arg15[%c1_126, %c0_127, %c0_128] : memref<2x32x32xbf16, #tpu.memory_space<vmem>>, vector<1x32x32xbf16>
    %286 = vector.shape_cast %285 : vector<1x32x32xbf16> to vector<32x32xbf16>
    %c1_129 = arith.constant 1 : index
    %c0_130 = arith.constant 0 : index
    %c0_131 = arith.constant 0 : index
    %287 = vector.load %arg16[%c1_129, %c0_130, %c0_131] : memref<2x1x32xf32, #tpu.memory_space<vmem>>, vector<1x1x32xf32>
    %288 = vector.shape_cast %287 : vector<1x1x32xf32> to vector<1x32xf32>
    %c1_132 = arith.constant 1 : index
    %c0_133 = arith.constant 0 : index
    %c0_134 = arith.constant 0 : index
    %289 = vector.load %arg17[%c1_132, %c0_133, %c0_134] : memref<2x32x32xbf16, #tpu.memory_space<vmem>>, vector<1x32x32xbf16>
    %290 = vector.shape_cast %289 : vector<1x32x32xbf16> to vector<32x32xbf16>
    %c1_135 = arith.constant 1 : index
    %c0_136 = arith.constant 0 : index
    %c0_137 = arith.constant 0 : index
    %291 = vector.load %arg18[%c1_135, %c0_136, %c0_137] : memref<2x1x32xf32, #tpu.memory_space<vmem>>, vector<1x1x32xf32>
    %292 = vector.shape_cast %291 : vector<1x1x32xf32> to vector<1x32xf32>
    %c1_138 = arith.constant 1 : index
    %c0_139 = arith.constant 0 : index
    %c0_140 = arith.constant 0 : index
    %293 = vector.load %arg19[%c1_138, %c0_139, %c0_140] : memref<2x32x32xbf16, #tpu.memory_space<vmem>>, vector<1x32x32xbf16>
    %294 = vector.shape_cast %293 : vector<1x32x32xbf16> to vector<32x32xbf16>
    %c1_141 = arith.constant 1 : index
    %c0_142 = arith.constant 0 : index
    %c0_143 = arith.constant 0 : index
    %295 = vector.load %arg20[%c1_141, %c0_142, %c0_143] : memref<2x1x32xf32, #tpu.memory_space<vmem>>, vector<1x1x32xf32>
    %296 = vector.shape_cast %295 : vector<1x1x32xf32> to vector<1x32xf32>
    %297 = arith.truncf %280 : vector<16x32xf32> to vector<16x32xbf16>
    %cst_144 = arith.constant dense<0.000000e+00> : vector<16x32xf32>
    %298 = tpu.matmul %297, %282, %cst_144 {dimension_numbers = #tpu.dot_dimension_numbers<[1], [0], [0], [1], [0, 0, 1, 1], [], []>} : vector<16x32xbf16>, vector<32x32xbf16>, vector<16x32xf32> -> vector<16x32xf32>
    %299 = vector.broadcast %284 : vector<1x32xf32> to vector<16x32xf32>
    %300 = arith.addf %298, %299 : vector<16x32xf32>
    %301 = arith.truncf %280 : vector<16x32xf32> to vector<16x32xbf16>
    %cst_145 = arith.constant dense<0.000000e+00> : vector<16x32xf32>
    %302 = tpu.matmul %301, %286, %cst_145 {dimension_numbers = #tpu.dot_dimension_numbers<[1], [0], [0], [1], [0, 0, 1, 1], [], []>} : vector<16x32xbf16>, vector<32x32xbf16>, vector<16x32xf32> -> vector<16x32xf32>
    %303 = vector.broadcast %288 : vector<1x32xf32> to vector<16x32xf32>
    %304 = arith.addf %302, %303 : vector<16x32xf32>
    %305 = arith.truncf %280 : vector<16x32xf32> to vector<16x32xbf16>
    %cst_146 = arith.constant dense<0.000000e+00> : vector<16x32xf32>
    %306 = tpu.matmul %305, %290, %cst_146 {dimension_numbers = #tpu.dot_dimension_numbers<[1], [0], [0], [1], [0, 0, 1, 1], [], []>} : vector<16x32xbf16>, vector<32x32xbf16>, vector<16x32xf32> -> vector<16x32xf32>
    %307 = vector.broadcast %292 : vector<1x32xf32> to vector<16x32xf32>
    %308 = arith.addf %306, %307 : vector<16x32xf32>
    %309 = vector.extract_strided_slice %300 {offsets = [0, 0], sizes = [8, 32], strides = [1, 1]} : vector<16x32xf32> to vector<8x32xf32>
    %310 = vector.extract_strided_slice %304 {offsets = [0, 0], sizes = [8, 32], strides = [1, 1]} : vector<16x32xf32> to vector<8x32xf32>
    %311 = vector.extract_strided_slice %308 {offsets = [0, 0], sizes = [8, 32], strides = [1, 1]} : vector<16x32xf32> to vector<8x32xf32>
    %312 = vector.extract_strided_slice %0 {offsets = [0, 0, 0], sizes = [1, 1, 8], strides = [1, 1, 1]} : vector<2x1x8xf32> to vector<1x1x8xf32>
    %313 = vector.shape_cast %312 : vector<1x1x8xf32> to vector<1x8xf32>
    %314 = vector.extract_strided_slice %309 {offsets = [0, 0], sizes = [8, 8], strides = [1, 1]} : vector<8x32xf32> to vector<8x8xf32>
    %315 = vector.extract_strided_slice %310 {offsets = [0, 0], sizes = [8, 8], strides = [1, 1]} : vector<8x32xf32> to vector<8x8xf32>
    %316 = vector.extract_strided_slice %311 {offsets = [0, 0], sizes = [8, 8], strides = [1, 1]} : vector<8x32xf32> to vector<8x8xf32>
    %cst_147 = arith.constant dense<0.000000e+00> : vector<8x8xf32>
    %317 = tpu.matmul %314, %315, %cst_147 {dimension_numbers = #tpu.dot_dimension_numbers<[1], [1], [0], [0], [0, 0, 1, 0], [], []>} : vector<8x8xf32>, vector<8x8xf32>, vector<8x8xf32> -> vector<8x8xf32>
    %318 = vector.broadcast %313 : vector<1x8xf32> to vector<8x8xf32>
    %319 = arith.addf %317, %318 : vector<8x8xf32>
    %cst_148 = arith.constant dense<0xFF800000> : vector<8xf32>
    %320 = vector.multi_reduction <maximumf>, %319, %cst_148 [1] : vector<8x8xf32> to vector<8xf32>
    %321 = vector.shape_cast %320 : vector<8xf32> to vector<8x1xf32>
    %322 = vector.broadcast %321 : vector<8x1xf32> to vector<8x8xf32>
    %323 = arith.subf %319, %322 : vector<8x8xf32>
    %324 = math.exp %323 : vector<8x8xf32>
    %cst_149 = arith.constant dense<0.000000e+00> : vector<8xf32>
    %325 = vector.multi_reduction <add>, %324, %cst_149 [1] : vector<8x8xf32> to vector<8xf32>
    %326 = vector.shape_cast %325 : vector<8xf32> to vector<8x1xf32>
    %327 = vector.broadcast %326 : vector<8x1xf32> to vector<8x8xf32>
    %328 = arith.divf %324, %327 : vector<8x8xf32>
    %cst_150 = arith.constant dense<0.000000e+00> : vector<8x8xf32>
    %329 = tpu.matmul %328, %316, %cst_150 {dimension_numbers = #tpu.dot_dimension_numbers<[1], [0], [0], [1], [0, 0, 1, 1], [], []>} : vector<8x8xf32>, vector<8x8xf32>, vector<8x8xf32> -> vector<8x8xf32>
    %330 = vector.extract_strided_slice %309 {offsets = [0, 8], sizes = [8, 8], strides = [1, 1]} : vector<8x32xf32> to vector<8x8xf32>
    %331 = vector.extract_strided_slice %310 {offsets = [0, 8], sizes = [8, 8], strides = [1, 1]} : vector<8x32xf32> to vector<8x8xf32>
    %332 = vector.extract_strided_slice %311 {offsets = [0, 8], sizes = [8, 8], strides = [1, 1]} : vector<8x32xf32> to vector<8x8xf32>
    %cst_151 = arith.constant dense<0.000000e+00> : vector<8x8xf32>
    %333 = tpu.matmul %330, %331, %cst_151 {dimension_numbers = #tpu.dot_dimension_numbers<[1], [1], [0], [0], [0, 0, 1, 0], [], []>} : vector<8x8xf32>, vector<8x8xf32>, vector<8x8xf32> -> vector<8x8xf32>
    %334 = vector.broadcast %313 : vector<1x8xf32> to vector<8x8xf32>
    %335 = arith.addf %333, %334 : vector<8x8xf32>
    %cst_152 = arith.constant dense<0xFF800000> : vector<8xf32>
    %336 = vector.multi_reduction <maximumf>, %335, %cst_152 [1] : vector<8x8xf32> to vector<8xf32>
    %337 = vector.shape_cast %336 : vector<8xf32> to vector<8x1xf32>
    %338 = vector.broadcast %337 : vector<8x1xf32> to vector<8x8xf32>
    %339 = arith.subf %335, %338 : vector<8x8xf32>
    %340 = math.exp %339 : vector<8x8xf32>
    %cst_153 = arith.constant dense<0.000000e+00> : vector<8xf32>
    %341 = vector.multi_reduction <add>, %340, %cst_153 [1] : vector<8x8xf32> to vector<8xf32>
    %342 = vector.shape_cast %341 : vector<8xf32> to vector<8x1xf32>
    %343 = vector.broadcast %342 : vector<8x1xf32> to vector<8x8xf32>
    %344 = arith.divf %340, %343 : vector<8x8xf32>
    %cst_154 = arith.constant dense<0.000000e+00> : vector<8x8xf32>
    %345 = tpu.matmul %344, %332, %cst_154 {dimension_numbers = #tpu.dot_dimension_numbers<[1], [0], [0], [1], [0, 0, 1, 1], [], []>} : vector<8x8xf32>, vector<8x8xf32>, vector<8x8xf32> -> vector<8x8xf32>
    %346 = vector.extract_strided_slice %309 {offsets = [0, 16], sizes = [8, 8], strides = [1, 1]} : vector<8x32xf32> to vector<8x8xf32>
    %347 = vector.extract_strided_slice %310 {offsets = [0, 16], sizes = [8, 8], strides = [1, 1]} : vector<8x32xf32> to vector<8x8xf32>
    %348 = vector.extract_strided_slice %311 {offsets = [0, 16], sizes = [8, 8], strides = [1, 1]} : vector<8x32xf32> to vector<8x8xf32>
    %cst_155 = arith.constant dense<0.000000e+00> : vector<8x8xf32>
    %349 = tpu.matmul %346, %347, %cst_155 {dimension_numbers = #tpu.dot_dimension_numbers<[1], [1], [0], [0], [0, 0, 1, 0], [], []>} : vector<8x8xf32>, vector<8x8xf32>, vector<8x8xf32> -> vector<8x8xf32>
    %350 = vector.broadcast %313 : vector<1x8xf32> to vector<8x8xf32>
    %351 = arith.addf %349, %350 : vector<8x8xf32>
    %cst_156 = arith.constant dense<0xFF800000> : vector<8xf32>
    %352 = vector.multi_reduction <maximumf>, %351, %cst_156 [1] : vector<8x8xf32> to vector<8xf32>
    %353 = vector.shape_cast %352 : vector<8xf32> to vector<8x1xf32>
    %354 = vector.broadcast %353 : vector<8x1xf32> to vector<8x8xf32>
    %355 = arith.subf %351, %354 : vector<8x8xf32>
    %356 = math.exp %355 : vector<8x8xf32>
    %cst_157 = arith.constant dense<0.000000e+00> : vector<8xf32>
    %357 = vector.multi_reduction <add>, %356, %cst_157 [1] : vector<8x8xf32> to vector<8xf32>
    %358 = vector.shape_cast %357 : vector<8xf32> to vector<8x1xf32>
    %359 = vector.broadcast %358 : vector<8x1xf32> to vector<8x8xf32>
    %360 = arith.divf %356, %359 : vector<8x8xf32>
    %cst_158 = arith.constant dense<0.000000e+00> : vector<8x8xf32>
    %361 = tpu.matmul %360, %348, %cst_158 {dimension_numbers = #tpu.dot_dimension_numbers<[1], [0], [0], [1], [0, 0, 1, 1], [], []>} : vector<8x8xf32>, vector<8x8xf32>, vector<8x8xf32> -> vector<8x8xf32>
    %362 = vector.extract_strided_slice %309 {offsets = [0, 24], sizes = [8, 8], strides = [1, 1]} : vector<8x32xf32> to vector<8x8xf32>
    %363 = vector.extract_strided_slice %310 {offsets = [0, 24], sizes = [8, 8], strides = [1, 1]} : vector<8x32xf32> to vector<8x8xf32>
    %364 = vector.extract_strided_slice %311 {offsets = [0, 24], sizes = [8, 8], strides = [1, 1]} : vector<8x32xf32> to vector<8x8xf32>
    %cst_159 = arith.constant dense<0.000000e+00> : vector<8x8xf32>
    %365 = tpu.matmul %362, %363, %cst_159 {dimension_numbers = #tpu.dot_dimension_numbers<[1], [1], [0], [0], [0, 0, 1, 0], [], []>} : vector<8x8xf32>, vector<8x8xf32>, vector<8x8xf32> -> vector<8x8xf32>
    %366 = vector.broadcast %313 : vector<1x8xf32> to vector<8x8xf32>
    %367 = arith.addf %365, %366 : vector<8x8xf32>
    %cst_160 = arith.constant dense<0xFF800000> : vector<8xf32>
    %368 = vector.multi_reduction <maximumf>, %367, %cst_160 [1] : vector<8x8xf32> to vector<8xf32>
    %369 = vector.shape_cast %368 : vector<8xf32> to vector<8x1xf32>
    %370 = vector.broadcast %369 : vector<8x1xf32> to vector<8x8xf32>
    %371 = arith.subf %367, %370 : vector<8x8xf32>
    %372 = math.exp %371 : vector<8x8xf32>
    %cst_161 = arith.constant dense<0.000000e+00> : vector<8xf32>
    %373 = vector.multi_reduction <add>, %372, %cst_161 [1] : vector<8x8xf32> to vector<8xf32>
    %374 = vector.shape_cast %373 : vector<8xf32> to vector<8x1xf32>
    %375 = vector.broadcast %374 : vector<8x1xf32> to vector<8x8xf32>
    %376 = arith.divf %372, %375 : vector<8x8xf32>
    %cst_162 = arith.constant dense<0.000000e+00> : vector<8x8xf32>
    %377 = tpu.matmul %376, %364, %cst_162 {dimension_numbers = #tpu.dot_dimension_numbers<[1], [0], [0], [1], [0, 0, 1, 1], [], []>} : vector<8x8xf32>, vector<8x8xf32>, vector<8x8xf32> -> vector<8x8xf32>
    %378 = tpu.concatenate %329, %345, %361, %377 in 1 : vector<8x8xf32>, vector<8x8xf32>, vector<8x8xf32>, vector<8x8xf32> -> vector<8x32xf32>
    %379 = vector.extract_strided_slice %300 {offsets = [8, 0], sizes = [8, 32], strides = [1, 1]} : vector<16x32xf32> to vector<8x32xf32>
    %380 = vector.extract_strided_slice %304 {offsets = [8, 0], sizes = [8, 32], strides = [1, 1]} : vector<16x32xf32> to vector<8x32xf32>
    %381 = vector.extract_strided_slice %308 {offsets = [8, 0], sizes = [8, 32], strides = [1, 1]} : vector<16x32xf32> to vector<8x32xf32>
    %382 = vector.extract_strided_slice %0 {offsets = [1, 0, 0], sizes = [1, 1, 8], strides = [1, 1, 1]} : vector<2x1x8xf32> to vector<1x1x8xf32>
    %383 = vector.shape_cast %382 : vector<1x1x8xf32> to vector<1x8xf32>
    %384 = vector.extract_strided_slice %379 {offsets = [0, 0], sizes = [8, 8], strides = [1, 1]} : vector<8x32xf32> to vector<8x8xf32>
    %385 = vector.extract_strided_slice %380 {offsets = [0, 0], sizes = [8, 8], strides = [1, 1]} : vector<8x32xf32> to vector<8x8xf32>
    %386 = vector.extract_strided_slice %381 {offsets = [0, 0], sizes = [8, 8], strides = [1, 1]} : vector<8x32xf32> to vector<8x8xf32>
    %cst_163 = arith.constant dense<0.000000e+00> : vector<8x8xf32>
    %387 = tpu.matmul %384, %385, %cst_163 {dimension_numbers = #tpu.dot_dimension_numbers<[1], [1], [0], [0], [0, 0, 1, 0], [], []>} : vector<8x8xf32>, vector<8x8xf32>, vector<8x8xf32> -> vector<8x8xf32>
    %388 = vector.broadcast %383 : vector<1x8xf32> to vector<8x8xf32>
    %389 = arith.addf %387, %388 : vector<8x8xf32>
    %cst_164 = arith.constant dense<0xFF800000> : vector<8xf32>
    %390 = vector.multi_reduction <maximumf>, %389, %cst_164 [1] : vector<8x8xf32> to vector<8xf32>
    %391 = vector.shape_cast %390 : vector<8xf32> to vector<8x1xf32>
    %392 = vector.broadcast %391 : vector<8x1xf32> to vector<8x8xf32>
    %393 = arith.subf %389, %392 : vector<8x8xf32>
    %394 = math.exp %393 : vector<8x8xf32>
    %cst_165 = arith.constant dense<0.000000e+00> : vector<8xf32>
    %395 = vector.multi_reduction <add>, %394, %cst_165 [1] : vector<8x8xf32> to vector<8xf32>
    %396 = vector.shape_cast %395 : vector<8xf32> to vector<8x1xf32>
    %397 = vector.broadcast %396 : vector<8x1xf32> to vector<8x8xf32>
    %398 = arith.divf %394, %397 : vector<8x8xf32>
    %cst_166 = arith.constant dense<0.000000e+00> : vector<8x8xf32>
    %399 = tpu.matmul %398, %386, %cst_166 {dimension_numbers = #tpu.dot_dimension_numbers<[1], [0], [0], [1], [0, 0, 1, 1], [], []>} : vector<8x8xf32>, vector<8x8xf32>, vector<8x8xf32> -> vector<8x8xf32>
    %400 = vector.extract_strided_slice %379 {offsets = [0, 8], sizes = [8, 8], strides = [1, 1]} : vector<8x32xf32> to vector<8x8xf32>
    %401 = vector.extract_strided_slice %380 {offsets = [0, 8], sizes = [8, 8], strides = [1, 1]} : vector<8x32xf32> to vector<8x8xf32>
    %402 = vector.extract_strided_slice %381 {offsets = [0, 8], sizes = [8, 8], strides = [1, 1]} : vector<8x32xf32> to vector<8x8xf32>
    %cst_167 = arith.constant dense<0.000000e+00> : vector<8x8xf32>
    %403 = tpu.matmul %400, %401, %cst_167 {dimension_numbers = #tpu.dot_dimension_numbers<[1], [1], [0], [0], [0, 0, 1, 0], [], []>} : vector<8x8xf32>, vector<8x8xf32>, vector<8x8xf32> -> vector<8x8xf32>
    %404 = vector.broadcast %383 : vector<1x8xf32> to vector<8x8xf32>
    %405 = arith.addf %403, %404 : vector<8x8xf32>
    %cst_168 = arith.constant dense<0xFF800000> : vector<8xf32>
    %406 = vector.multi_reduction <maximumf>, %405, %cst_168 [1] : vector<8x8xf32> to vector<8xf32>
    %407 = vector.shape_cast %406 : vector<8xf32> to vector<8x1xf32>
    %408 = vector.broadcast %407 : vector<8x1xf32> to vector<8x8xf32>
    %409 = arith.subf %405, %408 : vector<8x8xf32>
    %410 = math.exp %409 : vector<8x8xf32>
    %cst_169 = arith.constant dense<0.000000e+00> : vector<8xf32>
    %411 = vector.multi_reduction <add>, %410, %cst_169 [1] : vector<8x8xf32> to vector<8xf32>
    %412 = vector.shape_cast %411 : vector<8xf32> to vector<8x1xf32>
    %413 = vector.broadcast %412 : vector<8x1xf32> to vector<8x8xf32>
    %414 = arith.divf %410, %413 : vector<8x8xf32>
    %cst_170 = arith.constant dense<0.000000e+00> : vector<8x8xf32>
    %415 = tpu.matmul %414, %402, %cst_170 {dimension_numbers = #tpu.dot_dimension_numbers<[1], [0], [0], [1], [0, 0, 1, 1], [], []>} : vector<8x8xf32>, vector<8x8xf32>, vector<8x8xf32> -> vector<8x8xf32>
    %416 = vector.extract_strided_slice %379 {offsets = [0, 16], sizes = [8, 8], strides = [1, 1]} : vector<8x32xf32> to vector<8x8xf32>
    %417 = vector.extract_strided_slice %380 {offsets = [0, 16], sizes = [8, 8], strides = [1, 1]} : vector<8x32xf32> to vector<8x8xf32>
    %418 = vector.extract_strided_slice %381 {offsets = [0, 16], sizes = [8, 8], strides = [1, 1]} : vector<8x32xf32> to vector<8x8xf32>
    %cst_171 = arith.constant dense<0.000000e+00> : vector<8x8xf32>
    %419 = tpu.matmul %416, %417, %cst_171 {dimension_numbers = #tpu.dot_dimension_numbers<[1], [1], [0], [0], [0, 0, 1, 0], [], []>} : vector<8x8xf32>, vector<8x8xf32>, vector<8x8xf32> -> vector<8x8xf32>
    %420 = vector.broadcast %383 : vector<1x8xf32> to vector<8x8xf32>
    %421 = arith.addf %419, %420 : vector<8x8xf32>
    %cst_172 = arith.constant dense<0xFF800000> : vector<8xf32>
    %422 = vector.multi_reduction <maximumf>, %421, %cst_172 [1] : vector<8x8xf32> to vector<8xf32>
    %423 = vector.shape_cast %422 : vector<8xf32> to vector<8x1xf32>
    %424 = vector.broadcast %423 : vector<8x1xf32> to vector<8x8xf32>
    %425 = arith.subf %421, %424 : vector<8x8xf32>
    %426 = math.exp %425 : vector<8x8xf32>
    %cst_173 = arith.constant dense<0.000000e+00> : vector<8xf32>
    %427 = vector.multi_reduction <add>, %426, %cst_173 [1] : vector<8x8xf32> to vector<8xf32>
    %428 = vector.shape_cast %427 : vector<8xf32> to vector<8x1xf32>
    %429 = vector.broadcast %428 : vector<8x1xf32> to vector<8x8xf32>
    %430 = arith.divf %426, %429 : vector<8x8xf32>
    %cst_174 = arith.constant dense<0.000000e+00> : vector<8x8xf32>
    %431 = tpu.matmul %430, %418, %cst_174 {dimension_numbers = #tpu.dot_dimension_numbers<[1], [0], [0], [1], [0, 0, 1, 1], [], []>} : vector<8x8xf32>, vector<8x8xf32>, vector<8x8xf32> -> vector<8x8xf32>
    %432 = vector.extract_strided_slice %379 {offsets = [0, 24], sizes = [8, 8], strides = [1, 1]} : vector<8x32xf32> to vector<8x8xf32>
    %433 = vector.extract_strided_slice %380 {offsets = [0, 24], sizes = [8, 8], strides = [1, 1]} : vector<8x32xf32> to vector<8x8xf32>
    %434 = vector.extract_strided_slice %381 {offsets = [0, 24], sizes = [8, 8], strides = [1, 1]} : vector<8x32xf32> to vector<8x8xf32>
    %cst_175 = arith.constant dense<0.000000e+00> : vector<8x8xf32>
    %435 = tpu.matmul %432, %433, %cst_175 {dimension_numbers = #tpu.dot_dimension_numbers<[1], [1], [0], [0], [0, 0, 1, 0], [], []>} : vector<8x8xf32>, vector<8x8xf32>, vector<8x8xf32> -> vector<8x8xf32>
    %436 = vector.broadcast %383 : vector<1x8xf32> to vector<8x8xf32>
    %437 = arith.addf %435, %436 : vector<8x8xf32>
    %cst_176 = arith.constant dense<0xFF800000> : vector<8xf32>
    %438 = vector.multi_reduction <maximumf>, %437, %cst_176 [1] : vector<8x8xf32> to vector<8xf32>
    %439 = vector.shape_cast %438 : vector<8xf32> to vector<8x1xf32>
    %440 = vector.broadcast %439 : vector<8x1xf32> to vector<8x8xf32>
    %441 = arith.subf %437, %440 : vector<8x8xf32>
    %442 = math.exp %441 : vector<8x8xf32>
    %cst_177 = arith.constant dense<0.000000e+00> : vector<8xf32>
    %443 = vector.multi_reduction <add>, %442, %cst_177 [1] : vector<8x8xf32> to vector<8xf32>
    %444 = vector.shape_cast %443 : vector<8xf32> to vector<8x1xf32>
    %445 = vector.broadcast %444 : vector<8x1xf32> to vector<8x8xf32>
    %446 = arith.divf %442, %445 : vector<8x8xf32>
    %cst_178 = arith.constant dense<0.000000e+00> : vector<8x8xf32>
    %447 = tpu.matmul %446, %434, %cst_178 {dimension_numbers = #tpu.dot_dimension_numbers<[1], [0], [0], [1], [0, 0, 1, 1], [], []>} : vector<8x8xf32>, vector<8x8xf32>, vector<8x8xf32> -> vector<8x8xf32>
    %448 = tpu.concatenate %399, %415, %431, %447 in 1 : vector<8x8xf32>, vector<8x8xf32>, vector<8x8xf32>, vector<8x8xf32> -> vector<8x32xf32>
    %449 = tpu.concatenate %378, %448 in 0 : vector<8x32xf32>, vector<8x32xf32> -> vector<16x32xf32>
    %450 = arith.truncf %449 : vector<16x32xf32> to vector<16x32xbf16>
    %cst_179 = arith.constant dense<0.000000e+00> : vector<16x32xf32>
    %451 = tpu.matmul %450, %294, %cst_179 {dimension_numbers = #tpu.dot_dimension_numbers<[1], [0], [0], [1], [0, 0, 1, 1], [], []>} : vector<16x32xbf16>, vector<32x32xbf16>, vector<16x32xf32> -> vector<16x32xf32>
    %452 = vector.broadcast %296 : vector<1x32xf32> to vector<16x32xf32>
    %453 = arith.addf %451, %452 : vector<16x32xf32>
    %454 = arith.addf %254, %453 : vector<16x32xf32>
    %c1_180 = arith.constant 1 : index
    %c0_181 = arith.constant 0 : index
    %c0_182 = arith.constant 0 : index
    %455 = vector.load %arg21[%c1_180, %c0_181, %c0_182] : memref<2x1x32xf32, #tpu.memory_space<vmem>>, vector<1x1x32xf32>
    %456 = vector.shape_cast %455 : vector<1x1x32xf32> to vector<1x32xf32>
    %c1_183 = arith.constant 1 : index
    %c0_184 = arith.constant 0 : index
    %c0_185 = arith.constant 0 : index
    %457 = vector.load %arg22[%c1_183, %c0_184, %c0_185] : memref<2x1x32xf32, #tpu.memory_space<vmem>>, vector<1x1x32xf32>
    %458 = vector.shape_cast %457 : vector<1x1x32xf32> to vector<1x32xf32>
    %cst_186 = arith.constant dense<0.000000e+00> : vector<16xf32>
    %459 = vector.multi_reduction <add>, %454, %cst_186 [1] : vector<16x32xf32> to vector<16xf32>
    %460 = vector.shape_cast %459 : vector<16xf32> to vector<16x1xf32>
    %cst_187 = arith.constant 3.200000e+01 : f32
    %461 = vector.broadcast %cst_187 : f32 to vector<16x1xf32>
    %462 = arith.divf %460, %461 : vector<16x1xf32>
    %463 = vector.broadcast %462 : vector<16x1xf32> to vector<16x32xf32>
    %464 = arith.subf %454, %463 : vector<16x32xf32>
    %465 = arith.mulf %464, %464 : vector<16x32xf32>
    %cst_188 = arith.constant dense<0.000000e+00> : vector<16xf32>
    %466 = vector.multi_reduction <add>, %465, %cst_188 [1] : vector<16x32xf32> to vector<16xf32>
    %467 = vector.shape_cast %466 : vector<16xf32> to vector<16x1xf32>
    %cst_189 = arith.constant 3.100000e+01 : f32
    %468 = vector.broadcast %cst_189 : f32 to vector<16x1xf32>
    %469 = arith.divf %467, %468 : vector<16x1xf32>
    %470 = vector.broadcast %462 : vector<16x1xf32> to vector<16x32xf32>
    %471 = arith.subf %454, %470 : vector<16x32xf32>
    %472 = vector.broadcast %456 : vector<1x32xf32> to vector<16x32xf32>
    %473 = arith.mulf %472, %471 : vector<16x32xf32>
    %474 = math.sqrt %469 : vector<16x1xf32>
    %cst_190 = arith.constant 9.99999997E-7 : f32
    %475 = vector.broadcast %cst_190 : f32 to vector<16x1xf32>
    %476 = arith.addf %474, %475 : vector<16x1xf32>
    %477 = vector.broadcast %476 : vector<16x1xf32> to vector<16x32xf32>
    %478 = arith.divf %473, %477 : vector<16x32xf32>
    %479 = vector.broadcast %458 : vector<1x32xf32> to vector<16x32xf32>
    %480 = arith.addf %478, %479 : vector<16x32xf32>
    %c1_191 = arith.constant 1 : index
    %c0_192 = arith.constant 0 : index
    %c0_193 = arith.constant 0 : index
    %481 = vector.load %arg23[%c1_191, %c0_192, %c0_193] : memref<2x32x64xbf16, #tpu.memory_space<vmem>>, vector<1x32x64xbf16>
    %482 = vector.shape_cast %481 : vector<1x32x64xbf16> to vector<32x64xbf16>
    %c1_194 = arith.constant 1 : index
    %c0_195 = arith.constant 0 : index
    %c0_196 = arith.constant 0 : index
    %483 = vector.load %arg24[%c1_194, %c0_195, %c0_196] : memref<2x1x64xf32, #tpu.memory_space<vmem>>, vector<1x1x64xf32>
    %484 = vector.shape_cast %483 : vector<1x1x64xf32> to vector<1x64xf32>
    %c1_197 = arith.constant 1 : index
    %c0_198 = arith.constant 0 : index
    %c0_199 = arith.constant 0 : index
    %485 = vector.load %arg25[%c1_197, %c0_198, %c0_199] : memref<2x64x32xbf16, #tpu.memory_space<vmem>>, vector<1x64x32xbf16>
    %486 = vector.shape_cast %485 : vector<1x64x32xbf16> to vector<64x32xbf16>
    %c1_200 = arith.constant 1 : index
    %c0_201 = arith.constant 0 : index
    %c0_202 = arith.constant 0 : index
    %487 = vector.load %arg26[%c1_200, %c0_201, %c0_202] : memref<2x1x32xf32, #tpu.memory_space<vmem>>, vector<1x1x32xf32>
    %488 = vector.shape_cast %487 : vector<1x1x32xf32> to vector<1x32xf32>
    %489 = arith.truncf %480 : vector<16x32xf32> to vector<16x32xbf16>
    %cst_203 = arith.constant dense<0.000000e+00> : vector<16x64xf32>
    %490 = tpu.matmul %489, %482, %cst_203 {dimension_numbers = #tpu.dot_dimension_numbers<[1], [0], [0], [1], [0, 0, 1, 1], [], []>} : vector<16x32xbf16>, vector<32x64xbf16>, vector<16x64xf32> -> vector<16x64xf32>
    %491 = vector.broadcast %484 : vector<1x64xf32> to vector<16x64xf32>
    %492 = arith.addf %490, %491 : vector<16x64xf32>
    %cst_204 = arith.constant 0.000000e+00 : f32
    %493 = vector.broadcast %cst_204 : f32 to vector<16x64xf32>
    %494 = arith.maximumf %492, %493 : vector<16x64xf32>
    %495 = arith.truncf %494 : vector<16x64xf32> to vector<16x64xbf16>
    %cst_205 = arith.constant dense<0.000000e+00> : vector<16x32xf32>
    %496 = tpu.matmul %495, %486, %cst_205 {dimension_numbers = #tpu.dot_dimension_numbers<[1], [0], [0], [1], [0, 0, 1, 1], [], []>} : vector<16x64xbf16>, vector<64x32xbf16>, vector<16x32xf32> -> vector<16x32xf32>
    %497 = vector.broadcast %488 : vector<1x32xf32> to vector<16x32xf32>
    %498 = arith.addf %496, %497 : vector<16x32xf32>
    %499 = arith.addf %454, %498 : vector<16x32xf32>
    %c0_206 = arith.constant 0 : index
    %c0_207 = arith.constant 0 : index
    %500 = vector.load %arg27[%c0_206, %c0_207] : memref<1x32xf32, #tpu.memory_space<vmem>>, vector<1x32xf32>
    %c0_208 = arith.constant 0 : index
    %c0_209 = arith.constant 0 : index
    %501 = vector.load %arg28[%c0_208, %c0_209] : memref<1x32xf32, #tpu.memory_space<vmem>>, vector<1x32xf32>
    %cst_210 = arith.constant dense<0.000000e+00> : vector<16xf32>
    %502 = vector.multi_reduction <add>, %499, %cst_210 [1] : vector<16x32xf32> to vector<16xf32>
    %503 = vector.shape_cast %502 : vector<16xf32> to vector<16x1xf32>
    %cst_211 = arith.constant 3.200000e+01 : f32
    %504 = vector.broadcast %cst_211 : f32 to vector<16x1xf32>
    %505 = arith.divf %503, %504 : vector<16x1xf32>
    %506 = vector.broadcast %505 : vector<16x1xf32> to vector<16x32xf32>
    %507 = arith.subf %499, %506 : vector<16x32xf32>
    %508 = arith.mulf %507, %507 : vector<16x32xf32>
    %cst_212 = arith.constant dense<0.000000e+00> : vector<16xf32>
    %509 = vector.multi_reduction <add>, %508, %cst_212 [1] : vector<16x32xf32> to vector<16xf32>
    %510 = vector.shape_cast %509 : vector<16xf32> to vector<16x1xf32>
    %cst_213 = arith.constant 3.100000e+01 : f32
    %511 = vector.broadcast %cst_213 : f32 to vector<16x1xf32>
    %512 = arith.divf %510, %511 : vector<16x1xf32>
    %513 = vector.broadcast %505 : vector<16x1xf32> to vector<16x32xf32>
    %514 = arith.subf %499, %513 : vector<16x32xf32>
    %515 = vector.broadcast %500 : vector<1x32xf32> to vector<16x32xf32>
    %516 = arith.mulf %515, %514 : vector<16x32xf32>
    %517 = math.sqrt %512 : vector<16x1xf32>
    %cst_214 = arith.constant 9.99999997E-7 : f32
    %518 = vector.broadcast %cst_214 : f32 to vector<16x1xf32>
    %519 = arith.addf %517, %518 : vector<16x1xf32>
    %520 = vector.broadcast %519 : vector<16x1xf32> to vector<16x32xf32>
    %521 = arith.divf %516, %520 : vector<16x32xf32>
    %522 = vector.broadcast %501 : vector<1x32xf32> to vector<16x32xf32>
    %523 = arith.addf %521, %522 : vector<16x32xf32>
    %c0_215 = arith.constant 0 : index
    %c0_216 = arith.constant 0 : index
    %524 = vector.load %arg2[%c0_215, %c0_216] : memref<16x3xf32, #tpu.memory_space<vmem>>, vector<16x3xf32>
    %c0_217 = arith.constant 0 : index
    %c0_218 = arith.constant 0 : index
    %525 = vector.load %arg9[%c0_217, %c0_218] : memref<3x32xf32, #tpu.memory_space<vmem>>, vector<3x32xf32>
    %cst_219 = arith.constant dense<0.000000e+00> : vector<16x32xf32>
    %526 = tpu.matmul %524, %525, %cst_219 {dimension_numbers = #tpu.dot_dimension_numbers<[1], [0], [0], [1], [0, 0, 1, 1], [], []>} : vector<16x3xf32>, vector<3x32xf32>, vector<16x32xf32> -> vector<16x32xf32>
    %c0_220 = arith.constant 0 : index
    %c0_221 = arith.constant 0 : index
    %527 = vector.load %arg10[%c0_220, %c0_221] : memref<1x32xf32, #tpu.memory_space<vmem>>, vector<1x32xf32>
    %528 = vector.broadcast %527 : vector<1x32xf32> to vector<16x32xf32>
    %529 = arith.addf %526, %528 : vector<16x32xf32>
    %c0_222 = arith.constant 0 : index
    %c0_223 = arith.constant 0 : index
    %530 = vector.load %arg6[%c0_222, %c0_223] : memref<16x32xf32, #tpu.memory_space<vmem>>, vector<16x32xf32>
    %531 = arith.addf %529, %530 : vector<16x32xf32>
    %c0_224 = arith.constant 0 : index
    %c0_225 = arith.constant 0 : index
    %c0_226 = arith.constant 0 : index
    %532 = vector.load %arg29[%c0_224, %c0_225, %c0_226] : memref<2x1x32xf32, #tpu.memory_space<vmem>>, vector<1x1x32xf32>
    %533 = vector.shape_cast %532 : vector<1x1x32xf32> to vector<1x32xf32>
    %c0_227 = arith.constant 0 : index
    %c0_228 = arith.constant 0 : index
    %c0_229 = arith.constant 0 : index
    %534 = vector.load %arg30[%c0_227, %c0_228, %c0_229] : memref<2x1x32xf32, #tpu.memory_space<vmem>>, vector<1x1x32xf32>
    %535 = vector.shape_cast %534 : vector<1x1x32xf32> to vector<1x32xf32>
    %cst_230 = arith.constant dense<0.000000e+00> : vector<16xf32>
    %536 = vector.multi_reduction <add>, %531, %cst_230 [1] : vector<16x32xf32> to vector<16xf32>
    %537 = vector.shape_cast %536 : vector<16xf32> to vector<16x1xf32>
    %cst_231 = arith.constant 3.200000e+01 : f32
    %538 = vector.broadcast %cst_231 : f32 to vector<16x1xf32>
    %539 = arith.divf %537, %538 : vector<16x1xf32>
    %540 = vector.broadcast %539 : vector<16x1xf32> to vector<16x32xf32>
    %541 = arith.subf %531, %540 : vector<16x32xf32>
    %542 = arith.mulf %541, %541 : vector<16x32xf32>
    %cst_232 = arith.constant dense<0.000000e+00> : vector<16xf32>
    %543 = vector.multi_reduction <add>, %542, %cst_232 [1] : vector<16x32xf32> to vector<16xf32>
    %544 = vector.shape_cast %543 : vector<16xf32> to vector<16x1xf32>
    %cst_233 = arith.constant 3.100000e+01 : f32
    %545 = vector.broadcast %cst_233 : f32 to vector<16x1xf32>
    %546 = arith.divf %544, %545 : vector<16x1xf32>
    %547 = vector.broadcast %539 : vector<16x1xf32> to vector<16x32xf32>
    %548 = arith.subf %531, %547 : vector<16x32xf32>
    %549 = vector.broadcast %533 : vector<1x32xf32> to vector<16x32xf32>
    %550 = arith.mulf %549, %548 : vector<16x32xf32>
    %551 = math.sqrt %546 : vector<16x1xf32>
    %cst_234 = arith.constant 9.99999997E-7 : f32
    %552 = vector.broadcast %cst_234 : f32 to vector<16x1xf32>
    %553 = arith.addf %551, %552 : vector<16x1xf32>
    %554 = vector.broadcast %553 : vector<16x1xf32> to vector<16x32xf32>
    %555 = arith.divf %550, %554 : vector<16x32xf32>
    %556 = vector.broadcast %535 : vector<1x32xf32> to vector<16x32xf32>
    %557 = arith.addf %555, %556 : vector<16x32xf32>
    %c0_235 = arith.constant 0 : index
    %c0_236 = arith.constant 0 : index
    %c0_237 = arith.constant 0 : index
    %558 = vector.load %arg31[%c0_235, %c0_236, %c0_237] : memref<2x32x32xbf16, #tpu.memory_space<vmem>>, vector<1x32x32xbf16>
    %559 = vector.shape_cast %558 : vector<1x32x32xbf16> to vector<32x32xbf16>
    %c0_238 = arith.constant 0 : index
    %c0_239 = arith.constant 0 : index
    %c0_240 = arith.constant 0 : index
    %560 = vector.load %arg32[%c0_238, %c0_239, %c0_240] : memref<2x1x32xf32, #tpu.memory_space<vmem>>, vector<1x1x32xf32>
    %561 = vector.shape_cast %560 : vector<1x1x32xf32> to vector<1x32xf32>
    %c0_241 = arith.constant 0 : index
    %c0_242 = arith.constant 0 : index
    %c0_243 = arith.constant 0 : index
    %562 = vector.load %arg33[%c0_241, %c0_242, %c0_243] : memref<2x32x32xbf16, #tpu.memory_space<vmem>>, vector<1x32x32xbf16>
    %563 = vector.shape_cast %562 : vector<1x32x32xbf16> to vector<32x32xbf16>
    %c0_244 = arith.constant 0 : index
    %c0_245 = arith.constant 0 : index
    %c0_246 = arith.constant 0 : index
    %564 = vector.load %arg34[%c0_244, %c0_245, %c0_246] : memref<2x1x32xf32, #tpu.memory_space<vmem>>, vector<1x1x32xf32>
    %565 = vector.shape_cast %564 : vector<1x1x32xf32> to vector<1x32xf32>
    %c0_247 = arith.constant 0 : index
    %c0_248 = arith.constant 0 : index
    %c0_249 = arith.constant 0 : index
    %566 = vector.load %arg35[%c0_247, %c0_248, %c0_249] : memref<2x32x32xbf16, #tpu.memory_space<vmem>>, vector<1x32x32xbf16>
    %567 = vector.shape_cast %566 : vector<1x32x32xbf16> to vector<32x32xbf16>
    %c0_250 = arith.constant 0 : index
    %c0_251 = arith.constant 0 : index
    %c0_252 = arith.constant 0 : index
    %568 = vector.load %arg36[%c0_250, %c0_251, %c0_252] : memref<2x1x32xf32, #tpu.memory_space<vmem>>, vector<1x1x32xf32>
    %569 = vector.shape_cast %568 : vector<1x1x32xf32> to vector<1x32xf32>
    %c0_253 = arith.constant 0 : index
    %c0_254 = arith.constant 0 : index
    %c0_255 = arith.constant 0 : index
    %570 = vector.load %arg37[%c0_253, %c0_254, %c0_255] : memref<2x32x32xbf16, #tpu.memory_space<vmem>>, vector<1x32x32xbf16>
    %571 = vector.shape_cast %570 : vector<1x32x32xbf16> to vector<32x32xbf16>
    %c0_256 = arith.constant 0 : index
    %c0_257 = arith.constant 0 : index
    %c0_258 = arith.constant 0 : index
    %572 = vector.load %arg38[%c0_256, %c0_257, %c0_258] : memref<2x1x32xf32, #tpu.memory_space<vmem>>, vector<1x1x32xf32>
    %573 = vector.shape_cast %572 : vector<1x1x32xf32> to vector<1x32xf32>
    %574 = arith.truncf %557 : vector<16x32xf32> to vector<16x32xbf16>
    %cst_259 = arith.constant dense<0.000000e+00> : vector<16x32xf32>
    %575 = tpu.matmul %574, %559, %cst_259 {dimension_numbers = #tpu.dot_dimension_numbers<[1], [0], [0], [1], [0, 0, 1, 1], [], []>} : vector<16x32xbf16>, vector<32x32xbf16>, vector<16x32xf32> -> vector<16x32xf32>
    %576 = vector.broadcast %561 : vector<1x32xf32> to vector<16x32xf32>
    %577 = arith.addf %575, %576 : vector<16x32xf32>
    %578 = arith.truncf %557 : vector<16x32xf32> to vector<16x32xbf16>
    %cst_260 = arith.constant dense<0.000000e+00> : vector<16x32xf32>
    %579 = tpu.matmul %578, %563, %cst_260 {dimension_numbers = #tpu.dot_dimension_numbers<[1], [0], [0], [1], [0, 0, 1, 1], [], []>} : vector<16x32xbf16>, vector<32x32xbf16>, vector<16x32xf32> -> vector<16x32xf32>
    %580 = vector.broadcast %565 : vector<1x32xf32> to vector<16x32xf32>
    %581 = arith.addf %579, %580 : vector<16x32xf32>
    %582 = arith.truncf %557 : vector<16x32xf32> to vector<16x32xbf16>
    %cst_261 = arith.constant dense<0.000000e+00> : vector<16x32xf32>
    %583 = tpu.matmul %582, %567, %cst_261 {dimension_numbers = #tpu.dot_dimension_numbers<[1], [0], [0], [1], [0, 0, 1, 1], [], []>} : vector<16x32xbf16>, vector<32x32xbf16>, vector<16x32xf32> -> vector<16x32xf32>
    %584 = vector.broadcast %569 : vector<1x32xf32> to vector<16x32xf32>
    %585 = arith.addf %583, %584 : vector<16x32xf32>
    %586 = vector.extract_strided_slice %577 {offsets = [0, 0], sizes = [8, 32], strides = [1, 1]} : vector<16x32xf32> to vector<8x32xf32>
    %587 = vector.extract_strided_slice %581 {offsets = [0, 0], sizes = [8, 32], strides = [1, 1]} : vector<16x32xf32> to vector<8x32xf32>
    %588 = vector.extract_strided_slice %585 {offsets = [0, 0], sizes = [8, 32], strides = [1, 1]} : vector<16x32xf32> to vector<8x32xf32>
    %589 = vector.extract_strided_slice %1 {offsets = [0, 0, 0], sizes = [1, 8, 8], strides = [1, 1, 1]} : vector<2x8x8xf32> to vector<1x8x8xf32>
    %590 = vector.shape_cast %589 : vector<1x8x8xf32> to vector<8x8xf32>
    %591 = vector.extract_strided_slice %586 {offsets = [0, 0], sizes = [8, 8], strides = [1, 1]} : vector<8x32xf32> to vector<8x8xf32>
    %592 = vector.extract_strided_slice %587 {offsets = [0, 0], sizes = [8, 8], strides = [1, 1]} : vector<8x32xf32> to vector<8x8xf32>
    %593 = vector.extract_strided_slice %588 {offsets = [0, 0], sizes = [8, 8], strides = [1, 1]} : vector<8x32xf32> to vector<8x8xf32>
    %cst_262 = arith.constant dense<0.000000e+00> : vector<8x8xf32>
    %594 = tpu.matmul %591, %592, %cst_262 {dimension_numbers = #tpu.dot_dimension_numbers<[1], [1], [0], [0], [0, 0, 1, 0], [], []>} : vector<8x8xf32>, vector<8x8xf32>, vector<8x8xf32> -> vector<8x8xf32>
    %595 = arith.addf %594, %590 : vector<8x8xf32>
    %cst_263 = arith.constant dense<0xFF800000> : vector<8xf32>
    %596 = vector.multi_reduction <maximumf>, %595, %cst_263 [1] : vector<8x8xf32> to vector<8xf32>
    %597 = vector.shape_cast %596 : vector<8xf32> to vector<8x1xf32>
    %598 = vector.broadcast %597 : vector<8x1xf32> to vector<8x8xf32>
    %599 = arith.subf %595, %598 : vector<8x8xf32>
    %600 = math.exp %599 : vector<8x8xf32>
    %cst_264 = arith.constant dense<0.000000e+00> : vector<8xf32>
    %601 = vector.multi_reduction <add>, %600, %cst_264 [1] : vector<8x8xf32> to vector<8xf32>
    %602 = vector.shape_cast %601 : vector<8xf32> to vector<8x1xf32>
    %603 = vector.broadcast %602 : vector<8x1xf32> to vector<8x8xf32>
    %604 = arith.divf %600, %603 : vector<8x8xf32>
    %cst_265 = arith.constant dense<0.000000e+00> : vector<8x8xf32>
    %605 = tpu.matmul %604, %593, %cst_265 {dimension_numbers = #tpu.dot_dimension_numbers<[1], [0], [0], [1], [0, 0, 1, 1], [], []>} : vector<8x8xf32>, vector<8x8xf32>, vector<8x8xf32> -> vector<8x8xf32>
    %606 = vector.extract_strided_slice %586 {offsets = [0, 8], sizes = [8, 8], strides = [1, 1]} : vector<8x32xf32> to vector<8x8xf32>
    %607 = vector.extract_strided_slice %587 {offsets = [0, 8], sizes = [8, 8], strides = [1, 1]} : vector<8x32xf32> to vector<8x8xf32>
    %608 = vector.extract_strided_slice %588 {offsets = [0, 8], sizes = [8, 8], strides = [1, 1]} : vector<8x32xf32> to vector<8x8xf32>
    %cst_266 = arith.constant dense<0.000000e+00> : vector<8x8xf32>
    %609 = tpu.matmul %606, %607, %cst_266 {dimension_numbers = #tpu.dot_dimension_numbers<[1], [1], [0], [0], [0, 0, 1, 0], [], []>} : vector<8x8xf32>, vector<8x8xf32>, vector<8x8xf32> -> vector<8x8xf32>
    %610 = arith.addf %609, %590 : vector<8x8xf32>
    %cst_267 = arith.constant dense<0xFF800000> : vector<8xf32>
    %611 = vector.multi_reduction <maximumf>, %610, %cst_267 [1] : vector<8x8xf32> to vector<8xf32>
    %612 = vector.shape_cast %611 : vector<8xf32> to vector<8x1xf32>
    %613 = vector.broadcast %612 : vector<8x1xf32> to vector<8x8xf32>
    %614 = arith.subf %610, %613 : vector<8x8xf32>
    %615 = math.exp %614 : vector<8x8xf32>
    %cst_268 = arith.constant dense<0.000000e+00> : vector<8xf32>
    %616 = vector.multi_reduction <add>, %615, %cst_268 [1] : vector<8x8xf32> to vector<8xf32>
    %617 = vector.shape_cast %616 : vector<8xf32> to vector<8x1xf32>
    %618 = vector.broadcast %617 : vector<8x1xf32> to vector<8x8xf32>
    %619 = arith.divf %615, %618 : vector<8x8xf32>
    %cst_269 = arith.constant dense<0.000000e+00> : vector<8x8xf32>
    %620 = tpu.matmul %619, %608, %cst_269 {dimension_numbers = #tpu.dot_dimension_numbers<[1], [0], [0], [1], [0, 0, 1, 1], [], []>} : vector<8x8xf32>, vector<8x8xf32>, vector<8x8xf32> -> vector<8x8xf32>
    %621 = vector.extract_strided_slice %586 {offsets = [0, 16], sizes = [8, 8], strides = [1, 1]} : vector<8x32xf32> to vector<8x8xf32>
    %622 = vector.extract_strided_slice %587 {offsets = [0, 16], sizes = [8, 8], strides = [1, 1]} : vector<8x32xf32> to vector<8x8xf32>
    %623 = vector.extract_strided_slice %588 {offsets = [0, 16], sizes = [8, 8], strides = [1, 1]} : vector<8x32xf32> to vector<8x8xf32>
    %cst_270 = arith.constant dense<0.000000e+00> : vector<8x8xf32>
    %624 = tpu.matmul %621, %622, %cst_270 {dimension_numbers = #tpu.dot_dimension_numbers<[1], [1], [0], [0], [0, 0, 1, 0], [], []>} : vector<8x8xf32>, vector<8x8xf32>, vector<8x8xf32> -> vector<8x8xf32>
    %625 = arith.addf %624, %590 : vector<8x8xf32>
    %cst_271 = arith.constant dense<0xFF800000> : vector<8xf32>
    %626 = vector.multi_reduction <maximumf>, %625, %cst_271 [1] : vector<8x8xf32> to vector<8xf32>
    %627 = vector.shape_cast %626 : vector<8xf32> to vector<8x1xf32>
    %628 = vector.broadcast %627 : vector<8x1xf32> to vector<8x8xf32>
    %629 = arith.subf %625, %628 : vector<8x8xf32>
    %630 = math.exp %629 : vector<8x8xf32>
    %cst_272 = arith.constant dense<0.000000e+00> : vector<8xf32>
    %631 = vector.multi_reduction <add>, %630, %cst_272 [1] : vector<8x8xf32> to vector<8xf32>
    %632 = vector.shape_cast %631 : vector<8xf32> to vector<8x1xf32>
    %633 = vector.broadcast %632 : vector<8x1xf32> to vector<8x8xf32>
    %634 = arith.divf %630, %633 : vector<8x8xf32>
    %cst_273 = arith.constant dense<0.000000e+00> : vector<8x8xf32>
    %635 = tpu.matmul %634, %623, %cst_273 {dimension_numbers = #tpu.dot_dimension_numbers<[1], [0], [0], [1], [0, 0, 1, 1], [], []>} : vector<8x8xf32>, vector<8x8xf32>, vector<8x8xf32> -> vector<8x8xf32>
    %636 = vector.extract_strided_slice %586 {offsets = [0, 24], sizes = [8, 8], strides = [1, 1]} : vector<8x32xf32> to vector<8x8xf32>
    %637 = vector.extract_strided_slice %587 {offsets = [0, 24], sizes = [8, 8], strides = [1, 1]} : vector<8x32xf32> to vector<8x8xf32>
    %638 = vector.extract_strided_slice %588 {offsets = [0, 24], sizes = [8, 8], strides = [1, 1]} : vector<8x32xf32> to vector<8x8xf32>
    %cst_274 = arith.constant dense<0.000000e+00> : vector<8x8xf32>
    %639 = tpu.matmul %636, %637, %cst_274 {dimension_numbers = #tpu.dot_dimension_numbers<[1], [1], [0], [0], [0, 0, 1, 0], [], []>} : vector<8x8xf32>, vector<8x8xf32>, vector<8x8xf32> -> vector<8x8xf32>
    %640 = arith.addf %639, %590 : vector<8x8xf32>
    %cst_275 = arith.constant dense<0xFF800000> : vector<8xf32>
    %641 = vector.multi_reduction <maximumf>, %640, %cst_275 [1] : vector<8x8xf32> to vector<8xf32>
    %642 = vector.shape_cast %641 : vector<8xf32> to vector<8x1xf32>
    %643 = vector.broadcast %642 : vector<8x1xf32> to vector<8x8xf32>
    %644 = arith.subf %640, %643 : vector<8x8xf32>
    %645 = math.exp %644 : vector<8x8xf32>
    %cst_276 = arith.constant dense<0.000000e+00> : vector<8xf32>
    %646 = vector.multi_reduction <add>, %645, %cst_276 [1] : vector<8x8xf32> to vector<8xf32>
    %647 = vector.shape_cast %646 : vector<8xf32> to vector<8x1xf32>
    %648 = vector.broadcast %647 : vector<8x1xf32> to vector<8x8xf32>
    %649 = arith.divf %645, %648 : vector<8x8xf32>
    %cst_277 = arith.constant dense<0.000000e+00> : vector<8x8xf32>
    %650 = tpu.matmul %649, %638, %cst_277 {dimension_numbers = #tpu.dot_dimension_numbers<[1], [0], [0], [1], [0, 0, 1, 1], [], []>} : vector<8x8xf32>, vector<8x8xf32>, vector<8x8xf32> -> vector<8x8xf32>
    %651 = tpu.concatenate %605, %620, %635, %650 in 1 : vector<8x8xf32>, vector<8x8xf32>, vector<8x8xf32>, vector<8x8xf32> -> vector<8x32xf32>
    %652 = vector.extract_strided_slice %577 {offsets = [8, 0], sizes = [8, 32], strides = [1, 1]} : vector<16x32xf32> to vector<8x32xf32>
    %653 = vector.extract_strided_slice %581 {offsets = [8, 0], sizes = [8, 32], strides = [1, 1]} : vector<16x32xf32> to vector<8x32xf32>
    %654 = vector.extract_strided_slice %585 {offsets = [8, 0], sizes = [8, 32], strides = [1, 1]} : vector<16x32xf32> to vector<8x32xf32>
    %655 = vector.extract_strided_slice %1 {offsets = [1, 0, 0], sizes = [1, 8, 8], strides = [1, 1, 1]} : vector<2x8x8xf32> to vector<1x8x8xf32>
    %656 = vector.shape_cast %655 : vector<1x8x8xf32> to vector<8x8xf32>
    %657 = vector.extract_strided_slice %652 {offsets = [0, 0], sizes = [8, 8], strides = [1, 1]} : vector<8x32xf32> to vector<8x8xf32>
    %658 = vector.extract_strided_slice %653 {offsets = [0, 0], sizes = [8, 8], strides = [1, 1]} : vector<8x32xf32> to vector<8x8xf32>
    %659 = vector.extract_strided_slice %654 {offsets = [0, 0], sizes = [8, 8], strides = [1, 1]} : vector<8x32xf32> to vector<8x8xf32>
    %cst_278 = arith.constant dense<0.000000e+00> : vector<8x8xf32>
    %660 = tpu.matmul %657, %658, %cst_278 {dimension_numbers = #tpu.dot_dimension_numbers<[1], [1], [0], [0], [0, 0, 1, 0], [], []>} : vector<8x8xf32>, vector<8x8xf32>, vector<8x8xf32> -> vector<8x8xf32>
    %661 = arith.addf %660, %656 : vector<8x8xf32>
    %cst_279 = arith.constant dense<0xFF800000> : vector<8xf32>
    %662 = vector.multi_reduction <maximumf>, %661, %cst_279 [1] : vector<8x8xf32> to vector<8xf32>
    %663 = vector.shape_cast %662 : vector<8xf32> to vector<8x1xf32>
    %664 = vector.broadcast %663 : vector<8x1xf32> to vector<8x8xf32>
    %665 = arith.subf %661, %664 : vector<8x8xf32>
    %666 = math.exp %665 : vector<8x8xf32>
    %cst_280 = arith.constant dense<0.000000e+00> : vector<8xf32>
    %667 = vector.multi_reduction <add>, %666, %cst_280 [1] : vector<8x8xf32> to vector<8xf32>
    %668 = vector.shape_cast %667 : vector<8xf32> to vector<8x1xf32>
    %669 = vector.broadcast %668 : vector<8x1xf32> to vector<8x8xf32>
    %670 = arith.divf %666, %669 : vector<8x8xf32>
    %cst_281 = arith.constant dense<0.000000e+00> : vector<8x8xf32>
    %671 = tpu.matmul %670, %659, %cst_281 {dimension_numbers = #tpu.dot_dimension_numbers<[1], [0], [0], [1], [0, 0, 1, 1], [], []>} : vector<8x8xf32>, vector<8x8xf32>, vector<8x8xf32> -> vector<8x8xf32>
    %672 = vector.extract_strided_slice %652 {offsets = [0, 8], sizes = [8, 8], strides = [1, 1]} : vector<8x32xf32> to vector<8x8xf32>
    %673 = vector.extract_strided_slice %653 {offsets = [0, 8], sizes = [8, 8], strides = [1, 1]} : vector<8x32xf32> to vector<8x8xf32>
    %674 = vector.extract_strided_slice %654 {offsets = [0, 8], sizes = [8, 8], strides = [1, 1]} : vector<8x32xf32> to vector<8x8xf32>
    %cst_282 = arith.constant dense<0.000000e+00> : vector<8x8xf32>
    %675 = tpu.matmul %672, %673, %cst_282 {dimension_numbers = #tpu.dot_dimension_numbers<[1], [1], [0], [0], [0, 0, 1, 0], [], []>} : vector<8x8xf32>, vector<8x8xf32>, vector<8x8xf32> -> vector<8x8xf32>
    %676 = arith.addf %675, %656 : vector<8x8xf32>
    %cst_283 = arith.constant dense<0xFF800000> : vector<8xf32>
    %677 = vector.multi_reduction <maximumf>, %676, %cst_283 [1] : vector<8x8xf32> to vector<8xf32>
    %678 = vector.shape_cast %677 : vector<8xf32> to vector<8x1xf32>
    %679 = vector.broadcast %678 : vector<8x1xf32> to vector<8x8xf32>
    %680 = arith.subf %676, %679 : vector<8x8xf32>
    %681 = math.exp %680 : vector<8x8xf32>
    %cst_284 = arith.constant dense<0.000000e+00> : vector<8xf32>
    %682 = vector.multi_reduction <add>, %681, %cst_284 [1] : vector<8x8xf32> to vector<8xf32>
    %683 = vector.shape_cast %682 : vector<8xf32> to vector<8x1xf32>
    %684 = vector.broadcast %683 : vector<8x1xf32> to vector<8x8xf32>
    %685 = arith.divf %681, %684 : vector<8x8xf32>
    %cst_285 = arith.constant dense<0.000000e+00> : vector<8x8xf32>
    %686 = tpu.matmul %685, %674, %cst_285 {dimension_numbers = #tpu.dot_dimension_numbers<[1], [0], [0], [1], [0, 0, 1, 1], [], []>} : vector<8x8xf32>, vector<8x8xf32>, vector<8x8xf32> -> vector<8x8xf32>
    %687 = vector.extract_strided_slice %652 {offsets = [0, 16], sizes = [8, 8], strides = [1, 1]} : vector<8x32xf32> to vector<8x8xf32>
    %688 = vector.extract_strided_slice %653 {offsets = [0, 16], sizes = [8, 8], strides = [1, 1]} : vector<8x32xf32> to vector<8x8xf32>
    %689 = vector.extract_strided_slice %654 {offsets = [0, 16], sizes = [8, 8], strides = [1, 1]} : vector<8x32xf32> to vector<8x8xf32>
    %cst_286 = arith.constant dense<0.000000e+00> : vector<8x8xf32>
    %690 = tpu.matmul %687, %688, %cst_286 {dimension_numbers = #tpu.dot_dimension_numbers<[1], [1], [0], [0], [0, 0, 1, 0], [], []>} : vector<8x8xf32>, vector<8x8xf32>, vector<8x8xf32> -> vector<8x8xf32>
    %691 = arith.addf %690, %656 : vector<8x8xf32>
    %cst_287 = arith.constant dense<0xFF800000> : vector<8xf32>
    %692 = vector.multi_reduction <maximumf>, %691, %cst_287 [1] : vector<8x8xf32> to vector<8xf32>
    %693 = vector.shape_cast %692 : vector<8xf32> to vector<8x1xf32>
    %694 = vector.broadcast %693 : vector<8x1xf32> to vector<8x8xf32>
    %695 = arith.subf %691, %694 : vector<8x8xf32>
    %696 = math.exp %695 : vector<8x8xf32>
    %cst_288 = arith.constant dense<0.000000e+00> : vector<8xf32>
    %697 = vector.multi_reduction <add>, %696, %cst_288 [1] : vector<8x8xf32> to vector<8xf32>
    %698 = vector.shape_cast %697 : vector<8xf32> to vector<8x1xf32>
    %699 = vector.broadcast %698 : vector<8x1xf32> to vector<8x8xf32>
    %700 = arith.divf %696, %699 : vector<8x8xf32>
    %cst_289 = arith.constant dense<0.000000e+00> : vector<8x8xf32>
    %701 = tpu.matmul %700, %689, %cst_289 {dimension_numbers = #tpu.dot_dimension_numbers<[1], [0], [0], [1], [0, 0, 1, 1], [], []>} : vector<8x8xf32>, vector<8x8xf32>, vector<8x8xf32> -> vector<8x8xf32>
    %702 = vector.extract_strided_slice %652 {offsets = [0, 24], sizes = [8, 8], strides = [1, 1]} : vector<8x32xf32> to vector<8x8xf32>
    %703 = vector.extract_strided_slice %653 {offsets = [0, 24], sizes = [8, 8], strides = [1, 1]} : vector<8x32xf32> to vector<8x8xf32>
    %704 = vector.extract_strided_slice %654 {offsets = [0, 24], sizes = [8, 8], strides = [1, 1]} : vector<8x32xf32> to vector<8x8xf32>
    %cst_290 = arith.constant dense<0.000000e+00> : vector<8x8xf32>
    %705 = tpu.matmul %702, %703, %cst_290 {dimension_numbers = #tpu.dot_dimension_numbers<[1], [1], [0], [0], [0, 0, 1, 0], [], []>} : vector<8x8xf32>, vector<8x8xf32>, vector<8x8xf32> -> vector<8x8xf32>
    %706 = arith.addf %705, %656 : vector<8x8xf32>
    %cst_291 = arith.constant dense<0xFF800000> : vector<8xf32>
    %707 = vector.multi_reduction <maximumf>, %706, %cst_291 [1] : vector<8x8xf32> to vector<8xf32>
    %708 = vector.shape_cast %707 : vector<8xf32> to vector<8x1xf32>
    %709 = vector.broadcast %708 : vector<8x1xf32> to vector<8x8xf32>
    %710 = arith.subf %706, %709 : vector<8x8xf32>
    %711 = math.exp %710 : vector<8x8xf32>
    %cst_292 = arith.constant dense<0.000000e+00> : vector<8xf32>
    %712 = vector.multi_reduction <add>, %711, %cst_292 [1] : vector<8x8xf32> to vector<8xf32>
    %713 = vector.shape_cast %712 : vector<8xf32> to vector<8x1xf32>
    %714 = vector.broadcast %713 : vector<8x1xf32> to vector<8x8xf32>
    %715 = arith.divf %711, %714 : vector<8x8xf32>
    %cst_293 = arith.constant dense<0.000000e+00> : vector<8x8xf32>
    %716 = tpu.matmul %715, %704, %cst_293 {dimension_numbers = #tpu.dot_dimension_numbers<[1], [0], [0], [1], [0, 0, 1, 1], [], []>} : vector<8x8xf32>, vector<8x8xf32>, vector<8x8xf32> -> vector<8x8xf32>
    %717 = tpu.concatenate %671, %686, %701, %716 in 1 : vector<8x8xf32>, vector<8x8xf32>, vector<8x8xf32>, vector<8x8xf32> -> vector<8x32xf32>
    %718 = tpu.concatenate %651, %717 in 0 : vector<8x32xf32>, vector<8x32xf32> -> vector<16x32xf32>
    %719 = arith.truncf %718 : vector<16x32xf32> to vector<16x32xbf16>
    %cst_294 = arith.constant dense<0.000000e+00> : vector<16x32xf32>
    %720 = tpu.matmul %719, %571, %cst_294 {dimension_numbers = #tpu.dot_dimension_numbers<[1], [0], [0], [1], [0, 0, 1, 1], [], []>} : vector<16x32xbf16>, vector<32x32xbf16>, vector<16x32xf32> -> vector<16x32xf32>
    %721 = vector.broadcast %573 : vector<1x32xf32> to vector<16x32xf32>
    %722 = arith.addf %720, %721 : vector<16x32xf32>
    %723 = arith.addf %531, %722 : vector<16x32xf32>
    %c0_295 = arith.constant 0 : index
    %c0_296 = arith.constant 0 : index
    %c0_297 = arith.constant 0 : index
    %724 = vector.load %arg39[%c0_295, %c0_296, %c0_297] : memref<2x1x32xf32, #tpu.memory_space<vmem>>, vector<1x1x32xf32>
    %725 = vector.shape_cast %724 : vector<1x1x32xf32> to vector<1x32xf32>
    %c0_298 = arith.constant 0 : index
    %c0_299 = arith.constant 0 : index
    %c0_300 = arith.constant 0 : index
    %726 = vector.load %arg40[%c0_298, %c0_299, %c0_300] : memref<2x1x32xf32, #tpu.memory_space<vmem>>, vector<1x1x32xf32>
    %727 = vector.shape_cast %726 : vector<1x1x32xf32> to vector<1x32xf32>
    %cst_301 = arith.constant dense<0.000000e+00> : vector<16xf32>
    %728 = vector.multi_reduction <add>, %723, %cst_301 [1] : vector<16x32xf32> to vector<16xf32>
    %729 = vector.shape_cast %728 : vector<16xf32> to vector<16x1xf32>
    %cst_302 = arith.constant 3.200000e+01 : f32
    %730 = vector.broadcast %cst_302 : f32 to vector<16x1xf32>
    %731 = arith.divf %729, %730 : vector<16x1xf32>
    %732 = vector.broadcast %731 : vector<16x1xf32> to vector<16x32xf32>
    %733 = arith.subf %723, %732 : vector<16x32xf32>
    %734 = arith.mulf %733, %733 : vector<16x32xf32>
    %cst_303 = arith.constant dense<0.000000e+00> : vector<16xf32>
    %735 = vector.multi_reduction <add>, %734, %cst_303 [1] : vector<16x32xf32> to vector<16xf32>
    %736 = vector.shape_cast %735 : vector<16xf32> to vector<16x1xf32>
    %cst_304 = arith.constant 3.100000e+01 : f32
    %737 = vector.broadcast %cst_304 : f32 to vector<16x1xf32>
    %738 = arith.divf %736, %737 : vector<16x1xf32>
    %739 = vector.broadcast %731 : vector<16x1xf32> to vector<16x32xf32>
    %740 = arith.subf %723, %739 : vector<16x32xf32>
    %741 = vector.broadcast %725 : vector<1x32xf32> to vector<16x32xf32>
    %742 = arith.mulf %741, %740 : vector<16x32xf32>
    %743 = math.sqrt %738 : vector<16x1xf32>
    %cst_305 = arith.constant 9.99999997E-7 : f32
    %744 = vector.broadcast %cst_305 : f32 to vector<16x1xf32>
    %745 = arith.addf %743, %744 : vector<16x1xf32>
    %746 = vector.broadcast %745 : vector<16x1xf32> to vector<16x32xf32>
    %747 = arith.divf %742, %746 : vector<16x32xf32>
    %748 = vector.broadcast %727 : vector<1x32xf32> to vector<16x32xf32>
    %749 = arith.addf %747, %748 : vector<16x32xf32>
    %c0_306 = arith.constant 0 : index
    %c0_307 = arith.constant 0 : index
    %c0_308 = arith.constant 0 : index
    %750 = vector.load %arg41[%c0_306, %c0_307, %c0_308] : memref<2x32x32xbf16, #tpu.memory_space<vmem>>, vector<1x32x32xbf16>
    %751 = vector.shape_cast %750 : vector<1x32x32xbf16> to vector<32x32xbf16>
    %c0_309 = arith.constant 0 : index
    %c0_310 = arith.constant 0 : index
    %c0_311 = arith.constant 0 : index
    %752 = vector.load %arg42[%c0_309, %c0_310, %c0_311] : memref<2x1x32xf32, #tpu.memory_space<vmem>>, vector<1x1x32xf32>
    %753 = vector.shape_cast %752 : vector<1x1x32xf32> to vector<1x32xf32>
    %c0_312 = arith.constant 0 : index
    %c0_313 = arith.constant 0 : index
    %c0_314 = arith.constant 0 : index
    %754 = vector.load %arg43[%c0_312, %c0_313, %c0_314] : memref<2x32x32xbf16, #tpu.memory_space<vmem>>, vector<1x32x32xbf16>
    %755 = vector.shape_cast %754 : vector<1x32x32xbf16> to vector<32x32xbf16>
    %c0_315 = arith.constant 0 : index
    %c0_316 = arith.constant 0 : index
    %c0_317 = arith.constant 0 : index
    %756 = vector.load %arg44[%c0_315, %c0_316, %c0_317] : memref<2x1x32xf32, #tpu.memory_space<vmem>>, vector<1x1x32xf32>
    %757 = vector.shape_cast %756 : vector<1x1x32xf32> to vector<1x32xf32>
    %c0_318 = arith.constant 0 : index
    %c0_319 = arith.constant 0 : index
    %c0_320 = arith.constant 0 : index
    %758 = vector.load %arg45[%c0_318, %c0_319, %c0_320] : memref<2x32x32xbf16, #tpu.memory_space<vmem>>, vector<1x32x32xbf16>
    %759 = vector.shape_cast %758 : vector<1x32x32xbf16> to vector<32x32xbf16>
    %c0_321 = arith.constant 0 : index
    %c0_322 = arith.constant 0 : index
    %c0_323 = arith.constant 0 : index
    %760 = vector.load %arg46[%c0_321, %c0_322, %c0_323] : memref<2x1x32xf32, #tpu.memory_space<vmem>>, vector<1x1x32xf32>
    %761 = vector.shape_cast %760 : vector<1x1x32xf32> to vector<1x32xf32>
    %c0_324 = arith.constant 0 : index
    %c0_325 = arith.constant 0 : index
    %c0_326 = arith.constant 0 : index
    %762 = vector.load %arg47[%c0_324, %c0_325, %c0_326] : memref<2x32x32xbf16, #tpu.memory_space<vmem>>, vector<1x32x32xbf16>
    %763 = vector.shape_cast %762 : vector<1x32x32xbf16> to vector<32x32xbf16>
    %c0_327 = arith.constant 0 : index
    %c0_328 = arith.constant 0 : index
    %c0_329 = arith.constant 0 : index
    %764 = vector.load %arg48[%c0_327, %c0_328, %c0_329] : memref<2x1x32xf32, #tpu.memory_space<vmem>>, vector<1x1x32xf32>
    %765 = vector.shape_cast %764 : vector<1x1x32xf32> to vector<1x32xf32>
    %766 = arith.truncf %749 : vector<16x32xf32> to vector<16x32xbf16>
    %cst_330 = arith.constant dense<0.000000e+00> : vector<16x32xf32>
    %767 = tpu.matmul %766, %751, %cst_330 {dimension_numbers = #tpu.dot_dimension_numbers<[1], [0], [0], [1], [0, 0, 1, 1], [], []>} : vector<16x32xbf16>, vector<32x32xbf16>, vector<16x32xf32> -> vector<16x32xf32>
    %768 = vector.broadcast %753 : vector<1x32xf32> to vector<16x32xf32>
    %769 = arith.addf %767, %768 : vector<16x32xf32>
    %770 = arith.truncf %523 : vector<16x32xf32> to vector<16x32xbf16>
    %cst_331 = arith.constant dense<0.000000e+00> : vector<16x32xf32>
    %771 = tpu.matmul %770, %755, %cst_331 {dimension_numbers = #tpu.dot_dimension_numbers<[1], [0], [0], [1], [0, 0, 1, 1], [], []>} : vector<16x32xbf16>, vector<32x32xbf16>, vector<16x32xf32> -> vector<16x32xf32>
    %772 = vector.broadcast %757 : vector<1x32xf32> to vector<16x32xf32>
    %773 = arith.addf %771, %772 : vector<16x32xf32>
    %774 = arith.truncf %523 : vector<16x32xf32> to vector<16x32xbf16>
    %cst_332 = arith.constant dense<0.000000e+00> : vector<16x32xf32>
    %775 = tpu.matmul %774, %759, %cst_332 {dimension_numbers = #tpu.dot_dimension_numbers<[1], [0], [0], [1], [0, 0, 1, 1], [], []>} : vector<16x32xbf16>, vector<32x32xbf16>, vector<16x32xf32> -> vector<16x32xf32>
    %776 = vector.broadcast %761 : vector<1x32xf32> to vector<16x32xf32>
    %777 = arith.addf %775, %776 : vector<16x32xf32>
    %778 = vector.extract_strided_slice %769 {offsets = [0, 0], sizes = [8, 32], strides = [1, 1]} : vector<16x32xf32> to vector<8x32xf32>
    %779 = vector.extract_strided_slice %773 {offsets = [0, 0], sizes = [8, 32], strides = [1, 1]} : vector<16x32xf32> to vector<8x32xf32>
    %780 = vector.extract_strided_slice %777 {offsets = [0, 0], sizes = [8, 32], strides = [1, 1]} : vector<16x32xf32> to vector<8x32xf32>
    %781 = vector.extract_strided_slice %0 {offsets = [0, 0, 0], sizes = [1, 1, 8], strides = [1, 1, 1]} : vector<2x1x8xf32> to vector<1x1x8xf32>
    %782 = vector.shape_cast %781 : vector<1x1x8xf32> to vector<1x8xf32>
    %783 = vector.extract_strided_slice %778 {offsets = [0, 0], sizes = [8, 8], strides = [1, 1]} : vector<8x32xf32> to vector<8x8xf32>
    %784 = vector.extract_strided_slice %779 {offsets = [0, 0], sizes = [8, 8], strides = [1, 1]} : vector<8x32xf32> to vector<8x8xf32>
    %785 = vector.extract_strided_slice %780 {offsets = [0, 0], sizes = [8, 8], strides = [1, 1]} : vector<8x32xf32> to vector<8x8xf32>
    %cst_333 = arith.constant dense<0.000000e+00> : vector<8x8xf32>
    %786 = tpu.matmul %783, %784, %cst_333 {dimension_numbers = #tpu.dot_dimension_numbers<[1], [1], [0], [0], [0, 0, 1, 0], [], []>} : vector<8x8xf32>, vector<8x8xf32>, vector<8x8xf32> -> vector<8x8xf32>
    %787 = vector.broadcast %782 : vector<1x8xf32> to vector<8x8xf32>
    %788 = arith.addf %786, %787 : vector<8x8xf32>
    %cst_334 = arith.constant dense<0xFF800000> : vector<8xf32>
    %789 = vector.multi_reduction <maximumf>, %788, %cst_334 [1] : vector<8x8xf32> to vector<8xf32>
    %790 = vector.shape_cast %789 : vector<8xf32> to vector<8x1xf32>
    %791 = vector.broadcast %790 : vector<8x1xf32> to vector<8x8xf32>
    %792 = arith.subf %788, %791 : vector<8x8xf32>
    %793 = math.exp %792 : vector<8x8xf32>
    %cst_335 = arith.constant dense<0.000000e+00> : vector<8xf32>
    %794 = vector.multi_reduction <add>, %793, %cst_335 [1] : vector<8x8xf32> to vector<8xf32>
    %795 = vector.shape_cast %794 : vector<8xf32> to vector<8x1xf32>
    %796 = vector.broadcast %795 : vector<8x1xf32> to vector<8x8xf32>
    %797 = arith.divf %793, %796 : vector<8x8xf32>
    %cst_336 = arith.constant dense<0.000000e+00> : vector<8x8xf32>
    %798 = tpu.matmul %797, %785, %cst_336 {dimension_numbers = #tpu.dot_dimension_numbers<[1], [0], [0], [1], [0, 0, 1, 1], [], []>} : vector<8x8xf32>, vector<8x8xf32>, vector<8x8xf32> -> vector<8x8xf32>
    %799 = vector.extract_strided_slice %778 {offsets = [0, 8], sizes = [8, 8], strides = [1, 1]} : vector<8x32xf32> to vector<8x8xf32>
    %800 = vector.extract_strided_slice %779 {offsets = [0, 8], sizes = [8, 8], strides = [1, 1]} : vector<8x32xf32> to vector<8x8xf32>
    %801 = vector.extract_strided_slice %780 {offsets = [0, 8], sizes = [8, 8], strides = [1, 1]} : vector<8x32xf32> to vector<8x8xf32>
    %cst_337 = arith.constant dense<0.000000e+00> : vector<8x8xf32>
    %802 = tpu.matmul %799, %800, %cst_337 {dimension_numbers = #tpu.dot_dimension_numbers<[1], [1], [0], [0], [0, 0, 1, 0], [], []>} : vector<8x8xf32>, vector<8x8xf32>, vector<8x8xf32> -> vector<8x8xf32>
    %803 = vector.broadcast %782 : vector<1x8xf32> to vector<8x8xf32>
    %804 = arith.addf %802, %803 : vector<8x8xf32>
    %cst_338 = arith.constant dense<0xFF800000> : vector<8xf32>
    %805 = vector.multi_reduction <maximumf>, %804, %cst_338 [1] : vector<8x8xf32> to vector<8xf32>
    %806 = vector.shape_cast %805 : vector<8xf32> to vector<8x1xf32>
    %807 = vector.broadcast %806 : vector<8x1xf32> to vector<8x8xf32>
    %808 = arith.subf %804, %807 : vector<8x8xf32>
    %809 = math.exp %808 : vector<8x8xf32>
    %cst_339 = arith.constant dense<0.000000e+00> : vector<8xf32>
    %810 = vector.multi_reduction <add>, %809, %cst_339 [1] : vector<8x8xf32> to vector<8xf32>
    %811 = vector.shape_cast %810 : vector<8xf32> to vector<8x1xf32>
    %812 = vector.broadcast %811 : vector<8x1xf32> to vector<8x8xf32>
    %813 = arith.divf %809, %812 : vector<8x8xf32>
    %cst_340 = arith.constant dense<0.000000e+00> : vector<8x8xf32>
    %814 = tpu.matmul %813, %801, %cst_340 {dimension_numbers = #tpu.dot_dimension_numbers<[1], [0], [0], [1], [0, 0, 1, 1], [], []>} : vector<8x8xf32>, vector<8x8xf32>, vector<8x8xf32> -> vector<8x8xf32>
    %815 = vector.extract_strided_slice %778 {offsets = [0, 16], sizes = [8, 8], strides = [1, 1]} : vector<8x32xf32> to vector<8x8xf32>
    %816 = vector.extract_strided_slice %779 {offsets = [0, 16], sizes = [8, 8], strides = [1, 1]} : vector<8x32xf32> to vector<8x8xf32>
    %817 = vector.extract_strided_slice %780 {offsets = [0, 16], sizes = [8, 8], strides = [1, 1]} : vector<8x32xf32> to vector<8x8xf32>
    %cst_341 = arith.constant dense<0.000000e+00> : vector<8x8xf32>
    %818 = tpu.matmul %815, %816, %cst_341 {dimension_numbers = #tpu.dot_dimension_numbers<[1], [1], [0], [0], [0, 0, 1, 0], [], []>} : vector<8x8xf32>, vector<8x8xf32>, vector<8x8xf32> -> vector<8x8xf32>
    %819 = vector.broadcast %782 : vector<1x8xf32> to vector<8x8xf32>
    %820 = arith.addf %818, %819 : vector<8x8xf32>
    %cst_342 = arith.constant dense<0xFF800000> : vector<8xf32>
    %821 = vector.multi_reduction <maximumf>, %820, %cst_342 [1] : vector<8x8xf32> to vector<8xf32>
    %822 = vector.shape_cast %821 : vector<8xf32> to vector<8x1xf32>
    %823 = vector.broadcast %822 : vector<8x1xf32> to vector<8x8xf32>
    %824 = arith.subf %820, %823 : vector<8x8xf32>
    %825 = math.exp %824 : vector<8x8xf32>
    %cst_343 = arith.constant dense<0.000000e+00> : vector<8xf32>
    %826 = vector.multi_reduction <add>, %825, %cst_343 [1] : vector<8x8xf32> to vector<8xf32>
    %827 = vector.shape_cast %826 : vector<8xf32> to vector<8x1xf32>
    %828 = vector.broadcast %827 : vector<8x1xf32> to vector<8x8xf32>
    %829 = arith.divf %825, %828 : vector<8x8xf32>
    %cst_344 = arith.constant dense<0.000000e+00> : vector<8x8xf32>
    %830 = tpu.matmul %829, %817, %cst_344 {dimension_numbers = #tpu.dot_dimension_numbers<[1], [0], [0], [1], [0, 0, 1, 1], [], []>} : vector<8x8xf32>, vector<8x8xf32>, vector<8x8xf32> -> vector<8x8xf32>
    %831 = vector.extract_strided_slice %778 {offsets = [0, 24], sizes = [8, 8], strides = [1, 1]} : vector<8x32xf32> to vector<8x8xf32>
    %832 = vector.extract_strided_slice %779 {offsets = [0, 24], sizes = [8, 8], strides = [1, 1]} : vector<8x32xf32> to vector<8x8xf32>
    %833 = vector.extract_strided_slice %780 {offsets = [0, 24], sizes = [8, 8], strides = [1, 1]} : vector<8x32xf32> to vector<8x8xf32>
    %cst_345 = arith.constant dense<0.000000e+00> : vector<8x8xf32>
    %834 = tpu.matmul %831, %832, %cst_345 {dimension_numbers = #tpu.dot_dimension_numbers<[1], [1], [0], [0], [0, 0, 1, 0], [], []>} : vector<8x8xf32>, vector<8x8xf32>, vector<8x8xf32> -> vector<8x8xf32>
    %835 = vector.broadcast %782 : vector<1x8xf32> to vector<8x8xf32>
    %836 = arith.addf %834, %835 : vector<8x8xf32>
    %cst_346 = arith.constant dense<0xFF800000> : vector<8xf32>
    %837 = vector.multi_reduction <maximumf>, %836, %cst_346 [1] : vector<8x8xf32> to vector<8xf32>
    %838 = vector.shape_cast %837 : vector<8xf32> to vector<8x1xf32>
    %839 = vector.broadcast %838 : vector<8x1xf32> to vector<8x8xf32>
    %840 = arith.subf %836, %839 : vector<8x8xf32>
    %841 = math.exp %840 : vector<8x8xf32>
    %cst_347 = arith.constant dense<0.000000e+00> : vector<8xf32>
    %842 = vector.multi_reduction <add>, %841, %cst_347 [1] : vector<8x8xf32> to vector<8xf32>
    %843 = vector.shape_cast %842 : vector<8xf32> to vector<8x1xf32>
    %844 = vector.broadcast %843 : vector<8x1xf32> to vector<8x8xf32>
    %845 = arith.divf %841, %844 : vector<8x8xf32>
    %cst_348 = arith.constant dense<0.000000e+00> : vector<8x8xf32>
    %846 = tpu.matmul %845, %833, %cst_348 {dimension_numbers = #tpu.dot_dimension_numbers<[1], [0], [0], [1], [0, 0, 1, 1], [], []>} : vector<8x8xf32>, vector<8x8xf32>, vector<8x8xf32> -> vector<8x8xf32>
    %847 = tpu.concatenate %798, %814, %830, %846 in 1 : vector<8x8xf32>, vector<8x8xf32>, vector<8x8xf32>, vector<8x8xf32> -> vector<8x32xf32>
    %848 = vector.extract_strided_slice %769 {offsets = [8, 0], sizes = [8, 32], strides = [1, 1]} : vector<16x32xf32> to vector<8x32xf32>
    %849 = vector.extract_strided_slice %773 {offsets = [8, 0], sizes = [8, 32], strides = [1, 1]} : vector<16x32xf32> to vector<8x32xf32>
    %850 = vector.extract_strided_slice %777 {offsets = [8, 0], sizes = [8, 32], strides = [1, 1]} : vector<16x32xf32> to vector<8x32xf32>
    %851 = vector.extract_strided_slice %0 {offsets = [1, 0, 0], sizes = [1, 1, 8], strides = [1, 1, 1]} : vector<2x1x8xf32> to vector<1x1x8xf32>
    %852 = vector.shape_cast %851 : vector<1x1x8xf32> to vector<1x8xf32>
    %853 = vector.extract_strided_slice %848 {offsets = [0, 0], sizes = [8, 8], strides = [1, 1]} : vector<8x32xf32> to vector<8x8xf32>
    %854 = vector.extract_strided_slice %849 {offsets = [0, 0], sizes = [8, 8], strides = [1, 1]} : vector<8x32xf32> to vector<8x8xf32>
    %855 = vector.extract_strided_slice %850 {offsets = [0, 0], sizes = [8, 8], strides = [1, 1]} : vector<8x32xf32> to vector<8x8xf32>
    %cst_349 = arith.constant dense<0.000000e+00> : vector<8x8xf32>
    %856 = tpu.matmul %853, %854, %cst_349 {dimension_numbers = #tpu.dot_dimension_numbers<[1], [1], [0], [0], [0, 0, 1, 0], [], []>} : vector<8x8xf32>, vector<8x8xf32>, vector<8x8xf32> -> vector<8x8xf32>
    %857 = vector.broadcast %852 : vector<1x8xf32> to vector<8x8xf32>
    %858 = arith.addf %856, %857 : vector<8x8xf32>
    %cst_350 = arith.constant dense<0xFF800000> : vector<8xf32>
    %859 = vector.multi_reduction <maximumf>, %858, %cst_350 [1] : vector<8x8xf32> to vector<8xf32>
    %860 = vector.shape_cast %859 : vector<8xf32> to vector<8x1xf32>
    %861 = vector.broadcast %860 : vector<8x1xf32> to vector<8x8xf32>
    %862 = arith.subf %858, %861 : vector<8x8xf32>
    %863 = math.exp %862 : vector<8x8xf32>
    %cst_351 = arith.constant dense<0.000000e+00> : vector<8xf32>
    %864 = vector.multi_reduction <add>, %863, %cst_351 [1] : vector<8x8xf32> to vector<8xf32>
    %865 = vector.shape_cast %864 : vector<8xf32> to vector<8x1xf32>
    %866 = vector.broadcast %865 : vector<8x1xf32> to vector<8x8xf32>
    %867 = arith.divf %863, %866 : vector<8x8xf32>
    %cst_352 = arith.constant dense<0.000000e+00> : vector<8x8xf32>
    %868 = tpu.matmul %867, %855, %cst_352 {dimension_numbers = #tpu.dot_dimension_numbers<[1], [0], [0], [1], [0, 0, 1, 1], [], []>} : vector<8x8xf32>, vector<8x8xf32>, vector<8x8xf32> -> vector<8x8xf32>
    %869 = vector.extract_strided_slice %848 {offsets = [0, 8], sizes = [8, 8], strides = [1, 1]} : vector<8x32xf32> to vector<8x8xf32>
    %870 = vector.extract_strided_slice %849 {offsets = [0, 8], sizes = [8, 8], strides = [1, 1]} : vector<8x32xf32> to vector<8x8xf32>
    %871 = vector.extract_strided_slice %850 {offsets = [0, 8], sizes = [8, 8], strides = [1, 1]} : vector<8x32xf32> to vector<8x8xf32>
    %cst_353 = arith.constant dense<0.000000e+00> : vector<8x8xf32>
    %872 = tpu.matmul %869, %870, %cst_353 {dimension_numbers = #tpu.dot_dimension_numbers<[1], [1], [0], [0], [0, 0, 1, 0], [], []>} : vector<8x8xf32>, vector<8x8xf32>, vector<8x8xf32> -> vector<8x8xf32>
    %873 = vector.broadcast %852 : vector<1x8xf32> to vector<8x8xf32>
    %874 = arith.addf %872, %873 : vector<8x8xf32>
    %cst_354 = arith.constant dense<0xFF800000> : vector<8xf32>
    %875 = vector.multi_reduction <maximumf>, %874, %cst_354 [1] : vector<8x8xf32> to vector<8xf32>
    %876 = vector.shape_cast %875 : vector<8xf32> to vector<8x1xf32>
    %877 = vector.broadcast %876 : vector<8x1xf32> to vector<8x8xf32>
    %878 = arith.subf %874, %877 : vector<8x8xf32>
    %879 = math.exp %878 : vector<8x8xf32>
    %cst_355 = arith.constant dense<0.000000e+00> : vector<8xf32>
    %880 = vector.multi_reduction <add>, %879, %cst_355 [1] : vector<8x8xf32> to vector<8xf32>
    %881 = vector.shape_cast %880 : vector<8xf32> to vector<8x1xf32>
    %882 = vector.broadcast %881 : vector<8x1xf32> to vector<8x8xf32>
    %883 = arith.divf %879, %882 : vector<8x8xf32>
    %cst_356 = arith.constant dense<0.000000e+00> : vector<8x8xf32>
    %884 = tpu.matmul %883, %871, %cst_356 {dimension_numbers = #tpu.dot_dimension_numbers<[1], [0], [0], [1], [0, 0, 1, 1], [], []>} : vector<8x8xf32>, vector<8x8xf32>, vector<8x8xf32> -> vector<8x8xf32>
    %885 = vector.extract_strided_slice %848 {offsets = [0, 16], sizes = [8, 8], strides = [1, 1]} : vector<8x32xf32> to vector<8x8xf32>
    %886 = vector.extract_strided_slice %849 {offsets = [0, 16], sizes = [8, 8], strides = [1, 1]} : vector<8x32xf32> to vector<8x8xf32>
    %887 = vector.extract_strided_slice %850 {offsets = [0, 16], sizes = [8, 8], strides = [1, 1]} : vector<8x32xf32> to vector<8x8xf32>
    %cst_357 = arith.constant dense<0.000000e+00> : vector<8x8xf32>
    %888 = tpu.matmul %885, %886, %cst_357 {dimension_numbers = #tpu.dot_dimension_numbers<[1], [1], [0], [0], [0, 0, 1, 0], [], []>} : vector<8x8xf32>, vector<8x8xf32>, vector<8x8xf32> -> vector<8x8xf32>
    %889 = vector.broadcast %852 : vector<1x8xf32> to vector<8x8xf32>
    %890 = arith.addf %888, %889 : vector<8x8xf32>
    %cst_358 = arith.constant dense<0xFF800000> : vector<8xf32>
    %891 = vector.multi_reduction <maximumf>, %890, %cst_358 [1] : vector<8x8xf32> to vector<8xf32>
    %892 = vector.shape_cast %891 : vector<8xf32> to vector<8x1xf32>
    %893 = vector.broadcast %892 : vector<8x1xf32> to vector<8x8xf32>
    %894 = arith.subf %890, %893 : vector<8x8xf32>
    %895 = math.exp %894 : vector<8x8xf32>
    %cst_359 = arith.constant dense<0.000000e+00> : vector<8xf32>
    %896 = vector.multi_reduction <add>, %895, %cst_359 [1] : vector<8x8xf32> to vector<8xf32>
    %897 = vector.shape_cast %896 : vector<8xf32> to vector<8x1xf32>
    %898 = vector.broadcast %897 : vector<8x1xf32> to vector<8x8xf32>
    %899 = arith.divf %895, %898 : vector<8x8xf32>
    %cst_360 = arith.constant dense<0.000000e+00> : vector<8x8xf32>
    %900 = tpu.matmul %899, %887, %cst_360 {dimension_numbers = #tpu.dot_dimension_numbers<[1], [0], [0], [1], [0, 0, 1, 1], [], []>} : vector<8x8xf32>, vector<8x8xf32>, vector<8x8xf32> -> vector<8x8xf32>
    %901 = vector.extract_strided_slice %848 {offsets = [0, 24], sizes = [8, 8], strides = [1, 1]} : vector<8x32xf32> to vector<8x8xf32>
    %902 = vector.extract_strided_slice %849 {offsets = [0, 24], sizes = [8, 8], strides = [1, 1]} : vector<8x32xf32> to vector<8x8xf32>
    %903 = vector.extract_strided_slice %850 {offsets = [0, 24], sizes = [8, 8], strides = [1, 1]} : vector<8x32xf32> to vector<8x8xf32>
    %cst_361 = arith.constant dense<0.000000e+00> : vector<8x8xf32>
    %904 = tpu.matmul %901, %902, %cst_361 {dimension_numbers = #tpu.dot_dimension_numbers<[1], [1], [0], [0], [0, 0, 1, 0], [], []>} : vector<8x8xf32>, vector<8x8xf32>, vector<8x8xf32> -> vector<8x8xf32>
    %905 = vector.broadcast %852 : vector<1x8xf32> to vector<8x8xf32>
    %906 = arith.addf %904, %905 : vector<8x8xf32>
    %cst_362 = arith.constant dense<0xFF800000> : vector<8xf32>
    %907 = vector.multi_reduction <maximumf>, %906, %cst_362 [1] : vector<8x8xf32> to vector<8xf32>
    %908 = vector.shape_cast %907 : vector<8xf32> to vector<8x1xf32>
    %909 = vector.broadcast %908 : vector<8x1xf32> to vector<8x8xf32>
    %910 = arith.subf %906, %909 : vector<8x8xf32>
    %911 = math.exp %910 : vector<8x8xf32>
    %cst_363 = arith.constant dense<0.000000e+00> : vector<8xf32>
    %912 = vector.multi_reduction <add>, %911, %cst_363 [1] : vector<8x8xf32> to vector<8xf32>
    %913 = vector.shape_cast %912 : vector<8xf32> to vector<8x1xf32>
    %914 = vector.broadcast %913 : vector<8x1xf32> to vector<8x8xf32>
    %915 = arith.divf %911, %914 : vector<8x8xf32>
    %cst_364 = arith.constant dense<0.000000e+00> : vector<8x8xf32>
    %916 = tpu.matmul %915, %903, %cst_364 {dimension_numbers = #tpu.dot_dimension_numbers<[1], [0], [0], [1], [0, 0, 1, 1], [], []>} : vector<8x8xf32>, vector<8x8xf32>, vector<8x8xf32> -> vector<8x8xf32>
    %917 = tpu.concatenate %868, %884, %900, %916 in 1 : vector<8x8xf32>, vector<8x8xf32>, vector<8x8xf32>, vector<8x8xf32> -> vector<8x32xf32>
    %918 = tpu.concatenate %847, %917 in 0 : vector<8x32xf32>, vector<8x32xf32> -> vector<16x32xf32>
    %919 = arith.truncf %918 : vector<16x32xf32> to vector<16x32xbf16>
    %cst_365 = arith.constant dense<0.000000e+00> : vector<16x32xf32>
    %920 = tpu.matmul %919, %763, %cst_365 {dimension_numbers = #tpu.dot_dimension_numbers<[1], [0], [0], [1], [0, 0, 1, 1], [], []>} : vector<16x32xbf16>, vector<32x32xbf16>, vector<16x32xf32> -> vector<16x32xf32>
    %921 = vector.broadcast %765 : vector<1x32xf32> to vector<16x32xf32>
    %922 = arith.addf %920, %921 : vector<16x32xf32>
    %923 = arith.addf %723, %922 : vector<16x32xf32>
    %c0_366 = arith.constant 0 : index
    %c0_367 = arith.constant 0 : index
    %c0_368 = arith.constant 0 : index
    %924 = vector.load %arg49[%c0_366, %c0_367, %c0_368] : memref<2x1x32xf32, #tpu.memory_space<vmem>>, vector<1x1x32xf32>
    %925 = vector.shape_cast %924 : vector<1x1x32xf32> to vector<1x32xf32>
    %c0_369 = arith.constant 0 : index
    %c0_370 = arith.constant 0 : index
    %c0_371 = arith.constant 0 : index
    %926 = vector.load %arg50[%c0_369, %c0_370, %c0_371] : memref<2x1x32xf32, #tpu.memory_space<vmem>>, vector<1x1x32xf32>
    %927 = vector.shape_cast %926 : vector<1x1x32xf32> to vector<1x32xf32>
    %cst_372 = arith.constant dense<0.000000e+00> : vector<16xf32>
    %928 = vector.multi_reduction <add>, %923, %cst_372 [1] : vector<16x32xf32> to vector<16xf32>
    %929 = vector.shape_cast %928 : vector<16xf32> to vector<16x1xf32>
    %cst_373 = arith.constant 3.200000e+01 : f32
    %930 = vector.broadcast %cst_373 : f32 to vector<16x1xf32>
    %931 = arith.divf %929, %930 : vector<16x1xf32>
    %932 = vector.broadcast %931 : vector<16x1xf32> to vector<16x32xf32>
    %933 = arith.subf %923, %932 : vector<16x32xf32>
    %934 = arith.mulf %933, %933 : vector<16x32xf32>
    %cst_374 = arith.constant dense<0.000000e+00> : vector<16xf32>
    %935 = vector.multi_reduction <add>, %934, %cst_374 [1] : vector<16x32xf32> to vector<16xf32>
    %936 = vector.shape_cast %935 : vector<16xf32> to vector<16x1xf32>
    %cst_375 = arith.constant 3.100000e+01 : f32
    %937 = vector.broadcast %cst_375 : f32 to vector<16x1xf32>
    %938 = arith.divf %936, %937 : vector<16x1xf32>
    %939 = vector.broadcast %931 : vector<16x1xf32> to vector<16x32xf32>
    %940 = arith.subf %923, %939 : vector<16x32xf32>
    %941 = vector.broadcast %925 : vector<1x32xf32> to vector<16x32xf32>
    %942 = arith.mulf %941, %940 : vector<16x32xf32>
    %943 = math.sqrt %938 : vector<16x1xf32>
    %cst_376 = arith.constant 9.99999997E-7 : f32
    %944 = vector.broadcast %cst_376 : f32 to vector<16x1xf32>
    %945 = arith.addf %943, %944 : vector<16x1xf32>
    %946 = vector.broadcast %945 : vector<16x1xf32> to vector<16x32xf32>
    %947 = arith.divf %942, %946 : vector<16x32xf32>
    %948 = vector.broadcast %927 : vector<1x32xf32> to vector<16x32xf32>
    %949 = arith.addf %947, %948 : vector<16x32xf32>
    %c0_377 = arith.constant 0 : index
    %c0_378 = arith.constant 0 : index
    %c0_379 = arith.constant 0 : index
    %950 = vector.load %arg51[%c0_377, %c0_378, %c0_379] : memref<2x32x64xbf16, #tpu.memory_space<vmem>>, vector<1x32x64xbf16>
    %951 = vector.shape_cast %950 : vector<1x32x64xbf16> to vector<32x64xbf16>
    %c0_380 = arith.constant 0 : index
    %c0_381 = arith.constant 0 : index
    %c0_382 = arith.constant 0 : index
    %952 = vector.load %arg52[%c0_380, %c0_381, %c0_382] : memref<2x1x64xf32, #tpu.memory_space<vmem>>, vector<1x1x64xf32>
    %953 = vector.shape_cast %952 : vector<1x1x64xf32> to vector<1x64xf32>
    %c0_383 = arith.constant 0 : index
    %c0_384 = arith.constant 0 : index
    %c0_385 = arith.constant 0 : index
    %954 = vector.load %arg53[%c0_383, %c0_384, %c0_385] : memref<2x64x32xbf16, #tpu.memory_space<vmem>>, vector<1x64x32xbf16>
    %955 = vector.shape_cast %954 : vector<1x64x32xbf16> to vector<64x32xbf16>
    %c0_386 = arith.constant 0 : index
    %c0_387 = arith.constant 0 : index
    %c0_388 = arith.constant 0 : index
    %956 = vector.load %arg54[%c0_386, %c0_387, %c0_388] : memref<2x1x32xf32, #tpu.memory_space<vmem>>, vector<1x1x32xf32>
    %957 = vector.shape_cast %956 : vector<1x1x32xf32> to vector<1x32xf32>
    %958 = arith.truncf %949 : vector<16x32xf32> to vector<16x32xbf16>
    %cst_389 = arith.constant dense<0.000000e+00> : vector<16x64xf32>
    %959 = tpu.matmul %958, %951, %cst_389 {dimension_numbers = #tpu.dot_dimension_numbers<[1], [0], [0], [1], [0, 0, 1, 1], [], []>} : vector<16x32xbf16>, vector<32x64xbf16>, vector<16x64xf32> -> vector<16x64xf32>
    %960 = vector.broadcast %953 : vector<1x64xf32> to vector<16x64xf32>
    %961 = arith.addf %959, %960 : vector<16x64xf32>
    %cst_390 = arith.constant 0.000000e+00 : f32
    %962 = vector.broadcast %cst_390 : f32 to vector<16x64xf32>
    %963 = arith.maximumf %961, %962 : vector<16x64xf32>
    %964 = arith.truncf %963 : vector<16x64xf32> to vector<16x64xbf16>
    %cst_391 = arith.constant dense<0.000000e+00> : vector<16x32xf32>
    %965 = tpu.matmul %964, %955, %cst_391 {dimension_numbers = #tpu.dot_dimension_numbers<[1], [0], [0], [1], [0, 0, 1, 1], [], []>} : vector<16x64xbf16>, vector<64x32xbf16>, vector<16x32xf32> -> vector<16x32xf32>
    %966 = vector.broadcast %957 : vector<1x32xf32> to vector<16x32xf32>
    %967 = arith.addf %965, %966 : vector<16x32xf32>
    %968 = arith.addf %923, %967 : vector<16x32xf32>
    %c1_392 = arith.constant 1 : index
    %c0_393 = arith.constant 0 : index
    %c0_394 = arith.constant 0 : index
    %969 = vector.load %arg29[%c1_392, %c0_393, %c0_394] : memref<2x1x32xf32, #tpu.memory_space<vmem>>, vector<1x1x32xf32>
    %970 = vector.shape_cast %969 : vector<1x1x32xf32> to vector<1x32xf32>
    %c1_395 = arith.constant 1 : index
    %c0_396 = arith.constant 0 : index
    %c0_397 = arith.constant 0 : index
    %971 = vector.load %arg30[%c1_395, %c0_396, %c0_397] : memref<2x1x32xf32, #tpu.memory_space<vmem>>, vector<1x1x32xf32>
    %972 = vector.shape_cast %971 : vector<1x1x32xf32> to vector<1x32xf32>
    %cst_398 = arith.constant dense<0.000000e+00> : vector<16xf32>
    %973 = vector.multi_reduction <add>, %968, %cst_398 [1] : vector<16x32xf32> to vector<16xf32>
    %974 = vector.shape_cast %973 : vector<16xf32> to vector<16x1xf32>
    %cst_399 = arith.constant 3.200000e+01 : f32
    %975 = vector.broadcast %cst_399 : f32 to vector<16x1xf32>
    %976 = arith.divf %974, %975 : vector<16x1xf32>
    %977 = vector.broadcast %976 : vector<16x1xf32> to vector<16x32xf32>
    %978 = arith.subf %968, %977 : vector<16x32xf32>
    %979 = arith.mulf %978, %978 : vector<16x32xf32>
    %cst_400 = arith.constant dense<0.000000e+00> : vector<16xf32>
    %980 = vector.multi_reduction <add>, %979, %cst_400 [1] : vector<16x32xf32> to vector<16xf32>
    %981 = vector.shape_cast %980 : vector<16xf32> to vector<16x1xf32>
    %cst_401 = arith.constant 3.100000e+01 : f32
    %982 = vector.broadcast %cst_401 : f32 to vector<16x1xf32>
    %983 = arith.divf %981, %982 : vector<16x1xf32>
    %984 = vector.broadcast %976 : vector<16x1xf32> to vector<16x32xf32>
    %985 = arith.subf %968, %984 : vector<16x32xf32>
    %986 = vector.broadcast %970 : vector<1x32xf32> to vector<16x32xf32>
    %987 = arith.mulf %986, %985 : vector<16x32xf32>
    %988 = math.sqrt %983 : vector<16x1xf32>
    %cst_402 = arith.constant 9.99999997E-7 : f32
    %989 = vector.broadcast %cst_402 : f32 to vector<16x1xf32>
    %990 = arith.addf %988, %989 : vector<16x1xf32>
    %991 = vector.broadcast %990 : vector<16x1xf32> to vector<16x32xf32>
    %992 = arith.divf %987, %991 : vector<16x32xf32>
    %993 = vector.broadcast %972 : vector<1x32xf32> to vector<16x32xf32>
    %994 = arith.addf %992, %993 : vector<16x32xf32>
    %c1_403 = arith.constant 1 : index
    %c0_404 = arith.constant 0 : index
    %c0_405 = arith.constant 0 : index
    %995 = vector.load %arg31[%c1_403, %c0_404, %c0_405] : memref<2x32x32xbf16, #tpu.memory_space<vmem>>, vector<1x32x32xbf16>
    %996 = vector.shape_cast %995 : vector<1x32x32xbf16> to vector<32x32xbf16>
    %c1_406 = arith.constant 1 : index
    %c0_407 = arith.constant 0 : index
    %c0_408 = arith.constant 0 : index
    %997 = vector.load %arg32[%c1_406, %c0_407, %c0_408] : memref<2x1x32xf32, #tpu.memory_space<vmem>>, vector<1x1x32xf32>
    %998 = vector.shape_cast %997 : vector<1x1x32xf32> to vector<1x32xf32>
    %c1_409 = arith.constant 1 : index
    %c0_410 = arith.constant 0 : index
    %c0_411 = arith.constant 0 : index
    %999 = vector.load %arg33[%c1_409, %c0_410, %c0_411] : memref<2x32x32xbf16, #tpu.memory_space<vmem>>, vector<1x32x32xbf16>
    %1000 = vector.shape_cast %999 : vector<1x32x32xbf16> to vector<32x32xbf16>
    %c1_412 = arith.constant 1 : index
    %c0_413 = arith.constant 0 : index
    %c0_414 = arith.constant 0 : index
    %1001 = vector.load %arg34[%c1_412, %c0_413, %c0_414] : memref<2x1x32xf32, #tpu.memory_space<vmem>>, vector<1x1x32xf32>
    %1002 = vector.shape_cast %1001 : vector<1x1x32xf32> to vector<1x32xf32>
    %c1_415 = arith.constant 1 : index
    %c0_416 = arith.constant 0 : index
    %c0_417 = arith.constant 0 : index
    %1003 = vector.load %arg35[%c1_415, %c0_416, %c0_417] : memref<2x32x32xbf16, #tpu.memory_space<vmem>>, vector<1x32x32xbf16>
    %1004 = vector.shape_cast %1003 : vector<1x32x32xbf16> to vector<32x32xbf16>
    %c1_418 = arith.constant 1 : index
    %c0_419 = arith.constant 0 : index
    %c0_420 = arith.constant 0 : index
    %1005 = vector.load %arg36[%c1_418, %c0_419, %c0_420] : memref<2x1x32xf32, #tpu.memory_space<vmem>>, vector<1x1x32xf32>
    %1006 = vector.shape_cast %1005 : vector<1x1x32xf32> to vector<1x32xf32>
    %c1_421 = arith.constant 1 : index
    %c0_422 = arith.constant 0 : index
    %c0_423 = arith.constant 0 : index
    %1007 = vector.load %arg37[%c1_421, %c0_422, %c0_423] : memref<2x32x32xbf16, #tpu.memory_space<vmem>>, vector<1x32x32xbf16>
    %1008 = vector.shape_cast %1007 : vector<1x32x32xbf16> to vector<32x32xbf16>
    %c1_424 = arith.constant 1 : index
    %c0_425 = arith.constant 0 : index
    %c0_426 = arith.constant 0 : index
    %1009 = vector.load %arg38[%c1_424, %c0_425, %c0_426] : memref<2x1x32xf32, #tpu.memory_space<vmem>>, vector<1x1x32xf32>
    %1010 = vector.shape_cast %1009 : vector<1x1x32xf32> to vector<1x32xf32>
    %1011 = arith.truncf %994 : vector<16x32xf32> to vector<16x32xbf16>
    %cst_427 = arith.constant dense<0.000000e+00> : vector<16x32xf32>
    %1012 = tpu.matmul %1011, %996, %cst_427 {dimension_numbers = #tpu.dot_dimension_numbers<[1], [0], [0], [1], [0, 0, 1, 1], [], []>} : vector<16x32xbf16>, vector<32x32xbf16>, vector<16x32xf32> -> vector<16x32xf32>
    %1013 = vector.broadcast %998 : vector<1x32xf32> to vector<16x32xf32>
    %1014 = arith.addf %1012, %1013 : vector<16x32xf32>
    %1015 = arith.truncf %994 : vector<16x32xf32> to vector<16x32xbf16>
    %cst_428 = arith.constant dense<0.000000e+00> : vector<16x32xf32>
    %1016 = tpu.matmul %1015, %1000, %cst_428 {dimension_numbers = #tpu.dot_dimension_numbers<[1], [0], [0], [1], [0, 0, 1, 1], [], []>} : vector<16x32xbf16>, vector<32x32xbf16>, vector<16x32xf32> -> vector<16x32xf32>
    %1017 = vector.broadcast %1002 : vector<1x32xf32> to vector<16x32xf32>
    %1018 = arith.addf %1016, %1017 : vector<16x32xf32>
    %1019 = arith.truncf %994 : vector<16x32xf32> to vector<16x32xbf16>
    %cst_429 = arith.constant dense<0.000000e+00> : vector<16x32xf32>
    %1020 = tpu.matmul %1019, %1004, %cst_429 {dimension_numbers = #tpu.dot_dimension_numbers<[1], [0], [0], [1], [0, 0, 1, 1], [], []>} : vector<16x32xbf16>, vector<32x32xbf16>, vector<16x32xf32> -> vector<16x32xf32>
    %1021 = vector.broadcast %1006 : vector<1x32xf32> to vector<16x32xf32>
    %1022 = arith.addf %1020, %1021 : vector<16x32xf32>
    %1023 = vector.extract_strided_slice %1014 {offsets = [0, 0], sizes = [8, 32], strides = [1, 1]} : vector<16x32xf32> to vector<8x32xf32>
    %1024 = vector.extract_strided_slice %1018 {offsets = [0, 0], sizes = [8, 32], strides = [1, 1]} : vector<16x32xf32> to vector<8x32xf32>
    %1025 = vector.extract_strided_slice %1022 {offsets = [0, 0], sizes = [8, 32], strides = [1, 1]} : vector<16x32xf32> to vector<8x32xf32>
    %1026 = vector.extract_strided_slice %1 {offsets = [0, 0, 0], sizes = [1, 8, 8], strides = [1, 1, 1]} : vector<2x8x8xf32> to vector<1x8x8xf32>
    %1027 = vector.shape_cast %1026 : vector<1x8x8xf32> to vector<8x8xf32>
    %1028 = vector.extract_strided_slice %1023 {offsets = [0, 0], sizes = [8, 8], strides = [1, 1]} : vector<8x32xf32> to vector<8x8xf32>
    %1029 = vector.extract_strided_slice %1024 {offsets = [0, 0], sizes = [8, 8], strides = [1, 1]} : vector<8x32xf32> to vector<8x8xf32>
    %1030 = vector.extract_strided_slice %1025 {offsets = [0, 0], sizes = [8, 8], strides = [1, 1]} : vector<8x32xf32> to vector<8x8xf32>
    %cst_430 = arith.constant dense<0.000000e+00> : vector<8x8xf32>
    %1031 = tpu.matmul %1028, %1029, %cst_430 {dimension_numbers = #tpu.dot_dimension_numbers<[1], [1], [0], [0], [0, 0, 1, 0], [], []>} : vector<8x8xf32>, vector<8x8xf32>, vector<8x8xf32> -> vector<8x8xf32>
    %1032 = arith.addf %1031, %1027 : vector<8x8xf32>
    %cst_431 = arith.constant dense<0xFF800000> : vector<8xf32>
    %1033 = vector.multi_reduction <maximumf>, %1032, %cst_431 [1] : vector<8x8xf32> to vector<8xf32>
    %1034 = vector.shape_cast %1033 : vector<8xf32> to vector<8x1xf32>
    %1035 = vector.broadcast %1034 : vector<8x1xf32> to vector<8x8xf32>
    %1036 = arith.subf %1032, %1035 : vector<8x8xf32>
    %1037 = math.exp %1036 : vector<8x8xf32>
    %cst_432 = arith.constant dense<0.000000e+00> : vector<8xf32>
    %1038 = vector.multi_reduction <add>, %1037, %cst_432 [1] : vector<8x8xf32> to vector<8xf32>
    %1039 = vector.shape_cast %1038 : vector<8xf32> to vector<8x1xf32>
    %1040 = vector.broadcast %1039 : vector<8x1xf32> to vector<8x8xf32>
    %1041 = arith.divf %1037, %1040 : vector<8x8xf32>
    %cst_433 = arith.constant dense<0.000000e+00> : vector<8x8xf32>
    %1042 = tpu.matmul %1041, %1030, %cst_433 {dimension_numbers = #tpu.dot_dimension_numbers<[1], [0], [0], [1], [0, 0, 1, 1], [], []>} : vector<8x8xf32>, vector<8x8xf32>, vector<8x8xf32> -> vector<8x8xf32>
    %1043 = vector.extract_strided_slice %1023 {offsets = [0, 8], sizes = [8, 8], strides = [1, 1]} : vector<8x32xf32> to vector<8x8xf32>
    %1044 = vector.extract_strided_slice %1024 {offsets = [0, 8], sizes = [8, 8], strides = [1, 1]} : vector<8x32xf32> to vector<8x8xf32>
    %1045 = vector.extract_strided_slice %1025 {offsets = [0, 8], sizes = [8, 8], strides = [1, 1]} : vector<8x32xf32> to vector<8x8xf32>
    %cst_434 = arith.constant dense<0.000000e+00> : vector<8x8xf32>
    %1046 = tpu.matmul %1043, %1044, %cst_434 {dimension_numbers = #tpu.dot_dimension_numbers<[1], [1], [0], [0], [0, 0, 1, 0], [], []>} : vector<8x8xf32>, vector<8x8xf32>, vector<8x8xf32> -> vector<8x8xf32>
    %1047 = arith.addf %1046, %1027 : vector<8x8xf32>
    %cst_435 = arith.constant dense<0xFF800000> : vector<8xf32>
    %1048 = vector.multi_reduction <maximumf>, %1047, %cst_435 [1] : vector<8x8xf32> to vector<8xf32>
    %1049 = vector.shape_cast %1048 : vector<8xf32> to vector<8x1xf32>
    %1050 = vector.broadcast %1049 : vector<8x1xf32> to vector<8x8xf32>
    %1051 = arith.subf %1047, %1050 : vector<8x8xf32>
    %1052 = math.exp %1051 : vector<8x8xf32>
    %cst_436 = arith.constant dense<0.000000e+00> : vector<8xf32>
    %1053 = vector.multi_reduction <add>, %1052, %cst_436 [1] : vector<8x8xf32> to vector<8xf32>
    %1054 = vector.shape_cast %1053 : vector<8xf32> to vector<8x1xf32>
    %1055 = vector.broadcast %1054 : vector<8x1xf32> to vector<8x8xf32>
    %1056 = arith.divf %1052, %1055 : vector<8x8xf32>
    %cst_437 = arith.constant dense<0.000000e+00> : vector<8x8xf32>
    %1057 = tpu.matmul %1056, %1045, %cst_437 {dimension_numbers = #tpu.dot_dimension_numbers<[1], [0], [0], [1], [0, 0, 1, 1], [], []>} : vector<8x8xf32>, vector<8x8xf32>, vector<8x8xf32> -> vector<8x8xf32>
    %1058 = vector.extract_strided_slice %1023 {offsets = [0, 16], sizes = [8, 8], strides = [1, 1]} : vector<8x32xf32> to vector<8x8xf32>
    %1059 = vector.extract_strided_slice %1024 {offsets = [0, 16], sizes = [8, 8], strides = [1, 1]} : vector<8x32xf32> to vector<8x8xf32>
    %1060 = vector.extract_strided_slice %1025 {offsets = [0, 16], sizes = [8, 8], strides = [1, 1]} : vector<8x32xf32> to vector<8x8xf32>
    %cst_438 = arith.constant dense<0.000000e+00> : vector<8x8xf32>
    %1061 = tpu.matmul %1058, %1059, %cst_438 {dimension_numbers = #tpu.dot_dimension_numbers<[1], [1], [0], [0], [0, 0, 1, 0], [], []>} : vector<8x8xf32>, vector<8x8xf32>, vector<8x8xf32> -> vector<8x8xf32>
    %1062 = arith.addf %1061, %1027 : vector<8x8xf32>
    %cst_439 = arith.constant dense<0xFF800000> : vector<8xf32>
    %1063 = vector.multi_reduction <maximumf>, %1062, %cst_439 [1] : vector<8x8xf32> to vector<8xf32>
    %1064 = vector.shape_cast %1063 : vector<8xf32> to vector<8x1xf32>
    %1065 = vector.broadcast %1064 : vector<8x1xf32> to vector<8x8xf32>
    %1066 = arith.subf %1062, %1065 : vector<8x8xf32>
    %1067 = math.exp %1066 : vector<8x8xf32>
    %cst_440 = arith.constant dense<0.000000e+00> : vector<8xf32>
    %1068 = vector.multi_reduction <add>, %1067, %cst_440 [1] : vector<8x8xf32> to vector<8xf32>
    %1069 = vector.shape_cast %1068 : vector<8xf32> to vector<8x1xf32>
    %1070 = vector.broadcast %1069 : vector<8x1xf32> to vector<8x8xf32>
    %1071 = arith.divf %1067, %1070 : vector<8x8xf32>
    %cst_441 = arith.constant dense<0.000000e+00> : vector<8x8xf32>
    %1072 = tpu.matmul %1071, %1060, %cst_441 {dimension_numbers = #tpu.dot_dimension_numbers<[1], [0], [0], [1], [0, 0, 1, 1], [], []>} : vector<8x8xf32>, vector<8x8xf32>, vector<8x8xf32> -> vector<8x8xf32>
    %1073 = vector.extract_strided_slice %1023 {offsets = [0, 24], sizes = [8, 8], strides = [1, 1]} : vector<8x32xf32> to vector<8x8xf32>
    %1074 = vector.extract_strided_slice %1024 {offsets = [0, 24], sizes = [8, 8], strides = [1, 1]} : vector<8x32xf32> to vector<8x8xf32>
    %1075 = vector.extract_strided_slice %1025 {offsets = [0, 24], sizes = [8, 8], strides = [1, 1]} : vector<8x32xf32> to vector<8x8xf32>
    %cst_442 = arith.constant dense<0.000000e+00> : vector<8x8xf32>
    %1076 = tpu.matmul %1073, %1074, %cst_442 {dimension_numbers = #tpu.dot_dimension_numbers<[1], [1], [0], [0], [0, 0, 1, 0], [], []>} : vector<8x8xf32>, vector<8x8xf32>, vector<8x8xf32> -> vector<8x8xf32>
    %1077 = arith.addf %1076, %1027 : vector<8x8xf32>
    %cst_443 = arith.constant dense<0xFF800000> : vector<8xf32>
    %1078 = vector.multi_reduction <maximumf>, %1077, %cst_443 [1] : vector<8x8xf32> to vector<8xf32>
    %1079 = vector.shape_cast %1078 : vector<8xf32> to vector<8x1xf32>
    %1080 = vector.broadcast %1079 : vector<8x1xf32> to vector<8x8xf32>
    %1081 = arith.subf %1077, %1080 : vector<8x8xf32>
    %1082 = math.exp %1081 : vector<8x8xf32>
    %cst_444 = arith.constant dense<0.000000e+00> : vector<8xf32>
    %1083 = vector.multi_reduction <add>, %1082, %cst_444 [1] : vector<8x8xf32> to vector<8xf32>
    %1084 = vector.shape_cast %1083 : vector<8xf32> to vector<8x1xf32>
    %1085 = vector.broadcast %1084 : vector<8x1xf32> to vector<8x8xf32>
    %1086 = arith.divf %1082, %1085 : vector<8x8xf32>
    %cst_445 = arith.constant dense<0.000000e+00> : vector<8x8xf32>
    %1087 = tpu.matmul %1086, %1075, %cst_445 {dimension_numbers = #tpu.dot_dimension_numbers<[1], [0], [0], [1], [0, 0, 1, 1], [], []>} : vector<8x8xf32>, vector<8x8xf32>, vector<8x8xf32> -> vector<8x8xf32>
    %1088 = tpu.concatenate %1042, %1057, %1072, %1087 in 1 : vector<8x8xf32>, vector<8x8xf32>, vector<8x8xf32>, vector<8x8xf32> -> vector<8x32xf32>
    %1089 = vector.extract_strided_slice %1014 {offsets = [8, 0], sizes = [8, 32], strides = [1, 1]} : vector<16x32xf32> to vector<8x32xf32>
    %1090 = vector.extract_strided_slice %1018 {offsets = [8, 0], sizes = [8, 32], strides = [1, 1]} : vector<16x32xf32> to vector<8x32xf32>
    %1091 = vector.extract_strided_slice %1022 {offsets = [8, 0], sizes = [8, 32], strides = [1, 1]} : vector<16x32xf32> to vector<8x32xf32>
    %1092 = vector.extract_strided_slice %1 {offsets = [1, 0, 0], sizes = [1, 8, 8], strides = [1, 1, 1]} : vector<2x8x8xf32> to vector<1x8x8xf32>
    %1093 = vector.shape_cast %1092 : vector<1x8x8xf32> to vector<8x8xf32>
    %1094 = vector.extract_strided_slice %1089 {offsets = [0, 0], sizes = [8, 8], strides = [1, 1]} : vector<8x32xf32> to vector<8x8xf32>
    %1095 = vector.extract_strided_slice %1090 {offsets = [0, 0], sizes = [8, 8], strides = [1, 1]} : vector<8x32xf32> to vector<8x8xf32>
    %1096 = vector.extract_strided_slice %1091 {offsets = [0, 0], sizes = [8, 8], strides = [1, 1]} : vector<8x32xf32> to vector<8x8xf32>
    %cst_446 = arith.constant dense<0.000000e+00> : vector<8x8xf32>
    %1097 = tpu.matmul %1094, %1095, %cst_446 {dimension_numbers = #tpu.dot_dimension_numbers<[1], [1], [0], [0], [0, 0, 1, 0], [], []>} : vector<8x8xf32>, vector<8x8xf32>, vector<8x8xf32> -> vector<8x8xf32>
    %1098 = arith.addf %1097, %1093 : vector<8x8xf32>
    %cst_447 = arith.constant dense<0xFF800000> : vector<8xf32>
    %1099 = vector.multi_reduction <maximumf>, %1098, %cst_447 [1] : vector<8x8xf32> to vector<8xf32>
    %1100 = vector.shape_cast %1099 : vector<8xf32> to vector<8x1xf32>
    %1101 = vector.broadcast %1100 : vector<8x1xf32> to vector<8x8xf32>
    %1102 = arith.subf %1098, %1101 : vector<8x8xf32>
    %1103 = math.exp %1102 : vector<8x8xf32>
    %cst_448 = arith.constant dense<0.000000e+00> : vector<8xf32>
    %1104 = vector.multi_reduction <add>, %1103, %cst_448 [1] : vector<8x8xf32> to vector<8xf32>
    %1105 = vector.shape_cast %1104 : vector<8xf32> to vector<8x1xf32>
    %1106 = vector.broadcast %1105 : vector<8x1xf32> to vector<8x8xf32>
    %1107 = arith.divf %1103, %1106 : vector<8x8xf32>
    %cst_449 = arith.constant dense<0.000000e+00> : vector<8x8xf32>
    %1108 = tpu.matmul %1107, %1096, %cst_449 {dimension_numbers = #tpu.dot_dimension_numbers<[1], [0], [0], [1], [0, 0, 1, 1], [], []>} : vector<8x8xf32>, vector<8x8xf32>, vector<8x8xf32> -> vector<8x8xf32>
    %1109 = vector.extract_strided_slice %1089 {offsets = [0, 8], sizes = [8, 8], strides = [1, 1]} : vector<8x32xf32> to vector<8x8xf32>
    %1110 = vector.extract_strided_slice %1090 {offsets = [0, 8], sizes = [8, 8], strides = [1, 1]} : vector<8x32xf32> to vector<8x8xf32>
    %1111 = vector.extract_strided_slice %1091 {offsets = [0, 8], sizes = [8, 8], strides = [1, 1]} : vector<8x32xf32> to vector<8x8xf32>
    %cst_450 = arith.constant dense<0.000000e+00> : vector<8x8xf32>
    %1112 = tpu.matmul %1109, %1110, %cst_450 {dimension_numbers = #tpu.dot_dimension_numbers<[1], [1], [0], [0], [0, 0, 1, 0], [], []>} : vector<8x8xf32>, vector<8x8xf32>, vector<8x8xf32> -> vector<8x8xf32>
    %1113 = arith.addf %1112, %1093 : vector<8x8xf32>
    %cst_451 = arith.constant dense<0xFF800000> : vector<8xf32>
    %1114 = vector.multi_reduction <maximumf>, %1113, %cst_451 [1] : vector<8x8xf32> to vector<8xf32>
    %1115 = vector.shape_cast %1114 : vector<8xf32> to vector<8x1xf32>
    %1116 = vector.broadcast %1115 : vector<8x1xf32> to vector<8x8xf32>
    %1117 = arith.subf %1113, %1116 : vector<8x8xf32>
    %1118 = math.exp %1117 : vector<8x8xf32>
    %cst_452 = arith.constant dense<0.000000e+00> : vector<8xf32>
    %1119 = vector.multi_reduction <add>, %1118, %cst_452 [1] : vector<8x8xf32> to vector<8xf32>
    %1120 = vector.shape_cast %1119 : vector<8xf32> to vector<8x1xf32>
    %1121 = vector.broadcast %1120 : vector<8x1xf32> to vector<8x8xf32>
    %1122 = arith.divf %1118, %1121 : vector<8x8xf32>
    %cst_453 = arith.constant dense<0.000000e+00> : vector<8x8xf32>
    %1123 = tpu.matmul %1122, %1111, %cst_453 {dimension_numbers = #tpu.dot_dimension_numbers<[1], [0], [0], [1], [0, 0, 1, 1], [], []>} : vector<8x8xf32>, vector<8x8xf32>, vector<8x8xf32> -> vector<8x8xf32>
    %1124 = vector.extract_strided_slice %1089 {offsets = [0, 16], sizes = [8, 8], strides = [1, 1]} : vector<8x32xf32> to vector<8x8xf32>
    %1125 = vector.extract_strided_slice %1090 {offsets = [0, 16], sizes = [8, 8], strides = [1, 1]} : vector<8x32xf32> to vector<8x8xf32>
    %1126 = vector.extract_strided_slice %1091 {offsets = [0, 16], sizes = [8, 8], strides = [1, 1]} : vector<8x32xf32> to vector<8x8xf32>
    %cst_454 = arith.constant dense<0.000000e+00> : vector<8x8xf32>
    %1127 = tpu.matmul %1124, %1125, %cst_454 {dimension_numbers = #tpu.dot_dimension_numbers<[1], [1], [0], [0], [0, 0, 1, 0], [], []>} : vector<8x8xf32>, vector<8x8xf32>, vector<8x8xf32> -> vector<8x8xf32>
    %1128 = arith.addf %1127, %1093 : vector<8x8xf32>
    %cst_455 = arith.constant dense<0xFF800000> : vector<8xf32>
    %1129 = vector.multi_reduction <maximumf>, %1128, %cst_455 [1] : vector<8x8xf32> to vector<8xf32>
    %1130 = vector.shape_cast %1129 : vector<8xf32> to vector<8x1xf32>
    %1131 = vector.broadcast %1130 : vector<8x1xf32> to vector<8x8xf32>
    %1132 = arith.subf %1128, %1131 : vector<8x8xf32>
    %1133 = math.exp %1132 : vector<8x8xf32>
    %cst_456 = arith.constant dense<0.000000e+00> : vector<8xf32>
    %1134 = vector.multi_reduction <add>, %1133, %cst_456 [1] : vector<8x8xf32> to vector<8xf32>
    %1135 = vector.shape_cast %1134 : vector<8xf32> to vector<8x1xf32>
    %1136 = vector.broadcast %1135 : vector<8x1xf32> to vector<8x8xf32>
    %1137 = arith.divf %1133, %1136 : vector<8x8xf32>
    %cst_457 = arith.constant dense<0.000000e+00> : vector<8x8xf32>
    %1138 = tpu.matmul %1137, %1126, %cst_457 {dimension_numbers = #tpu.dot_dimension_numbers<[1], [0], [0], [1], [0, 0, 1, 1], [], []>} : vector<8x8xf32>, vector<8x8xf32>, vector<8x8xf32> -> vector<8x8xf32>
    %1139 = vector.extract_strided_slice %1089 {offsets = [0, 24], sizes = [8, 8], strides = [1, 1]} : vector<8x32xf32> to vector<8x8xf32>
    %1140 = vector.extract_strided_slice %1090 {offsets = [0, 24], sizes = [8, 8], strides = [1, 1]} : vector<8x32xf32> to vector<8x8xf32>
    %1141 = vector.extract_strided_slice %1091 {offsets = [0, 24], sizes = [8, 8], strides = [1, 1]} : vector<8x32xf32> to vector<8x8xf32>
    %cst_458 = arith.constant dense<0.000000e+00> : vector<8x8xf32>
    %1142 = tpu.matmul %1139, %1140, %cst_458 {dimension_numbers = #tpu.dot_dimension_numbers<[1], [1], [0], [0], [0, 0, 1, 0], [], []>} : vector<8x8xf32>, vector<8x8xf32>, vector<8x8xf32> -> vector<8x8xf32>
    %1143 = arith.addf %1142, %1093 : vector<8x8xf32>
    %cst_459 = arith.constant dense<0xFF800000> : vector<8xf32>
    %1144 = vector.multi_reduction <maximumf>, %1143, %cst_459 [1] : vector<8x8xf32> to vector<8xf32>
    %1145 = vector.shape_cast %1144 : vector<8xf32> to vector<8x1xf32>
    %1146 = vector.broadcast %1145 : vector<8x1xf32> to vector<8x8xf32>
    %1147 = arith.subf %1143, %1146 : vector<8x8xf32>
    %1148 = math.exp %1147 : vector<8x8xf32>
    %cst_460 = arith.constant dense<0.000000e+00> : vector<8xf32>
    %1149 = vector.multi_reduction <add>, %1148, %cst_460 [1] : vector<8x8xf32> to vector<8xf32>
    %1150 = vector.shape_cast %1149 : vector<8xf32> to vector<8x1xf32>
    %1151 = vector.broadcast %1150 : vector<8x1xf32> to vector<8x8xf32>
    %1152 = arith.divf %1148, %1151 : vector<8x8xf32>
    %cst_461 = arith.constant dense<0.000000e+00> : vector<8x8xf32>
    %1153 = tpu.matmul %1152, %1141, %cst_461 {dimension_numbers = #tpu.dot_dimension_numbers<[1], [0], [0], [1], [0, 0, 1, 1], [], []>} : vector<8x8xf32>, vector<8x8xf32>, vector<8x8xf32> -> vector<8x8xf32>
    %1154 = tpu.concatenate %1108, %1123, %1138, %1153 in 1 : vector<8x8xf32>, vector<8x8xf32>, vector<8x8xf32>, vector<8x8xf32> -> vector<8x32xf32>
    %1155 = tpu.concatenate %1088, %1154 in 0 : vector<8x32xf32>, vector<8x32xf32> -> vector<16x32xf32>
    %1156 = arith.truncf %1155 : vector<16x32xf32> to vector<16x32xbf16>
    %cst_462 = arith.constant dense<0.000000e+00> : vector<16x32xf32>
    %1157 = tpu.matmul %1156, %1008, %cst_462 {dimension_numbers = #tpu.dot_dimension_numbers<[1], [0], [0], [1], [0, 0, 1, 1], [], []>} : vector<16x32xbf16>, vector<32x32xbf16>, vector<16x32xf32> -> vector<16x32xf32>
    %1158 = vector.broadcast %1010 : vector<1x32xf32> to vector<16x32xf32>
    %1159 = arith.addf %1157, %1158 : vector<16x32xf32>
    %1160 = arith.addf %968, %1159 : vector<16x32xf32>
    %c1_463 = arith.constant 1 : index
    %c0_464 = arith.constant 0 : index
    %c0_465 = arith.constant 0 : index
    %1161 = vector.load %arg39[%c1_463, %c0_464, %c0_465] : memref<2x1x32xf32, #tpu.memory_space<vmem>>, vector<1x1x32xf32>
    %1162 = vector.shape_cast %1161 : vector<1x1x32xf32> to vector<1x32xf32>
    %c1_466 = arith.constant 1 : index
    %c0_467 = arith.constant 0 : index
    %c0_468 = arith.constant 0 : index
    %1163 = vector.load %arg40[%c1_466, %c0_467, %c0_468] : memref<2x1x32xf32, #tpu.memory_space<vmem>>, vector<1x1x32xf32>
    %1164 = vector.shape_cast %1163 : vector<1x1x32xf32> to vector<1x32xf32>
    %cst_469 = arith.constant dense<0.000000e+00> : vector<16xf32>
    %1165 = vector.multi_reduction <add>, %1160, %cst_469 [1] : vector<16x32xf32> to vector<16xf32>
    %1166 = vector.shape_cast %1165 : vector<16xf32> to vector<16x1xf32>
    %cst_470 = arith.constant 3.200000e+01 : f32
    %1167 = vector.broadcast %cst_470 : f32 to vector<16x1xf32>
    %1168 = arith.divf %1166, %1167 : vector<16x1xf32>
    %1169 = vector.broadcast %1168 : vector<16x1xf32> to vector<16x32xf32>
    %1170 = arith.subf %1160, %1169 : vector<16x32xf32>
    %1171 = arith.mulf %1170, %1170 : vector<16x32xf32>
    %cst_471 = arith.constant dense<0.000000e+00> : vector<16xf32>
    %1172 = vector.multi_reduction <add>, %1171, %cst_471 [1] : vector<16x32xf32> to vector<16xf32>
    %1173 = vector.shape_cast %1172 : vector<16xf32> to vector<16x1xf32>
    %cst_472 = arith.constant 3.100000e+01 : f32
    %1174 = vector.broadcast %cst_472 : f32 to vector<16x1xf32>
    %1175 = arith.divf %1173, %1174 : vector<16x1xf32>
    %1176 = vector.broadcast %1168 : vector<16x1xf32> to vector<16x32xf32>
    %1177 = arith.subf %1160, %1176 : vector<16x32xf32>
    %1178 = vector.broadcast %1162 : vector<1x32xf32> to vector<16x32xf32>
    %1179 = arith.mulf %1178, %1177 : vector<16x32xf32>
    %1180 = math.sqrt %1175 : vector<16x1xf32>
    %cst_473 = arith.constant 9.99999997E-7 : f32
    %1181 = vector.broadcast %cst_473 : f32 to vector<16x1xf32>
    %1182 = arith.addf %1180, %1181 : vector<16x1xf32>
    %1183 = vector.broadcast %1182 : vector<16x1xf32> to vector<16x32xf32>
    %1184 = arith.divf %1179, %1183 : vector<16x32xf32>
    %1185 = vector.broadcast %1164 : vector<1x32xf32> to vector<16x32xf32>
    %1186 = arith.addf %1184, %1185 : vector<16x32xf32>
    %c1_474 = arith.constant 1 : index
    %c0_475 = arith.constant 0 : index
    %c0_476 = arith.constant 0 : index
    %1187 = vector.load %arg41[%c1_474, %c0_475, %c0_476] : memref<2x32x32xbf16, #tpu.memory_space<vmem>>, vector<1x32x32xbf16>
    %1188 = vector.shape_cast %1187 : vector<1x32x32xbf16> to vector<32x32xbf16>
    %c1_477 = arith.constant 1 : index
    %c0_478 = arith.constant 0 : index
    %c0_479 = arith.constant 0 : index
    %1189 = vector.load %arg42[%c1_477, %c0_478, %c0_479] : memref<2x1x32xf32, #tpu.memory_space<vmem>>, vector<1x1x32xf32>
    %1190 = vector.shape_cast %1189 : vector<1x1x32xf32> to vector<1x32xf32>
    %c1_480 = arith.constant 1 : index
    %c0_481 = arith.constant 0 : index
    %c0_482 = arith.constant 0 : index
    %1191 = vector.load %arg43[%c1_480, %c0_481, %c0_482] : memref<2x32x32xbf16, #tpu.memory_space<vmem>>, vector<1x32x32xbf16>
    %1192 = vector.shape_cast %1191 : vector<1x32x32xbf16> to vector<32x32xbf16>
    %c1_483 = arith.constant 1 : index
    %c0_484 = arith.constant 0 : index
    %c0_485 = arith.constant 0 : index
    %1193 = vector.load %arg44[%c1_483, %c0_484, %c0_485] : memref<2x1x32xf32, #tpu.memory_space<vmem>>, vector<1x1x32xf32>
    %1194 = vector.shape_cast %1193 : vector<1x1x32xf32> to vector<1x32xf32>
    %c1_486 = arith.constant 1 : index
    %c0_487 = arith.constant 0 : index
    %c0_488 = arith.constant 0 : index
    %1195 = vector.load %arg45[%c1_486, %c0_487, %c0_488] : memref<2x32x32xbf16, #tpu.memory_space<vmem>>, vector<1x32x32xbf16>
    %1196 = vector.shape_cast %1195 : vector<1x32x32xbf16> to vector<32x32xbf16>
    %c1_489 = arith.constant 1 : index
    %c0_490 = arith.constant 0 : index
    %c0_491 = arith.constant 0 : index
    %1197 = vector.load %arg46[%c1_489, %c0_490, %c0_491] : memref<2x1x32xf32, #tpu.memory_space<vmem>>, vector<1x1x32xf32>
    %1198 = vector.shape_cast %1197 : vector<1x1x32xf32> to vector<1x32xf32>
    %c1_492 = arith.constant 1 : index
    %c0_493 = arith.constant 0 : index
    %c0_494 = arith.constant 0 : index
    %1199 = vector.load %arg47[%c1_492, %c0_493, %c0_494] : memref<2x32x32xbf16, #tpu.memory_space<vmem>>, vector<1x32x32xbf16>
    %1200 = vector.shape_cast %1199 : vector<1x32x32xbf16> to vector<32x32xbf16>
    %c1_495 = arith.constant 1 : index
    %c0_496 = arith.constant 0 : index
    %c0_497 = arith.constant 0 : index
    %1201 = vector.load %arg48[%c1_495, %c0_496, %c0_497] : memref<2x1x32xf32, #tpu.memory_space<vmem>>, vector<1x1x32xf32>
    %1202 = vector.shape_cast %1201 : vector<1x1x32xf32> to vector<1x32xf32>
    %1203 = arith.truncf %1186 : vector<16x32xf32> to vector<16x32xbf16>
    %cst_498 = arith.constant dense<0.000000e+00> : vector<16x32xf32>
    %1204 = tpu.matmul %1203, %1188, %cst_498 {dimension_numbers = #tpu.dot_dimension_numbers<[1], [0], [0], [1], [0, 0, 1, 1], [], []>} : vector<16x32xbf16>, vector<32x32xbf16>, vector<16x32xf32> -> vector<16x32xf32>
    %1205 = vector.broadcast %1190 : vector<1x32xf32> to vector<16x32xf32>
    %1206 = arith.addf %1204, %1205 : vector<16x32xf32>
    %1207 = arith.truncf %523 : vector<16x32xf32> to vector<16x32xbf16>
    %cst_499 = arith.constant dense<0.000000e+00> : vector<16x32xf32>
    %1208 = tpu.matmul %1207, %1192, %cst_499 {dimension_numbers = #tpu.dot_dimension_numbers<[1], [0], [0], [1], [0, 0, 1, 1], [], []>} : vector<16x32xbf16>, vector<32x32xbf16>, vector<16x32xf32> -> vector<16x32xf32>
    %1209 = vector.broadcast %1194 : vector<1x32xf32> to vector<16x32xf32>
    %1210 = arith.addf %1208, %1209 : vector<16x32xf32>
    %1211 = arith.truncf %523 : vector<16x32xf32> to vector<16x32xbf16>
    %cst_500 = arith.constant dense<0.000000e+00> : vector<16x32xf32>
    %1212 = tpu.matmul %1211, %1196, %cst_500 {dimension_numbers = #tpu.dot_dimension_numbers<[1], [0], [0], [1], [0, 0, 1, 1], [], []>} : vector<16x32xbf16>, vector<32x32xbf16>, vector<16x32xf32> -> vector<16x32xf32>
    %1213 = vector.broadcast %1198 : vector<1x32xf32> to vector<16x32xf32>
    %1214 = arith.addf %1212, %1213 : vector<16x32xf32>
    %1215 = vector.extract_strided_slice %1206 {offsets = [0, 0], sizes = [8, 32], strides = [1, 1]} : vector<16x32xf32> to vector<8x32xf32>
    %1216 = vector.extract_strided_slice %1210 {offsets = [0, 0], sizes = [8, 32], strides = [1, 1]} : vector<16x32xf32> to vector<8x32xf32>
    %1217 = vector.extract_strided_slice %1214 {offsets = [0, 0], sizes = [8, 32], strides = [1, 1]} : vector<16x32xf32> to vector<8x32xf32>
    %1218 = vector.extract_strided_slice %0 {offsets = [0, 0, 0], sizes = [1, 1, 8], strides = [1, 1, 1]} : vector<2x1x8xf32> to vector<1x1x8xf32>
    %1219 = vector.shape_cast %1218 : vector<1x1x8xf32> to vector<1x8xf32>
    %1220 = vector.extract_strided_slice %1215 {offsets = [0, 0], sizes = [8, 8], strides = [1, 1]} : vector<8x32xf32> to vector<8x8xf32>
    %1221 = vector.extract_strided_slice %1216 {offsets = [0, 0], sizes = [8, 8], strides = [1, 1]} : vector<8x32xf32> to vector<8x8xf32>
    %1222 = vector.extract_strided_slice %1217 {offsets = [0, 0], sizes = [8, 8], strides = [1, 1]} : vector<8x32xf32> to vector<8x8xf32>
    %cst_501 = arith.constant dense<0.000000e+00> : vector<8x8xf32>
    %1223 = tpu.matmul %1220, %1221, %cst_501 {dimension_numbers = #tpu.dot_dimension_numbers<[1], [1], [0], [0], [0, 0, 1, 0], [], []>} : vector<8x8xf32>, vector<8x8xf32>, vector<8x8xf32> -> vector<8x8xf32>
    %1224 = vector.broadcast %1219 : vector<1x8xf32> to vector<8x8xf32>
    %1225 = arith.addf %1223, %1224 : vector<8x8xf32>
    %cst_502 = arith.constant dense<0xFF800000> : vector<8xf32>
    %1226 = vector.multi_reduction <maximumf>, %1225, %cst_502 [1] : vector<8x8xf32> to vector<8xf32>
    %1227 = vector.shape_cast %1226 : vector<8xf32> to vector<8x1xf32>
    %1228 = vector.broadcast %1227 : vector<8x1xf32> to vector<8x8xf32>
    %1229 = arith.subf %1225, %1228 : vector<8x8xf32>
    %1230 = math.exp %1229 : vector<8x8xf32>
    %cst_503 = arith.constant dense<0.000000e+00> : vector<8xf32>
    %1231 = vector.multi_reduction <add>, %1230, %cst_503 [1] : vector<8x8xf32> to vector<8xf32>
    %1232 = vector.shape_cast %1231 : vector<8xf32> to vector<8x1xf32>
    %1233 = vector.broadcast %1232 : vector<8x1xf32> to vector<8x8xf32>
    %1234 = arith.divf %1230, %1233 : vector<8x8xf32>
    %cst_504 = arith.constant dense<0.000000e+00> : vector<8x8xf32>
    %1235 = tpu.matmul %1234, %1222, %cst_504 {dimension_numbers = #tpu.dot_dimension_numbers<[1], [0], [0], [1], [0, 0, 1, 1], [], []>} : vector<8x8xf32>, vector<8x8xf32>, vector<8x8xf32> -> vector<8x8xf32>
    %1236 = vector.extract_strided_slice %1215 {offsets = [0, 8], sizes = [8, 8], strides = [1, 1]} : vector<8x32xf32> to vector<8x8xf32>
    %1237 = vector.extract_strided_slice %1216 {offsets = [0, 8], sizes = [8, 8], strides = [1, 1]} : vector<8x32xf32> to vector<8x8xf32>
    %1238 = vector.extract_strided_slice %1217 {offsets = [0, 8], sizes = [8, 8], strides = [1, 1]} : vector<8x32xf32> to vector<8x8xf32>
    %cst_505 = arith.constant dense<0.000000e+00> : vector<8x8xf32>
    %1239 = tpu.matmul %1236, %1237, %cst_505 {dimension_numbers = #tpu.dot_dimension_numbers<[1], [1], [0], [0], [0, 0, 1, 0], [], []>} : vector<8x8xf32>, vector<8x8xf32>, vector<8x8xf32> -> vector<8x8xf32>
    %1240 = vector.broadcast %1219 : vector<1x8xf32> to vector<8x8xf32>
    %1241 = arith.addf %1239, %1240 : vector<8x8xf32>
    %cst_506 = arith.constant dense<0xFF800000> : vector<8xf32>
    %1242 = vector.multi_reduction <maximumf>, %1241, %cst_506 [1] : vector<8x8xf32> to vector<8xf32>
    %1243 = vector.shape_cast %1242 : vector<8xf32> to vector<8x1xf32>
    %1244 = vector.broadcast %1243 : vector<8x1xf32> to vector<8x8xf32>
    %1245 = arith.subf %1241, %1244 : vector<8x8xf32>
    %1246 = math.exp %1245 : vector<8x8xf32>
    %cst_507 = arith.constant dense<0.000000e+00> : vector<8xf32>
    %1247 = vector.multi_reduction <add>, %1246, %cst_507 [1] : vector<8x8xf32> to vector<8xf32>
    %1248 = vector.shape_cast %1247 : vector<8xf32> to vector<8x1xf32>
    %1249 = vector.broadcast %1248 : vector<8x1xf32> to vector<8x8xf32>
    %1250 = arith.divf %1246, %1249 : vector<8x8xf32>
    %cst_508 = arith.constant dense<0.000000e+00> : vector<8x8xf32>
    %1251 = tpu.matmul %1250, %1238, %cst_508 {dimension_numbers = #tpu.dot_dimension_numbers<[1], [0], [0], [1], [0, 0, 1, 1], [], []>} : vector<8x8xf32>, vector<8x8xf32>, vector<8x8xf32> -> vector<8x8xf32>
    %1252 = vector.extract_strided_slice %1215 {offsets = [0, 16], sizes = [8, 8], strides = [1, 1]} : vector<8x32xf32> to vector<8x8xf32>
    %1253 = vector.extract_strided_slice %1216 {offsets = [0, 16], sizes = [8, 8], strides = [1, 1]} : vector<8x32xf32> to vector<8x8xf32>
    %1254 = vector.extract_strided_slice %1217 {offsets = [0, 16], sizes = [8, 8], strides = [1, 1]} : vector<8x32xf32> to vector<8x8xf32>
    %cst_509 = arith.constant dense<0.000000e+00> : vector<8x8xf32>
    %1255 = tpu.matmul %1252, %1253, %cst_509 {dimension_numbers = #tpu.dot_dimension_numbers<[1], [1], [0], [0], [0, 0, 1, 0], [], []>} : vector<8x8xf32>, vector<8x8xf32>, vector<8x8xf32> -> vector<8x8xf32>
    %1256 = vector.broadcast %1219 : vector<1x8xf32> to vector<8x8xf32>
    %1257 = arith.addf %1255, %1256 : vector<8x8xf32>
    %cst_510 = arith.constant dense<0xFF800000> : vector<8xf32>
    %1258 = vector.multi_reduction <maximumf>, %1257, %cst_510 [1] : vector<8x8xf32> to vector<8xf32>
    %1259 = vector.shape_cast %1258 : vector<8xf32> to vector<8x1xf32>
    %1260 = vector.broadcast %1259 : vector<8x1xf32> to vector<8x8xf32>
    %1261 = arith.subf %1257, %1260 : vector<8x8xf32>
    %1262 = math.exp %1261 : vector<8x8xf32>
    %cst_511 = arith.constant dense<0.000000e+00> : vector<8xf32>
    %1263 = vector.multi_reduction <add>, %1262, %cst_511 [1] : vector<8x8xf32> to vector<8xf32>
    %1264 = vector.shape_cast %1263 : vector<8xf32> to vector<8x1xf32>
    %1265 = vector.broadcast %1264 : vector<8x1xf32> to vector<8x8xf32>
    %1266 = arith.divf %1262, %1265 : vector<8x8xf32>
    %cst_512 = arith.constant dense<0.000000e+00> : vector<8x8xf32>
    %1267 = tpu.matmul %1266, %1254, %cst_512 {dimension_numbers = #tpu.dot_dimension_numbers<[1], [0], [0], [1], [0, 0, 1, 1], [], []>} : vector<8x8xf32>, vector<8x8xf32>, vector<8x8xf32> -> vector<8x8xf32>
    %1268 = vector.extract_strided_slice %1215 {offsets = [0, 24], sizes = [8, 8], strides = [1, 1]} : vector<8x32xf32> to vector<8x8xf32>
    %1269 = vector.extract_strided_slice %1216 {offsets = [0, 24], sizes = [8, 8], strides = [1, 1]} : vector<8x32xf32> to vector<8x8xf32>
    %1270 = vector.extract_strided_slice %1217 {offsets = [0, 24], sizes = [8, 8], strides = [1, 1]} : vector<8x32xf32> to vector<8x8xf32>
    %cst_513 = arith.constant dense<0.000000e+00> : vector<8x8xf32>
    %1271 = tpu.matmul %1268, %1269, %cst_513 {dimension_numbers = #tpu.dot_dimension_numbers<[1], [1], [0], [0], [0, 0, 1, 0], [], []>} : vector<8x8xf32>, vector<8x8xf32>, vector<8x8xf32> -> vector<8x8xf32>
    %1272 = vector.broadcast %1219 : vector<1x8xf32> to vector<8x8xf32>
    %1273 = arith.addf %1271, %1272 : vector<8x8xf32>
    %cst_514 = arith.constant dense<0xFF800000> : vector<8xf32>
    %1274 = vector.multi_reduction <maximumf>, %1273, %cst_514 [1] : vector<8x8xf32> to vector<8xf32>
    %1275 = vector.shape_cast %1274 : vector<8xf32> to vector<8x1xf32>
    %1276 = vector.broadcast %1275 : vector<8x1xf32> to vector<8x8xf32>
    %1277 = arith.subf %1273, %1276 : vector<8x8xf32>
    %1278 = math.exp %1277 : vector<8x8xf32>
    %cst_515 = arith.constant dense<0.000000e+00> : vector<8xf32>
    %1279 = vector.multi_reduction <add>, %1278, %cst_515 [1] : vector<8x8xf32> to vector<8xf32>
    %1280 = vector.shape_cast %1279 : vector<8xf32> to vector<8x1xf32>
    %1281 = vector.broadcast %1280 : vector<8x1xf32> to vector<8x8xf32>
    %1282 = arith.divf %1278, %1281 : vector<8x8xf32>
    %cst_516 = arith.constant dense<0.000000e+00> : vector<8x8xf32>
    %1283 = tpu.matmul %1282, %1270, %cst_516 {dimension_numbers = #tpu.dot_dimension_numbers<[1], [0], [0], [1], [0, 0, 1, 1], [], []>} : vector<8x8xf32>, vector<8x8xf32>, vector<8x8xf32> -> vector<8x8xf32>
    %1284 = tpu.concatenate %1235, %1251, %1267, %1283 in 1 : vector<8x8xf32>, vector<8x8xf32>, vector<8x8xf32>, vector<8x8xf32> -> vector<8x32xf32>
    %1285 = vector.extract_strided_slice %1206 {offsets = [8, 0], sizes = [8, 32], strides = [1, 1]} : vector<16x32xf32> to vector<8x32xf32>
    %1286 = vector.extract_strided_slice %1210 {offsets = [8, 0], sizes = [8, 32], strides = [1, 1]} : vector<16x32xf32> to vector<8x32xf32>
    %1287 = vector.extract_strided_slice %1214 {offsets = [8, 0], sizes = [8, 32], strides = [1, 1]} : vector<16x32xf32> to vector<8x32xf32>
    %1288 = vector.extract_strided_slice %0 {offsets = [1, 0, 0], sizes = [1, 1, 8], strides = [1, 1, 1]} : vector<2x1x8xf32> to vector<1x1x8xf32>
    %1289 = vector.shape_cast %1288 : vector<1x1x8xf32> to vector<1x8xf32>
    %1290 = vector.extract_strided_slice %1285 {offsets = [0, 0], sizes = [8, 8], strides = [1, 1]} : vector<8x32xf32> to vector<8x8xf32>
    %1291 = vector.extract_strided_slice %1286 {offsets = [0, 0], sizes = [8, 8], strides = [1, 1]} : vector<8x32xf32> to vector<8x8xf32>
    %1292 = vector.extract_strided_slice %1287 {offsets = [0, 0], sizes = [8, 8], strides = [1, 1]} : vector<8x32xf32> to vector<8x8xf32>
    %cst_517 = arith.constant dense<0.000000e+00> : vector<8x8xf32>
    %1293 = tpu.matmul %1290, %1291, %cst_517 {dimension_numbers = #tpu.dot_dimension_numbers<[1], [1], [0], [0], [0, 0, 1, 0], [], []>} : vector<8x8xf32>, vector<8x8xf32>, vector<8x8xf32> -> vector<8x8xf32>
    %1294 = vector.broadcast %1289 : vector<1x8xf32> to vector<8x8xf32>
    %1295 = arith.addf %1293, %1294 : vector<8x8xf32>
    %cst_518 = arith.constant dense<0xFF800000> : vector<8xf32>
    %1296 = vector.multi_reduction <maximumf>, %1295, %cst_518 [1] : vector<8x8xf32> to vector<8xf32>
    %1297 = vector.shape_cast %1296 : vector<8xf32> to vector<8x1xf32>
    %1298 = vector.broadcast %1297 : vector<8x1xf32> to vector<8x8xf32>
    %1299 = arith.subf %1295, %1298 : vector<8x8xf32>
    %1300 = math.exp %1299 : vector<8x8xf32>
    %cst_519 = arith.constant dense<0.000000e+00> : vector<8xf32>
    %1301 = vector.multi_reduction <add>, %1300, %cst_519 [1] : vector<8x8xf32> to vector<8xf32>
    %1302 = vector.shape_cast %1301 : vector<8xf32> to vector<8x1xf32>
    %1303 = vector.broadcast %1302 : vector<8x1xf32> to vector<8x8xf32>
    %1304 = arith.divf %1300, %1303 : vector<8x8xf32>
    %cst_520 = arith.constant dense<0.000000e+00> : vector<8x8xf32>
    %1305 = tpu.matmul %1304, %1292, %cst_520 {dimension_numbers = #tpu.dot_dimension_numbers<[1], [0], [0], [1], [0, 0, 1, 1], [], []>} : vector<8x8xf32>, vector<8x8xf32>, vector<8x8xf32> -> vector<8x8xf32>
    %1306 = vector.extract_strided_slice %1285 {offsets = [0, 8], sizes = [8, 8], strides = [1, 1]} : vector<8x32xf32> to vector<8x8xf32>
    %1307 = vector.extract_strided_slice %1286 {offsets = [0, 8], sizes = [8, 8], strides = [1, 1]} : vector<8x32xf32> to vector<8x8xf32>
    %1308 = vector.extract_strided_slice %1287 {offsets = [0, 8], sizes = [8, 8], strides = [1, 1]} : vector<8x32xf32> to vector<8x8xf32>
    %cst_521 = arith.constant dense<0.000000e+00> : vector<8x8xf32>
    %1309 = tpu.matmul %1306, %1307, %cst_521 {dimension_numbers = #tpu.dot_dimension_numbers<[1], [1], [0], [0], [0, 0, 1, 0], [], []>} : vector<8x8xf32>, vector<8x8xf32>, vector<8x8xf32> -> vector<8x8xf32>
    %1310 = vector.broadcast %1289 : vector<1x8xf32> to vector<8x8xf32>
    %1311 = arith.addf %1309, %1310 : vector<8x8xf32>
    %cst_522 = arith.constant dense<0xFF800000> : vector<8xf32>
    %1312 = vector.multi_reduction <maximumf>, %1311, %cst_522 [1] : vector<8x8xf32> to vector<8xf32>
    %1313 = vector.shape_cast %1312 : vector<8xf32> to vector<8x1xf32>
    %1314 = vector.broadcast %1313 : vector<8x1xf32> to vector<8x8xf32>
    %1315 = arith.subf %1311, %1314 : vector<8x8xf32>
    %1316 = math.exp %1315 : vector<8x8xf32>
    %cst_523 = arith.constant dense<0.000000e+00> : vector<8xf32>
    %1317 = vector.multi_reduction <add>, %1316, %cst_523 [1] : vector<8x8xf32> to vector<8xf32>
    %1318 = vector.shape_cast %1317 : vector<8xf32> to vector<8x1xf32>
    %1319 = vector.broadcast %1318 : vector<8x1xf32> to vector<8x8xf32>
    %1320 = arith.divf %1316, %1319 : vector<8x8xf32>
    %cst_524 = arith.constant dense<0.000000e+00> : vector<8x8xf32>
    %1321 = tpu.matmul %1320, %1308, %cst_524 {dimension_numbers = #tpu.dot_dimension_numbers<[1], [0], [0], [1], [0, 0, 1, 1], [], []>} : vector<8x8xf32>, vector<8x8xf32>, vector<8x8xf32> -> vector<8x8xf32>
    %1322 = vector.extract_strided_slice %1285 {offsets = [0, 16], sizes = [8, 8], strides = [1, 1]} : vector<8x32xf32> to vector<8x8xf32>
    %1323 = vector.extract_strided_slice %1286 {offsets = [0, 16], sizes = [8, 8], strides = [1, 1]} : vector<8x32xf32> to vector<8x8xf32>
    %1324 = vector.extract_strided_slice %1287 {offsets = [0, 16], sizes = [8, 8], strides = [1, 1]} : vector<8x32xf32> to vector<8x8xf32>
    %cst_525 = arith.constant dense<0.000000e+00> : vector<8x8xf32>
    %1325 = tpu.matmul %1322, %1323, %cst_525 {dimension_numbers = #tpu.dot_dimension_numbers<[1], [1], [0], [0], [0, 0, 1, 0], [], []>} : vector<8x8xf32>, vector<8x8xf32>, vector<8x8xf32> -> vector<8x8xf32>
    %1326 = vector.broadcast %1289 : vector<1x8xf32> to vector<8x8xf32>
    %1327 = arith.addf %1325, %1326 : vector<8x8xf32>
    %cst_526 = arith.constant dense<0xFF800000> : vector<8xf32>
    %1328 = vector.multi_reduction <maximumf>, %1327, %cst_526 [1] : vector<8x8xf32> to vector<8xf32>
    %1329 = vector.shape_cast %1328 : vector<8xf32> to vector<8x1xf32>
    %1330 = vector.broadcast %1329 : vector<8x1xf32> to vector<8x8xf32>
    %1331 = arith.subf %1327, %1330 : vector<8x8xf32>
    %1332 = math.exp %1331 : vector<8x8xf32>
    %cst_527 = arith.constant dense<0.000000e+00> : vector<8xf32>
    %1333 = vector.multi_reduction <add>, %1332, %cst_527 [1] : vector<8x8xf32> to vector<8xf32>
    %1334 = vector.shape_cast %1333 : vector<8xf32> to vector<8x1xf32>
    %1335 = vector.broadcast %1334 : vector<8x1xf32> to vector<8x8xf32>
    %1336 = arith.divf %1332, %1335 : vector<8x8xf32>
    %cst_528 = arith.constant dense<0.000000e+00> : vector<8x8xf32>
    %1337 = tpu.matmul %1336, %1324, %cst_528 {dimension_numbers = #tpu.dot_dimension_numbers<[1], [0], [0], [1], [0, 0, 1, 1], [], []>} : vector<8x8xf32>, vector<8x8xf32>, vector<8x8xf32> -> vector<8x8xf32>
    %1338 = vector.extract_strided_slice %1285 {offsets = [0, 24], sizes = [8, 8], strides = [1, 1]} : vector<8x32xf32> to vector<8x8xf32>
    %1339 = vector.extract_strided_slice %1286 {offsets = [0, 24], sizes = [8, 8], strides = [1, 1]} : vector<8x32xf32> to vector<8x8xf32>
    %1340 = vector.extract_strided_slice %1287 {offsets = [0, 24], sizes = [8, 8], strides = [1, 1]} : vector<8x32xf32> to vector<8x8xf32>
    %cst_529 = arith.constant dense<0.000000e+00> : vector<8x8xf32>
    %1341 = tpu.matmul %1338, %1339, %cst_529 {dimension_numbers = #tpu.dot_dimension_numbers<[1], [1], [0], [0], [0, 0, 1, 0], [], []>} : vector<8x8xf32>, vector<8x8xf32>, vector<8x8xf32> -> vector<8x8xf32>
    %1342 = vector.broadcast %1289 : vector<1x8xf32> to vector<8x8xf32>
    %1343 = arith.addf %1341, %1342 : vector<8x8xf32>
    %cst_530 = arith.constant dense<0xFF800000> : vector<8xf32>
    %1344 = vector.multi_reduction <maximumf>, %1343, %cst_530 [1] : vector<8x8xf32> to vector<8xf32>
    %1345 = vector.shape_cast %1344 : vector<8xf32> to vector<8x1xf32>
    %1346 = vector.broadcast %1345 : vector<8x1xf32> to vector<8x8xf32>
    %1347 = arith.subf %1343, %1346 : vector<8x8xf32>
    %1348 = math.exp %1347 : vector<8x8xf32>
    %cst_531 = arith.constant dense<0.000000e+00> : vector<8xf32>
    %1349 = vector.multi_reduction <add>, %1348, %cst_531 [1] : vector<8x8xf32> to vector<8xf32>
    %1350 = vector.shape_cast %1349 : vector<8xf32> to vector<8x1xf32>
    %1351 = vector.broadcast %1350 : vector<8x1xf32> to vector<8x8xf32>
    %1352 = arith.divf %1348, %1351 : vector<8x8xf32>
    %cst_532 = arith.constant dense<0.000000e+00> : vector<8x8xf32>
    %1353 = tpu.matmul %1352, %1340, %cst_532 {dimension_numbers = #tpu.dot_dimension_numbers<[1], [0], [0], [1], [0, 0, 1, 1], [], []>} : vector<8x8xf32>, vector<8x8xf32>, vector<8x8xf32> -> vector<8x8xf32>
    %1354 = tpu.concatenate %1305, %1321, %1337, %1353 in 1 : vector<8x8xf32>, vector<8x8xf32>, vector<8x8xf32>, vector<8x8xf32> -> vector<8x32xf32>
    %1355 = tpu.concatenate %1284, %1354 in 0 : vector<8x32xf32>, vector<8x32xf32> -> vector<16x32xf32>
    %1356 = arith.truncf %1355 : vector<16x32xf32> to vector<16x32xbf16>
    %cst_533 = arith.constant dense<0.000000e+00> : vector<16x32xf32>
    %1357 = tpu.matmul %1356, %1200, %cst_533 {dimension_numbers = #tpu.dot_dimension_numbers<[1], [0], [0], [1], [0, 0, 1, 1], [], []>} : vector<16x32xbf16>, vector<32x32xbf16>, vector<16x32xf32> -> vector<16x32xf32>
    %1358 = vector.broadcast %1202 : vector<1x32xf32> to vector<16x32xf32>
    %1359 = arith.addf %1357, %1358 : vector<16x32xf32>
    %1360 = arith.addf %1160, %1359 : vector<16x32xf32>
    %c1_534 = arith.constant 1 : index
    %c0_535 = arith.constant 0 : index
    %c0_536 = arith.constant 0 : index
    %1361 = vector.load %arg49[%c1_534, %c0_535, %c0_536] : memref<2x1x32xf32, #tpu.memory_space<vmem>>, vector<1x1x32xf32>
    %1362 = vector.shape_cast %1361 : vector<1x1x32xf32> to vector<1x32xf32>
    %c1_537 = arith.constant 1 : index
    %c0_538 = arith.constant 0 : index
    %c0_539 = arith.constant 0 : index
    %1363 = vector.load %arg50[%c1_537, %c0_538, %c0_539] : memref<2x1x32xf32, #tpu.memory_space<vmem>>, vector<1x1x32xf32>
    %1364 = vector.shape_cast %1363 : vector<1x1x32xf32> to vector<1x32xf32>
    %cst_540 = arith.constant dense<0.000000e+00> : vector<16xf32>
    %1365 = vector.multi_reduction <add>, %1360, %cst_540 [1] : vector<16x32xf32> to vector<16xf32>
    %1366 = vector.shape_cast %1365 : vector<16xf32> to vector<16x1xf32>
    %cst_541 = arith.constant 3.200000e+01 : f32
    %1367 = vector.broadcast %cst_541 : f32 to vector<16x1xf32>
    %1368 = arith.divf %1366, %1367 : vector<16x1xf32>
    %1369 = vector.broadcast %1368 : vector<16x1xf32> to vector<16x32xf32>
    %1370 = arith.subf %1360, %1369 : vector<16x32xf32>
    %1371 = arith.mulf %1370, %1370 : vector<16x32xf32>
    %cst_542 = arith.constant dense<0.000000e+00> : vector<16xf32>
    %1372 = vector.multi_reduction <add>, %1371, %cst_542 [1] : vector<16x32xf32> to vector<16xf32>
    %1373 = vector.shape_cast %1372 : vector<16xf32> to vector<16x1xf32>
    %cst_543 = arith.constant 3.100000e+01 : f32
    %1374 = vector.broadcast %cst_543 : f32 to vector<16x1xf32>
    %1375 = arith.divf %1373, %1374 : vector<16x1xf32>
    %1376 = vector.broadcast %1368 : vector<16x1xf32> to vector<16x32xf32>
    %1377 = arith.subf %1360, %1376 : vector<16x32xf32>
    %1378 = vector.broadcast %1362 : vector<1x32xf32> to vector<16x32xf32>
    %1379 = arith.mulf %1378, %1377 : vector<16x32xf32>
    %1380 = math.sqrt %1375 : vector<16x1xf32>
    %cst_544 = arith.constant 9.99999997E-7 : f32
    %1381 = vector.broadcast %cst_544 : f32 to vector<16x1xf32>
    %1382 = arith.addf %1380, %1381 : vector<16x1xf32>
    %1383 = vector.broadcast %1382 : vector<16x1xf32> to vector<16x32xf32>
    %1384 = arith.divf %1379, %1383 : vector<16x32xf32>
    %1385 = vector.broadcast %1364 : vector<1x32xf32> to vector<16x32xf32>
    %1386 = arith.addf %1384, %1385 : vector<16x32xf32>
    %c1_545 = arith.constant 1 : index
    %c0_546 = arith.constant 0 : index
    %c0_547 = arith.constant 0 : index
    %1387 = vector.load %arg51[%c1_545, %c0_546, %c0_547] : memref<2x32x64xbf16, #tpu.memory_space<vmem>>, vector<1x32x64xbf16>
    %1388 = vector.shape_cast %1387 : vector<1x32x64xbf16> to vector<32x64xbf16>
    %c1_548 = arith.constant 1 : index
    %c0_549 = arith.constant 0 : index
    %c0_550 = arith.constant 0 : index
    %1389 = vector.load %arg52[%c1_548, %c0_549, %c0_550] : memref<2x1x64xf32, #tpu.memory_space<vmem>>, vector<1x1x64xf32>
    %1390 = vector.shape_cast %1389 : vector<1x1x64xf32> to vector<1x64xf32>
    %c1_551 = arith.constant 1 : index
    %c0_552 = arith.constant 0 : index
    %c0_553 = arith.constant 0 : index
    %1391 = vector.load %arg53[%c1_551, %c0_552, %c0_553] : memref<2x64x32xbf16, #tpu.memory_space<vmem>>, vector<1x64x32xbf16>
    %1392 = vector.shape_cast %1391 : vector<1x64x32xbf16> to vector<64x32xbf16>
    %c1_554 = arith.constant 1 : index
    %c0_555 = arith.constant 0 : index
    %c0_556 = arith.constant 0 : index
    %1393 = vector.load %arg54[%c1_554, %c0_555, %c0_556] : memref<2x1x32xf32, #tpu.memory_space<vmem>>, vector<1x1x32xf32>
    %1394 = vector.shape_cast %1393 : vector<1x1x32xf32> to vector<1x32xf32>
    %1395 = arith.truncf %1386 : vector<16x32xf32> to vector<16x32xbf16>
    %cst_557 = arith.constant dense<0.000000e+00> : vector<16x64xf32>
    %1396 = tpu.matmul %1395, %1388, %cst_557 {dimension_numbers = #tpu.dot_dimension_numbers<[1], [0], [0], [1], [0, 0, 1, 1], [], []>} : vector<16x32xbf16>, vector<32x64xbf16>, vector<16x64xf32> -> vector<16x64xf32>
    %1397 = vector.broadcast %1390 : vector<1x64xf32> to vector<16x64xf32>
    %1398 = arith.addf %1396, %1397 : vector<16x64xf32>
    %cst_558 = arith.constant 0.000000e+00 : f32
    %1399 = vector.broadcast %cst_558 : f32 to vector<16x64xf32>
    %1400 = arith.maximumf %1398, %1399 : vector<16x64xf32>
    %1401 = arith.truncf %1400 : vector<16x64xf32> to vector<16x64xbf16>
    %cst_559 = arith.constant dense<0.000000e+00> : vector<16x32xf32>
    %1402 = tpu.matmul %1401, %1392, %cst_559 {dimension_numbers = #tpu.dot_dimension_numbers<[1], [0], [0], [1], [0, 0, 1, 1], [], []>} : vector<16x64xbf16>, vector<64x32xbf16>, vector<16x32xf32> -> vector<16x32xf32>
    %1403 = vector.broadcast %1394 : vector<1x32xf32> to vector<16x32xf32>
    %1404 = arith.addf %1402, %1403 : vector<16x32xf32>
    %1405 = arith.addf %1360, %1404 : vector<16x32xf32>
    %c0_560 = arith.constant 0 : index
    %c0_561 = arith.constant 0 : index
    %1406 = vector.load %arg55[%c0_560, %c0_561] : memref<1x32xf32, #tpu.memory_space<vmem>>, vector<1x32xf32>
    %c0_562 = arith.constant 0 : index
    %c0_563 = arith.constant 0 : index
    %1407 = vector.load %arg56[%c0_562, %c0_563] : memref<1x32xf32, #tpu.memory_space<vmem>>, vector<1x32xf32>
    %cst_564 = arith.constant dense<0.000000e+00> : vector<16xf32>
    %1408 = vector.multi_reduction <add>, %1405, %cst_564 [1] : vector<16x32xf32> to vector<16xf32>
    %1409 = vector.shape_cast %1408 : vector<16xf32> to vector<16x1xf32>
    %cst_565 = arith.constant 3.200000e+01 : f32
    %1410 = vector.broadcast %cst_565 : f32 to vector<16x1xf32>
    %1411 = arith.divf %1409, %1410 : vector<16x1xf32>
    %1412 = vector.broadcast %1411 : vector<16x1xf32> to vector<16x32xf32>
    %1413 = arith.subf %1405, %1412 : vector<16x32xf32>
    %1414 = arith.mulf %1413, %1413 : vector<16x32xf32>
    %cst_566 = arith.constant dense<0.000000e+00> : vector<16xf32>
    %1415 = vector.multi_reduction <add>, %1414, %cst_566 [1] : vector<16x32xf32> to vector<16xf32>
    %1416 = vector.shape_cast %1415 : vector<16xf32> to vector<16x1xf32>
    %cst_567 = arith.constant 3.100000e+01 : f32
    %1417 = vector.broadcast %cst_567 : f32 to vector<16x1xf32>
    %1418 = arith.divf %1416, %1417 : vector<16x1xf32>
    %1419 = vector.broadcast %1411 : vector<16x1xf32> to vector<16x32xf32>
    %1420 = arith.subf %1405, %1419 : vector<16x32xf32>
    %1421 = vector.broadcast %1406 : vector<1x32xf32> to vector<16x32xf32>
    %1422 = arith.mulf %1421, %1420 : vector<16x32xf32>
    %1423 = math.sqrt %1418 : vector<16x1xf32>
    %cst_568 = arith.constant 9.99999997E-7 : f32
    %1424 = vector.broadcast %cst_568 : f32 to vector<16x1xf32>
    %1425 = arith.addf %1423, %1424 : vector<16x1xf32>
    %1426 = vector.broadcast %1425 : vector<16x1xf32> to vector<16x32xf32>
    %1427 = arith.divf %1422, %1426 : vector<16x32xf32>
    %1428 = vector.broadcast %1407 : vector<1x32xf32> to vector<16x32xf32>
    %1429 = arith.addf %1427, %1428 : vector<16x32xf32>
    %c0_569 = arith.constant 0 : index
    %c0_570 = arith.constant 0 : index
    %1430 = vector.load %arg57[%c0_569, %c0_570] : memref<32x128xbf16, #tpu.memory_space<vmem>>, vector<32x128xbf16>
    %1431 = arith.truncf %1429 : vector<16x32xf32> to vector<16x32xbf16>
    %cst_571 = arith.constant dense<0.000000e+00> : vector<16x128xf32>
    %1432 = tpu.matmul %1431, %1430, %cst_571 {dimension_numbers = #tpu.dot_dimension_numbers<[1], [0], [0], [1], [0, 0, 1, 1], [], []>} : vector<16x32xbf16>, vector<32x128xbf16>, vector<16x128xf32> -> vector<16x128xf32>
    %c0_572 = arith.constant 0 : index
    %c0_573 = arith.constant 0 : index
    %1433 = vector.load %arg58[%c0_572, %c0_573] : memref<1x128xf32, #tpu.memory_space<vmem>>, vector<1x128xf32>
    %1434 = vector.broadcast %1433 : vector<1x128xf32> to vector<16x128xf32>
    %1435 = arith.addf %1432, %1434 : vector<16x128xf32>
    %c0_574 = arith.constant 0 : index
    %c0_575 = arith.constant 0 : index
    %1436 = vector.load %arg59[%c0_574, %c0_575] : memref<16x128xf32, #tpu.memory_space<vmem>>, vector<16x128xf32>
    tpu.vector_store %arg59[%c0_574, %c0_575], %1435 {strides = array<i32>} : memref<16x128xf32, #tpu.memory_space<vmem>>, vector<16x128xf32>,
    return
  }
  func.func @transform_0(%arg0: i32) -> (i32, i32) {
    %c0_i32 = arith.constant 0 : i32
    %c0_i32_0 = arith.constant 0 : i32
    %c0_i32_1 = arith.constant 0 : i32
    return %c0_i32, %c0_i32_0 : i32, i32
  }
  func.func @transform_1(%arg0: i32) -> (i32, i32) {
    %c0_i32 = arith.constant 0 : i32
    %c0_i32_0 = arith.constant 0 : i32
    %c0_i32_1 = arith.constant 0 : i32
    return %c0_i32, %c0_i32_0 : i32, i32
  }
  func.func @transform_2(%arg0: i32) -> (i32, i32, i32) {
    %c0_i32 = arith.constant 0 : i32
    %c0_i32_0 = arith.constant 0 : i32
    %c0_i32_1 = arith.constant 0 : i32
    %c0_i32_2 = arith.constant 0 : i32
    return %c0_i32, %c0_i32_0, %c0_i32_1 : i32, i32, i32
  }
  func.func @transform_3(%arg0: i32) -> (i32, i32, i32) {
    %c0_i32 = arith.constant 0 : i32
    %c0_i32_0 = arith.constant 0 : i32
    %c0_i32_1 = arith.constant 0 : i32
    %c0_i32_2 = arith.constant 0 : i32
    return %c0_i32, %c0_i32_0, %c0_i32_1 : i32, i32, i32
  }
  func.func @transform_4(%arg0: i32) -> (i32, i32) {
    %c0_i32 = arith.constant 0 : i32
    %c0_i32_0 = arith.constant 0 : i32
    %c0_i32_1 = arith.constant 0 : i32
    return %c0_i32, %c0_i32_0 : i32, i32
  }
  func.func @transform_5(%arg0: i32) -> (i32, i32) {
    %c0_i32 = arith.constant 0 : i32
    %c0_i32_0 = arith.constant 0 : i32
    %c0_i32_1 = arith.constant 0 : i32
    return %c0_i32, %c0_i32_0 : i32, i32
  }
  func.func @transform_6(%arg0: i32) -> (i32, i32) {
    %c0_i32 = arith.constant 0 : i32
    %c0_i32_0 = arith.constant 0 : i32
    %c0_i32_1 = arith.constant 0 : i32
    return %c0_i32, %c0_i32_0 : i32, i32
  }
  func.func @transform_7(%arg0: i32) -> (i32, i32) {
    %c0_i32 = arith.constant 0 : i32
    %c0_i32_0 = arith.constant 0 : i32
    %c0_i32_1 = arith.constant 0 : i32
    return %c0_i32, %c0_i32_0 : i32, i32
  }
  func.func @transform_8(%arg0: i32) -> (i32, i32) {
    %c0_i32 = arith.constant 0 : i32
    %c0_i32_0 = arith.constant 0 : i32
    %c0_i32_1 = arith.constant 0 : i32
    return %c0_i32, %c0_i32_0 : i32, i32
  }
  func.func @transform_9(%arg0: i32) -> (i32, i32) {
    %c0_i32 = arith.constant 0 : i32
    %c0_i32_0 = arith.constant 0 : i32
    %c0_i32_1 = arith.constant 0 : i32
    return %c0_i32, %c0_i32_0 : i32, i32
  }
  func.func @transform_10(%arg0: i32) -> (i32, i32, i32) {
    %c0_i32 = arith.constant 0 : i32
    %c0_i32_0 = arith.constant 0 : i32
    %c0_i32_1 = arith.constant 0 : i32
    %c0_i32_2 = arith.constant 0 : i32
    return %c0_i32, %c0_i32_0, %c0_i32_1 : i32, i32, i32
  }
  func.func @transform_11(%arg0: i32) -> (i32, i32, i32) {
    %c0_i32 = arith.constant 0 : i32
    %c0_i32_0 = arith.constant 0 : i32
    %c0_i32_1 = arith.constant 0 : i32
    %c0_i32_2 = arith.constant 0 : i32
    return %c0_i32, %c0_i32_0, %c0_i32_1 : i32, i32, i32
  }
  func.func @transform_12(%arg0: i32) -> (i32, i32, i32) {
    %c0_i32 = arith.constant 0 : i32
    %c0_i32_0 = arith.constant 0 : i32
    %c0_i32_1 = arith.constant 0 : i32
    %c0_i32_2 = arith.constant 0 : i32
    return %c0_i32, %c0_i32_0, %c0_i32_1 : i32, i32, i32
  }
  func.func @transform_13(%arg0: i32) -> (i32, i32, i32) {
    %c0_i32 = arith.constant 0 : i32
    %c0_i32_0 = arith.constant 0 : i32
    %c0_i32_1 = arith.constant 0 : i32
    %c0_i32_2 = arith.constant 0 : i32
    return %c0_i32, %c0_i32_0, %c0_i32_1 : i32, i32, i32
  }
  func.func @transform_14(%arg0: i32) -> (i32, i32, i32) {
    %c0_i32 = arith.constant 0 : i32
    %c0_i32_0 = arith.constant 0 : i32
    %c0_i32_1 = arith.constant 0 : i32
    %c0_i32_2 = arith.constant 0 : i32
    return %c0_i32, %c0_i32_0, %c0_i32_1 : i32, i32, i32
  }
  func.func @transform_15(%arg0: i32) -> (i32, i32, i32) {
    %c0_i32 = arith.constant 0 : i32
    %c0_i32_0 = arith.constant 0 : i32
    %c0_i32_1 = arith.constant 0 : i32
    %c0_i32_2 = arith.constant 0 : i32
    return %c0_i32, %c0_i32_0, %c0_i32_1 : i32, i32, i32
  }
  func.func @transform_16(%arg0: i32) -> (i32, i32, i32) {
    %c0_i32 = arith.constant 0 : i32
    %c0_i32_0 = arith.constant 0 : i32
    %c0_i32_1 = arith.constant 0 : i32
    %c0_i32_2 = arith.constant 0 : i32
    return %c0_i32, %c0_i32_0, %c0_i32_1 : i32, i32, i32
  }
  func.func @transform_17(%arg0: i32) -> (i32, i32, i32) {
    %c0_i32 = arith.constant 0 : i32
    %c0_i32_0 = arith.constant 0 : i32
    %c0_i32_1 = arith.constant 0 : i32
    %c0_i32_2 = arith.constant 0 : i32
    return %c0_i32, %c0_i32_0, %c0_i32_1 : i32, i32, i32
  }
  func.func @transform_18(%arg0: i32) -> (i32, i32, i32) {
    %c0_i32 = arith.constant 0 : i32
    %c0_i32_0 = arith.constant 0 : i32
    %c0_i32_1 = arith.constant 0 : i32
    %c0_i32_2 = arith.constant 0 : i32
    return %c0_i32, %c0_i32_0, %c0_i32_1 : i32, i32, i32
  }
  func.func @transform_19(%arg0: i32) -> (i32, i32, i32) {
    %c0_i32 = arith.constant 0 : i32
    %c0_i32_0 = arith.constant 0 : i32
    %c0_i32_1 = arith.constant 0 : i32
    %c0_i32_2 = arith.constant 0 : i32
    return %c0_i32, %c0_i32_0, %c0_i32_1 : i32, i32, i32
  }
  func.func @transform_20(%arg0: i32) -> (i32, i32, i32) {
    %c0_i32 = arith.constant 0 : i32
    %c0_i32_0 = arith.constant 0 : i32
    %c0_i32_1 = arith.constant 0 : i32
    %c0_i32_2 = arith.constant 0 : i32
    return %c0_i32, %c0_i32_0, %c0_i32_1 : i32, i32, i32
  }
  func.func @transform_21(%arg0: i32) -> (i32, i32, i32) {
    %c0_i32 = arith.constant 0 : i32
    %c0_i32_0 = arith.constant 0 : i32
    %c0_i32_1 = arith.constant 0 : i32
    %c0_i32_2 = arith.constant 0 : i32
    return %c0_i32, %c0_i32_0, %c0_i32_1 : i32, i32, i32
  }
  func.func @transform_22(%arg0: i32) -> (i32, i32, i32) {
    %c0_i32 = arith.constant 0 : i32
    %c0_i32_0 = arith.constant 0 : i32
    %c0_i32_1 = arith.constant 0 : i32
    %c0_i32_2 = arith.constant 0 : i32
    return %c0_i32, %c0_i32_0, %c0_i32_1 : i32, i32, i32
  }
  func.func @transform_23(%arg0: i32) -> (i32, i32, i32) {
    %c0_i32 = arith.constant 0 : i32
    %c0_i32_0 = arith.constant 0 : i32
    %c0_i32_1 = arith.constant 0 : i32
    %c0_i32_2 = arith.constant 0 : i32
    return %c0_i32, %c0_i32_0, %c0_i32_1 : i32, i32, i32
  }
  func.func @transform_24(%arg0: i32) -> (i32, i32, i32) {
    %c0_i32 = arith.constant 0 : i32
    %c0_i32_0 = arith.constant 0 : i32
    %c0_i32_1 = arith.constant 0 : i32
    %c0_i32_2 = arith.constant 0 : i32
    return %c0_i32, %c0_i32_0, %c0_i32_1 : i32, i32, i32
  }
  func.func @transform_25(%arg0: i32) -> (i32, i32, i32) {
    %c0_i32 = arith.constant 0 : i32
    %c0_i32_0 = arith.constant 0 : i32
    %c0_i32_1 = arith.constant 0 : i32
    %c0_i32_2 = arith.constant 0 : i32
    return %c0_i32, %c0_i32_0, %c0_i32_1 : i32, i32, i32
  }
  func.func @transform_26(%arg0: i32) -> (i32, i32) {
    %c0_i32 = arith.constant 0 : i32
    %c0_i32_0 = arith.constant 0 : i32
    %c0_i32_1 = arith.constant 0 : i32
    return %c0_i32, %c0_i32_0 : i32, i32
  }
  func.func @transform_27(%arg0: i32) -> (i32, i32) {
    %c0_i32 = arith.constant 0 : i32
    %c0_i32_0 = arith.constant 0 : i32
    %c0_i32_1 = arith.constant 0 : i32
    return %c0_i32, %c0_i32_0 : i32, i32
  }
  func.func @transform_28(%arg0: i32) -> (i32, i32, i32) {
    %c0_i32 = arith.constant 0 : i32
    %c0_i32_0 = arith.constant 0 : i32
    %c0_i32_1 = arith.constant 0 : i32
    %c0_i32_2 = arith.constant 0 : i32
    return %c0_i32, %c0_i32_0, %c0_i32_1 : i32, i32, i32
  }
  func.func @transform_29(%arg0: i32) -> (i32, i32, i32) {
    %c0_i32 = arith.constant 0 : i32
    %c0_i32_0 = arith.constant 0 : i32
    %c0_i32_1 = arith.constant 0 : i32
    %c0_i32_2 = arith.constant 0 : i32
    return %c0_i32, %c0_i32_0, %c0_i32_1 : i32, i32, i32
  }
  func.func @transform_30(%arg0: i32) -> (i32, i32, i32) {
    %c0_i32 = arith.constant 0 : i32
    %c0_i32_0 = arith.constant 0 : i32
    %c0_i32_1 = arith.constant 0 : i32
    %c0_i32_2 = arith.constant 0 : i32
    return %c0_i32, %c0_i32_0, %c0_i32_1 : i32, i32, i32
  }
  func.func @transform_31(%arg0: i32) -> (i32, i32, i32) {
    %c0_i32 = arith.constant 0 : i32
    %c0_i32_0 = arith.constant 0 : i32
    %c0_i32_1 = arith.constant 0 : i32
    %c0_i32_2 = arith.constant 0 : i32
    return %c0_i32, %c0_i32_0, %c0_i32_1 : i32, i32, i32
  }
  func.func @transform_32(%arg0: i32) -> (i32, i32, i32) {
    %c0_i32 = arith.constant 0 : i32
    %c0_i32_0 = arith.constant 0 : i32
    %c0_i32_1 = arith.constant 0 : i32
    %c0_i32_2 = arith.constant 0 : i32
    return %c0_i32, %c0_i32_0, %c0_i32_1 : i32, i32, i32
  }
  func.func @transform_33(%arg0: i32) -> (i32, i32, i32) {
    %c0_i32 = arith.constant 0 : i32
    %c0_i32_0 = arith.constant 0 : i32
    %c0_i32_1 = arith.constant 0 : i32
    %c0_i32_2 = arith.constant 0 : i32
    return %c0_i32, %c0_i32_0, %c0_i32_1 : i32, i32, i32
  }
  func.func @transform_34(%arg0: i32) -> (i32, i32, i32) {
    %c0_i32 = arith.constant 0 : i32
    %c0_i32_0 = arith.constant 0 : i32
    %c0_i32_1 = arith.constant 0 : i32
    %c0_i32_2 = arith.constant 0 : i32
    return %c0_i32, %c0_i32_0, %c0_i32_1 : i32, i32, i32
  }
  func.func @transform_35(%arg0: i32) -> (i32, i32, i32) {
    %c0_i32 = arith.constant 0 : i32
    %c0_i32_0 = arith.constant 0 : i32
    %c0_i32_1 = arith.constant 0 : i32
    %c0_i32_2 = arith.constant 0 : i32
    return %c0_i32, %c0_i32_0, %c0_i32_1 : i32, i32, i32
  }
  func.func @transform_36(%arg0: i32) -> (i32, i32, i32) {
    %c0_i32 = arith.constant 0 : i32
    %c0_i32_0 = arith.constant 0 : i32
    %c0_i32_1 = arith.constant 0 : i32
    %c0_i32_2 = arith.constant 0 : i32
    return %c0_i32, %c0_i32_0, %c0_i32_1 : i32, i32, i32
  }
  func.func @transform_37(%arg0: i32) -> (i32, i32, i32) {
    %c0_i32 = arith.constant 0 : i32
    %c0_i32_0 = arith.constant 0 : i32
    %c0_i32_1 = arith.constant 0 : i32
    %c0_i32_2 = arith.constant 0 : i32
    return %c0_i32, %c0_i32_0, %c0_i32_1 : i32, i32, i32
  }
  func.func @transform_38(%arg0: i32) -> (i32, i32, i32) {
    %c0_i32 = arith.constant 0 : i32
    %c0_i32_0 = arith.constant 0 : i32
    %c0_i32_1 = arith.constant 0 : i32
    %c0_i32_2 = arith.constant 0 : i32
    return %c0_i32, %c0_i32_0, %c0_i32_1 : i32, i32, i32
  }
  func.func @transform_39(%arg0: i32) -> (i32, i32, i32) {
    %c0_i32 = arith.constant 0 : i32
    %c0_i32_0 = arith.constant 0 : i32
    %c0_i32_1 = arith.constant 0 : i32
    %c0_i32_2 = arith.constant 0 : i32
    return %c0_i32, %c0_i32_0, %c0_i32_1 : i32, i32, i32
  }
  func.func @transform_40(%arg0: i32) -> (i32, i32, i32) {
    %c0_i32 = arith.constant 0 : i32
    %c0_i32_0 = arith.constant 0 : i32
    %c0_i32_1 = arith.constant 0 : i32
    %c0_i32_2 = arith.constant 0 : i32
    return %c0_i32, %c0_i32_0, %c0_i32_1 : i32, i32, i32
  }
  func.func @transform_41(%arg0: i32) -> (i32, i32, i32) {
    %c0_i32 = arith.constant 0 : i32
    %c0_i32_0 = arith.constant 0 : i32
    %c0_i32_1 = arith.constant 0 : i32
    %c0_i32_2 = arith.constant 0 : i32
    return %c0_i32, %c0_i32_0, %c0_i32_1 : i32, i32, i32
  }
  func.func @transform_42(%arg0: i32) -> (i32, i32, i32) {
    %c0_i32 = arith.constant 0 : i32
    %c0_i32_0 = arith.constant 0 : i32
    %c0_i32_1 = arith.constant 0 : i32
    %c0_i32_2 = arith.constant 0 : i32
    return %c0_i32, %c0_i32_0, %c0_i32_1 : i32, i32, i32
  }
  func.func @transform_43(%arg0: i32) -> (i32, i32, i32) {
    %c0_i32 = arith.constant 0 : i32
    %c0_i32_0 = arith.constant 0 : i32
    %c0_i32_1 = arith.constant 0 : i32
    %c0_i32_2 = arith.constant 0 : i32
    return %c0_i32, %c0_i32_0, %c0_i32_1 : i32, i32, i32
  }
  func.func @transform_44(%arg0: i32) -> (i32, i32, i32) {
    %c0_i32 = arith.constant 0 : i32
    %c0_i32_0 = arith.constant 0 : i32
    %c0_i32_1 = arith.constant 0 : i32
    %c0_i32_2 = arith.constant 0 : i32
    return %c0_i32, %c0_i32_0, %c0_i32_1 : i32, i32, i32
  }
  func.func @transform_45(%arg0: i32) -> (i32, i32, i32) {
    %c0_i32 = arith.constant 0 : i32
    %c0_i32_0 = arith.constant 0 : i32
    %c0_i32_1 = arith.constant 0 : i32
    %c0_i32_2 = arith.constant 0 : i32
    return %c0_i32, %c0_i32_0, %c0_i32_1 : i32, i32, i32
  }
  func.func @transform_46(%arg0: i32) -> (i32, i32, i32) {
    %c0_i32 = arith.constant 0 : i32
    %c0_i32_0 = arith.constant 0 : i32
    %c0_i32_1 = arith.constant 0 : i32
    %c0_i32_2 = arith.constant 0 : i32
    return %c0_i32, %c0_i32_0, %c0_i32_1 : i32, i32, i32
  }
  func.func @transform_47(%arg0: i32) -> (i32, i32, i32) {
    %c0_i32 = arith.constant 0 : i32
    %c0_i32_0 = arith.constant 0 : i32
    %c0_i32_1 = arith.constant 0 : i32
    %c0_i32_2 = arith.constant 0 : i32
    return %c0_i32, %c0_i32_0, %c0_i32_1 : i32, i32, i32
  }
  func.func @transform_48(%arg0: i32) -> (i32, i32, i32) {
    %c0_i32 = arith.constant 0 : i32
    %c0_i32_0 = arith.constant 0 : i32
    %c0_i32_1 = arith.constant 0 : i32
    %c0_i32_2 = arith.constant 0 : i32
    return %c0_i32, %c0_i32_0, %c0_i32_1 : i32, i32, i32
  }
  func.func @transform_49(%arg0: i32) -> (i32, i32, i32) {
    %c0_i32 = arith.constant 0 : i32
    %c0_i32_0 = arith.constant 0 : i32
    %c0_i32_1 = arith.constant 0 : i32
    %c0_i32_2 = arith.constant 0 : i32
    return %c0_i32, %c0_i32_0, %c0_i32_1 : i32, i32, i32
  }
  func.func @transform_50(%arg0: i32) -> (i32, i32, i32) {
    %c0_i32 = arith.constant 0 : i32
    %c0_i32_0 = arith.constant 0 : i32
    %c0_i32_1 = arith.constant 0 : i32
    %c0_i32_2 = arith.constant 0 : i32
    return %c0_i32, %c0_i32_0, %c0_i32_1 : i32, i32, i32
  }
  func.func @transform_51(%arg0: i32) -> (i32, i32, i32) {
    %c0_i32 = arith.constant 0 : i32
    %c0_i32_0 = arith.constant 0 : i32
    %c0_i32_1 = arith.constant 0 : i32
    %c0_i32_2 = arith.constant 0 : i32
    return %c0_i32, %c0_i32_0, %c0_i32_1 : i32, i32, i32
  }
  func.func @transform_52(%arg0: i32) -> (i32, i32, i32) {
    %c0_i32 = arith.constant 0 : i32
    %c0_i32_0 = arith.constant 0 : i32
    %c0_i32_1 = arith.constant 0 : i32
    %c0_i32_2 = arith.constant 0 : i32
    return %c0_i32, %c0_i32_0, %c0_i32_1 : i32, i32, i32
  }
  func.func @transform_53(%arg0: i32) -> (i32, i32, i32) {
    %c0_i32 = arith.constant 0 : i32
    %c0_i32_0 = arith.constant 0 : i32
    %c0_i32_1 = arith.constant 0 : i32
    %c0_i32_2 = arith.constant 0 : i32
    return %c0_i32, %c0_i32_0, %c0_i32_1 : i32, i32, i32
  }
  func.func @transform_54(%arg0: i32) -> (i32, i32) {
    %c0_i32 = arith.constant 0 : i32
    %c0_i32_0 = arith.constant 0 : i32
    %c0_i32_1 = arith.constant 0 : i32
    return %c0_i32, %c0_i32_0 : i32, i32
  }
  func.func @transform_55(%arg0: i32) -> (i32, i32) {
    %c0_i32 = arith.constant 0 : i32
    %c0_i32_0 = arith.constant 0 : i32
    %c0_i32_1 = arith.constant 0 : i32
    return %c0_i32, %c0_i32_0 : i32, i32
  }
  func.func @transform_56(%arg0: i32) -> (i32, i32) {
    %c0_i32 = arith.constant 0 : i32
    %c0_i32_0 = arith.constant 0 : i32
    %c0_i32_1 = arith.constant 0 : i32
    return %c0_i32, %c0_i32_0 : i32, i32
  }
  func.func @transform_57(%arg0: i32) -> (i32, i32) {
    %c0_i32 = arith.constant 0 : i32
    %c0_i32_0 = arith.constant 0 : i32
    %c0_i32_1 = arith.constant 0 : i32
    return %c0_i32, %c0_i32_0 : i32, i32
  }
  func.func @transform_58(%arg0: i32) -> (i32, i32) {
    %c0_i32 = arith.constant 0 : i32
    %c0_i32_0 = arith.constant 0 : i32
    %c0_i32_1 = arith.constant 0 : i32
    return %c0_i32, %c0_i32_0 : i32, i32
  }
}

</mosaic_0001>

<bundles_post_ra>
// kernel: individual_tf_forward.1
= control target key start
LH: loop header
LB: loop body
LE: loop exit
PB: predicated region body
PF: predicated region fallthrough
CT: control target
= control target key end

     0   :  { %s14837_s6 = smov 1   ;;  %s14838_s10 = smov 2   ;;  %s16874_s0 = inlined_call_operand.smem [shape: u32[59], index: -1, kind: input, shape index: {}] }
   0x1   :  { %s14947_s5 = sld [smem:[%s16874_s0]]   ;;  %s14839_s14 = smov 3  }
   0x2   :  { %s14952_s9 = sld [smem:[%s16874_s0 + %s14837_s6]]   ;;  %s14840_s18 = smov 4  }
   0x3   :  { %s14957_s13 = sld [smem:[%s16874_s0 + %s14838_s10]]   ;;  %s14841_s22 = smov 5  }
   0x4   :  { %s14962_s17 = sld [smem:[%s16874_s0 + %s14839_s14]]   ;;  %s14842_s26 = smov 6  }
   0x5   :  { %s14967_s21 = sld [smem:[%s16874_s0 + %s14840_s18]]   ;;  %s14843_s30 = smov 7  }
   0x6   :  { %s14972_s25 = sld [smem:[%s16874_s0 + %s14841_s22]]   ;;  %s14844_s4 = smov 8  }
   0x7   :  { %16912 = sst [smem:[#allocation69_spill]] %s14947_s5  ;;  %s14845_s10 = smov 9  }
   0x8   :  { %16913 = sst [smem:[#allocation70_spill]] %s14952_s9  ;;  %s14846_s15 = smov 10  }
   0x9   :  { %16914 = sst [smem:[#allocation71_spill]] %s14957_s13  ;;  %s14847_s20 = smov 11  }
   0xa   :  { %16915 = sst [smem:[#allocation72_spill]] %s14962_s17  ;;  %s14849_s1 = smov 13  }
   0xb   :  { %16916 = sst [smem:[#allocation73_spill]] %s14967_s21  ;;  %s14850_s7 = smov 14  }
   0xc   :  { %16917 = sst [smem:[#allocation74_spill]] %s14972_s25  ;;  %s14852_s22 = smov 16  }
   0xd   :  { %s14977_s29 = sld [smem:[%s16874_s0 + %s14842_s26]]   ;;  %s14848_s26 = smov 12  }
   0xe   :  { %s14982_s3 = sld [smem:[%s16874_s0 + %s14843_s30]]   ;;  %s14853_s28 = smov 17  }
   0xf   :  { %s14987_s8 = sld [smem:[%s16874_s0 + %s14844_s4]]  }
  0x10   :  { %s14992_s14 = sld [smem:[%s16874_s0 + %s14845_s10]]  }
  0x11   :  { %s14997_s19 = sld [smem:[%s16874_s0 + %s14846_s15]]   ;;  %s14851_s15 = smov 15  }
  0x12   :  { %s15002_s24 = sld [smem:[%s16874_s0 + %s14847_s20]]  }
  0x13   :  { %16918 = sst [smem:[#allocation75_spill]] %s14977_s29 }
  0x14   :  { %16919 = sst [smem:[#allocation76_spill]] %s14982_s3 }
  0x15   :  { %16920 = sst [smem:[#allocation77_spill]] %s14987_s8 }
  0x16   :  { %16921 = sst [smem:[#allocation78_spill]] %s14992_s14 }
  0x17   :  { %16922 = sst [smem:[#allocation79_spill]] %s14997_s19 }
  0x18   :  { %s15007_s30 = sld [smem:[%s16874_s0 + %s14848_s26]]  }
  0x19   :  { %s15012_s6 = sld [smem:[%s16874_s0 + %s14849_s1]]  }
  0x1a   :  { %s15017_s12 = sld [smem:[%s16874_s0 + %s14850_s7]]   ;;  %s14854_s7 = smov 18  }
  0x1b   :  { %s15022_s20 = sld [smem:[%s16874_s0 + %s14851_s15]]   ;;  %s14855_s15 = smov 19  }
  0x1c   :  { %s15027_s27 = sld [smem:[%s16874_s0 + %s14852_s22]]   ;;  %s14856_s22 = smov 20  }
  0x1d   :  { %s15032_s4 = sld [smem:[%s16874_s0 + %s14853_s28]]   ;;  %s14857_s28 = smov 21  }
  0x1e   :  { %16923 = sst [smem:[#allocation80_spill]] %s15007_s30 }
  0x1f   :  { %16924 = sst [smem:[#allocation81_spill]] %s15012_s6 }
  0x20   :  { %16925 = sst [smem:[#allocation82_spill]] %s15017_s12 }
  0x21   :  { %s15037_s17 = sld [smem:[%s16874_s0 + %s14854_s7]]   ;;  %s14858_s7 = smov 22  }
  0x22   :  { %16926 = sst [smem:[#allocation83_spill]] %s15027_s27 }
  0x23   :  { %16927 = sst [smem:[#allocation84_spill]] %s15032_s4 }
  0x24   :  { %s15042_s25 = sld [smem:[%s16874_s0 + %s14855_s15]]   ;;  %s14859_s15 = smov 23  }
  0x25   :  { %s15047_s14 = sld [smem:[%s16874_s0 + %s14856_s22]]   ;;  %s14860_s22 = smov 24  }
  0x26   :  { %s15052_s9 = sld [smem:[%s16874_s0 + %s14857_s28]]   ;;  %s14861_s28 = smov 25  }
  0x27   :  { %16928 = sst [smem:[#allocation85_spill]] %s15037_s17 }
  0x28   :  { %s15057_s8 = sld [smem:[%s16874_s0 + %s14858_s7]]   ;;  %s14862_s7 = smov 26  }
  0x29   :  { %s15062_s17 = sld [smem:[%s16874_s0 + %s14859_s15]]   ;;  %s14863_s15 = smov 27  }
  0x2a   :  { %s15067_s13 = sld [smem:[%s16874_s0 + %s14860_s22]]   ;;  %s14864_s22 = smov 28  }
  0x2b   :  { %16929 = sst [smem:[#allocation86_spill]] %s15047_s14 }
  0x2c   :  { %s15072_s27 = sld [smem:[%s16874_s0 + %s14861_s28]]   ;;  %s14865_s28 = smov 29  }
  0x2d   :  { %s15082_s12 = sld [smem:[%s16874_s0 + %s14863_s15]]   ;;  %s14867_s15 = smov 31  }
  0x2e   :  { %16930 = sst [smem:[#allocation87_spill]] %s15057_s8 }
  0x2f   :  { %16931 = sst [smem:[#allocation88_spill]] %s15062_s17 }
  0x30   :  { %16932 = sst [smem:[#allocation89_spill]] %s15067_s13 }
  0x31   :  { %s15077_s8 = sld [smem:[%s16874_s0 + %s14862_s7]]   ;;  %s14866_s7 = smov 30  }
  0x32   :  { %s15087_s13 = sld [smem:[%s16874_s0 + %s14864_s22]]   ;;  %s14868_s22 = smov 32  }
  0x33   :  { %s15092_s30 = sld [smem:[%s16874_s0 + %s14865_s28]]   ;;  %s14869_s28 = smov 33  }
  0x34   :  { %s15097_s21 = sld [smem:[%s16874_s0 + %s14866_s7]]   ;;  %s14870_s7 = smov 34  }
  0x35   :  { %s15102_s3 = sld [smem:[%s16874_s0 + %s14867_s15]]   ;;  %s14871_s15 = smov 35  }
  0x36   :  { %s15107_s5 = sld [smem:[%s16874_s0 + %s14868_s22]]   ;;  %s14872_s22 = smov 36  }
  0x37   :  { %16933 = sst [smem:[#allocation90_spill]] %s15077_s8 }
  0x38   :  { %16934 = sst [smem:[#allocation91_spill]] %s15087_s13 }
  0x39   :  { %s15112_s29 = sld [smem:[%s16874_s0 + %s14869_s28]]   ;;  %s14873_s28 = smov 37  }
  0x3a   :  { %16935 = sst [smem:[#allocation92_spill]] %s15097_s21 }
  0x3b   :  { %16936 = sst [smem:[#allocation93_spill]] %s15102_s3 }
  0x3c   :  { %16937 = sst [smem:[#allocation94_spill]] %s15107_s5 }
  0x3d   :  { %s15117_s21 = sld [smem:[%s16874_s0 + %s14870_s7]]   ;;  %s14874_s7 = smov 38  }
  0x3e   :  { %s15122_s3 = sld [smem:[%s16874_s0 + %s14871_s15]]   ;;  %s14875_s15 = smov 39  }
  0x3f   :  { %s15127_s5 = sld [smem:[%s16874_s0 + %s14872_s22]]   ;;  %s14876_s22 = smov 40  }
  0x40   :  { %s15132_s13 = sld [smem:[%s16874_s0 + %s14873_s28]]   ;;  %s14877_s28 = smov 41  }
  0x41   :  { %s15152_s8 = sld [smem:[%s16874_s0 + %s14877_s28]]   ;;  %s14881_s28 = smov 45  }
  0x43   :  { %16938 = sst [smem:[#allocation95_spill]] %s15117_s21 }
  0x44   :  { %16939 = sst [smem:[#allocation96_spill]] %s15122_s3 }
  0x45   :  { %16940 = sst [smem:[#allocation97_spill]] %s15127_s5 }
  0x46   :  { %s15137_s21 = sld [smem:[%s16874_s0 + %s14874_s7]]   ;;  %s14878_s7 = smov 42  }
  0x47   :  { %s15142_s3 = sld [smem:[%s16874_s0 + %s14875_s15]]   ;;  %s14879_s15 = smov 43  }
  0x48   :  { %s15147_s5 = sld [smem:[%s16874_s0 + %s14876_s22]]   ;;  %s14880_s22 = smov 44  }
  0x49   :  { %16943 = sst [smem:[#allocation100_spill]] %s15152_s8 }
  0x4a   :  { %s15162_s17 = sld [smem:[%s16874_s0 + %s14879_s15]]   ;;  %s14883_s15 = smov 47  }
  0x4b   :  { %s15172_s8 = sld [smem:[%s16874_s0 + %s14881_s28]]   ;;  %s14885_s28 = smov 49  }
  0x4c   :  { %16941 = sst [smem:[#allocation98_spill]] %s15137_s21 }
  0x4d   :  { %s15157_s21 = sld [smem:[%s16874_s0 + %s14878_s7]]   ;;  %s14882_s7 = smov 46  }
  0x4e   :  { %16942 = sst [smem:[#allocation99_spill]] %s15147_s5 }
  0x4f   :  { %s15167_s5 = sld [smem:[%s16874_s0 + %s14880_s22]]   ;;  %s14884_s22 = smov 48  }
  0x50   :  { %s15182_s14 = sld [smem:[%s16874_s0 + %s14883_s15]]   ;;  %s14887_s15 = smov 51  }
  0x51   :  { %s15192_s4 = sld [smem:[%s16874_s0 + %s14885_s28]]   ;;  %s14889_s28 = smov 53  }
  0x52   :  { %s15202_s6 = sld [smem:[%s16874_s0 + %s14887_s15]]   ;;  %s14891_s15 = smov 55  }
  0x53   :  { %16944 = sst [smem:[#allocation101_spill]] %s15157_s21 }
  0x54   :  { %s15177_s21 = sld [smem:[%s16874_s0 + %s14882_s7]]   ;;  %s14886_s7 = smov 50  }
  0x55   :  { %16945 = sst [smem:[#allocation102_spill]] %s15167_s5 }
  0x56   :  { %s15187_s5 = sld [smem:[%s16874_s0 + %s14884_s22]]   ;;  %s14888_s22 = smov 52  }
  0x57   :  { %s15212_s19 = sld [smem:[%s16874_s0 + %s14889_s28]]   ;;  %s14893_s28 = smov 57  }
  0x58   :  { %16949 = sst [smem:[#allocation106_spill]] %s15202_s6 }
  0x59   :  { %s15222_s6 = sld [smem:[%s16874_s0 + %s14891_s15]]  }
  0x5a   :  { %16946 = sst [smem:[#allocation103_spill]] %s15177_s21 }
  0x5b   :  { %s15197_s21 = sld [smem:[%s16874_s0 + %s14886_s7]]   ;;  %s14890_s7 = smov 54  }
  0x5c   :  { %16947 = sst [smem:[#allocation104_spill]] %s15187_s5 }
  0x5d   :  { %s15207_s5 = sld [smem:[%s16874_s0 + %s14888_s22]]   ;;  %s14892_s22 = smov 56  }
  0x5e   :  { %16951 = sst [smem:[#allocation108_spill]] %s15212_s19 }
  0x5f   :  { %s15232_s19 = sld [smem:[%s16874_s0 + %s14893_s28]]  }
  0x61   :  { %16948 = sst [smem:[#allocation105_spill]] %s15197_s21 }
  0x62   :  { %s15217_s21 = sld [smem:[%s16874_s0 + %s14890_s7]]   ;;  %s14894_s7 = smov 58  }
  0x63   :  { %16950 = sst [smem:[#allocation107_spill]] %s15207_s5 }
  0x64   :  { %s15227_s5 = sld [smem:[%s16874_s0 + %s14892_s22]]  }
  0x68   :  { %16952 = sst [smem:[#allocation109_spill]] %s15217_s21 }
  0x69   :  { %s15237_s21 = sld [smem:[%s16874_s0 + %s14894_s7]]  }
  0x6a   :  { %122 = vsyncpa [#allocation3], 0 }
  0x6b   :  { %123 = vsyncpa [#allocation5], 0 }
  0x6c   :  { %124 = vsyncpa [#allocation8], 0 }
  0x6d   :  { %125 = vsyncpa [#allocation11], 0 }
  0x6e   :  { %126 = vsyncpa [#allocation14], 0 }
  0x6f   :  { %127 = vsyncpa [#allocation17], 0 }
  0x70   :  { %128 = vsyncpa [#allocation20], 0 }
  0x71   :  { %129 = vsyncpa [#allocation23], 0 }
  0x72   :  { %130 = vsyncpa [#allocation26], 0 }
  0x73   :  { %131 = vsyncpa [#allocation29], 0 }
  0x74   :  { %132 = vsyncpa [#allocation32], 0 }
  0x75   :  { %133 = vsyncpa [#allocation35], 0 }
  0x76   :  { %134 = vsyncpa [#allocation38], 0 }
  0x77   :  { %135 = vsyncpa [#allocation41], 0 }
  0x78   :  { %136 = vsyncpa [#allocation44], 0 }
  0x79   :  { %137 = vsyncpa [#allocation47], 0 }
  0x7a   :  { %138 = vsyncpa [#allocation50], 0  ;;  %s14895_s0 = smov [#allocation4]   ;;  %s14896_s16 = smov [#allocation7]  }
  0x7b   :  { %s176_s15 = sshll.u32 %s14895_s0, 4  ;;  %s204_s18 = sshll.u32 %s14896_s16, 4  ;;  %s177_s15 = int_to_ptr.vmem [resolvable:$true] %s176_s15  ;;  %s15239_s18 = int_to_ptr.vmem [resolvable:$true] %s204_s18 }
  0x7c   :  { %s14077_s22 = scalar_lea.hbm %s15002_s24, 32 }
  0x7d   :  { %p14078_p0 = scmp.ne.s32.totalorder %s15002_s24, %s14077_s22  ;;  %p14081_p1 = scmp.lt.u32.totalorder %s14077_s22, %s15002_s24 }
  0x7f   :  { %p14083_p2 = pnand %p14081_p1, %p14078_p0 }
  0x81   :  { %14086 = shalt.err (!%p14083_p2)
}
  0x82   :  { %s14087_s23 = scalar_lea.vmem %s177_s15, 32  ;;  %p14092_p4 = scmp.lt.s32.totalorder %s177_s15, %s177_s15 }
  0x83   :  { %p14088_p3 = scmp.ne.s32.totalorder %s177_s15, %s14087_s23  ;;  %p14093_p5 = scmp.lt.s32.totalorder %s14087_s23, %s14087_s23 }
  0x85   :  { %p14094_p6 = por %p14093_p5, %p14092_p4 }
  0x87   :  { %p14095_p7 = pnand %p14094_p6, %p14088_p3 }
  0x89   :  { %14098 = shalt.err (!%p14095_p7)
}
  0x8a   :  { %s14897_s26 = smov 16   ;;  %s14898_s28 = smov 1  }
  0x8b   :  { %182 = dma.hbm_to_vmem [thread:$0]  %s15002_s24, 32, %s177_s15, [#allocation5], %s14897_s26, %s14897_s26, %s14898_s28  }
  0x8c   :  { %s14099_s1 = scalar_lea.hbm %s15022_s20, 32 }
  0x8d   :  { %p14100_p8 = scmp.ne.s32.totalorder %s15022_s20, %s14099_s1  ;;  %p14103_p9 = scmp.lt.u32.totalorder %s14099_s1, %s15022_s20 }
  0x8f   :  { %p14105_p10 = pnand %p14103_p9, %p14100_p8 }
  0x91   :  { %14108 = shalt.err (!%p14105_p10)
}
  0x92   :  { %s14109_s2 = scalar_lea.vmem %s15239_s18, 32  ;;  %p14114_p12 = scmp.lt.s32.totalorder %s15239_s18, %s15239_s18 }
  0x93   :  { %p14110_p11 = scmp.ne.s32.totalorder %s15239_s18, %s14109_s2  ;;  %p14115_p13 = scmp.lt.s32.totalorder %s14109_s2, %s14109_s2 }
  0x95   :  { %p14116_p0 = por %p14115_p13, %p14114_p12 }
  0x97   :  { %p14117_p1 = pnand %p14116_p0, %p14110_p11 }
  0x99   :  { %14120 = shalt.err (!%p14117_p1)
}
  0x9a   :  { %210 = dma.hbm_to_vmem [thread:$0]  %s15022_s20, 32, %s15239_s18, [#allocation8], %s14897_s26, %s14897_s26, %s14898_s28  }
  0x9b   :  { %s14899_s24 = smov [#allocation10]   ;;  %s14900_s10 = smov [#allocation13]  }
  0x9c   :  { %s232_s7 = sshll.u32 %s14899_s24, 4  ;;  %s256_s11 = sshll.u32 %s14900_s10, 4  ;;  %s233_s7 = int_to_ptr.vmem [resolvable:$true] %s232_s7  ;;  %s15260_s11 = int_to_ptr.vmem [resolvable:$true] %s256_s11 }
  0x9d   :  { %s14121_s0 = scalar_lea.hbm %s15042_s25, 32 }
  0x9e   :  { %p14122_p2 = scmp.ne.s32.totalorder %s15042_s25, %s14121_s0  ;;  %p14125_p3 = scmp.lt.u32.totalorder %s14121_s0, %s15042_s25 }
  0xa0   :  { %p14127_p4 = pnand %p14125_p3, %p14122_p2 }
  0xa2   :  { %14130 = shalt.err (!%p14127_p4)
}
  0xa3   :  { %s14131_s15 = scalar_lea.vmem %s233_s7, 32  ;;  %p14136_p6 = scmp.lt.s32.totalorder %s233_s7, %s233_s7 }
  0xa4   :  { %p14132_p5 = scmp.ne.s32.totalorder %s233_s7, %s14131_s15  ;;  %p14137_p7 = scmp.lt.s32.totalorder %s14131_s15, %s14131_s15 }
  0xa6   :  { %p14138_p8 = por %p14137_p7, %p14136_p6 }
  0xa8   :  { %p14139_p9 = pnand %p14138_p8, %p14132_p5 }
  0xaa   :  { %14142 = shalt.err (!%p14139_p9)
}
  0xab   :  { %238 = dma.hbm_to_vmem [thread:$0]  %s15042_s25, 32, %s233_s7, [#allocation11], %s14897_s26, %s14897_s26, %s14898_s28  }
  0xac   :  { %s14143_s20 = scalar_lea.hbm %s15052_s9, 32 }
  0xad   :  { %p14144_p10 = scmp.ne.s32.totalorder %s15052_s9, %s14143_s20  ;;  %p14147_p11 = scmp.lt.u32.totalorder %s14143_s20, %s15052_s9 }
  0xaf   :  { %p14149_p12 = pnand %p14147_p11, %p14144_p10 }
  0xb1   :  { %14152 = shalt.err (!%p14149_p12)
}
  0xb2   :  { %s14153_s16 = scalar_lea.vmem %s15260_s11, 32  ;;  %p14158_p0 = scmp.lt.s32.totalorder %s15260_s11, %s15260_s11 }
  0xb3   :  { %p14154_p13 = scmp.ne.s32.totalorder %s15260_s11, %s14153_s16  ;;  %p14159_p1 = scmp.lt.s32.totalorder %s14153_s16, %s14153_s16 }
  0xb5   :  { %p14160_p2 = por %p14159_p1, %p14158_p0 }
  0xb7   :  { %p14161_p3 = pnand %p14160_p2, %p14154_p13 }
  0xb9   :  { %14164 = shalt.err (!%p14161_p3)
}
  0xba   :  { %262 = dma.hbm_to_vmem [thread:$0]  %s15052_s9, 32, %s15260_s11, [#allocation14], %s14897_s26, %s14897_s26, %s14898_s28  }
  0xbb   :  { %s14901_s25 = smov [#allocation16]   ;;  %s14902_s22 = smov [#allocation19]  }
  0xbc   :  { %s284_s18 = sshll.u32 %s14901_s25, 4  ;;  %s307_s23 = sshll.u32 %s14902_s22, 4  ;;  %s285_s18 = int_to_ptr.vmem [resolvable:$true] %s284_s18  ;;  %s308_s23 = int_to_ptr.vmem [resolvable:$true] %s307_s23 }
  0xbd   :  { %s14165_s1 = scalar_lea.hbm %s15072_s27, 32 }
  0xbe   :  { %p14166_p4 = scmp.ne.s32.totalorder %s15072_s27, %s14165_s1  ;;  %p14169_p5 = scmp.lt.u32.totalorder %s14165_s1, %s15072_s27 }
  0xc0   :  { %p14171_p6 = pnand %p14169_p5, %p14166_p4 }
  0xc2   :  { %14174 = shalt.err (!%p14171_p6)
}
  0xc3   :  { %s14175_s2 = scalar_lea.vmem %s285_s18, 32  ;;  %p14180_p8 = scmp.lt.s32.totalorder %s285_s18, %s285_s18 }
  0xc4   :  { %p14176_p7 = scmp.ne.s32.totalorder %s285_s18, %s14175_s2  ;;  %p14181_p9 = scmp.lt.s32.totalorder %s14175_s2, %s14175_s2 }
  0xc6   :  { %p14182_p10 = por %p14181_p9, %p14180_p8 }
  0xc8   :  { %p14183_p11 = pnand %p14182_p10, %p14176_p7 }
  0xca   :  { %14186 = shalt.err (!%p14183_p11)
}
  0xcb   :  { %290 = dma.hbm_to_vmem [thread:$0]  %s15072_s27, 32, %s285_s18, [#allocation17], %s14897_s26, %s14897_s26, %s14898_s28  }
  0xcc   :  { %s14187_s9 = scalar_lea.hbm %s15082_s12, 16 }
  0xcd   :  { %p14188_p12 = scmp.ne.s32.totalorder %s15082_s12, %s14187_s9  ;;  %p14191_p13 = scmp.lt.u32.totalorder %s14187_s9, %s15082_s12 }
  0xcf   :  { %p14193_p0 = pnand %p14191_p13, %p14188_p12 }
  0xd1   :  { %14196 = shalt.err (!%p14193_p0)
}
  0xd2   :  { %s14197_s24 = scalar_lea.vmem %s308_s23, 16  ;;  %s14201_s7 = scalar_lea.vmem %s308_s23, 32 }
  0xd3   :  { %p14198_p1 = scmp.ne.s32.totalorder %s308_s23, %s14197_s24  ;;  %p14202_p2 = scmp.lt.s32.totalorder %s308_s23, %s308_s23 }
  0xd4   :  { %p14203_p3 = scmp.lt.s32.totalorder %s14201_s7, %s14197_s24 }
  0xd6   :  { %p14204_p4 = por %p14203_p3, %p14202_p2 }
  0xd8   :  { %p14205_p5 = pnand %p14204_p4, %p14198_p1 }
  0xda   :  { %14208 = shalt.err (!%p14205_p5)
}
  0xdb   :  { %310 = dma.hbm_to_vmem [thread:$0]  %s15082_s12, 16, %s308_s23, [#allocation20]  }
  0xdc   :  { %s14903_s10 = smov [#allocation22]   ;;  %s14904_s11 = smov [#allocation25]  }
  0xdd   :  { %s328_s27 = sshll.u32 %s14903_s10, 4  ;;  %s356_s0 = sshll.u32 %s14904_s11, 4  ;;  %s329_s27 = int_to_ptr.vmem [resolvable:$true] %s328_s27  ;;  %s15292_s0 = int_to_ptr.vmem [resolvable:$true] %s356_s0 }
  0xde   :  { %s14209_s15 = scalar_lea.hbm %s15092_s30, 32 }
  0xdf   :  { %p14210_p6 = scmp.ne.s32.totalorder %s15092_s30, %s14209_s15  ;;  %p14213_p7 = scmp.lt.u32.totalorder %s14209_s15, %s15092_s30 }
  0xe1   :  { %p14215_p8 = pnand %p14213_p7, %p14210_p6 }
  0xe3   :  { %14218 = shalt.err (!%p14215_p8)
}
  0xe4   :  { %s14219_s20 = scalar_lea.vmem %s329_s27, 32  ;;  %p14224_p10 = scmp.lt.s32.totalorder %s329_s27, %s329_s27 }
  0xe5   :  { %p14220_p9 = scmp.ne.s32.totalorder %s329_s27, %s14219_s20  ;;  %p14225_p11 = scmp.lt.s32.totalorder %s14219_s20, %s14219_s20 }
  0xe7   :  { %p14226_p12 = por %p14225_p11, %p14224_p10 }
  0xe9   :  { %p14227_p13 = pnand %p14226_p12, %p14220_p9 }
  0xeb   :  { %14230 = shalt.err (!%p14227_p13)
}
  0xec   :  { %334 = dma.hbm_to_vmem [thread:$0]  %s15092_s30, 32, %s329_s27, [#allocation23], %s14897_s26, %s14897_s26, %s14898_s28  }
  0xed   :  { %s14231_s12 = scalar_lea.hbm %s15112_s29, 32 }
  0xee   :  { %p14232_p0 = scmp.ne.s32.totalorder %s15112_s29, %s14231_s12  ;;  %p14235_p1 = scmp.lt.u32.totalorder %s14231_s12, %s15112_s29 }
  0xf0   :  { %p14237_p2 = pnand %p14235_p1, %p14232_p0 }
  0xf2   :  { %14240 = shalt.err (!%p14237_p2)
}
  0xf3   :  { %s14241_s16 = scalar_lea.vmem %s15292_s0, 32  ;;  %p14246_p4 = scmp.lt.s32.totalorder %s15292_s0, %s15292_s0 }
  0xf4   :  { %p14242_p3 = scmp.ne.s32.totalorder %s15292_s0, %s14241_s16  ;;  %p14247_p5 = scmp.lt.s32.totalorder %s14241_s16, %s14241_s16 }
  0xf6   :  { %p14248_p6 = por %p14247_p5, %p14246_p4 }
  0xf8   :  { %p14249_p7 = pnand %p14248_p6, %p14242_p3 }
  0xfa   :  { %14252 = shalt.err (!%p14249_p7)
}
  0xfb   :  { %362 = dma.hbm_to_vmem [thread:$0]  %s15112_s29, 32, %s15292_s0, [#allocation26], %s14897_s26, %s14897_s26, %s14898_s28  }
  0xfc   :  { %s14905_s30 = smov [#allocation28]   ;;  %s14906_s18 = smov [#allocation31]  }
  0xfd   :  { %s384_s25 = sshll.u32 %s14905_s30, 4  ;;  %s408_s22 = sshll.u32 %s14906_s18, 4  ;;  %s385_s25 = int_to_ptr.vmem [resolvable:$true] %s384_s25  ;;  %s15313_s22 = int_to_ptr.vmem [resolvable:$true] %s408_s22 }
  0xfe   :  { %s14253_s23 = scalar_lea.hbm %s15132_s13, 32 }
  0xff   :  { %p14254_p8 = scmp.ne.s32.totalorder %s15132_s13, %s14253_s23  ;;  %p14257_p9 = scmp.lt.u32.totalorder %s14253_s23, %s15132_s13 }
 0x101   :  { %p14259_p10 = pnand %p14257_p9, %p14254_p8 }
 0x103   :  { %14262 = shalt.err (!%p14259_p10)
}
 0x104   :  { %s14263_s1 = scalar_lea.vmem %s385_s25, 32  ;;  %p14268_p12 = scmp.lt.s32.totalorder %s385_s25, %s385_s25 }
 0x105   :  { %p14264_p11 = scmp.ne.s32.totalorder %s385_s25, %s14263_s1  ;;  %p14269_p13 = scmp.lt.s32.totalorder %s14263_s1, %s14263_s1 }
 0x107   :  { %p14270_p0 = por %p14269_p13, %p14268_p12 }
 0x109   :  { %p14271_p1 = pnand %p14270_p0, %p14264_p11 }
 0x10b   :  { %14274 = shalt.err (!%p14271_p1)
}
 0x10c   :  { %390 = dma.hbm_to_vmem [thread:$0]  %s15132_s13, 32, %s385_s25, [#allocation29], %s14897_s26, %s14897_s26, %s14898_s28  }
 0x10d   :  { %s14275_s29 = scalar_lea.hbm %s15142_s3, 32 }
 0x10e   :  { %p14276_p2 = scmp.ne.s32.totalorder %s15142_s3, %s14275_s29  ;;  %p14279_p3 = scmp.lt.u32.totalorder %s14275_s29, %s15142_s3 }
 0x110   :  { %p14281_p4 = pnand %p14279_p3, %p14276_p2 }
 0x112   :  { %14284 = shalt.err (!%p14281_p4)
}
 0x113   :  { %s14285_s2 = scalar_lea.vmem %s15313_s22, 32  ;;  %p14290_p6 = scmp.lt.s32.totalorder %s15313_s22, %s15313_s22 }
 0x114   :  { %p14286_p5 = scmp.ne.s32.totalorder %s15313_s22, %s14285_s2  ;;  %p14291_p7 = scmp.lt.s32.totalorder %s14285_s2, %s14285_s2 }
 0x116   :  { %p14292_p8 = por %p14291_p7, %p14290_p6 }
 0x118   :  { %p14293_p9 = pnand %p14292_p8, %p14286_p5 }
 0x11a   :  { %14296 = shalt.err (!%p14293_p9)
}
 0x11b   :  { %414 = dma.hbm_to_vmem [thread:$0]  %s15142_s3, 32, %s15313_s22, [#allocation32], %s14897_s26, %s14897_s26, %s14898_s28  }
 0x11c   :  { %s14907_s13 = smov [#allocation34]   ;;  %s14908_s24 = smov [#allocation37]  }
 0x11d   :  { %s436_s9 = sshll.u32 %s14907_s13, 4  ;;  %s460_s7 = sshll.u32 %s14908_s24, 4  ;;  %s437_s9 = int_to_ptr.vmem [resolvable:$true] %s436_s9  ;;  %s15334_s7 = int_to_ptr.vmem [resolvable:$true] %s460_s7 }
 0x11e   :  { %s14297_s10 = scalar_lea.hbm %s15162_s17, 32 }
 0x11f   :  { %p14298_p10 = scmp.ne.s32.totalorder %s15162_s17, %s14297_s10  ;;  %p14301_p11 = scmp.lt.u32.totalorder %s14297_s10, %s15162_s17 }
 0x121   :  { %p14303_p12 = pnand %p14301_p11, %p14298_p10 }
 0x123   :  { %14306 = shalt.err (!%p14303_p12)
}
 0x124   :  { %s14307_s27 = scalar_lea.vmem %s437_s9, 32  ;;  %p14312_p0 = scmp.lt.s32.totalorder %s437_s9, %s437_s9 }
 0x125   :  { %p14308_p13 = scmp.ne.s32.totalorder %s437_s9, %s14307_s27  ;;  %p14313_p1 = scmp.lt.s32.totalorder %s14307_s27, %s14307_s27 }
 0x127   :  { %p14314_p2 = por %p14313_p1, %p14312_p0 }
 0x129   :  { %p14315_p3 = pnand %p14314_p2, %p14308_p13 }
 0x12b   :  { %14318 = shalt.err (!%p14315_p3)
}
 0x12c   :  { %442 = dma.hbm_to_vmem [thread:$0]  %s15162_s17, 32, %s437_s9, [#allocation35], %s14897_s26, %s14897_s26, %s14898_s28  }
 0x12d   :  { %s14319_s3 = scalar_lea.hbm %s15172_s8, 32 }
 0x12e   :  { %p14320_p4 = scmp.ne.s32.totalorder %s15172_s8, %s14319_s3  ;;  %p14323_p5 = scmp.lt.u32.totalorder %s14319_s3, %s15172_s8 }
 0x130   :  { %p14325_p6 = pnand %p14323_p5, %p14320_p4 }
 0x132   :  { %14328 = shalt.err (!%p14325_p6)
}
 0x133   :  { %s14329_s11 = scalar_lea.vmem %s15334_s7, 32  ;;  %p14334_p8 = scmp.lt.s32.totalorder %s15334_s7, %s15334_s7 }
 0x134   :  { %p14330_p7 = scmp.ne.s32.totalorder %s15334_s7, %s14329_s11  ;;  %p14335_p9 = scmp.lt.s32.totalorder %s14329_s11, %s14329_s11 }
 0x136   :  { %p14336_p10 = por %p14335_p9, %p14334_p8 }
 0x138   :  { %p14337_p11 = pnand %p14336_p10, %p14330_p7 }
 0x13a   :  { %14340 = shalt.err (!%p14337_p11)
}
 0x13b   :  { %466 = dma.hbm_to_vmem [thread:$0]  %s15172_s8, 32, %s15334_s7, [#allocation38], %s14897_s26, %s14897_s26, %s14898_s28  }
 0x13c   :  { %s14909_s17 = smov [#allocation40]   ;;  %s14910_s15 = smov [#allocation43]  }
 0x13d   :  { %s484_s0 = sshll.u32 %s14909_s17, 4  ;;  %s508_s20 = sshll.u32 %s14910_s15, 4  ;;  %s485_s0 = int_to_ptr.vmem [resolvable:$true] %s484_s0  ;;  %s15355_s20 = int_to_ptr.vmem [resolvable:$true] %s508_s20 }
 0x13e   :  { %s14341_s12 = scalar_lea.hbm %s15182_s14, 32 }
 0x13f   :  { %p14342_p12 = scmp.ne.s32.totalorder %s15182_s14, %s14341_s12  ;;  %p14345_p13 = scmp.lt.u32.totalorder %s14341_s12, %s15182_s14 }
 0x141   :  { %p14347_p0 = pnand %p14345_p13, %p14342_p12 }
 0x143   :  { %14350 = shalt.err (!%p14347_p0)
}
 0x144   :  { %s14351_s16 = scalar_lea.vmem %s485_s0, 32  ;;  %p14356_p2 = scmp.lt.s32.totalorder %s485_s0, %s485_s0 }
 0x145   :  { %p14352_p1 = scmp.ne.s32.totalorder %s485_s0, %s14351_s16  ;;  %p14357_p3 = scmp.lt.s32.totalorder %s14351_s16, %s14351_s16 }
 0x147   :  { %p14358_p4 = por %p14357_p3, %p14356_p2 }
 0x149   :  { %p14359_p5 = pnand %p14358_p4, %p14352_p1 }
 0x14b   :  { %14362 = shalt.err (!%p14359_p5)
}
 0x14c   :  { %490 = dma.hbm_to_vmem [thread:$0]  %s15182_s14, 32, %s485_s0, [#allocation41], %s14897_s26, %s14897_s26, %s14898_s28  }
 0x14d   :  { %s14363_s8 = scalar_lea.hbm %s15192_s4, 32 }
 0x14e   :  { %p14364_p6 = scmp.ne.s32.totalorder %s15192_s4, %s14363_s8  ;;  %p14367_p7 = scmp.lt.u32.totalorder %s14363_s8, %s15192_s4 }
 0x150   :  { %p14369_p8 = pnand %p14367_p7, %p14364_p6 }
 0x152   :  { %14372 = shalt.err (!%p14369_p8)
}
 0x153   :  { %s14373_s30 = scalar_lea.vmem %s15355_s20, 32  ;;  %p14378_p10 = scmp.lt.s32.totalorder %s15355_s20, %s15355_s20 }
 0x154   :  { %p14374_p9 = scmp.ne.s32.totalorder %s15355_s20, %s14373_s30  ;;  %p14379_p11 = scmp.lt.s32.totalorder %s14373_s30, %s14373_s30 }
 0x156   :  { %p14380_p12 = por %p14379_p11, %p14378_p10 }
 0x158   :  { %p14381_p13 = pnand %p14380_p12, %p14374_p9 }
 0x15a   :  { %14384 = shalt.err (!%p14381_p13)
}
 0x15b   :  { %s16953_s14 = sld [smem:[#allocation106_spill]]  ;;  %s14911_s25 = smov [#allocation46]  }
 0x15c   :  { %514 = dma.hbm_to_vmem [thread:$0]  %s15192_s4, 32, %s15355_s20, [#allocation44], %s14897_s26, %s14897_s26, %s14898_s28  }
 0x15d   :  { %s532_s18 = sshll.u32 %s14911_s25, 4  ;;  %s14912_s22 = smov [#allocation49]   ;;  %s533_s18 = int_to_ptr.vmem [resolvable:$true] %s532_s18 }
 0x15e   :  { %s559_s23 = sshll.u32 %s14912_s22, 4  ;;  %s560_s23 = int_to_ptr.vmem [resolvable:$true] %s559_s23 }
 0x161   :  { %s14385_s1 = scalar_lea.hbm %s16953_s14, 32 }
 0x162   :  { %p14386_p0 = scmp.ne.s32.totalorder %s16953_s14, %s14385_s1  ;;  %p14389_p1 = scmp.lt.u32.totalorder %s14385_s1, %s16953_s14 }
 0x164   :  { %p14391_p2 = pnand %p14389_p1, %p14386_p0 }
 0x166   :  { %14394 = shalt.err (!%p14391_p2)
}
 0x167   :  { %s14395_s29 = scalar_lea.vmem %s533_s18, 32  ;;  %p14400_p4 = scmp.lt.s32.totalorder %s533_s18, %s533_s18 }
 0x168   :  { %p14396_p3 = scmp.ne.s32.totalorder %s533_s18, %s14395_s29  ;;  %p14401_p5 = scmp.lt.s32.totalorder %s14395_s29, %s14395_s29 }
 0x16a   :  { %p14402_p6 = por %p14401_p5, %p14400_p4 }
 0x16c   :  { %p14403_p7 = pnand %p14402_p6, %p14396_p3 }
 0x16e   :  { %14406 = shalt.err (!%p14403_p7)
}
 0x16f   :  { %s16954_s4 = sld [smem:[#allocation109_spill]] }
 0x170   :  { %538 = dma.hbm_to_vmem [thread:$0]  %s16953_s14, 32, %s533_s18, [#allocation47], %s14897_s26, %s14897_s26, %s14898_s28  }
 0x175   :  { %s14407_s2 = scalar_lea.hbm %s16954_s4, 16 }
 0x176   :  { %p14408_p8 = scmp.ne.s32.totalorder %s16954_s4, %s14407_s2  ;;  %p14411_p9 = scmp.lt.u32.totalorder %s14407_s2, %s16954_s4 }
 0x178   :  { %p14413_p10 = pnand %p14411_p9, %p14408_p8 }
 0x17a   :  { %14416 = shalt.err (!%p14413_p10)
}
 0x17b   :  { %s14417_s13 = scalar_lea.vmem %s560_s23, 16  ;;  %s14421_s9 = scalar_lea.vmem %s560_s23, 32 }
 0x17c   :  { %p14418_p11 = scmp.ne.s32.totalorder %s560_s23, %s14417_s13  ;;  %p14422_p12 = scmp.lt.s32.totalorder %s560_s23, %s560_s23 }
 0x17d   :  { %p14423_p13 = scmp.lt.s32.totalorder %s14421_s9, %s14417_s13 }
 0x17f   :  { %p14424_p0 = por %p14423_p13, %p14422_p12 }
 0x181   :  { %p14425_p1 = pnand %p14424_p0, %p14418_p11 }
 0x183   :  { %14428 = shalt.err (!%p14425_p1)
}
 0x184   :  { %s16955_s24 = sld [smem:[#allocation79_spill]]  ;;  %s14913_s7 = smov [#allocation2]  }
 0x185   :  { %562 = dma.hbm_to_vmem [thread:$0]  %s16954_s4, 16, %s560_s23, [#allocation50]  }
 0x186   :  { %s164_s10 = sshll.u32 %s14913_s7, 4  ;;  %s14914_s27 = smov [#allocation6]   ;;  %s165_s10 = int_to_ptr.vmem [resolvable:$true] %s164_s10 }
 0x187   :  { %s190_s3 = sshll.u32 %s14914_s27, 4  ;;  %s15387_s3 = int_to_ptr.vmem [resolvable:$true] %s190_s3 }
 0x18a   :  { %s14429_s11 = scalar_lea.hbm %s16955_s24, 32 }
 0x18b   :  { %p14430_p2 = scmp.ne.s32.totalorder %s16955_s24, %s14429_s11  ;;  %p14433_p3 = scmp.lt.u32.totalorder %s14429_s11, %s16955_s24 }
 0x18d   :  { %p14435_p4 = pnand %p14433_p3, %p14430_p2 }
 0x18f   :  { %14438 = shalt.err (!%p14435_p4)
}
 0x190   :  { %s14439_s17 = scalar_lea.vmem %s165_s10, 32  ;;  %p14444_p6 = scmp.lt.s32.totalorder %s165_s10, %s165_s10 }
 0x191   :  { %p14440_p5 = scmp.ne.s32.totalorder %s165_s10, %s14439_s17  ;;  %p14445_p7 = scmp.lt.s32.totalorder %s14439_s17, %s14439_s17 }
 0x193   :  { %p14446_p8 = por %p14445_p7, %p14444_p6 }
 0x195   :  { %p14447_p9 = pnand %p14446_p8, %p14440_p5 }
 0x197   :  { %14450 = shalt.err (!%p14447_p9)
}
 0x198   :  { %s16956_s0 = sld [smem:[#allocation81_spill]] }
 0x199   :  { %170 = dma.hbm_to_vmem [thread:$0]  %s16955_s24, 32, %s165_s10, [#allocation3], %s14897_s26, %s14897_s26, %s14898_s28  }
 0x19e   :  { %s14451_s15 = scalar_lea.hbm %s16956_s0, 32 }
 0x19f   :  { %p14452_p10 = scmp.ne.s32.totalorder %s16956_s0, %s14451_s15  ;;  %p14455_p11 = scmp.lt.u32.totalorder %s14451_s15, %s16956_s0 }
 0x1a1   :  { %p14457_p12 = pnand %p14455_p11, %p14452_p10 }
 0x1a3   :  { %14460 = shalt.err (!%p14457_p12)
}
 0x1a4   :  { %s14461_s20 = scalar_lea.vmem %s15387_s3, 32  ;;  %p14466_p0 = scmp.lt.s32.totalorder %s15387_s3, %s15387_s3 }
 0x1a5   :  { %p14462_p13 = scmp.ne.s32.totalorder %s15387_s3, %s14461_s20  ;;  %p14467_p1 = scmp.lt.s32.totalorder %s14461_s20, %s14461_s20 }
 0x1a7   :  { %p14468_p2 = por %p14467_p1, %p14466_p0 }
 0x1a9   :  { %p14469_p3 = pnand %p14468_p2, %p14462_p13 }
 0x1ab   :  { %14472 = shalt.err (!%p14469_p3)
}
 0x1ac   :  { %s16957_s12 = sld [smem:[#allocation84_spill]]  ;;  %s14915_s16 = smov [#allocation9]  }
 0x1ad   :  { %196 = dma.hbm_to_vmem [thread:$0]  %s16956_s0, 32, %s15387_s3, [#allocation5], %s14897_s26, %s14897_s26, %s14898_s28  }
 0x1ae   :  { %s218_s8 = sshll.u32 %s14915_s16, 4  ;;  %s14916_s30 = smov [#allocation12]   ;;  %s219_s8 = int_to_ptr.vmem [resolvable:$true] %s218_s8 }
 0x1af   :  { %s244_s14 = sshll.u32 %s14916_s30, 4  ;;  %s15408_s14 = int_to_ptr.vmem [resolvable:$true] %s244_s14 }
 0x1b2   :  { %s14473_s25 = scalar_lea.hbm %s16957_s12, 32 }
 0x1b3   :  { %p14474_p4 = scmp.ne.s32.totalorder %s16957_s12, %s14473_s25  ;;  %p14477_p5 = scmp.lt.u32.totalorder %s14473_s25, %s16957_s12 }
 0x1b5   :  { %p14479_p6 = pnand %p14477_p5, %p14474_p4 }
 0x1b7   :  { %14482 = shalt.err (!%p14479_p6)
}
 0x1b8   :  { %s14483_s18 = scalar_lea.vmem %s219_s8, 32  ;;  %p14488_p8 = scmp.lt.s32.totalorder %s219_s8, %s219_s8 }
 0x1b9   :  { %p14484_p7 = scmp.ne.s32.totalorder %s219_s8, %s14483_s18  ;;  %p14489_p9 = scmp.lt.s32.totalorder %s14483_s18, %s14483_s18 }
 0x1bb   :  { %p14490_p10 = por %p14489_p9, %p14488_p8 }
 0x1bd   :  { %p14491_p11 = pnand %p14490_p10, %p14484_p7 }
 0x1bf   :  { %14494 = shalt.err (!%p14491_p11)
}
 0x1c0   :  { %s16958_s22 = sld [smem:[#allocation86_spill]] }
 0x1c1   :  { %224 = dma.hbm_to_vmem [thread:$0]  %s16957_s12, 32, %s219_s8, [#allocation8], %s14897_s26, %s14897_s26, %s14898_s28  }
 0x1c6   :  { %s14495_s23 = scalar_lea.hbm %s16958_s22, 32 }
 0x1c7   :  { %p14496_p12 = scmp.ne.s32.totalorder %s16958_s22, %s14495_s23  ;;  %p14499_p13 = scmp.lt.u32.totalorder %s14495_s23, %s16958_s22 }
 0x1c9   :  { %p14501_p0 = pnand %p14499_p13, %p14496_p12 }
 0x1cb   :  { %14504 = shalt.err (!%p14501_p0)
}
 0x1cc   :  { %s14505_s1 = scalar_lea.vmem %s15408_s14, 32  ;;  %p14510_p2 = scmp.lt.s32.totalorder %s15408_s14, %s15408_s14 }
 0x1cd   :  { %p14506_p1 = scmp.ne.s32.totalorder %s15408_s14, %s14505_s1  ;;  %p14511_p3 = scmp.lt.s32.totalorder %s14505_s1, %s14505_s1 }
 0x1cf   :  { %p14512_p4 = por %p14511_p3, %p14510_p2 }
 0x1d1   :  { %p14513_p5 = pnand %p14512_p4, %p14506_p1 }
 0x1d3   :  { %14516 = shalt.err (!%p14513_p5)
}
 0x1d4   :  { %s16959_s29 = sld [smem:[#allocation88_spill]]  ;;  %s14917_s4 = smov [#allocation15]  }
 0x1d5   :  { %250 = dma.hbm_to_vmem [thread:$0]  %s16958_s22, 32, %s15408_s14, [#allocation11], %s14897_s26, %s14897_s26, %s14898_s28  }
 0x1d6   :  { %s270_s2 = sshll.u32 %s14917_s4, 4  ;;  %s14918_s13 = smov [#allocation18]   ;;  %s271_s2 = int_to_ptr.vmem [resolvable:$true] %s270_s2 }
 0x1d7   :  { %s297_s9 = sshll.u32 %s14918_s13, 4  ;;  %s298_s9 = int_to_ptr.vmem [resolvable:$true] %s297_s9 }
 0x1da   :  { %s14517_s24 = scalar_lea.hbm %s16959_s29, 32 }
 0x1db   :  { %p14518_p6 = scmp.ne.s32.totalorder %s16959_s29, %s14517_s24  ;;  %p14521_p7 = scmp.lt.u32.totalorder %s14517_s24, %s16959_s29 }
 0x1dd   :  { %p14523_p8 = pnand %p14521_p7, %p14518_p6 }
 0x1df   :  { %14526 = shalt.err (!%p14523_p8)
}
 0x1e0   :  { %s14527_s7 = scalar_lea.vmem %s271_s2, 32  ;;  %p14532_p10 = scmp.lt.s32.totalorder %s271_s2, %s271_s2 }
 0x1e1   :  { %p14528_p9 = scmp.ne.s32.totalorder %s271_s2, %s14527_s7  ;;  %p14533_p11 = scmp.lt.s32.totalorder %s14527_s7, %s14527_s7 }
 0x1e3   :  { %p14534_p12 = por %p14533_p11, %p14532_p10 }
 0x1e5   :  { %p14535_p13 = pnand %p14534_p12, %p14528_p9 }
 0x1e7   :  { %14538 = shalt.err (!%p14535_p13)
}
 0x1e8   :  { %s16960_s10 = sld [smem:[#allocation90_spill]] }
 0x1e9   :  { %276 = dma.hbm_to_vmem [thread:$0]  %s16959_s29, 32, %s271_s2, [#allocation14], %s14897_s26, %s14897_s26, %s14898_s28  }
 0x1ee   :  { %s14539_s27 = scalar_lea.hbm %s16960_s10, 16 }
 0x1ef   :  { %p14540_p0 = scmp.ne.s32.totalorder %s16960_s10, %s14539_s27  ;;  %p14543_p1 = scmp.lt.u32.totalorder %s14539_s27, %s16960_s10 }
 0x1f1   :  { %p14545_p2 = pnand %p14543_p1, %p14540_p0 }
 0x1f3   :  { %14548 = shalt.err (!%p14545_p2)
}
 0x1f4   :  { %s14549_s3 = scalar_lea.vmem %s298_s9, 16  ;;  %s14553_s11 = scalar_lea.vmem %s298_s9, 32 }
 0x1f5   :  { %p14550_p3 = scmp.ne.s32.totalorder %s298_s9, %s14549_s3  ;;  %p14554_p4 = scmp.lt.s32.totalorder %s298_s9, %s298_s9 }
 0x1f6   :  { %p14555_p5 = scmp.lt.s32.totalorder %s14553_s11, %s14549_s3 }
 0x1f8   :  { %p14556_p6 = por %p14555_p5, %p14554_p4 }
 0x1fa   :  { %p14557_p7 = pnand %p14556_p6, %p14550_p3 }
 0x1fc   :  { %14560 = shalt.err (!%p14557_p7)
}
 0x1fd   :  { %s16961_s17 = sld [smem:[#allocation91_spill]]  ;;  %s14919_s0 = smov [#allocation21]  }
 0x1fe   :  { %300 = dma.hbm_to_vmem [thread:$0]  %s16960_s10, 16, %s298_s9, [#allocation17]  }
 0x1ff   :  { %s316_s15 = sshll.u32 %s14919_s0, 4  ;;  %s14920_s20 = smov [#allocation24]   ;;  %s317_s15 = int_to_ptr.vmem [resolvable:$true] %s316_s15 }
 0x200   :  { %s342_s12 = sshll.u32 %s14920_s20, 4  ;;  %s15440_s12 = int_to_ptr.vmem [resolvable:$true] %s342_s12 }
 0x203   :  { %s14561_s16 = scalar_lea.hbm %s16961_s17, 32 }
 0x204   :  { %p14562_p8 = scmp.ne.s32.totalorder %s16961_s17, %s14561_s16  ;;  %p14565_p9 = scmp.lt.u32.totalorder %s14561_s16, %s16961_s17 }
 0x206   :  { %p14567_p10 = pnand %p14565_p9, %p14562_p8 }
 0x208   :  { %14570 = shalt.err (!%p14567_p10)
}
 0x209   :  { %s14571_s8 = scalar_lea.vmem %s317_s15, 32  ;;  %p14576_p12 = scmp.lt.s32.totalorder %s317_s15, %s317_s15 }
 0x20a   :  { %p14572_p11 = scmp.ne.s32.totalorder %s317_s15, %s14571_s8  ;;  %p14577_p13 = scmp.lt.s32.totalorder %s14571_s8, %s14571_s8 }
 0x20c   :  { %p14578_p0 = por %p14577_p13, %p14576_p12 }
 0x20e   :  { %p14579_p1 = pnand %p14578_p0, %p14572_p11 }
 0x210   :  { %14582 = shalt.err (!%p14579_p1)
}
 0x211   :  { %s16962_s30 = sld [smem:[#allocation93_spill]] }
 0x212   :  { %322 = dma.hbm_to_vmem [thread:$0]  %s16961_s17, 32, %s317_s15, [#allocation20], %s14897_s26, %s14897_s26, %s14898_s28  }
 0x217   :  { %s14583_s14 = scalar_lea.hbm %s16962_s30, 32 }
 0x218   :  { %p14584_p2 = scmp.ne.s32.totalorder %s16962_s30, %s14583_s14  ;;  %p14587_p3 = scmp.lt.u32.totalorder %s14583_s14, %s16962_s30 }
 0x21a   :  { %p14589_p4 = pnand %p14587_p3, %p14584_p2 }
 0x21c   :  { %14592 = shalt.err (!%p14589_p4)
}
 0x21d   :  { %s14593_s25 = scalar_lea.vmem %s15440_s12, 32  ;;  %p14598_p6 = scmp.lt.s32.totalorder %s15440_s12, %s15440_s12 }
 0x21e   :  { %p14594_p5 = scmp.ne.s32.totalorder %s15440_s12, %s14593_s25  ;;  %p14599_p7 = scmp.lt.s32.totalorder %s14593_s25, %s14593_s25 }
 0x220   :  { %p14600_p8 = por %p14599_p7, %p14598_p6 }
 0x222   :  { %p14601_p9 = pnand %p14600_p8, %p14594_p5 }
 0x224   :  { %14604 = shalt.err (!%p14601_p9)
}
 0x225   :  { %s16963_s18 = sld [smem:[#allocation96_spill]]  ;;  %s14921_s22 = smov [#allocation27]  }
 0x226   :  { %348 = dma.hbm_to_vmem [thread:$0]  %s16962_s30, 32, %s15440_s12, [#allocation23], %s14897_s26, %s14897_s26, %s14898_s28  }
 0x227   :  { %s370_s23 = sshll.u32 %s14921_s22, 4  ;;  %s14922_s1 = smov [#allocation30]   ;;  %s371_s23 = int_to_ptr.vmem [resolvable:$true] %s370_s23 }
 0x228   :  { %s396_s29 = sshll.u32 %s14922_s1, 4  ;;  %s15461_s29 = int_to_ptr.vmem [resolvable:$true] %s396_s29 }
 0x22b   :  { %s14605_s4 = scalar_lea.hbm %s16963_s18, 32 }
 0x22c   :  { %p14606_p10 = scmp.ne.s32.totalorder %s16963_s18, %s14605_s4  ;;  %p14609_p11 = scmp.lt.u32.totalorder %s14605_s4, %s16963_s18 }
 0x22e   :  { %p14611_p12 = pnand %p14609_p11, %p14606_p10 }
 0x230   :  { %14614 = shalt.err (!%p14611_p12)
}
 0x231   :  { %s14615_s2 = scalar_lea.vmem %s371_s23, 32  ;;  %p14620_p0 = scmp.lt.s32.totalorder %s371_s23, %s371_s23 }
 0x232   :  { %p14616_p13 = scmp.ne.s32.totalorder %s371_s23, %s14615_s2  ;;  %p14621_p1 = scmp.lt.s32.totalorder %s14615_s2, %s14615_s2 }
 0x234   :  { %p14622_p2 = por %p14621_p1, %p14620_p0 }
 0x236   :  { %p14623_p3 = pnand %p14622_p2, %p14616_p13 }
 0x238   :  { %14626 = shalt.err (!%p14623_p3)
}
 0x239   :  { %s16964_s13 = sld [smem:[#allocation98_spill]] }
 0x23a   :  { %376 = dma.hbm_to_vmem [thread:$0]  %s16963_s18, 32, %s371_s23, [#allocation26], %s14897_s26, %s14897_s26, %s14898_s28  }
 0x23f   :  { %s14627_s9 = scalar_lea.hbm %s16964_s13, 32 }
 0x240   :  { %p14628_p4 = scmp.ne.s32.totalorder %s16964_s13, %s14627_s9  ;;  %p14631_p5 = scmp.lt.u32.totalorder %s14627_s9, %s16964_s13 }
 0x242   :  { %p14633_p6 = pnand %p14631_p5, %p14628_p4 }
 0x244   :  { %14636 = shalt.err (!%p14633_p6)
}
 0x245   :  { %s14637_s24 = scalar_lea.vmem %s15461_s29, 32  ;;  %p14642_p8 = scmp.lt.s32.totalorder %s15461_s29, %s15461_s29 }
 0x246   :  { %p14638_p7 = scmp.ne.s32.totalorder %s15461_s29, %s14637_s24  ;;  %p14643_p9 = scmp.lt.s32.totalorder %s14637_s24, %s14637_s24 }
 0x248   :  { %p14644_p10 = por %p14643_p9, %p14642_p8 }
 0x24a   :  { %p14645_p11 = pnand %p14644_p10, %p14638_p7 }
 0x24c   :  { %14648 = shalt.err (!%p14645_p11)
}
 0x24d   :  { %s16965_s7 = sld [smem:[#allocation100_spill]]  ;;  %s14923_s10 = smov [#allocation33]  }
 0x24e   :  { %402 = dma.hbm_to_vmem [thread:$0]  %s16964_s13, 32, %s15461_s29, [#allocation29], %s14897_s26, %s14897_s26, %s14898_s28  }
 0x24f   :  { %s422_s27 = sshll.u32 %s14923_s10, 4  ;;  %s14924_s3 = smov [#allocation36]   ;;  %s423_s27 = int_to_ptr.vmem [resolvable:$true] %s422_s27 }
 0x250   :  { %s448_s11 = sshll.u32 %s14924_s3, 4  ;;  %s15482_s11 = int_to_ptr.vmem [resolvable:$true] %s448_s11 }
 0x253   :  { %s14649_s17 = scalar_lea.hbm %s16965_s7, 32 }
 0x254   :  { %p14650_p12 = scmp.ne.s32.totalorder %s16965_s7, %s14649_s17  ;;  %p14653_p13 = scmp.lt.u32.totalorder %s14649_s17, %s16965_s7 }
 0x256   :  { %p14655_p0 = pnand %p14653_p13, %p14650_p12 }
 0x258   :  { %14658 = shalt.err (!%p14655_p0)
}
 0x259   :  { %s14659_s0 = scalar_lea.vmem %s423_s27, 32  ;;  %p14664_p2 = scmp.lt.s32.totalorder %s423_s27, %s423_s27 }
 0x25a   :  { %p14660_p1 = scmp.ne.s32.totalorder %s423_s27, %s14659_s0  ;;  %p14665_p3 = scmp.lt.s32.totalorder %s14659_s0, %s14659_s0 }
 0x25c   :  { %p14666_p4 = por %p14665_p3, %p14664_p2 }
 0x25e   :  { %p14667_p5 = pnand %p14666_p4, %p14660_p1 }
 0x260   :  { %14670 = shalt.err (!%p14667_p5)
}
 0x261   :  { %s16966_s15 = sld [smem:[#allocation102_spill]] }
 0x262   :  { %428 = dma.hbm_to_vmem [thread:$0]  %s16965_s7, 32, %s423_s27, [#allocation32], %s14897_s26, %s14897_s26, %s14898_s28  }
 0x267   :  { %s14671_s20 = scalar_lea.hbm %s16966_s15, 512 }
 0x268   :  { %p14672_p6 = scmp.ne.s32.totalorder %s16966_s15, %s14671_s20  ;;  %p14675_p7 = scmp.lt.u32.totalorder %s14671_s20, %s16966_s15 }
 0x26a   :  { %p14677_p8 = pnand %p14675_p7, %p14672_p6 }
 0x26c   :  { %14680 = shalt.err (!%p14677_p8)
}
 0x26d   :  { %s14681_s12 = scalar_lea.vmem %s15482_s11, 512  ;;  %p14686_p10 = scmp.lt.s32.totalorder %s15482_s11, %s15482_s11 }
 0x26e   :  { %p14682_p9 = scmp.ne.s32.totalorder %s15482_s11, %s14681_s12  ;;  %p14687_p11 = scmp.lt.s32.totalorder %s14681_s12, %s14681_s12 }
 0x270   :  { %p14688_p12 = por %p14687_p11, %p14686_p10 }
 0x272   :  { %p14689_p13 = pnand %p14688_p12, %p14682_p9 }
 0x274   :  { %14692 = shalt.err (!%p14689_p13)
}
 0x275   :  { %s14925_s16 = smov 64   ;;  %s16967_s8 = sld [smem:[#allocation103_spill]] }
 0x276   :  { %s14926_s30 = smov 4   ;;  %s14927_s14 = smov [#allocation39]  }
 0x277   :  { %454 = dma.hbm_to_vmem [thread:$0]  %s16966_s15, 512, %s15482_s11, [#allocation35], %s14925_s16, %s14925_s16, %s14926_s30  }
 0x278   :  { %s472_s25 = sshll.u32 %s14927_s14, 4  ;;  %s14928_s18 = smov [#allocation42]   ;;  %s473_s25 = int_to_ptr.vmem [resolvable:$true] %s472_s25 }
 0x279   :  { %s496_s22 = sshll.u32 %s14928_s18, 4  ;;  %s15503_s22 = int_to_ptr.vmem [resolvable:$true] %s496_s22 }
 0x27b   :  { %s14693_s23 = scalar_lea.hbm %s16967_s8, 512 }
 0x27c   :  { %p14694_p0 = scmp.ne.s32.totalorder %s16967_s8, %s14693_s23  ;;  %p14697_p1 = scmp.lt.u32.totalorder %s14693_s23, %s16967_s8 }
 0x27e   :  { %p14699_p2 = pnand %p14697_p1, %p14694_p0 }
 0x280   :  { %14702 = shalt.err (!%p14699_p2)
}
 0x281   :  { %s14703_s1 = scalar_lea.vmem %s473_s25, 512  ;;  %p14708_p4 = scmp.lt.s32.totalorder %s473_s25, %s473_s25 }
 0x282   :  { %p14704_p3 = scmp.ne.s32.totalorder %s473_s25, %s14703_s1  ;;  %p14709_p5 = scmp.lt.s32.totalorder %s14703_s1, %s14703_s1 }
 0x284   :  { %p14710_p6 = por %p14709_p5, %p14708_p4 }
 0x286   :  { %p14711_p7 = pnand %p14710_p6, %p14704_p3 }
 0x288   :  { %14714 = shalt.err (!%p14711_p7)
}
 0x289   :  { %s16968_s29 = sld [smem:[#allocation104_spill]] }
 0x28a   :  { %478 = dma.hbm_to_vmem [thread:$0]  %s16967_s8, 512, %s473_s25, [#allocation38], %s14925_s16, %s14925_s16, %s14926_s30  }
 0x28f   :  { %s14715_s4 = scalar_lea.hbm %s16968_s29, 32 }
 0x290   :  { %p14716_p8 = scmp.ne.s32.totalorder %s16968_s29, %s14715_s4  ;;  %p14719_p9 = scmp.lt.u32.totalorder %s14715_s4, %s16968_s29 }
 0x292   :  { %p14721_p10 = pnand %p14719_p9, %p14716_p8 }
 0x294   :  { %14724 = shalt.err (!%p14721_p10)
}
 0x295   :  { %s14725_s2 = scalar_lea.vmem %s15503_s22, 32  ;;  %p14730_p12 = scmp.lt.s32.totalorder %s15503_s22, %s15503_s22 }
 0x296   :  { %p14726_p11 = scmp.ne.s32.totalorder %s15503_s22, %s14725_s2  ;;  %p14731_p13 = scmp.lt.s32.totalorder %s14725_s2, %s14725_s2 }
 0x298   :  { %p14732_p0 = por %p14731_p13, %p14730_p12 }
 0x29a   :  { %p14733_p1 = pnand %p14732_p0, %p14726_p11 }
 0x29c   :  { %14736 = shalt.err (!%p14733_p1)
}
 0x29d   :  { %s16969_s13 = sld [smem:[#allocation105_spill]]  ;;  %s14929_s9 = smov [#allocation45]  }
 0x29e   :  { %502 = dma.hbm_to_vmem [thread:$0]  %s16968_s29, 32, %s15503_s22, [#allocation41], %s14897_s26, %s14897_s26, %s14898_s28  }
 0x29f   :  { %s520_s24 = sshll.u32 %s14929_s9, 4  ;;  %s14930_s7 = smov [#allocation48]   ;;  %s521_s24 = int_to_ptr.vmem [resolvable:$true] %s520_s24 }
 0x2a0   :  { %s546_s10 = sshll.u32 %s14930_s7, 4  ;;  %s15524_s10 = int_to_ptr.vmem [resolvable:$true] %s546_s10 }
 0x2a3   :  { %s14737_s27 = scalar_lea.hbm %s16969_s13, 512 }
 0x2a4   :  { %p14738_p2 = scmp.ne.s32.totalorder %s16969_s13, %s14737_s27  ;;  %p14741_p3 = scmp.lt.u32.totalorder %s14737_s27, %s16969_s13 }
 0x2a6   :  { %p14743_p4 = pnand %p14741_p3, %p14738_p2 }
 0x2a8   :  { %14746 = shalt.err (!%p14743_p4)
}
 0x2a9   :  { %s14747_s3 = scalar_lea.vmem %s521_s24, 512  ;;  %p14752_p6 = scmp.lt.s32.totalorder %s521_s24, %s521_s24 }
 0x2aa   :  { %p14748_p5 = scmp.ne.s32.totalorder %s521_s24, %s14747_s3  ;;  %p14753_p7 = scmp.lt.s32.totalorder %s14747_s3, %s14747_s3 }
 0x2ac   :  { %p14754_p8 = por %p14753_p7, %p14752_p6 }
 0x2ae   :  { %p14755_p9 = pnand %p14754_p8, %p14748_p5 }
 0x2b0   :  { %14758 = shalt.err (!%p14755_p9)
}
 0x2b1   :  { %s16970_s11 = sld [smem:[#allocation108_spill]] }
 0x2b2   :  { %526 = dma.hbm_to_vmem [thread:$0]  %s16969_s13, 512, %s521_s24, [#allocation44], %s14925_s16, %s14925_s16, %s14926_s30  }
 0x2b7   :  { %s14759_s17 = scalar_lea.hbm %s16970_s11, 32 }
 0x2b8   :  { %p14760_p10 = scmp.ne.s32.totalorder %s16970_s11, %s14759_s17  ;;  %p14763_p11 = scmp.lt.u32.totalorder %s14759_s17, %s16970_s11 }
 0x2ba   :  { %p14765_p12 = pnand %p14763_p11, %p14760_p10 }
 0x2bc   :  { %14768 = shalt.err (!%p14765_p12)
}
 0x2bd   :  { %s14769_s0 = scalar_lea.vmem %s15524_s10, 32  ;;  %p14774_p0 = scmp.lt.s32.totalorder %s15524_s10, %s15524_s10 }
 0x2be   :  { %p14770_p13 = scmp.ne.s32.totalorder %s15524_s10, %s14769_s0  ;;  %p14775_p1 = scmp.lt.s32.totalorder %s14769_s0, %s14769_s0 }
 0x2c0   :  { %p14776_p2 = por %p14775_p1, %p14774_p0 }
 0x2c2   :  { %p14777_p3 = pnand %p14776_p2, %p14770_p13 }
 0x2c4   :  { %14780 = shalt.err (!%p14777_p3)
}
 0x2c5   :  { %552 = dma.hbm_to_vmem [thread:$0]  %s16970_s11, 32, %s15524_s10, [#allocation47], %s14897_s26, %s14897_s26, %s14898_s28  }
 0x2c6   :  { %s14931_s15 = smov [#allocation51]   ;;  %s14781_s12 = scalar_lea.hbm %s15222_s6, 16 }
 0x2c7   :  { %s569_s20 = sshll.u32 %s14931_s15, 4  ;;  %p14782_p4 = scmp.ne.s32.totalorder %s15222_s6, %s14781_s12  ;;  %s570_s20 = int_to_ptr.vmem [resolvable:$true] %s569_s20 }
 0x2c8   :  { %p14785_p5 = scmp.lt.u32.totalorder %s14781_s12, %s15222_s6 }
 0x2ca   :  { %p14787_p6 = pnand %p14785_p5, %p14782_p4 }
 0x2cc   :  { %14790 = shalt.err (!%p14787_p6)
}
 0x2cd   :  { %s14791_s16 = scalar_lea.vmem %s570_s20, 16  ;;  %s14795_s8 = scalar_lea.vmem %s570_s20, 32 }
 0x2ce   :  { %p14792_p7 = scmp.ne.s32.totalorder %s570_s20, %s14791_s16  ;;  %p14796_p8 = scmp.lt.s32.totalorder %s570_s20, %s570_s20 }
 0x2cf   :  { %p14797_p9 = scmp.lt.s32.totalorder %s14795_s8, %s14791_s16 }
 0x2d1   :  { %p14798_p10 = por %p14797_p9, %p14796_p8 }
 0x2d3   :  { %p14799_p11 = pnand %p14798_p10, %p14792_p7 }
 0x2d5   :  { %14802 = shalt.err (!%p14799_p11)
}
 0x2d6   :  { %572 = dma.hbm_to_vmem [thread:$0]  %s15222_s6, 16, %s570_s20, [#allocation50]  }
 0x2d7   :  { %14803 = dma.done.wait [#allocation3], 32  }
 0x2d8   :  { %14804 = vsyncadd [#allocation3], 4294967264 }
 0x2d9   :  { %14805 = dma.done.wait [#allocation5], 64  }
 0x2da   :  { %14806 = vsyncadd [#allocation5], 4294967232 }
 0x2db   :  { %14807 = dma.done.wait [#allocation8], 64  }
 0x2dc   :  { %14808 = vsyncadd [#allocation8], 4294967232 }
 0x2dd   :  { %14809 = dma.done.wait [#allocation11], 64  }
 0x2de   :  { %14810 = vsyncadd [#allocation11], 4294967232 }
 0x2df   :  { %14811 = dma.done.wait [#allocation14], 64  }
 0x2e0   :  { %14812 = vsyncadd [#allocation14], 4294967232 }
 0x2e1   :  { %14813 = dma.done.wait [#allocation17], 48  }
 0x2e2   :  { %14814 = vsyncadd [#allocation17], 4294967248 }
 0x2e3   :  { %14815 = dma.done.wait [#allocation20], 48  }
 0x2e4   :  { %14816 = vsyncadd [#allocation20], 4294967248 }
 0x2e5   :  { %14817 = dma.done.wait [#allocation23], 64  }
 0x2e6   :  { %14818 = vsyncadd [#allocation23], 4294967232 }
 0x2e7   :  { %14819 = dma.done.wait [#allocation26], 64  }
 0x2e8   :  { %14820 = vsyncadd [#allocation26], 4294967232 }
 0x2e9   :  { %14821 = dma.done.wait [#allocation29], 64  }
 0x2ea   :  { %14822 = vsyncadd [#allocation29], 4294967232 }
 0x2eb   :  { %14823 = dma.done.wait [#allocation32], 64  }
 0x2ec   :  { %14824 = vsyncadd [#allocation32], 4294967232 }
 0x2ed   :  { %14825 = dma.done.wait [#allocation35], 544  }
 0x2ee   :  { %14826 = vsyncadd [#allocation35], 4294966752 }
 0x2ef   :  { %14827 = dma.done.wait [#allocation38], 544  }
 0x2f0   :  { %14828 = vsyncadd [#allocation38], 4294966752 }
 0x2f1   :  { %14829 = dma.done.wait [#allocation41], 64  }
 0x2f2   :  { %14830 = vsyncadd [#allocation41], 4294967232 }
 0x2f3   :  { %14831 = dma.done.wait [#allocation44], 544  }
 0x2f4   :  { %14832 = vsyncadd [#allocation44], 4294966752 }
 0x2f5   :  { %14833 = dma.done.wait [#allocation47], 64  }
 0x2f6   :  { %14834 = vsyncadd [#allocation47], 4294967232 }
 0x2f7   :  { %14835 = dma.done.wait [#allocation50], 32  }
 0x2f8   :  { %14836 = vsyncadd [#allocation50], 4294967264  ;;  %s16971_s6 = sld [smem:[#allocation75_spill]]  ;;  %s16972_s28 = sld [smem:[#allocation69_spill]]  ;;  %vm698_vm0 = vcmask 1041408   ;;  %vm691_vm1 = vcmask 15360  }
 0x2f9   :  { %s16973_s30 = sld [smem:[#allocation76_spill]]  ;;  %s16974_s14 = sld [smem:[#allocation73_spill]]  ;;  %vm783_vm2 = vcmask 261120   ;;  %v14932_v26 = vmov 0.0   ;;  %vm14933_vm3 = vmmov 0   ;;  %vm1049_vm8 = vcmask 64512  }
 0x2fa   :  { %s16975_s25 = sld [smem:[#allocation80_spill]]  ;;  %s16976_s18 = sld [smem:[#allocation82_spill]]  ;;  %12751 = vmatprep.subr.bf16.mxu1 %v14932_v26  ;;  %12755 = vmatprep.mubr.msk.bf16.mxu1 %vm14933_vm3, %v14932_v26  ;;  %v12067_v45 = vld [vmem:[#allocation2] ss:$0 sm:$0xff]  ;;  %v12068_v51 = vld [vmem:[#allocation4] ss:$0 sm:$0xff] }
 0x2fb   :  { %s16977_s22 = sld [smem:[#allocation83_spill]]  ;;  %v12069_v58 = vld [vmem:[#allocation6] ss:$0 sm:$0xff]  ;;  %v12073_v59 = vld [vmem:[#allocation7] ss:$0 sm:$0xff]  ;;  %s14934_s23 = smov 120  }
 0x2fc   :  { %s16978_s1 = sld [smem:[#allocation71_spill]]  ;;  %s14935_s29 = smov 112   ;;  %vm1719_vm9 = vcmask 130048   ;;  %vm1721_vm10 = vcmask 195584   ;;  %vm2633_vm15 = vcmask 523264  }
 0x2fd   :  { %s14936_s4 = smov 104   ;;  %s16979_s2 = sld [smem:[#allocation85_spill]] }
 0x2fe   :  { %v683_v0 = vld [vmem:[%s16971_s6] sm:$0x3]  ;;  %v682_v2 = vld [vmem:[%s16972_s28 + $0x8] sm:$0xff]  ;;  %s14937_s13 = smov 8   ;;  %s14938_s9 = smov 24  }
 0x2ff   :  { %v681_v1 = vld [vmem:[%s16972_s28] sm:$0xff]  ;;  %12746 = vmatprep.subr.msk.mxu0 %vm698_vm0, %v683_v0  ;;  %v778_v9 = vld [vmem:[%s16974_s14 + $0x8] sm:$0xff]  ;;  %s16980_s24 = sld [smem:[#allocation87_spill]]  ;;  %s16981_s7 = sld [smem:[#allocation89_spill]] }
 0x300   :  { %12748 = vmatprep.mubr.msk.f32.mxu0 %vm691_vm1, %v681_v1  ;;  %12747 = vmatpush3.msk.msra.mxu0 %vm698_vm0, %v683_v0  ;;  %v12063_v3 = vld [vmem:[%s16973_s30] ss:$0 sm:$0xff]  ;;  %v13710_v27 = vld [vmem:[%s16975_s25 + $0x8] sm:$0xff]   ;;  %s16982_s10 = sld [smem:[#allocation77_spill]]  ;;  %s16983_s27 = sld [smem:[#allocation70_spill]] }
 0x301   :  { %12749 = vmatmul.mubr.msk.f32.vlgmr.msra.gmra.mrb[0].mxu0 %vm691_vm1, %v682_v2  ;;  %v777_v6 = vld [vmem:[%s16974_s14] sm:$0xff]  ;;  %12759 = vmatprep.subr.bf16.mxu0 %v14932_v26  ;;  %v13711_v28 = vld [vmem:[%s16976_s18 + $0x8] sm:$0xff]   ;;  %s16984_s3 = sld [smem:[#allocation78_spill]]  ;;  %s16985_s11 = sld [smem:[#allocation74_spill]] }
 0x302   :  { %v13708_v24 = vld [vmem:[%s16975_s25] sm:$0xff]   ;;  %12763 = vmatprep.mubr.msk.bf16.mxu0 %vm14933_vm3, %v14932_v26  ;;  %v13713_v57 = vld [vmem:[%s16977_s22 + $0x8] sm:$0xff]   ;;  %s16986_s17 = sld [smem:[#allocation92_spill]]  ;;  %s16987_s0 = sld [smem:[#allocation94_spill]] }
 0x303   :  { %v13709_v25 = vld [vmem:[%s16976_s18] sm:$0xff]   ;;  %12752 = vmatpush3.bf16.msra.mxu1 %v13708_v24  ;;  %s16988_s15 = sld [smem:[#allocation95_spill]]  ;;  %s16989_s20 = sld [smem:[#allocation72_spill]] }
 0x304   :  { %12760 = vmatpush3.bf16.msra.mxu0 %v13709_v25  ;;  %12753 = vmatprep.subr.bf16.mxu1 %v14932_v26  ;;  %v13712_v55 = vld [vmem:[%s16977_s22] sm:$0xff]   ;;  %s16990_s12 = sld [smem:[#allocation97_spill]]  ;;  %s16991_s16 = sld [smem:[#allocation101_spill]] }
 0x305   :  { %12761 = vmatprep.subr.bf16.mxu0 %v14932_v26  ;;  %s16992_s8 = sld [smem:[#allocation99_spill]] }
 0x306   :  { %s16993_s6 = sld [smem:[#allocation107_spill]] }
 0x307   :  { %12754 = vmatpush3.bf16.msra.mxu1 %v13710_v27 }
 0x308   :  { %12762 = vmatpush3.bf16.msra.mxu0 %v13711_v28  ;;  %12767 = vmatprep.subr.bf16.mxu1 %v14932_v26 }
 0x309   :  { %12775 = vmatprep.subr.mxu0 %v14932_v26 }
 0x3d4   :  { %v12750_v4 = vpop.f32.mrb[0].mxu0 }
 0x3d5   :  { %v768_v5 = vpop.f32.mrb[1].mxu0  ;;  %v774_v7 = vadd.f32 %v12750_v4, %v12063_v3 }
 0x3d6   :  { %v769_v8 = vadd.f32 %v12063_v3, %v768_v5 }
 0x3d7   :  { %v15557_v11 = vadd.f32 %v778_v9, %v774_v7 }
 0x3d8   :  { %v15555_v10 = vadd.f32 %v777_v6, %v769_v8  ;;  %v12077_v8 = vld [vmem:[#allocation9] ss:$0 sm:$0xff] }
 0x3d9   :  { %v787_v13 = vsel %vm783_vm2, %v15557_v11, 0.0 }
 0x3da   :  { %v784_v12 = vsel %vm783_vm2, %v15555_v10, 0.0 }
 0x3db   :  { %785 = vadd.xlane.f32.xlu0 %v784_v12 }
 0x3df   :  { %788 = vadd.xlane.f32.xlu0 %v787_v13 }
 0x468   :  { %v786_v14 = vpop.xlane.xlu0 %785 }
 0x469   :  { %v791_v15 = vmul.f32 0.03125, %v786_v14 }
 0x46b   :  { %v793_v16 = vsub.f32 %v15555_v10, %v791_v15 }
 0x46c   :  { %v789_v17 = vpop.xlane.xlu0 %788 }
 0x46d   :  { %v792_v18 = vmul.f32 0.03125, %v789_v17  ;;  %v795_v19 = vmul.f32 %v793_v16, %v793_v16  ;;  %v812_v47 = vmul.f32 %v12067_v45, %v793_v16 }
 0x46f   :  { %v794_v20 = vsub.f32 %v15557_v11, %v792_v18  ;;  %v797_v21 = vsel %vm783_vm2, %v795_v19, 0.0  ;;  %v15612_v19 = vld [vmem:[%s16978_s1] ss:$0 sm:$0xff] }
 0x470   :  { %798 = vadd.xlane.f32.xlu1 %v797_v21 }
 0x471   :  { %v796_v22 = vmul.f32 %v794_v20, %v794_v20  ;;  %v813_v48 = vmul.f32 %v12067_v45, %v794_v20 }
 0x473   :  { %v800_v23 = vsel %vm783_vm2, %v796_v22, 0.0 }
 0x474   :  { %801 = vadd.xlane.f32.xlu1 %v800_v23 }
 0x4fd   :  { %v799_v29 = vpop.xlane.xlu1 %798 }
 0x4fe   :  { %v804_v30 = vmul.f32 0.032258064, %v799_v29 }
 0x500   :  { %13782 = vrsqrt.f32 %v804_v30  ;;  %vm816_vm4 = vcmp.eq.f32.partialorder %v804_v30, inf  ;;  %v819_v35 = vand.u32 2147483648, %v804_v30  ;;  %vm818_vm5 = vcmp.eq.f32.partialorder %v804_v30, 0.0 }
 0x501   :  { %v802_v31 = vpop.xlane.xlu1 %801 }
 0x502   :  { %v805_v32 = vmul.f32 0.032258064, %v802_v31 }
 0x504   :  { %13784 = vrsqrt.f32 %v805_v32  ;;  %vm823_vm6 = vcmp.eq.f32.partialorder %v805_v32, inf  ;;  %v826_v41 = vand.u32 2147483648, %v805_v32  ;;  %vm825_vm7 = vcmp.eq.f32.partialorder %v805_v32, 0.0 }
 0x50a   :  { %v13783_v33 = vpop.eup %13782 }
 0x50b   :  { %v815_v34 = vmul.f32 %v13783_v33, %v804_v30 }
 0x50d   :  { %v817_v36 = vsel %vm816_vm4, %v804_v30, %v815_v34 }
 0x50e   :  { %v13785_v37 = vpop.eup %13784  ;;  %v820_v38 = vsel %vm818_vm5, %v819_v35, %v817_v36 }
 0x50f   :  { %v828_v39 = vadd.f32 1e-06, %v820_v38  ;;  %v822_v40 = vmul.f32 %v13785_v37, %v805_v32 }
 0x511   :  { %v824_v42 = vsel %vm823_vm6, %v805_v32, %v822_v40  ;;  %13786 = vrcp.f32 %v828_v39  ;;  %vm4651_vm6 = vcmask 1042432  }
 0x512   :  { %v827_v43 = vsel %vm825_vm7, %v826_v41, %v824_v42 }
 0x513   :  { %v829_v44 = vadd.f32 1e-06, %v827_v43 }
 0x515   :  { %13788 = vrcp.f32 %v829_v44 }
 0x51b   :  { %v13787_v46 = vpop.eup %13786 }
 0x51c   :  { %v831_v49 = vmul.f32 %v13787_v46, %v812_v47 }
 0x51e   :  { %v840_v53 = vadd.f32 %v12068_v51, %v831_v49 }
 0x51f   :  { %v13789_v50 = vpop.eup %13788 }
 0x520   :  { %v833_v52 = vmul.f32 %v13789_v50, %v813_v48 }
 0x522   :  { %v841_v54 = vadd.f32 %v12068_v51, %v833_v52 }
 0x524   :  { %v862_v56 = vpack.c.bf16 %v841_v54, %v840_v53 }
 0x526   :  { %12756 = vmatmul.mubr.msk.bf16.vlgmr.msra.gmra.mrb[0].mxu1 %vm783_vm2, %v862_v56  ;;  %12764 = vmatmul.mubr.msk.bf16.vlgmr.msra.gmra.mrb[4].mxu0 %vm783_vm2, %v862_v56 }
 0x527   :  { %12768 = vmatpush3.bf16.msra.mxu1 %v13712_v55  ;;  %12771 = vmatprep.mubr.msk.bf16.mxu1 %vm14933_vm3, %v14932_v26 }
 0x528   :  { %12769 = vmatprep.subr.bf16.mxu1 %v14932_v26  ;;  %12777 = vmatprep.mubr.msk.f32.mxu0 %vm14933_vm3, %v14932_v26 }
 0x52b   :  { %12770 = vmatpush3.bf16.msra.mxu1 %v13713_v57 }
 0x52c   :  { %12795 = vmatprep.subr.mxu1 %v14932_v26 }
 0x52e   :  { %12772 = vmatmul.mubr.msk.bf16.vlgmr.msra.gmra.mrb[4].mxu1 %vm783_vm2, %v862_v56 }
 0x52f   :  { %12797 = vmatprep.mubr.msk.f32.mxu1 %vm14933_vm3, %v14932_v26 }
 0x5f9   :  { %v918_v60 = vpop.f32.mrb[0].mxu1  ;;  %v977_v61 = vpop.f32.mrb[4].mxu0 }
 0x5fa   :  { %v919_v62 = vadd.f32 %v12069_v58, %v918_v60  ;;  %v978_v63 = vadd.f32 %v12073_v59, %v977_v61  ;;  %v12757_v0 = vpop.f32.mrb[1].mxu1  ;;  %v12765_v1 = vpop.f32.mrb[5].mxu0 }
 0x5fb   :  { %v921_v2 = vpop.f32.mrb[2].mxu1  ;;  %v980_v3 = vpop.f32.mrb[6].mxu0 }
 0x5fc   :  { %v15594_v4 = vadd.f32 %v12069_v58, %v921_v2  ;;  %v981_v5 = vadd.f32 %v12073_v59, %v980_v3  ;;  %v12766_v6 = vpop.f32.mrb[7].mxu0  ;;  %12776 = vmatpush3.xpose.msk.msra.mxu0 %vm1049_vm8, %v978_v63  ;;  %1210 = vrot.lane.b32.xlu1 %v919_v62, %s14934_s23  ;;  %v12758_v7 = vpop.f32.mrb[3].mxu1  ;;  %v15676_v59 = vld [vmem:[%s16978_s1 + $0x1] ss:$0 sm:$0xff] }
 0x5fd   :  { %12780 = vmatprep.subr.mxu0 %v14932_v26 }
 0x5ff   :  { %12778 = vmatmul.mubr.msk.f32.vlgmr.msra.gmra.mrb[2].mxu0 %vm1049_vm8, %v919_v62 }
 0x600   :  { %1378 = vrot.lane.b32.xlu1 %v978_v63, %s14935_s29  ;;  %12782 = vmatprep.mubr.msk.f32.mxu0 %vm14933_vm3, %v14932_v26 }
 0x601   :  { %v1036_v9 = vpop.f32.mrb[4].mxu1 }
 0x602   :  { %v15603_v12 = vadd.f32 %v12077_v8, %v1036_v9  ;;  %v12773_v13 = vpop.f32.mrb[5].mxu1 }
 0x603   :  { %v1039_v14 = vpop.f32.mrb[6].mxu1 }
 0x604   :  { %v15605_v15 = vadd.f32 %v12077_v8, %v1039_v14  ;;  %v12774_v16 = vpop.f32.mrb[7].mxu1  ;;  %12781 = vmatpush3.msra.mxu0 %v15603_v12 }
 0x605   :  { %12785 = vmatprep.subr.mxu0 %v14932_v26 }
 0x66e   :  { %v1211_v17 = vpop.permute.xlu1 %1210 }
 0x672   :  { %v1379_v18 = vpop.permute.xlu1 %1378 }
 0x673   :  { %12796 = vmatpush3.xpose.msk.msra.mxu1 %vm1049_vm8, %v1379_v18 }
 0x674   :  { %12805 = vmatprep.subr.mxu1 %v14932_v26 }
 0x6d2   :  { %v1122_v20 = vpop.f32.mrb[2].mxu0 }
 0x6d3   :  { %v1123_v21 = vadd.f32 %v15612_v19, %v1122_v20  ;;  %v12779_v22 = vpop.f32.mrb[3].mxu0 }
 0x6d5   :  { %v1126_v23 = vsel %vm1049_vm8, %v1123_v21, -inf }
 0x6d6   :  { %1127 = vmax.xlane.f32.xlu0 %v1126_v23 }
 0x6ec   :  { %1212 = vrot.lane.b32.xlu0 %v978_v63, %s14934_s23 }
 0x6f0   :  { %1543 = vrot.lane.b32.xlu0 %v978_v63, %s14936_s4 }
 0x6f4   :  { %1891 = vrot.lane.b32.xlu0 %v981_v5, %s14934_s23 }
 0x6f8   :  { %2057 = vrot.lane.b32.xlu0 %v981_v5, %s14935_s29 }
 0x6fc   :  { %2222 = vrot.lane.b32.xlu0 %v981_v5, %s14936_s4 }
 0x763   :  { %v1128_v24 = vpop.xlane.xlu0 %1127 }
 0x764   :  { %v1129_v25 = vsub.f32 %v1123_v21, %v1128_v24 }
 0x766   :  { %v1130_v27 = vmul.f32 1.442695, %v1129_v25 }
 0x767   :  { %v1213_v30 = vpop.permute.xlu0 %1212 }
 0x768   :  { %13790 = vpow2.f32 %v1130_v27 }
 0x76b   :  { %v1544_v32 = vpop.permute.xlu0 %1543 }
 0x76f   :  { %v1892_v35 = vpop.permute.xlu0 %1891 }
 0x772   :  { %v13791_v28 = vpop.eup %13790 }
 0x773   :  { %v1132_v29 = vsel %vm1049_vm8, %v13791_v28, 0.0  ;;  %v2058_v39 = vpop.permute.xlu0 %2057 }
 0x774   :  { %1133 = vadd.xlane.f32.xlu1 %v1132_v29 }
 0x777   :  { %v2223_v41 = vpop.permute.xlu0 %2222 }
 0x785   :  { %1376 = vrot.lane.b32.xlu1 %v919_v62, %s14935_s29 }
 0x789   :  { %1541 = vrot.lane.b32.xlu1 %v919_v62, %s14936_s4 }
 0x78d   :  { %1889 = vrot.lane.b32.xlu1 %v15594_v4, %s14934_s23 }
 0x791   :  { %2055 = vrot.lane.b32.xlu1 %v15594_v4, %s14935_s29 }
 0x795   :  { %2220 = vrot.lane.b32.xlu1 %v15594_v4, %s14936_s4 }
 0x801   :  { %v1134_v31 = vpop.xlane.xlu1 %1133 }
 0x802   :  { %13792 = vrcp.f32 %v1134_v31 }
 0x805   :  { %v1377_v33 = vpop.permute.xlu1 %1376 }
 0x806   :  { %12798 = vmatmul.mubr.msk.f32.vlgmr.msra.gmra.mrb[8].mxu1 %vm1049_vm8, %v1377_v33 }
 0x807   :  { %12806 = vmatpush3.xpose.msk.msra.mxu1 %vm1049_vm8, %v1544_v32  ;;  %12807 = vmatprep.mubr.msk.f32.mxu1 %vm14933_vm3, %v14932_v26 }
 0x808   :  { %12815 = vmatprep.subr.mxu1 %v14932_v26 }
 0x809   :  { %v1542_v34 = vpop.permute.xlu1 %1541 }
 0x80a   :  { %12808 = vmatmul.mubr.msk.f32.vlgmr.msra.gmra.mrb[10].mxu1 %vm1049_vm8, %v1542_v34 }
 0x80b   :  { %12816 = vmatpush3.xpose.msk.msra.mxu1 %vm1049_vm8, %v981_v5  ;;  %12817 = vmatprep.mubr.msk.f32.mxu1 %vm14933_vm3, %v14932_v26 }
 0x80c   :  { %v13793_v36 = vpop.eup %13792  ;;  %12825 = vmatprep.subr.mxu1 %v14932_v26 }
 0x80d   :  { %v1890_v37 = vpop.permute.xlu1 %1889  ;;  %v1136_v38 = vmul.f32 %v13793_v36, %v13791_v28 }
 0x80e   :  { %12818 = vmatmul.mubr.msk.f32.vlgmr.msra.gmra.mrb[12].mxu1 %vm1049_vm8, %v15594_v4 }
 0x80f   :  { %12826 = vmatpush3.xpose.msk.msra.mxu1 %vm1049_vm8, %v1892_v35  ;;  %12783 = vmatmul.mubr.msk.f32.vlgmr.msra.gmra.mrb[8].mxu0 %vm1049_vm8, %v1136_v38 }
 0x810   :  { %12786 = vmatpush3.xpose.msk.msra.mxu0 %vm1049_vm8, %v1213_v30  ;;  %12827 = vmatprep.mubr.msk.f32.mxu1 %vm14933_vm3, %v14932_v26 }
 0x811   :  { %12835 = vmatprep.subr.mxu1 %v14932_v26  ;;  %12787 = vmatprep.mubr.msk.f32.mxu0 %vm14933_vm3, %v14932_v26  ;;  %v2056_v40 = vpop.permute.xlu1 %2055 }
 0x812   :  { %12828 = vmatmul.mubr.msk.f32.vlgmr.msra.gmra.mrb[14].mxu1 %vm1049_vm8, %v1890_v37  ;;  %12790 = vmatprep.subr.mxu0 %v14932_v26 }
 0x813   :  { %12836 = vmatpush3.xpose.msk.msra.mxu1 %vm1049_vm8, %v2058_v39  ;;  %12788 = vmatmul.mubr.msk.f32.vlgmr.msra.gmra.mrb[10].mxu0 %vm1049_vm8, %v1211_v17 }
 0x814   :  { %12837 = vmatprep.mubr.msk.f32.mxu1 %vm14933_vm3, %v14932_v26  ;;  %12845 = vmatprep.subr.mxu1 %v14932_v26 }
 0x815   :  { %12792 = vmatprep.mubr.msk.f32.mxu0 %vm14933_vm3, %v14932_v26  ;;  %v2221_v42 = vpop.permute.xlu1 %2220 }
 0x816   :  { %12838 = vmatmul.mubr.msk.f32.vlgmr.msra.gmra.mrb[16].mxu1 %vm1049_vm8, %v2056_v40 }
 0x817   :  { %12846 = vmatpush3.xpose.msk.msra.mxu1 %vm1049_vm8, %v2223_v41  ;;  %12847 = vmatprep.mubr.msk.f32.mxu1 %vm14933_vm3, %v14932_v26 }
 0x818   :  { %12855 = vmatprep.subr.bf16.mxu1 %v14932_v26 }
 0x81a   :  { %12848 = vmatmul.mubr.msk.f32.vlgmr.msra.gmra.mrb[18].mxu1 %vm1049_vm8, %v2221_v42 }
 0x81b   :  { %12859 = vmatprep.mubr.msk.bf16.mxu1 %vm14933_vm3, %v14932_v26 }
 0x8d9   :  { %v1450_v43 = vpop.f32.mrb[8].mxu1 }
 0x8da   :  { %v1451_v44 = vadd.f32 %v15612_v19, %v1450_v43  ;;  %v12799_v45 = vpop.f32.mrb[9].mxu1 }
 0x8dc   :  { %v1454_v46 = vsel %vm1049_vm8, %v1451_v44, -inf }
 0x8dd   :  { %1455 = vmax.xlane.f32.xlu1 %v1454_v46  ;;  %v1615_v47 = vpop.f32.mrb[10].mxu1 }
 0x8de   :  { %v12809_v48 = vpop.f32.mrb[11].mxu1  ;;  %v1616_v58 = vadd.f32 %v15612_v19, %v1615_v47 }
 0x8e0   :  { %v1619_v3 = vsel %vm1049_vm8, %v1616_v58, -inf }
 0x8e1   :  { %v1801_v49 = vpop.f32.mrb[12].mxu1 }
 0x8e2   :  { %v15669_v50 = vpop.f32.mrb[8].mxu0  ;;  %v12819_v51 = vpop.f32.mrb[13].mxu1  ;;  %v1802_v1 = vadd.f32 %v15676_v59, %v1801_v49 }
 0x8e3   :  { %v12784_v52 = vpop.f32.mrb[9].mxu0 }
 0x8e4   :  { %v1805_v6 = vsel %vm1049_vm8, %v1802_v1, -inf }
 0x8e5   :  { %v1963_v53 = vpop.f32.mrb[14].mxu1 }
 0x8e6   :  { %v1284_v54 = vpop.f32.mrb[10].mxu0  ;;  %v12829_v55 = vpop.f32.mrb[15].mxu1  ;;  %v1964_v5 = vadd.f32 %v15676_v59, %v1963_v53 }
 0x8e7   :  { %v15672_v56 = vadd.f32 %v15612_v19, %v1284_v54  ;;  %v12789_v57 = vpop.f32.mrb[11].mxu0 }
 0x8e8   :  { %v1967_v8 = vsel %vm1049_vm8, %v1964_v5, -inf }
 0x8e9   :  { %v2129_v60 = vpop.f32.mrb[16].mxu1  ;;  %v1288_v61 = vsel %vm1049_vm8, %v15672_v56, -inf }
 0x8ea   :  { %v2130_v62 = vadd.f32 %v15676_v59, %v2129_v60  ;;  %1289 = vmax.xlane.f32.xlu0 %v1288_v61  ;;  %v12839_v63 = vpop.f32.mrb[17].mxu1 }
 0x8ec   :  { %v2133_v0 = vsel %vm1049_vm8, %v2130_v62, -inf }
 0x8ed   :  { %2134 = vmax.xlane.f32.xlu1 %v2133_v0  ;;  %v2294_v2 = vpop.f32.mrb[18].mxu1 }
 0x8ee   :  { %1620 = vmax.xlane.f32.xlu0 %v1619_v3  ;;  %v12849_v4 = vpop.f32.mrb[19].mxu1  ;;  %v2295_v7 = vadd.f32 %v15676_v59, %v2294_v2 }
 0x8f0   :  { %v2298_v9 = vsel %vm1049_vm8, %v2295_v7, -inf }
 0x8f2   :  { %1806 = vmax.xlane.f32.xlu0 %v1805_v6 }
 0x8f6   :  { %1968 = vmax.xlane.f32.xlu0 %v1967_v8 }
 0x8fa   :  { %2299 = vmax.xlane.f32.xlu0 %v2298_v9 }
 0x96a   :  { %v1456_v13 = vpop.xlane.xlu1 %1455 }
 0x96b   :  { %v1457_v14 = vsub.f32 %v1451_v44, %v1456_v13 }
 0x96d   :  { %v1458_v16 = vmul.f32 1.442695, %v1457_v14 }
 0x96f   :  { %13794 = vpow2.f32 %v1458_v16 }
 0x977   :  { %v1290_v17 = vpop.xlane.xlu0 %1289 }
 0x978   :  { %v1291_v46 = vsub.f32 %v15672_v56, %v1290_v17 }
 0x979   :  { %v15689_v18 = vpop.eup %13794 }
 0x97a   :  { %v1460_v19 = vsel %vm1049_vm8, %v15689_v18, 0.0  ;;  %v2135_v20 = vpop.xlane.xlu1 %2134  ;;  %v1292_v47 = vmul.f32 1.442695, %v1291_v46 }
 0x97b   :  { %1461 = vadd.xlane.f32.xlu0 %v1460_v19  ;;  %v1621_v21 = vpop.xlane.xlu0 %1620  ;;  %v2136_v23 = vsub.f32 %v2130_v62, %v2135_v20 }
 0x97c   :  { %v1622_v22 = vsub.f32 %v1616_v58, %v1621_v21 }
 0x97d   :  { %v2137_v28 = vmul.f32 1.442695, %v2136_v23  ;;  %v13714_v23 = vld [vmem:[%s16979_s2] sm:$0xff]  }
 0x97e   :  { %v1623_v24 = vmul.f32 1.442695, %v1622_v22  ;;  %12856 = vmatpush3.bf16.msra.mxu1 %v13714_v23 }
 0x97f   :  { %v1807_v25 = vpop.xlane.xlu0 %1806  ;;  %12857 = vmatprep.subr.bf16.mxu1 %v14932_v26 }
 0x980   :  { %13796 = vpow2.f32 %v1623_v24  ;;  %v1808_v27 = vsub.f32 %v1802_v1, %v1807_v25 }
 0x982   :  { %v1809_v29 = vmul.f32 1.442695, %v1808_v27  ;;  %v13715_v27 = vld [vmem:[%s16979_s2 + $0x8] sm:$0xff]  }
 0x983   :  { %v1969_v30 = vpop.xlane.xlu0 %1968  ;;  %12858 = vmatpush3.bf16.msra.mxu1 %v13715_v27 }
 0x984   :  { %13798 = vpow2.f32 %v1809_v29  ;;  %v1970_v31 = vsub.f32 %v1964_v5, %v1969_v30  ;;  %12871 = vmatprep.subr.bf16.mxu1 %v14932_v26 }
 0x985   :  { %13800 = vpow2.f32 %v2137_v28 }
 0x986   :  { %v1971_v32 = vmul.f32 1.442695, %v1970_v31 }
 0x987   :  { %v2300_v33 = vpop.xlane.xlu0 %2299 }
 0x988   :  { %13802 = vpow2.f32 %v1971_v32  ;;  %v2301_v34 = vsub.f32 %v2295_v7, %v2300_v33 }
 0x98a   :  { %v13797_v35 = vpop.eup %13796  ;;  %v2302_v36 = vmul.f32 1.442695, %v2301_v34 }
 0x98b   :  { %v1625_v37 = vsel %vm1049_vm8, %v13797_v35, 0.0 }
 0x98c   :  { %13804 = vpow2.f32 %v2302_v36  ;;  %1626 = vadd.xlane.f32.xlu1 %v1625_v37 }
 0x98d   :  { %13806 = vpow2.f32 %v1292_v47 }
 0x98e   :  { %v13799_v38 = vpop.eup %13798 }
 0x98f   :  { %v1811_v39 = vsel %vm1049_vm8, %v13799_v38, 0.0  ;;  %v15695_v40 = vpop.eup %13800 }
 0x990   :  { %1812 = vadd.xlane.f32.xlu0 %v1811_v39  ;;  %v2139_v42 = vsel %vm1049_vm8, %v15695_v40, 0.0 }
 0x992   :  { %v15697_v41 = vpop.eup %13802 }
 0x993   :  { %v1973_v43 = vsel %vm1049_vm8, %v15697_v41, 0.0 }
 0x994   :  { %2140 = vadd.xlane.f32.xlu0 %v2139_v42  ;;  %1974 = vadd.xlane.f32.xlu1 %v1973_v43 }
 0x996   :  { %v15703_v44 = vpop.eup %13804 }
 0x997   :  { %v2304_v45 = vsel %vm1049_vm8, %v15703_v44, 0.0  ;;  %v13807_v48 = vpop.eup %13806 }
 0x998   :  { %2305 = vadd.xlane.f32.xlu1 %v2304_v45  ;;  %v1294_v49 = vsel %vm1049_vm8, %v13807_v48, 0.0 }
 0x9a9   :  { %1465 = vrot.lane.b32.xlu1 %v15603_v12, %s14935_s29 }
 0x9aa   :  { %1300 = vrot.lane.b32.xlu0 %v15603_v12, %s14934_s23 }
 0x9ae   :  { %2144 = vrot.lane.b32.xlu0 %v15605_v15, %s14935_s29 }
 0x9cd   :  { %1295 = vadd.xlane.f32.xlu1 %v1294_v49 }
 0x9de   :  { %1630 = vrot.lane.b32.xlu1 %v15603_v12, %s14936_s4 }
 0x9e2   :  { %1979 = vrot.lane.b32.xlu1 %v15605_v15, %s14934_s23 }
 0x9e6   :  { %2309 = vrot.lane.b32.xlu1 %v15605_v15, %s14936_s4 }
 0xa08   :  { %v1462_v51 = vpop.xlane.xlu0 %1461 }
 0xa19   :  { %v1627_v55 = vpop.xlane.xlu1 %1626 }
 0xa1d   :  { %v1813_v52 = vpop.xlane.xlu0 %1812 }
 0xa21   :  { %v2141_v53 = vpop.xlane.xlu0 %2140  ;;  %v1975_v56 = vpop.xlane.xlu1 %1974 }
 0xa25   :  { %v1301_v54 = vpop.permute.xlu0 %1300  ;;  %v2306_v57 = vpop.xlane.xlu1 %2305 }
 0xa26   :  { %12791 = vmatpush3.msra.mxu0 %v1301_v54  ;;  %v12107_v54 = vld [vmem:[#allocation10] ss:$0 sm:$0xff] }
 0xa27   :  { %12800 = vmatprep.subr.mxu0 %v14932_v26 }
 0xa29   :  { %v1466_v58 = vpop.permute.xlu1 %1465 }
 0xa5a   :  { %v1296_v60 = vpop.xlane.xlu1 %1295 }
 0xa5b   :  { %13808 = vrcp.f32 %v1296_v60 }
 0xa5c   :  { %13810 = vrcp.f32 %v1462_v51 }
 0xa5d   :  { %13812 = vrcp.f32 %v1627_v55 }
 0xa5e   :  { %13814 = vrcp.f32 %v1813_v52  ;;  %v1631_v1 = vpop.permute.xlu1 %1630 }
 0xa5f   :  { %13816 = vrcp.f32 %v1975_v56 }
 0xa60   :  { %13818 = vrcp.f32 %v2141_v53 }
 0xa61   :  { %13820 = vrcp.f32 %v2306_v57 }
 0xa62   :  { %v1980_v6 = vpop.permute.xlu1 %1979 }
 0xa65   :  { %v13809_v12 = vpop.eup %13808 }
 0xa66   :  { %v1298_v61 = vmul.f32 %v13809_v12, %v13807_v48  ;;  %v13811_v62 = vpop.eup %13810  ;;  %v2310_v14 = vpop.permute.xlu1 %2309 }
 0xa67   :  { %v1464_v63 = vmul.f32 %v13811_v62, %v15689_v18  ;;  %v13813_v0 = vpop.eup %13812 }
 0xa68   :  { %12793 = vmatmul.mubr.msk.f32.vlgmr.msra.gmra.mrb[12].mxu0 %vm1049_vm8, %v1298_v61  ;;  %v1629_v2 = vmul.f32 %v13813_v0, %v13797_v35  ;;  %v13815_v3 = vpop.eup %13814 }
 0xa69   :  { %12801 = vmatpush3.msra.mxu0 %v1466_v58  ;;  %12802 = vmatprep.mubr.msk.f32.mxu0 %vm14933_vm3, %v14932_v26  ;;  %v1815_v4 = vmul.f32 %v13815_v3, %v13799_v38  ;;  %v13817_v5 = vpop.eup %13816 }
 0xa6a   :  { %12810 = vmatprep.subr.mxu0 %v14932_v26  ;;  %v1977_v7 = vmul.f32 %v13817_v5, %v15697_v41  ;;  %v13819_v8 = vpop.eup %13818 }
 0xa6b   :  { %v2143_v9 = vmul.f32 %v13819_v8, %v15695_v40  ;;  %v13821_v13 = vpop.eup %13820  ;;  %v13716_v8 = vld [vmem:[%s16980_s24] sm:$0xff]  }
 0xa6c   :  { %12803 = vmatmul.mubr.msk.f32.vlgmr.msra.gmra.mrb[14].mxu0 %vm1049_vm8, %v1464_v63  ;;  %v2308_v16 = vmul.f32 %v13821_v13, %v15703_v44  ;;  %v13719_v13 = vld [vmem:[%s16981_s7 + $0x8] sm:$0xff]  }
 0xa6d   :  { %12811 = vmatpush3.msra.mxu0 %v1631_v1  ;;  %12812 = vmatprep.mubr.msk.f32.mxu0 %vm14933_vm3, %v14932_v26 }
 0xa6e   :  { %12820 = vmatprep.subr.mxu0 %v14932_v26 }
 0xa70   :  { %12813 = vmatmul.mubr.msk.f32.vlgmr.msra.gmra.mrb[16].mxu0 %vm1049_vm8, %v1629_v2 }
 0xa71   :  { %12821 = vmatpush3.msra.mxu0 %v15605_v15  ;;  %12822 = vmatprep.mubr.msk.f32.mxu0 %vm14933_vm3, %v14932_v26  ;;  %v2145_v15 = vpop.permute.xlu0 %2144 }
 0xa72   :  { %12830 = vmatprep.subr.mxu0 %v14932_v26 }
 0xa74   :  { %12823 = vmatmul.mubr.msk.f32.vlgmr.msra.gmra.mrb[18].mxu0 %vm1049_vm8, %v1815_v4 }
 0xa75   :  { %12831 = vmatpush3.msra.mxu0 %v1980_v6  ;;  %12832 = vmatprep.mubr.msk.f32.mxu0 %vm14933_vm3, %v14932_v26 }
 0xa76   :  { %12840 = vmatprep.subr.mxu0 %v14932_v26 }
 0xa78   :  { %12833 = vmatmul.mubr.msk.f32.vlgmr.msra.gmra.mrb[20].mxu0 %vm1049_vm8, %v1977_v7 }
 0xa79   :  { %12841 = vmatpush3.msra.mxu0 %v2145_v15  ;;  %12842 = vmatprep.mubr.msk.f32.mxu0 %vm14933_vm3, %v14932_v26  ;;  %v13717_v15 = vld [vmem:[%s16980_s24 + $0x8] sm:$0xff]  }
 0xa7a   :  { %12850 = vmatprep.subr.mxu0 %v14932_v26 }
 0xa7c   :  { %12843 = vmatmul.mubr.msk.f32.vlgmr.msra.gmra.mrb[22].mxu0 %vm1049_vm8, %v2143_v9  ;;  %v13718_v9 = vld [vmem:[%s16981_s7] sm:$0xff]  }
 0xa7d   :  { %12851 = vmatpush3.msra.mxu0 %v2310_v14  ;;  %12852 = vmatprep.mubr.msk.f32.mxu0 %vm14933_vm3, %v14932_v26 }
 0xa7e   :  { %12863 = vmatprep.subr.bf16.mxu0 %v14932_v26 }
 0xa80   :  { %12853 = vmatmul.mubr.msk.f32.vlgmr.msra.gmra.mrb[24].mxu0 %vm1049_vm8, %v2308_v16 }
 0xa81   :  { %12867 = vmatprep.mubr.msk.bf16.mxu0 %vm14933_vm3, %v14932_v26  ;;  %12864 = vmatpush3.bf16.msra.mxu0 %v13716_v8 }
 0xa82   :  { %12865 = vmatprep.subr.bf16.mxu0 %v14932_v26 }
 0xa85   :  { %12866 = vmatpush3.bf16.msra.mxu0 %v13717_v15 }
 0xa86   :  { %12883 = vmatprep.subr.bf16.mxu0 %v14932_v26 }
 0xb3b   :  { %v1372_v17 = vpop.f32.mrb[12].mxu0 }
 0xb3c   :  { %v12794_v18 = vpop.f32.mrb[13].mxu0 }
 0xb3f   :  { %v1537_v19 = vpop.f32.mrb[14].mxu0 }
 0xb40   :  { %v12804_v20 = vpop.f32.mrb[15].mxu0 }
 0xb43   :  { %v1702_v21 = vpop.f32.mrb[16].mxu0 }
 0xb44   :  { %v12814_v22 = vpop.f32.mrb[17].mxu0 }
 0xb47   :  { %v1885_v24 = vpop.f32.mrb[18].mxu0 }
 0xb48   :  { %v12824_v25 = vpop.f32.mrb[19].mxu0 }
 0xb4b   :  { %v2051_v28 = vpop.f32.mrb[20].mxu0 }
 0xb4c   :  { %v13618_v29 = vpack.i.bf16 %v2051_v28, %v1372_v17  ;;  %v12834_v30 = vpop.f32.mrb[21].mxu0 }
 0xb4e   :  { %13619 = vrot.lane.b32.xlu0 %v13618_v29, %s14937_s13 }
 0xb4f   :  { %v2216_v31 = vpop.f32.mrb[22].mxu0 }
 0xb50   :  { %v13623_v32 = vpack.i.bf16 %v2216_v31, %v1537_v19  ;;  %v12844_v33 = vpop.f32.mrb[23].mxu0 }
 0xb52   :  { %13624 = vrot.lane.b32.xlu1 %v13623_v32, %s14897_s26  ;;  %v12111_v32 = vld [vmem:[#allocation12] ss:$0 sm:$0xff] }
 0xb53   :  { %v2381_v34 = vpop.f32.mrb[24].mxu0 }
 0xb54   :  { %v13628_v35 = vpack.i.bf16 %v2381_v34, %v1702_v21  ;;  %v12854_v36 = vpop.f32.mrb[25].mxu0 }
 0xb56   :  { %13629 = vrot.lane.b32.xlu0 %v13628_v35, %s14938_s9 }
 0xbc0   :  { %v13620_v37 = vpop.permute.xlu0 %13619 }
 0xbc1   :  { %v13622_v39 = vunpack.i.h.bf16 %v13620_v37  ;;  %v13621_v40 = vunpack.i.l.bf16 %v13620_v37 }
 0xbc3   :  { %v2397_v44 = vsel %vm1049_vm8, %v1885_v24, %v13622_v39  ;;  %v1718_v45 = vsel %vm1049_vm8, %v15669_v50, %v13621_v40 }
 0xbc4   :  { %v13625_v38 = vpop.permute.xlu1 %13624 }
 0xbc5   :  { %v13627_v41 = vunpack.i.h.bf16 %v13625_v38  ;;  %v13626_v42 = vunpack.i.l.bf16 %v13625_v38  ;;  %v12112_v38 = vld [vmem:[#allocation13] ss:$0 sm:$0xff] }
 0xbc7   :  { %v1720_v48 = vsel %vm1719_vm9, %v1718_v45, %v13626_v42  ;;  %v2398_v49 = vsel %vm1719_vm9, %v2397_v44, %v13627_v41  ;;  %v13721_v44 = vld [vmem:[%s16981_s7 + $0x18] sm:$0xff]   ;;  %v12113_v45 = vld [vmem:[#allocation15] ss:$0 sm:$0xff] }
 0xbc8   :  { %v13630_v43 = vpop.permute.xlu0 %13629 }
 0xbc9   :  { %v13632_v46 = vunpack.i.h.bf16 %v13630_v43  ;;  %v13631_v47 = vunpack.i.l.bf16 %v13630_v43  ;;  %v13720_v43 = vld [vmem:[%s16981_s7 + $0x10] sm:$0xff]  }
 0xbcb   :  { %v1722_v51 = vsel %vm1721_vm10, %v1720_v48, %v13631_v47  ;;  %v2399_v52 = vsel %vm1721_vm10, %v2398_v49, %v13632_v46 }
 0xbcc   :  { %v2400_v53 = vpack.c.bf16 %v2399_v52, %v1722_v51 }
 0xbce   :  { %12860 = vmatmul.mubr.msk.bf16.vlgmr.msra.gmra.mrb[20].mxu1 %vm783_vm2, %v2400_v53 }
 0xbcf   :  { %12879 = vmatprep.mubr.msk.bf16.mxu1 %vm14933_vm3, %v14932_v26  ;;  %12872 = vmatpush3.bf16.msra.mxu1 %v13718_v9  ;;  %v13722_v9 = vld [vmem:[%s16975_s25 + $0x10] sm:$0xff]  }
 0xbd0   :  { %12873 = vmatprep.subr.bf16.mxu1 %v14932_v26 }
 0xbd3   :  { %12874 = vmatpush3.bf16.msra.mxu1 %v13719_v13  ;;  %v13723_v13 = vld [vmem:[%s16977_s22 + $0x10] sm:$0xff]  }
 0xbd4   :  { %12875 = vmatprep.subr.bf16.mxu1 %v14932_v26 }
 0xbd7   :  { %12876 = vmatpush3.bf16.msra.mxu1 %v13720_v43 }
 0xbd8   :  { %12877 = vmatprep.subr.bf16.mxu1 %v14932_v26 }
 0xbdb   :  { %12878 = vmatpush3.bf16.msra.mxu1 %v13721_v44  ;;  %v13726_v44 = vld [vmem:[%s16976_s18 + $0x10] sm:$0xff]  }
 0xbdc   :  { %12899 = vmatprep.subr.bf16.mxu1 %v14932_v26 }
 0xca1   :  { %v2456_v55 = vpop.f32.mrb[20].mxu1 }
 0xca2   :  { %v2457_v56 = vadd.f32 %v12107_v54, %v2456_v55  ;;  %v12861_v50 = vpop.f32.mrb[21].mxu1 }
 0xca3   :  { %v2459_v57 = vpop.f32.mrb[22].mxu1 }
 0xca4   :  { %v15772_v58 = vadd.f32 %v2457_v56, %v15555_v10  ;;  %v2460_v60 = vadd.f32 %v12107_v54, %v2459_v57  ;;  %v12862_v12 = vpop.f32.mrb[23].mxu1  ;;  %v12117_v56 = vld [vmem:[#allocation16] ss:$0 sm:$0xff] }
 0xca6   :  { %v15775_v61 = vadd.f32 %v2460_v60, %v15557_v11  ;;  %v2467_v62 = vsel %vm783_vm2, %v15772_v58, 0.0 }
 0xca7   :  { %2468 = vadd.xlane.f32.xlu1 %v2467_v62 }
 0xca8   :  { %v2470_v63 = vsel %vm783_vm2, %v15775_v61, 0.0 }
 0xca9   :  { %2471 = vadd.xlane.f32.xlu0 %v2470_v63 }
 0xd34   :  { %v2469_v0 = vpop.xlane.xlu1 %2468 }
 0xd35   :  { %v2473_v1 = vmul.f32 0.03125, %v2469_v0 }
 0xd36   :  { %v2472_v2 = vpop.xlane.xlu0 %2471 }
 0xd37   :  { %v2475_v10 = vsub.f32 %v15772_v58, %v2473_v1  ;;  %v2474_v3 = vmul.f32 0.03125, %v2472_v2 }
 0xd39   :  { %v2476_v11 = vsub.f32 %v15775_v61, %v2474_v3  ;;  %v2477_v4 = vmul.f32 %v2475_v10, %v2475_v10  ;;  %v2493_v34 = vmul.f32 %v12111_v32, %v2475_v10 }
 0xd3b   :  { %v2479_v5 = vsel %vm783_vm2, %v2477_v4, 0.0  ;;  %v2478_v6 = vmul.f32 %v2476_v11, %v2476_v11  ;;  %v2494_v35 = vmul.f32 %v12111_v32, %v2476_v11 }
 0xd3c   :  { %2480 = vadd.xlane.f32.xlu0 %v2479_v5 }
 0xd3d   :  { %v2482_v7 = vsel %vm783_vm2, %v2478_v6, 0.0 }
 0xd40   :  { %2483 = vadd.xlane.f32.xlu0 %v2482_v7 }
 0xdc9   :  { %v2481_v14 = vpop.xlane.xlu0 %2480 }
 0xdca   :  { %v2485_v16 = vmul.f32 0.032258064, %v2481_v14  ;;  %v13724_v14 = vld [vmem:[%s16975_s25 + $0x18] sm:$0xff]  }
 0xdcc   :  { %13822 = vrsqrt.f32 %v2485_v16  ;;  %vm2497_vm11 = vcmp.eq.f32.partialorder %v2485_v16, inf  ;;  %v2500_v21 = vand.u32 2147483648, %v2485_v16  ;;  %vm2499_vm12 = vcmp.eq.f32.partialorder %v2485_v16, 0.0 }
 0xdcd   :  { %v2484_v17 = vpop.xlane.xlu0 %2483 }
 0xdce   :  { %v2486_v18 = vmul.f32 0.032258064, %v2484_v17 }
 0xdd0   :  { %13824 = vrsqrt.f32 %v2486_v18  ;;  %vm2504_vm13 = vcmp.eq.f32.partialorder %v2486_v18, inf  ;;  %v2507_v28 = vand.u32 2147483648, %v2486_v18  ;;  %vm2506_vm14 = vcmp.eq.f32.partialorder %v2486_v18, 0.0 }
 0xdd6   :  { %v13823_v19 = vpop.eup %13822 }
 0xdd7   :  { %v2496_v20 = vmul.f32 %v13823_v19, %v2485_v16 }
 0xdd9   :  { %v2498_v22 = vsel %vm2497_vm11, %v2485_v16, %v2496_v20  ;;  %v13725_v16 = vld [vmem:[%s16977_s22 + $0x18] sm:$0xff]  }
 0xdda   :  { %v13825_v23 = vpop.eup %13824  ;;  %v2501_v24 = vsel %vm2499_vm12, %v2500_v21, %v2498_v22 }
 0xddb   :  { %v2509_v25 = vadd.f32 1e-06, %v2501_v24  ;;  %v2503_v27 = vmul.f32 %v13825_v23, %v2486_v18 }
 0xddd   :  { %13826 = vrcp.f32 %v2509_v25  ;;  %v2505_v29 = vsel %vm2504_vm13, %v2486_v18, %v2503_v27 }
 0xdde   :  { %v2508_v30 = vsel %vm2506_vm14, %v2507_v28, %v2505_v29  ;;  %vm4644_vm14 = vcmask 23552  }
 0xddf   :  { %v2510_v31 = vadd.f32 1e-06, %v2508_v30 }
 0xde1   :  { %13828 = vrcp.f32 %v2510_v31 }
 0xde7   :  { %v13827_v33 = vpop.eup %13826 }
 0xde8   :  { %v2512_v36 = vmul.f32 %v13827_v33, %v2493_v34  ;;  %v12123_v34 = vld [vmem:[#allocation2 + $0x1] ss:$0 sm:$0xff] }
 0xdea   :  { %v2521_v40 = vadd.f32 %v12112_v38, %v2512_v36 }
 0xdeb   :  { %v13829_v37 = vpop.eup %13828 }
 0xdec   :  { %v2514_v39 = vmul.f32 %v13829_v37, %v2494_v35 }
 0xdee   :  { %v2522_v41 = vadd.f32 %v12112_v38, %v2514_v39 }
 0xdf0   :  { %v2537_v42 = vpack.c.bf16 %v2522_v41, %v2521_v40  ;;  %v12124_v40 = vld [vmem:[#allocation4 + $0x1] ss:$0 sm:$0xff] }
 0xdf2   :  { %12868 = vmatmul.mubr.msk.bf16.vlgmr.msra.gmra.mrb[28].mxu0 %vm783_vm2, %v2537_v42 }
 0xdf3   :  { %12887 = vmatprep.mubr.msk.bf16.mxu0 %vm14933_vm3, %v14932_v26  ;;  %12884 = vmatpush3.bf16.msra.mxu0 %v13722_v9 }
 0xdf4   :  { %12885 = vmatprep.subr.bf16.mxu0 %v14932_v26 }
 0xdf7   :  { %12886 = vmatpush3.bf16.msra.mxu0 %v13724_v14 }
 0xdf8   :  { %12891 = vmatprep.subr.bf16.mxu0 %v14932_v26 }
 0xec5   :  { %v2593_v46 = vpop.f32.mrb[28].mxu0 }
 0xec6   :  { %v2594_v47 = vadd.f32 %v12113_v45, %v2593_v46  ;;  %v12869_v48 = vpop.f32.mrb[29].mxu0  ;;  %v13727_v46 = vld [vmem:[%s16976_s18 + $0x18] sm:$0xff]  }
 0xec7   :  { %v2596_v49 = vpop.f32.mrb[30].mxu0 }
 0xec8   :  { %v2597_v51 = vadd.f32 %v12113_v45, %v2596_v49  ;;  %v12870_v52 = vpop.f32.mrb[31].mxu0  ;;  %v2600_v53 = vmax.f32 %v2594_v47, 0.0  ;;  %v12141_v47 = vld [vmem:[#allocation6 + $0x1] ss:$0 sm:$0xff] }
 0xeca   :  { %v2601_v54 = vmax.f32 %v2597_v51, 0.0 }
 0xecc   :  { %v2602_v55 = vpack.c.bf16 %v2601_v54, %v2600_v53  ;;  %v12149_v54 = vld [vmem:[#allocation9 + $0x1] ss:$0 sm:$0xff] }
 0xece   :  { %12880 = vmatmul.mubr.msk.bf16.vlgmr.msra.gmra.mrb[24].mxu1 %vm2633_vm15, %v2602_v55 }
 0xecf   :  { %12903 = vmatprep.mubr.msk.bf16.mxu1 %vm14933_vm3, %v14932_v26  ;;  %12900 = vmatpush3.bf16.msra.mxu1 %v13723_v13 }
 0xed0   :  { %12901 = vmatprep.subr.bf16.mxu1 %v14932_v26 }
 0xed3   :  { %12902 = vmatpush3.bf16.msra.mxu1 %v13725_v16 }
 0xed4   :  { %12917 = vmatprep.subr.mxu1 %v14932_v26 }
 0xfa1   :  { %v2671_v50 = vpop.f32.mrb[24].mxu1 }
 0xfa2   :  { %v2672_v57 = vadd.f32 %v12117_v56, %v2671_v50  ;;  %v12881_v60 = vpop.f32.mrb[25].mxu1 }
 0xfa3   :  { %v2674_v12 = vpop.f32.mrb[26].mxu1 }
 0xfa4   :  { %v15804_v62 = vadd.f32 %v2672_v57, %v15772_v58  ;;  %v2675_v63 = vadd.f32 %v12117_v56, %v2674_v12  ;;  %v12882_v0 = vpop.f32.mrb[27].mxu1  ;;  %v12145_v12 = vld [vmem:[#allocation7 + $0x1] ss:$0 sm:$0xff] }
 0xfa6   :  { %v15807_v1 = vadd.f32 %v2675_v63, %v15775_v61  ;;  %v2684_v2 = vsel %vm783_vm2, %v15804_v62, 0.0 }
 0xfa7   :  { %2685 = vadd.xlane.f32.xlu1 %v2684_v2 }
 0xfa8   :  { %v2687_v10 = vsel %vm783_vm2, %v15807_v1, 0.0 }
 0xfa9   :  { %2688 = vadd.xlane.f32.xlu0 %v2687_v10 }
0x1034   :  { %v2686_v3 = vpop.xlane.xlu1 %2685 }
0x1035   :  { %v2690_v11 = vmul.f32 0.03125, %v2686_v3 }
0x1036   :  { %v2689_v58 = vpop.xlane.xlu0 %2688 }
0x1037   :  { %v2692_v4 = vsub.f32 %v15804_v62, %v2690_v11  ;;  %v2691_v5 = vmul.f32 0.03125, %v2689_v58 }
0x1039   :  { %v2693_v61 = vsub.f32 %v15807_v1, %v2691_v5  ;;  %v2694_v6 = vmul.f32 %v2692_v4, %v2692_v4  ;;  %v2710_v36 = vmul.f32 %v12123_v34, %v2692_v4 }
0x103b   :  { %v2696_v7 = vsel %vm783_vm2, %v2694_v6, 0.0  ;;  %v2695_v8 = vmul.f32 %v2693_v61, %v2693_v61  ;;  %v2711_v37 = vmul.f32 %v12123_v34, %v2693_v61 }
0x103c   :  { %2697 = vadd.xlane.f32.xlu1 %v2696_v7 }
0x103d   :  { %v2699_v15 = vsel %vm783_vm2, %v2695_v8, 0.0 }
0x103e   :  { %2700 = vadd.xlane.f32.xlu0 %v2699_v15 }
0x10c9   :  { %v2698_v17 = vpop.xlane.xlu1 %2697 }
0x10ca   :  { %v2702_v18 = vmul.f32 0.032258064, %v2698_v17 }
0x10cb   :  { %v2701_v19 = vpop.xlane.xlu0 %2700 }
0x10cc   :  { %13830 = vrsqrt.f32 %v2702_v18  ;;  %v2703_v20 = vmul.f32 0.032258064, %v2701_v19  ;;  %vm2714_vm0 = vcmp.eq.f32.partialorder %v2702_v18, inf  ;;  %v2717_v23 = vand.u32 2147483648, %v2702_v18 }
0x10cd   :  { %vm2716_vm1 = vcmp.eq.f32.partialorder %v2702_v18, 0.0 }
0x10ce   :  { %13832 = vrsqrt.f32 %v2703_v20  ;;  %vm2721_vm4 = vcmp.eq.f32.partialorder %v2703_v20, inf  ;;  %v2724_v30 = vand.u32 2147483648, %v2703_v20  ;;  %vm2723_vm5 = vcmp.eq.f32.partialorder %v2703_v20, 0.0 }
0x10d6   :  { %v13831_v21 = vpop.eup %13830 }
0x10d7   :  { %v2713_v22 = vmul.f32 %v13831_v21, %v2702_v18 }
0x10d8   :  { %v13833_v24 = vpop.eup %13832 }
0x10d9   :  { %v2715_v25 = vsel %vm2714_vm0, %v2702_v18, %v2713_v22  ;;  %v2720_v28 = vmul.f32 %v13833_v24, %v2703_v20 }
0x10da   :  { %v2718_v27 = vsel %vm2716_vm1, %v2717_v23, %v2715_v25 }
0x10db   :  { %v2726_v29 = vadd.f32 1e-06, %v2718_v27  ;;  %v2722_v31 = vsel %vm2721_vm4, %v2703_v20, %v2720_v28  ;;  %v14070_v20 = vld [vmem:[%s16978_s1] ss:$0 sm:$0xff] }
0x10dc   :  { %v2725_v32 = vsel %vm2723_vm5, %v2724_v30, %v2722_v31 }
0x10dd   :  { %13834 = vrcp.f32 %v2726_v29  ;;  %v2727_v33 = vadd.f32 1e-06, %v2725_v32 }
0x10df   :  { %13836 = vrcp.f32 %v2727_v33 }
0x10e7   :  { %v13835_v35 = vpop.eup %13834 }
0x10e8   :  { %v2729_v38 = vmul.f32 %v13835_v35, %v2710_v36 }
0x10e9   :  { %v13837_v39 = vpop.eup %13836 }
0x10ea   :  { %v2731_v41 = vmul.f32 %v13837_v39, %v2711_v37  ;;  %v2738_v42 = vadd.f32 %v12124_v40, %v2729_v38 }
0x10ec   :  { %v2739_v43 = vadd.f32 %v12124_v40, %v2731_v41 }
0x10ee   :  { %v2768_v45 = vpack.c.bf16 %v2739_v43, %v2738_v42 }
0x10f0   :  { %12888 = vmatmul.mubr.msk.bf16.vlgmr.msra.gmra.mrb[32].mxu0 %vm783_vm2, %v2768_v45  ;;  %12904 = vmatmul.mubr.msk.bf16.vlgmr.msra.gmra.mrb[28].mxu1 %vm783_vm2, %v2768_v45 }
0x10f1   :  { %12892 = vmatpush3.bf16.msra.mxu0 %v13726_v44  ;;  %12895 = vmatprep.mubr.msk.bf16.mxu0 %vm14933_vm3, %v14932_v26 }
0x10f2   :  { %12893 = vmatprep.subr.bf16.mxu0 %v14932_v26  ;;  %12919 = vmatprep.mubr.msk.f32.mxu1 %vm14933_vm3, %v14932_v26 }
0x10f5   :  { %12894 = vmatpush3.bf16.msra.mxu0 %v13727_v46 }
0x10f6   :  { %12907 = vmatprep.subr.mxu0 %v14932_v26 }
0x10f8   :  { %12896 = vmatmul.mubr.msk.bf16.vlgmr.msra.gmra.mrb[36].mxu0 %vm783_vm2, %v2768_v45 }
0x10f9   :  { %12909 = vmatprep.mubr.msk.f32.mxu0 %vm14933_vm3, %v14932_v26 }
0x11c3   :  { %v2824_v48 = vpop.f32.mrb[32].mxu0  ;;  %v2942_v49 = vpop.f32.mrb[28].mxu1 }
0x11c4   :  { %v2825_v51 = vadd.f32 %v12141_v47, %v2824_v48  ;;  %v12889_v52 = vpop.f32.mrb[33].mxu0  ;;  %v12905_v53 = vpop.f32.mrb[29].mxu1  ;;  %v15847_v58 = vadd.f32 %v12149_v54, %v2942_v49 }
0x11c5   :  { %v2827_v55 = vpop.f32.mrb[34].mxu0  ;;  %v2945_v56 = vpop.f32.mrb[30].mxu1 }
0x11c6   :  { %v15838_v50 = vadd.f32 %v12149_v54, %v2945_v56  ;;  %3275 = vrot.lane.b32.xlu1 %v2825_v51, %s14935_s29  ;;  %3109 = vrot.lane.b32.xlu0 %v2825_v51, %s14934_s23  ;;  %v12890_v57 = vpop.f32.mrb[35].mxu0  ;;  %v12906_v60 = vpop.f32.mrb[31].mxu1  ;;  %v2828_v0 = vadd.f32 %v12141_v47, %v2827_v55 }
0x11ca   :  { %3440 = vrot.lane.b32.xlu0 %v2825_v51, %s14936_s4 }
0x11cb   :  { %v2883_v63 = vpop.f32.mrb[36].mxu0 }
0x11cc   :  { %v2884_v2 = vadd.f32 %v12145_v12, %v2883_v63  ;;  %v12897_v10 = vpop.f32.mrb[37].mxu0 }
0x11cd   :  { %v2886_v3 = vpop.f32.mrb[38].mxu0 }
0x11ce   :  { %3780 = vrot.lane.b32.xlu0 %v2828_v0, %s14934_s23  ;;  %3111 = vrot.lane.b32.xlu1 %v2884_v2, %s14934_s23  ;;  %v12898_v11 = vpop.f32.mrb[39].mxu0  ;;  %v2887_v4 = vadd.f32 %v12145_v12, %v2886_v3 }
0x11cf   :  { %12908 = vmatpush3.xpose.msk.msra.mxu0 %vm1049_vm8, %v2884_v2 }
0x11d0   :  { %12912 = vmatprep.subr.mxu0 %v14932_v26 }
0x11d2   :  { %12910 = vmatmul.mubr.msk.f32.vlgmr.msra.gmra.mrb[26].mxu0 %vm1049_vm8, %v2825_v51  ;;  %3946 = vrot.lane.b32.xlu0 %v2828_v0, %s14935_s29 }
0x11d3   :  { %3277 = vrot.lane.b32.xlu1 %v2884_v2, %s14935_s29  ;;  %12913 = vmatpush3.msra.mxu0 %v15847_v58 }
0x11d4   :  { %12914 = vmatprep.mubr.msk.f32.mxu0 %vm14933_vm3, %v14932_v26  ;;  %12922 = vmatprep.subr.mxu0 %v14932_v26 }
0x11d6   :  { %4111 = vrot.lane.b32.xlu0 %v2828_v0, %s14936_s4 }
0x11d7   :  { %3442 = vrot.lane.b32.xlu1 %v2884_v2, %s14936_s4 }
0x11db   :  { %3782 = vrot.lane.b32.xlu1 %v2887_v4, %s14934_s23 }
0x11df   :  { %3948 = vrot.lane.b32.xlu1 %v2887_v4, %s14935_s29 }
0x11e3   :  { %4113 = vrot.lane.b32.xlu1 %v2887_v4, %s14936_s4 }
0x1238   :  { %v3276_v5 = vpop.permute.xlu1 %3275  ;;  %v3110_v6 = vpop.permute.xlu0 %3109 }
0x123c   :  { %v3441_v15 = vpop.permute.xlu0 %3440 }
0x1240   :  { %v3112_v61 = vpop.permute.xlu1 %3111  ;;  %v3781_v13 = vpop.permute.xlu0 %3780 }
0x1241   :  { %12918 = vmatpush3.xpose.msk.msra.mxu1 %vm1049_vm8, %v3112_v61 }
0x1242   :  { %12927 = vmatprep.subr.mxu1 %v14932_v26 }
0x1244   :  { %12920 = vmatmul.mubr.msk.f32.vlgmr.msra.gmra.mrb[32].mxu1 %vm1049_vm8, %v3110_v6  ;;  %v3947_v16 = vpop.permute.xlu0 %3946 }
0x1245   :  { %v3278_v7 = vpop.permute.xlu1 %3277  ;;  %12929 = vmatprep.mubr.msk.f32.mxu1 %vm14933_vm3, %v14932_v26 }
0x1246   :  { %12928 = vmatpush3.xpose.msk.msra.mxu1 %vm1049_vm8, %v3278_v7 }
0x1247   :  { %12937 = vmatprep.subr.mxu1 %v14932_v26 }
0x1248   :  { %v4112_v18 = vpop.permute.xlu0 %4111 }
0x1249   :  { %12930 = vmatmul.mubr.msk.f32.vlgmr.msra.gmra.mrb[34].mxu1 %vm1049_vm8, %v3276_v5  ;;  %v3443_v8 = vpop.permute.xlu1 %3442 }
0x124a   :  { %12938 = vmatpush3.xpose.msk.msra.mxu1 %vm1049_vm8, %v3443_v8  ;;  %12939 = vmatprep.mubr.msk.f32.mxu1 %vm14933_vm3, %v14932_v26 }
0x124b   :  { %12947 = vmatprep.subr.mxu1 %v14932_v26 }
0x124d   :  { %12940 = vmatmul.mubr.msk.f32.vlgmr.msra.gmra.mrb[36].mxu1 %vm1049_vm8, %v3441_v15  ;;  %v3783_v9 = vpop.permute.xlu1 %3782 }
0x124e   :  { %12948 = vmatpush3.xpose.msk.msra.mxu1 %vm1049_vm8, %v2887_v4  ;;  %12949 = vmatprep.mubr.msk.f32.mxu1 %vm14933_vm3, %v14932_v26 }
0x124f   :  { %12957 = vmatprep.subr.mxu1 %v14932_v26 }
0x1251   :  { %12950 = vmatmul.mubr.msk.f32.vlgmr.msra.gmra.mrb[38].mxu1 %vm1049_vm8, %v2828_v0  ;;  %v3949_v14 = vpop.permute.xlu1 %3948 }
0x1252   :  { %12958 = vmatpush3.xpose.msk.msra.mxu1 %vm1049_vm8, %v3783_v9  ;;  %12959 = vmatprep.mubr.msk.f32.mxu1 %vm14933_vm3, %v14932_v26 }
0x1253   :  { %12967 = vmatprep.subr.mxu1 %v14932_v26 }
0x1255   :  { %12960 = vmatmul.mubr.msk.f32.vlgmr.msra.gmra.mrb[40].mxu1 %vm1049_vm8, %v3781_v13  ;;  %v4114_v17 = vpop.permute.xlu1 %4113 }
0x1256   :  { %12968 = vmatpush3.xpose.msk.msra.mxu1 %vm1049_vm8, %v3949_v14  ;;  %12969 = vmatprep.mubr.msk.f32.mxu1 %vm14933_vm3, %v14932_v26 }
0x1257   :  { %12977 = vmatprep.subr.mxu1 %v14932_v26 }
0x1259   :  { %12970 = vmatmul.mubr.msk.f32.vlgmr.msra.gmra.mrb[42].mxu1 %vm1049_vm8, %v3947_v16 }
0x125a   :  { %12978 = vmatpush3.xpose.msk.msra.mxu1 %vm1049_vm8, %v4114_v17  ;;  %12979 = vmatprep.mubr.msk.f32.mxu1 %vm14933_vm3, %v14932_v26 }
0x125b   :  { %12987 = vmatprep.subr.bf16.mxu1 %v14932_v26 }
0x125d   :  { %12980 = vmatmul.mubr.msk.f32.vlgmr.msra.gmra.mrb[44].mxu1 %vm1049_vm8, %v4112_v18 }
0x125e   :  { %12991 = vmatprep.mubr.msk.bf16.mxu1 %vm14933_vm3, %v14932_v26 }
0x12a5   :  { %v3021_v19 = vpop.f32.mrb[26].mxu0 }
0x12a6   :  { %v3022_v21 = vadd.f32 %v14070_v20, %v3021_v19  ;;  %v12911_v22 = vpop.f32.mrb[27].mxu0 }
0x12a8   :  { %v3025_v23 = vsel %vm1049_vm8, %v3022_v21, -inf }
0x12a9   :  { %3026 = vmax.xlane.f32.xlu1 %v3025_v23 }
0x1317   :  { %v3183_v24 = vpop.f32.mrb[32].mxu1 }
0x1318   :  { %v3184_v25 = vadd.f32 %v14070_v20, %v3183_v24  ;;  %v12921_v27 = vpop.f32.mrb[33].mxu1 }
0x131a   :  { %v3187_v28 = vsel %vm1049_vm8, %v3184_v25, -inf }
0x131b   :  { %3188 = vmax.xlane.f32.xlu0 %v3187_v28 }
0x131c   :  { %v3349_v29 = vpop.f32.mrb[34].mxu1 }
0x131d   :  { %v3350_v30 = vadd.f32 %v14070_v20, %v3349_v29  ;;  %v12931_v31 = vpop.f32.mrb[35].mxu1 }
0x131f   :  { %v3353_v32 = vsel %vm1049_vm8, %v3350_v30, -inf }
0x1320   :  { %3354 = vmax.xlane.f32.xlu0 %v3353_v32  ;;  %v3514_v33 = vpop.f32.mrb[36].mxu1 }
0x1321   :  { %v3515_v34 = vadd.f32 %v14070_v20, %v3514_v33  ;;  %v12941_v35 = vpop.f32.mrb[37].mxu1 }
0x1323   :  { %v3518_v36 = vsel %vm1049_vm8, %v3515_v34, -inf }
0x1324   :  { %3519 = vmax.xlane.f32.xlu0 %v3518_v36  ;;  %v3692_v37 = vpop.f32.mrb[38].mxu1 }
0x1325   :  { %v3693_v38 = vadd.f32 %v15676_v59, %v3692_v37  ;;  %v12951_v39 = vpop.f32.mrb[39].mxu1 }
0x1327   :  { %v3696_v40 = vsel %vm1049_vm8, %v3693_v38, -inf }
0x1328   :  { %3697 = vmax.xlane.f32.xlu1 %v3696_v40  ;;  %v3854_v41 = vpop.f32.mrb[40].mxu1 }
0x1329   :  { %v3855_v42 = vadd.f32 %v15676_v59, %v3854_v41  ;;  %v12961_v43 = vpop.f32.mrb[41].mxu1 }
0x132b   :  { %v3858_v44 = vsel %vm1049_vm8, %v3855_v42, -inf }
0x132c   :  { %3859 = vmax.xlane.f32.xlu0 %v3858_v44  ;;  %v4020_v45 = vpop.f32.mrb[42].mxu1 }
0x132d   :  { %v4021_v46 = vadd.f32 %v15676_v59, %v4020_v45  ;;  %v12971_v47 = vpop.f32.mrb[43].mxu1 }
0x132f   :  { %v4024_v48 = vsel %vm1049_vm8, %v4021_v46, -inf }
0x1330   :  { %4025 = vmax.xlane.f32.xlu1 %v4024_v48  ;;  %v4185_v49 = vpop.f32.mrb[44].mxu1 }
0x1331   :  { %v4186_v51 = vadd.f32 %v15676_v59, %v4185_v49  ;;  %v12981_v52 = vpop.f32.mrb[45].mxu1 }
0x1333   :  { %v4189_v53 = vsel %vm1049_vm8, %v4186_v51, -inf }
0x1334   :  { %4190 = vmax.xlane.f32.xlu0 %v4189_v53 }
0x1336   :  { %v3027_v54 = vpop.xlane.xlu1 %3026 }
0x1337   :  { %v3028_v55 = vsub.f32 %v3022_v21, %v3027_v54 }
0x1339   :  { %v3029_v56 = vmul.f32 1.442695, %v3028_v55 }
0x133b   :  { %13838 = vpow2.f32 %v3029_v56 }
0x1341   :  { %3199 = vrot.lane.b32.xlu1 %v15847_v58, %s14934_s23 }
0x1345   :  { %v13839_v57 = vpop.eup %13838 }
0x1346   :  { %v3031_v60 = vsel %vm1049_vm8, %v13839_v57, 0.0 }
0x1365   :  { %3032 = vadd.xlane.f32.xlu1 %v3031_v60 }
0x13a8   :  { %v3189_v12 = vpop.xlane.xlu0 %3188 }
0x13a9   :  { %v3190_v63 = vsub.f32 %v3184_v25, %v3189_v12 }
0x13ab   :  { %v3191_v0 = vmul.f32 1.442695, %v3190_v63 }
0x13ad   :  { %13840 = vpow2.f32 %v3191_v0  ;;  %v3355_v59 = vpop.xlane.xlu0 %3354 }
0x13ae   :  { %v3356_v2 = vsub.f32 %v3350_v30, %v3355_v59 }
0x13b0   :  { %v3357_v10 = vmul.f32 1.442695, %v3356_v2 }
0x13b1   :  { %v3520_v3 = vpop.xlane.xlu0 %3519 }
0x13b2   :  { %13842 = vpow2.f32 %v3357_v10  ;;  %v3521_v11 = vsub.f32 %v3515_v34, %v3520_v3 }
0x13b4   :  { %v3522_v4 = vmul.f32 1.442695, %v3521_v11 }
0x13b5   :  { %v3698_v9 = vpop.xlane.xlu1 %3697 }
0x13b6   :  { %13844 = vpow2.f32 %v3522_v4  ;;  %v3699_v14 = vsub.f32 %v3693_v38, %v3698_v9  ;;  %v13729_v9 = vld [vmem:[%s16979_s2 + $0x18] sm:$0xff]  }
0x13b7   :  { %v13841_v5 = vpop.eup %13840 }
0x13b8   :  { %v3193_v61 = vsel %vm1049_vm8, %v13841_v5, 0.0  ;;  %v3700_v19 = vmul.f32 1.442695, %v3699_v14 }
0x13b9   :  { %3194 = vadd.xlane.f32.xlu0 %v3193_v61  ;;  %v3860_v13 = vpop.xlane.xlu0 %3859 }
0x13ba   :  { %v3861_v16 = vsub.f32 %v3855_v42, %v3860_v13  ;;  %13846 = vpow2.f32 %v3700_v19 }
0x13bc   :  { %v13843_v6 = vpop.eup %13842  ;;  %v3862_v21 = vmul.f32 1.442695, %v3861_v16 }
0x13bd   :  { %v3359_v7 = vsel %vm1049_vm8, %v13843_v6, 0.0  ;;  %v4026_v17 = vpop.xlane.xlu1 %4025 }
0x13be   :  { %3360 = vadd.xlane.f32.xlu1 %v3359_v7  ;;  %v4027_v20 = vsub.f32 %v4021_v46, %v4026_v17  ;;  %13848 = vpow2.f32 %v3862_v21  ;;  %v13728_v7 = vld [vmem:[%s16979_s2 + $0x10] sm:$0xff]  }
0x13bf   :  { %12988 = vmatpush3.bf16.msra.mxu1 %v13728_v7 }
0x13c0   :  { %v15914_v8 = vpop.eup %13844  ;;  %v4028_v23 = vmul.f32 1.442695, %v4027_v20  ;;  %12989 = vmatprep.subr.bf16.mxu1 %v14932_v26 }
0x13c1   :  { %v3524_v15 = vsel %vm1049_vm8, %v15914_v8, 0.0  ;;  %v4191_v18 = vpop.xlane.xlu0 %4190  ;;  %v3200_v25 = vpop.permute.xlu1 %3199 }
0x13c2   :  { %3525 = vadd.xlane.f32.xlu0 %v3524_v15  ;;  %v4192_v22 = vsub.f32 %v4186_v51, %v4191_v18  ;;  %13850 = vpow2.f32 %v4028_v23 }
0x13c3   :  { %12990 = vmatpush3.bf16.msra.mxu1 %v13729_v9 }
0x13c4   :  { %v4193_v24 = vmul.f32 1.442695, %v4192_v22  ;;  %v13847_v27 = vpop.eup %13846  ;;  %13003 = vmatprep.subr.bf16.mxu1 %v14932_v26 }
0x13c5   :  { %v3702_v30 = vsel %vm1049_vm8, %v13847_v27, 0.0 }
0x13c6   :  { %13852 = vpow2.f32 %v4193_v24 }
0x13cf   :  { %3529 = vrot.lane.b32.xlu1 %v15847_v58, %s14936_s4 }
0x13d3   :  { %3870 = vrot.lane.b32.xlu1 %v15838_v50, %s14934_s23 }
0x13d8   :  { %3364 = vrot.lane.b32.xlu0 %v15847_v58, %s14935_s29  ;;  %v13849_v58 = vpop.eup %13848 }
0x13d9   :  { %v15924_v29 = vpop.eup %13850  ;;  %v3864_v31 = vsel %vm1049_vm8, %v13849_v58, 0.0 }
0x13da   :  { %v15928_v32 = vpop.eup %13852  ;;  %v4030_v33 = vsel %vm1049_vm8, %v15924_v29, 0.0 }
0x13db   :  { %v4195_v34 = vsel %vm1049_vm8, %v15928_v32, 0.0 }
0x13f2   :  { %v3033_v28 = vpop.xlane.xlu1 %3032 }
0x13f3   :  { %13854 = vrcp.f32 %v3033_v28 }
0x13f7   :  { %3703 = vadd.xlane.f32.xlu1 %v3702_v30  ;;  %3865 = vadd.xlane.f32.xlu0 %v3864_v31 }
0x13fb   :  { %4031 = vadd.xlane.f32.xlu1 %v4030_v33  ;;  %4196 = vadd.xlane.f32.xlu0 %v4195_v34 }
0x13fd   :  { %v13855_v35 = vpop.eup %13854 }
0x13fe   :  { %v3035_v36 = vmul.f32 %v13855_v35, %v13839_v57 }
0x1400   :  { %12915 = vmatmul.mubr.msk.f32.vlgmr.msra.gmra.mrb[40].mxu0 %vm1049_vm8, %v3035_v36 }
0x1401   :  { %12923 = vmatpush3.msra.mxu0 %v3200_v25  ;;  %12924 = vmatprep.mubr.msk.f32.mxu0 %vm14933_vm3, %v14932_v26 }
0x1402   :  { %12932 = vmatprep.subr.mxu0 %v14932_v26 }
0x140c   :  { %4035 = vrot.lane.b32.xlu1 %v15838_v50, %s14935_s29 }
0x1411   :  { %4200 = vrot.lane.b32.xlu0 %v15838_v50, %s14936_s4 }
0x1446   :  { %v3195_v37 = vpop.xlane.xlu0 %3194 }
0x1447   :  { %13856 = vrcp.f32 %v3195_v37 }
0x144b   :  { %v3361_v38 = vpop.xlane.xlu1 %3360 }
0x144c   :  { %13858 = vrcp.f32 %v3361_v38 }
0x144f   :  { %v3526_v39 = vpop.xlane.xlu0 %3525  ;;  %v3530_v45 = vpop.permute.xlu1 %3529 }
0x1450   :  { %13860 = vrcp.f32 %v3526_v39  ;;  %v12177_v39 = vld [vmem:[#allocation10 + $0x1] ss:$0 sm:$0xff] }
0x1451   :  { %v13857_v40 = vpop.eup %13856 }
0x1452   :  { %v3197_v41 = vmul.f32 %v13857_v40, %v13841_v5 }
0x1453   :  { %v3365_v42 = vpop.permute.xlu0 %3364  ;;  %v3871_v48 = vpop.permute.xlu1 %3870 }
0x1454   :  { %12925 = vmatmul.mubr.msk.f32.vlgmr.msra.gmra.mrb[42].mxu0 %vm1049_vm8, %v3197_v41 }
0x1455   :  { %12933 = vmatpush3.msra.mxu0 %v3365_v42  ;;  %12934 = vmatprep.mubr.msk.f32.mxu0 %vm14933_vm3, %v14932_v26 }
0x1456   :  { %v13859_v43 = vpop.eup %13858  ;;  %12942 = vmatprep.subr.mxu0 %v14932_v26 }
0x1457   :  { %v3363_v44 = vmul.f32 %v13859_v43, %v13843_v6 }
0x1459   :  { %12935 = vmatmul.mubr.msk.f32.vlgmr.msra.gmra.mrb[44].mxu0 %vm1049_vm8, %v3363_v44 }
0x145a   :  { %v13861_v46 = vpop.eup %13860  ;;  %12943 = vmatpush3.msra.mxu0 %v3530_v45  ;;  %12944 = vmatprep.mubr.msk.f32.mxu0 %vm14933_vm3, %v14932_v26 }
0x145b   :  { %12952 = vmatprep.subr.mxu0 %v14932_v26  ;;  %v3528_v47 = vmul.f32 %v13861_v46, %v15914_v8 }
0x145d   :  { %12945 = vmatmul.mubr.msk.f32.vlgmr.msra.gmra.mrb[46].mxu0 %vm1049_vm8, %v3528_v47 }
0x145e   :  { %12953 = vmatpush3.msra.mxu0 %v15838_v50  ;;  %12954 = vmatprep.mubr.msk.f32.mxu0 %vm14933_vm3, %v14932_v26 }
0x145f   :  { %12962 = vmatprep.subr.mxu0 %v14932_v26 }
0x1484   :  { %v3704_v49 = vpop.xlane.xlu1 %3703  ;;  %v3866_v51 = vpop.xlane.xlu0 %3865 }
0x1485   :  { %13862 = vrcp.f32 %v3704_v49 }
0x1486   :  { %13864 = vrcp.f32 %v3866_v51 }
0x1488   :  { %v4032_v52 = vpop.xlane.xlu1 %4031  ;;  %v4197_v53 = vpop.xlane.xlu0 %4196 }
0x1489   :  { %13866 = vrcp.f32 %v4032_v52 }
0x148a   :  { %13868 = vrcp.f32 %v4197_v53 }
0x148c   :  { %v4036_v60 = vpop.permute.xlu1 %4035  ;;  %v4201_v0 = vpop.permute.xlu0 %4200 }
0x148f   :  { %v13863_v54 = vpop.eup %13862 }
0x1490   :  { %v3706_v55 = vmul.f32 %v13863_v54, %v13847_v27  ;;  %v13865_v56 = vpop.eup %13864 }
0x1491   :  { %v3868_v50 = vmul.f32 %v13865_v56, %v13849_v58 }
0x1492   :  { %12955 = vmatmul.mubr.msk.f32.vlgmr.msra.gmra.mrb[48].mxu0 %vm1049_vm8, %v3706_v55 }
0x1493   :  { %12963 = vmatpush3.msra.mxu0 %v3871_v48  ;;  %12964 = vmatprep.mubr.msk.f32.mxu0 %vm14933_vm3, %v14932_v26  ;;  %v13867_v57 = vpop.eup %13866 }
0x1494   :  { %12972 = vmatprep.subr.mxu0 %v14932_v26  ;;  %v4034_v12 = vmul.f32 %v13867_v57, %v15924_v29  ;;  %v13869_v63 = vpop.eup %13868 }
0x1495   :  { %v4199_v59 = vmul.f32 %v13869_v63, %v15928_v32  ;;  %v4636_v63 = vld [vmem:[%s16982_s10] sm:$0x7] }
0x1496   :  { %12965 = vmatmul.mubr.msk.f32.vlgmr.msra.gmra.mrb[50].mxu0 %vm1049_vm8, %v3868_v50 }
0x1497   :  { %12973 = vmatpush3.msra.mxu0 %v4036_v60  ;;  %12974 = vmatprep.mubr.msk.f32.mxu0 %vm14933_vm3, %v14932_v26  ;;  %v13730_v60 = vld [vmem:[%s16980_s24 + $0x10] sm:$0xff]  }
0x1498   :  { %12982 = vmatprep.subr.mxu0 %v14932_v26 }
0x149a   :  { %12975 = vmatmul.mubr.msk.f32.vlgmr.msra.gmra.mrb[52].mxu0 %vm1049_vm8, %v4034_v12  ;;  %v13731_v12 = vld [vmem:[%s16980_s24 + $0x18] sm:$0xff]  }
0x149b   :  { %12983 = vmatpush3.msra.mxu0 %v4201_v0  ;;  %12984 = vmatprep.mubr.msk.f32.mxu0 %vm14933_vm3, %v14932_v26  ;;  %v13732_v0 = vld [vmem:[%s16981_s7 + $0x20] sm:$0xff]  }
0x149c   :  { %12995 = vmatprep.subr.bf16.mxu0 %v14932_v26 }
0x149e   :  { %12985 = vmatmul.mubr.msk.f32.vlgmr.msra.gmra.mrb[54].mxu0 %vm1049_vm8, %v4199_v59  ;;  %v13733_v59 = vld [vmem:[%s16981_s7 + $0x28] sm:$0xff]  }
0x149f   :  { %12999 = vmatprep.mubr.msk.bf16.mxu0 %vm14933_vm3, %v14932_v26  ;;  %12996 = vmatpush3.bf16.msra.mxu0 %v13730_v60 }
0x14a0   :  { %12997 = vmatprep.subr.bf16.mxu0 %v14932_v26 }
0x14a3   :  { %12998 = vmatpush3.bf16.msra.mxu0 %v13731_v12 }
0x14a4   :  { %13015 = vmatprep.subr.msk.mxu0 %vm4651_vm6, %v4636_v63 }
0x14d3   :  { %v3105_v2 = vpop.f32.mrb[40].mxu0 }
0x14d4   :  { %v12916_v10 = vpop.f32.mrb[41].mxu0 }
0x1527   :  { %v3271_v3 = vpop.f32.mrb[42].mxu0 }
0x1528   :  { %v12926_v11 = vpop.f32.mrb[43].mxu0 }
0x152c   :  { %v3436_v4 = vpop.f32.mrb[44].mxu0 }
0x152d   :  { %v12936_v5 = vpop.f32.mrb[45].mxu0 }
0x1530   :  { %v3601_v61 = vpop.f32.mrb[46].mxu0 }
0x1531   :  { %v12946_v6 = vpop.f32.mrb[47].mxu0 }
0x1565   :  { %v3776_v8 = vpop.f32.mrb[48].mxu0 }
0x1566   :  { %v12956_v15 = vpop.f32.mrb[49].mxu0 }
0x1569   :  { %v3942_v13 = vpop.f32.mrb[50].mxu0 }
0x156a   :  { %v13633_v14 = vpack.i.bf16 %v3942_v13, %v3271_v3  ;;  %v12966_v16 = vpop.f32.mrb[51].mxu0 }
0x156c   :  { %13634 = vrot.lane.b32.xlu1 %v13633_v14, %s14937_s13 }
0x156d   :  { %v4107_v17 = vpop.f32.mrb[52].mxu0 }
0x156e   :  { %v13638_v18 = vpack.i.bf16 %v4107_v17, %v3436_v4  ;;  %v12976_v19 = vpop.f32.mrb[53].mxu0 }
0x1570   :  { %13639 = vrot.lane.b32.xlu0 %v13638_v18, %s14897_s26  ;;  %v12181_v18 = vld [vmem:[#allocation12 + $0x1] ss:$0 sm:$0xff] }
0x1571   :  { %v4272_v20 = vpop.f32.mrb[54].mxu0 }
0x1572   :  { %v13643_v21 = vpack.i.bf16 %v4272_v20, %v3601_v61  ;;  %v12986_v22 = vpop.f32.mrb[55].mxu0 }
0x1574   :  { %13644 = vrot.lane.b32.xlu1 %v13643_v21, %s14938_s9 }
0x15de   :  { %v13635_v23 = vpop.permute.xlu1 %13634 }
0x15df   :  { %v13637_v25 = vunpack.i.h.bf16 %v13635_v23  ;;  %v13636_v27 = vunpack.i.l.bf16 %v13635_v23 }
0x15e1   :  { %v4288_v30 = vsel %vm1049_vm8, %v3776_v8, %v13637_v25  ;;  %v3617_v31 = vsel %vm1049_vm8, %v3105_v2, %v13636_v27 }
0x15e2   :  { %v13640_v24 = vpop.permute.xlu0 %13639 }
0x15e3   :  { %v13642_v28 = vunpack.i.h.bf16 %v13640_v24  ;;  %v13641_v58 = vunpack.i.l.bf16 %v13640_v24  ;;  %v12182_v24 = vld [vmem:[#allocation13 + $0x1] ss:$0 sm:$0xff] }
0x15e5   :  { %v4289_v34 = vsel %vm1719_vm9, %v4288_v30, %v13642_v28  ;;  %v3618_v35 = vsel %vm1719_vm9, %v3617_v31, %v13641_v58  ;;  %v4635_v30 = vld [vmem:[%s16983_s27 + $0x8] sm:$0xff]  ;;  %v13734_v31 = vld [vmem:[%s16981_s7 + $0x30] sm:$0xff]  }
0x15e6   :  { %v13645_v29 = vpop.permute.xlu1 %13644 }
0x15e7   :  { %v13647_v32 = vunpack.i.h.bf16 %v13645_v29  ;;  %v13646_v33 = vunpack.i.l.bf16 %v13645_v29  ;;  %v4634_v29 = vld [vmem:[%s16983_s27] sm:$0xff] }
0x15e9   :  { %v3619_v36 = vsel %vm1721_vm10, %v3618_v35, %v13646_v33  ;;  %v4290_v37 = vsel %vm1721_vm10, %v4289_v34, %v13647_v32  ;;  %v13735_v32 = vld [vmem:[%s16981_s7 + $0x38] sm:$0xff]   ;;  %v12195_v33 = vld [vmem:[#allocation15 + $0x1] ss:$0 sm:$0xff] }
0x15ea   :  { %v4291_v38 = vpack.c.bf16 %v4290_v37, %v3619_v36 }
0x15ec   :  { %12992 = vmatmul.mubr.msk.bf16.vlgmr.msra.gmra.mrb[48].mxu1 %vm783_vm2, %v4291_v38 }
0x15ed   :  { %13011 = vmatprep.mubr.msk.bf16.mxu1 %vm14933_vm3, %v14932_v26  ;;  %13004 = vmatpush3.bf16.msra.mxu1 %v13732_v0 }
0x15ee   :  { %13005 = vmatprep.subr.bf16.mxu1 %v14932_v26 }
0x15f1   :  { %13006 = vmatpush3.bf16.msra.mxu1 %v13733_v59 }
0x15f2   :  { %13007 = vmatprep.subr.bf16.mxu1 %v14932_v26 }
0x15f5   :  { %13008 = vmatpush3.bf16.msra.mxu1 %v13734_v31  ;;  %v12212_v31 = vld [vmem:[#allocation22] ss:$0 sm:$0xff] }
0x15f6   :  { %13009 = vmatprep.subr.bf16.mxu1 %v14932_v26 }
0x15f9   :  { %13010 = vmatpush3.bf16.msra.mxu1 %v13735_v32 }
0x15fa   :  { %13028 = vmatprep.subr.bf16.mxu1 %v14932_v26 }
0x16bf   :  { %v4347_v40 = vpop.f32.mrb[48].mxu1 }
0x16c0   :  { %v4348_v41 = vadd.f32 %v12177_v39, %v4347_v40  ;;  %v12993_v42 = vpop.f32.mrb[49].mxu1 }
0x16c1   :  { %v4350_v43 = vpop.f32.mrb[50].mxu1  ;;  %v12207_v42 = vld [vmem:[%s16984_s3] ss:$0 sm:$0xff] }
0x16c2   :  { %v15990_v44 = vadd.f32 %v4348_v41, %v15804_v62  ;;  %v4351_v45 = vadd.f32 %v12177_v39, %v4350_v43  ;;  %v12994_v46 = vpop.f32.mrb[51].mxu1 }
0x16c3   :  { %v4731_v46 = vld [vmem:[%s16985_s11 + $0x8] sm:$0xff] }
0x16c4   :  { %v15993_v47 = vadd.f32 %v4351_v45, %v15807_v1  ;;  %v4360_v48 = vsel %vm783_vm2, %v15990_v44, 0.0 }
0x16c5   :  { %4361 = vadd.xlane.f32.xlu0 %v4360_v48 }
0x16c6   :  { %v4363_v49 = vsel %vm783_vm2, %v15993_v47, 0.0 }
0x16c7   :  { %4364 = vadd.xlane.f32.xlu1 %v4363_v49 }
0x1752   :  { %v4362_v51 = vpop.xlane.xlu0 %4361 }
0x1753   :  { %v4366_v52 = vmul.f32 0.03125, %v4362_v51  ;;  %v4730_v51 = vld [vmem:[%s16985_s11] sm:$0xff] }
0x1754   :  { %v4365_v62 = vpop.xlane.xlu1 %4364 }
0x1755   :  { %v4368_v53 = vsub.f32 %v15990_v44, %v4366_v52  ;;  %v4367_v54 = vmul.f32 0.03125, %v4365_v62 }
0x1757   :  { %v4369_v1 = vsub.f32 %v15993_v47, %v4367_v54  ;;  %v4370_v55 = vmul.f32 %v4368_v53, %v4368_v53  ;;  %v4386_v20 = vmul.f32 %v12181_v18, %v4368_v53 }
0x1759   :  { %v4372_v56 = vsel %vm783_vm2, %v4370_v55, 0.0  ;;  %v4371_v50 = vmul.f32 %v4369_v1, %v4369_v1  ;;  %v4387_v21 = vmul.f32 %v12181_v18, %v4369_v1 }
0x175a   :  { %4373 = vadd.xlane.f32.xlu0 %v4372_v56 }
0x175b   :  { %v4375_v57 = vsel %vm783_vm2, %v4371_v50, 0.0 }
0x175e   :  { %4376 = vadd.xlane.f32.xlu0 %v4375_v57 }
0x17e7   :  { %v4374_v2 = vpop.xlane.xlu0 %4373 }
0x17e8   :  { %v4378_v10 = vmul.f32 0.032258064, %v4374_v2 }
0x17ea   :  { %13870 = vrsqrt.f32 %v4378_v10  ;;  %vm4390_vm7 = vcmp.eq.f32.partialorder %v4378_v10, inf  ;;  %v4393_v61 = vand.u32 2147483648, %v4378_v10  ;;  %vm4392_vm11 = vcmp.eq.f32.partialorder %v4378_v10, 0.0 }
0x17eb   :  { %v4377_v3 = vpop.xlane.xlu0 %4376 }
0x17ec   :  { %v4379_v11 = vmul.f32 0.032258064, %v4377_v3  ;;  %v13737_v3 = vld [vmem:[%s16987_s0] sm:$0xff]  }
0x17ee   :  { %13872 = vrsqrt.f32 %v4379_v11  ;;  %vm4397_vm12 = vcmp.eq.f32.partialorder %v4379_v11, inf  ;;  %v4400_v13 = vand.u32 2147483648, %v4379_v11  ;;  %vm4399_vm13 = vcmp.eq.f32.partialorder %v4379_v11, 0.0 }
0x17f4   :  { %v13871_v4 = vpop.eup %13870 }
0x17f5   :  { %v4389_v5 = vmul.f32 %v13871_v4, %v4378_v10  ;;  %v13739_v4 = vld [vmem:[%s16987_s0 + $0x8] sm:$0xff]  }
0x17f7   :  { %v4391_v6 = vsel %vm4390_vm7, %v4378_v10, %v4389_v5  ;;  %v13736_v10 = vld [vmem:[%s16986_s17] sm:$0xff]  }
0x17f8   :  { %v13873_v7 = vpop.eup %13872  ;;  %v4394_v8 = vsel %vm4392_vm11, %v4393_v61, %v4391_v6 }
0x17f9   :  { %v4402_v15 = vadd.f32 1e-06, %v4394_v8  ;;  %v4396_v9 = vmul.f32 %v13873_v7, %v4379_v11 }
0x17fb   :  { %13874 = vrcp.f32 %v4402_v15  ;;  %v4398_v14 = vsel %vm4397_vm12, %v4379_v11, %v4396_v9  ;;  %v13738_v11 = vld [vmem:[%s16986_s17 + $0x8] sm:$0xff]  }
0x17fc   :  { %v4401_v16 = vsel %vm4399_vm13, %v4400_v13, %v4398_v14 }
0x17fd   :  { %v4403_v17 = vadd.f32 1e-06, %v4401_v16 }
0x17ff   :  { %13876 = vrcp.f32 %v4403_v17 }
0x1805   :  { %v13875_v19 = vpop.eup %13874 }
0x1806   :  { %v4405_v22 = vmul.f32 %v13875_v19, %v4386_v20 }
0x1808   :  { %v4414_v27 = vadd.f32 %v12182_v24, %v4405_v22 }
0x1809   :  { %v13877_v23 = vpop.eup %13876 }
0x180a   :  { %v4407_v25 = vmul.f32 %v13877_v23, %v4387_v21 }
0x180c   :  { %v4415_v28 = vadd.f32 %v12182_v24, %v4407_v25 }
0x180e   :  { %v4434_v58 = vpack.c.bf16 %v4415_v28, %v4414_v27  ;;  %v12211_v28 = vld [vmem:[#allocation21] ss:$0 sm:$0xff] }
0x1810   :  { %13000 = vmatmul.mubr.msk.bf16.vlgmr.msra.gmra.mrb[56].mxu0 %vm783_vm2, %v4434_v58 }
0x1811   :  { %13016 = vmatpush3.msk.msra.mxu0 %vm4651_vm6, %v4636_v63  ;;  %13017 = vmatprep.mubr.msk.f32.mxu0 %vm4644_vm14, %v4634_v29 }
0x1812   :  { %13020 = vmatprep.subr.bf16.mxu0 %v14932_v26 }
0x1818   :  { %13018 = vmatmul.mubr.msk.f32.vlgmr.msra.gmra.mrb[60].mxu0 %vm4644_vm14, %v4635_v30 }
0x1819   :  { %13024 = vmatprep.mubr.msk.bf16.mxu0 %vm14933_vm3, %v14932_v26  ;;  %13021 = vmatpush3.bf16.msra.mxu0 %v13736_v10 }
0x181a   :  { %13022 = vmatprep.subr.bf16.mxu0 %v14932_v26 }
0x181d   :  { %13023 = vmatpush3.bf16.msra.mxu0 %v13738_v11 }
0x181e   :  { %13036 = vmatprep.subr.bf16.mxu0 %v14932_v26 }
0x18e3   :  { %v4490_v34 = vpop.f32.mrb[56].mxu0 }
0x18e4   :  { %v4491_v35 = vadd.f32 %v12195_v33, %v4490_v34  ;;  %v13001_v36 = vpop.f32.mrb[57].mxu0 }
0x18e5   :  { %v4493_v37 = vpop.f32.mrb[58].mxu0 }
0x18e6   :  { %v4494_v38 = vadd.f32 %v12195_v33, %v4493_v37  ;;  %v13002_v39 = vpop.f32.mrb[59].mxu0  ;;  %v4497_v40 = vmax.f32 %v4491_v35, 0.0  ;;  %v13740_v37 = vld [vmem:[%s16988_s15] sm:$0xff]  }
0x18e7   :  { %v13741_v39 = vld [vmem:[%s16988_s15 + $0x8] sm:$0xff]  }
0x18e8   :  { %v4498_v41 = vmax.f32 %v4494_v38, 0.0 }
0x18ea   :  { %v4499_v43 = vpack.c.bf16 %v4498_v41, %v4497_v40  ;;  %v12213_v40 = vld [vmem:[#allocation24] ss:$0 sm:$0xff]  ;;  %v12217_v41 = vld [vmem:[#allocation25] ss:$0 sm:$0xff] }
0x18eb   :  { %v13019_v45 = vpop.f32.mrb[60].mxu0 }
0x18ec   :  { %v4727_v48 = vadd.f32 %v13019_v45, %v12207_v42  ;;  %13012 = vmatmul.mubr.msk.bf16.vlgmr.msra.gmra.mrb[52].mxu1 %vm2633_vm15, %v4499_v43  ;;  %v4721_v49 = vpop.f32.mrb[61].mxu0 }
0x18ed   :  { %v4722_v52 = vadd.f32 %v12207_v42, %v4721_v49  ;;  %13032 = vmatprep.mubr.msk.bf16.mxu1 %vm14933_vm3, %v14932_v26  ;;  %13029 = vmatpush3.bf16.msra.mxu1 %v13737_v3 }
0x18ee   :  { %v16029_v62 = vadd.f32 %v4731_v46, %v4727_v48  ;;  %13030 = vmatprep.subr.bf16.mxu1 %v14932_v26 }
0x18ef   :  { %v16031_v53 = vadd.f32 %v4730_v51, %v4722_v52 }
0x18f0   :  { %v4739_v54 = vsel %vm783_vm2, %v16029_v62, 0.0 }
0x18f1   :  { %4740 = vadd.xlane.f32.xlu1 %v4739_v54  ;;  %v4736_v1 = vsel %vm783_vm2, %v16031_v53, 0.0  ;;  %13031 = vmatpush3.bf16.msra.mxu1 %v13739_v4 }
0x18f2   :  { %4737 = vadd.xlane.f32.xlu0 %v4736_v1  ;;  %13044 = vmatprep.subr.mxu1 %v14932_v26 }
0x197e   :  { %v4741_v55 = vpop.xlane.xlu1 %4740 }
0x197f   :  { %v4743_v56 = vmul.f32 0.03125, %v4741_v55  ;;  %v4738_v50 = vpop.xlane.xlu0 %4737  ;;  %v12221_v55 = vld [vmem:[#allocation27] ss:$0 sm:$0xff] }
0x1980   :  { %v4742_v57 = vmul.f32 0.03125, %v4738_v50 }
0x1981   :  { %v4745_v60 = vsub.f32 %v16029_v62, %v4743_v56 }
0x1982   :  { %v4744_v12 = vsub.f32 %v16031_v53, %v4742_v57 }
0x1983   :  { %v4747_v63 = vmul.f32 %v4745_v60, %v4745_v60  ;;  %v4763_v58 = vmul.f32 %v12211_v28, %v4745_v60 }
0x1984   :  { %v4746_v0 = vmul.f32 %v4744_v12, %v4744_v12  ;;  %v4762_v30 = vmul.f32 %v12211_v28, %v4744_v12 }
0x1985   :  { %v4751_v59 = vsel %vm783_vm2, %v4747_v63, 0.0 }
0x1986   :  { %4752 = vadd.xlane.f32.xlu1 %v4751_v59  ;;  %v4748_v2 = vsel %vm783_vm2, %v4746_v0, 0.0 }
0x1987   :  { %4749 = vadd.xlane.f32.xlu0 %v4748_v2 }
0x19bf   :  { %v16049_v5 = vpop.f32.mrb[52].mxu1 }
0x19c0   :  { %v13013_v61 = vpop.f32.mrb[53].mxu1 }
0x19c1   :  { %v16051_v6 = vpop.f32.mrb[54].mxu1 }
0x19c2   :  { %v13014_v7 = vpop.f32.mrb[55].mxu1 }
0x1a13   :  { %v4753_v8 = vpop.xlane.xlu1 %4752 }
0x1a14   :  { %v4755_v15 = vmul.f32 0.032258064, %v4753_v8  ;;  %v4750_v9 = vpop.xlane.xlu0 %4749 }
0x1a15   :  { %v4754_v13 = vmul.f32 0.032258064, %v4750_v9 }
0x1a16   :  { %13878 = vrsqrt.f32 %v4755_v15  ;;  %vm4773_vm0 = vcmp.eq.f32.partialorder %v4755_v15, inf  ;;  %v4776_v18 = vand.u32 2147483648, %v4755_v15  ;;  %vm4775_vm1 = vcmp.eq.f32.partialorder %v4755_v15, 0.0 }
0x1a17   :  { %13880 = vrsqrt.f32 %v4754_v13  ;;  %vm4766_vm4 = vcmp.eq.f32.partialorder %v4754_v13, inf  ;;  %v4769_v21 = vand.u32 2147483648, %v4754_v13  ;;  %vm4768_vm5 = vcmp.eq.f32.partialorder %v4754_v13, 0.0 }
0x1a20   :  { %v13879_v14 = vpop.eup %13878 }
0x1a21   :  { %v13881_v16 = vpop.eup %13880  ;;  %v4772_v17 = vmul.f32 %v13879_v14, %v4755_v15 }
0x1a22   :  { %v4765_v19 = vmul.f32 %v13881_v16, %v4754_v13  ;;  %v679_v16 = vld [vmem:[%s16989_s20] sm:$0xff] }
0x1a23   :  { %v4774_v20 = vsel %vm4773_vm0, %v4755_v15, %v4772_v17 }
0x1a24   :  { %v4777_v22 = vsel %vm4775_vm1, %v4776_v18, %v4774_v20  ;;  %v4767_v23 = vsel %vm4766_vm4, %v4754_v13, %v4765_v19 }
0x1a25   :  { %v4779_v24 = vadd.f32 1e-06, %v4777_v22  ;;  %v4770_v25 = vsel %vm4768_vm5, %v4769_v21, %v4767_v23 }
0x1a26   :  { %v4778_v27 = vadd.f32 1e-06, %v4770_v25 }
0x1a27   :  { %13882 = vrcp.f32 %v4779_v24 }
0x1a28   :  { %13884 = vrcp.f32 %v4778_v27 }
0x1a31   :  { %v13883_v29 = vpop.eup %13882 }
0x1a32   :  { %v13885_v32 = vpop.eup %13884  ;;  %v4783_v33 = vmul.f32 %v13883_v29, %v4763_v58 }
0x1a33   :  { %v4781_v34 = vmul.f32 %v13885_v32, %v4762_v30  ;;  %v680_v32 = vld [vmem:[%s16989_s20 + $0x8] sm:$0xff] }
0x1a34   :  { %v4791_v35 = vadd.f32 %v12212_v31, %v4783_v33 }
0x1a35   :  { %v4790_v36 = vadd.f32 %v12212_v31, %v4781_v34 }
0x1a37   :  { %v4812_v38 = vpack.c.bf16 %v4791_v35, %v4790_v36 }
0x1a39   :  { %13025 = vmatmul.mubr.msk.bf16.vlgmr.msra.gmra.mrb[64].mxu0 %vm783_vm2, %v4812_v38  ;;  %13033 = vmatmul.mubr.msk.bf16.vlgmr.msra.gmra.mrb[56].mxu1 %vm783_vm2, %v4812_v38 }
0x1a3a   :  { %13037 = vmatpush3.bf16.msra.mxu0 %v13740_v37  ;;  %13040 = vmatprep.mubr.msk.bf16.mxu0 %vm14933_vm3, %v14932_v26 }
0x1a3b   :  { %13038 = vmatprep.subr.bf16.mxu0 %v14932_v26  ;;  %13046 = vmatprep.mubr.msk.f32.mxu1 %vm14933_vm3, %v14932_v26 }
0x1a3e   :  { %13039 = vmatpush3.bf16.msra.mxu0 %v13741_v39 }
0x1a3f   :  { %13049 = vmatprep.subr.mxu0 %v14932_v26 }
0x1a41   :  { %13041 = vmatmul.mubr.msk.bf16.vlgmr.msra.gmra.mrb[68].mxu0 %vm783_vm2, %v4812_v38 }
0x1a42   :  { %13051 = vmatprep.mubr.msk.f32.mxu0 %vm14933_vm3, %v14932_v26 }
0x1b0c   :  { %v4868_v42 = vpop.f32.mrb[64].mxu0  ;;  %v4927_v43 = vpop.f32.mrb[56].mxu1 }
0x1b0d   :  { %v4869_v45 = vadd.f32 %v12213_v40, %v4868_v42  ;;  %v4928_v46 = vadd.f32 %v12217_v41, %v4927_v43  ;;  %v13026_v48 = vpop.f32.mrb[65].mxu0  ;;  %v13034_v49 = vpop.f32.mrb[57].mxu1 }
0x1b0e   :  { %v4871_v51 = vpop.f32.mrb[66].mxu0  ;;  %v4930_v52 = vpop.f32.mrb[58].mxu1 }
0x1b0f   :  { %5153 = vrot.lane.b32.xlu1 %v4869_v45, %s14934_s23  ;;  %v13027_v54 = vpop.f32.mrb[67].mxu0  ;;  %5155 = vrot.lane.b32.xlu0 %v4928_v46, %s14934_s23  ;;  %v13035_v1 = vpop.f32.mrb[59].mxu1  ;;  %v4931_v60 = vadd.f32 %v12217_v41, %v4930_v52  ;;  %v4872_v59 = vadd.f32 %v12213_v40, %v4871_v51 }
0x1b10   :  { %13045 = vmatpush3.xpose.msk.msra.mxu1 %vm1049_vm8, %v4928_v46 }
0x1b11   :  { %13054 = vmatprep.subr.mxu1 %v14932_v26 }
0x1b13   :  { %13047 = vmatmul.mubr.msk.f32.vlgmr.msra.gmra.mrb[46].mxu1 %vm1049_vm8, %v4869_v45  ;;  %5321 = vrot.lane.b32.xlu1 %v4928_v46, %s14935_s29 }
0x1b14   :  { %5486 = vrot.lane.b32.xlu0 %v4928_v46, %s14936_s4  ;;  %v4986_v56 = vpop.f32.mrb[68].mxu0  ;;  %13056 = vmatprep.mubr.msk.f32.mxu1 %vm14933_vm3, %v14932_v26 }
0x1b15   :  { %v16075_v50 = vadd.f32 %v12221_v55, %v4986_v56  ;;  %v13042_v57 = vpop.f32.mrb[69].mxu0 }
0x1b16   :  { %v4989_v12 = vpop.f32.mrb[70].mxu0 }
0x1b17   :  { %v16077_v63 = vadd.f32 %v12221_v55, %v4989_v12  ;;  %v13043_v0 = vpop.f32.mrb[71].mxu0  ;;  %13050 = vmatpush3.msra.mxu0 %v16075_v50  ;;  %5319 = vrot.lane.b32.xlu1 %v4869_v45, %s14935_s29 }
0x1b18   :  { %5826 = vrot.lane.b32.xlu0 %v4931_v60, %s14934_s23  ;;  %13059 = vmatprep.subr.mxu0 %v14932_v26 }
0x1b1b   :  { %5484 = vrot.lane.b32.xlu1 %v4869_v45, %s14936_s4 }
0x1b1c   :  { %5992 = vrot.lane.b32.xlu0 %v4931_v60, %s14935_s29 }
0x1b1f   :  { %5824 = vrot.lane.b32.xlu1 %v4872_v59, %s14934_s23 }
0x1b20   :  { %6157 = vrot.lane.b32.xlu0 %v4931_v60, %s14936_s4 }
0x1b23   :  { %5990 = vrot.lane.b32.xlu1 %v4872_v59, %s14935_s29 }
0x1b27   :  { %6155 = vrot.lane.b32.xlu1 %v4872_v59, %s14936_s4 }
0x1b81   :  { %v5154_v2 = vpop.permute.xlu1 %5153  ;;  %v5156_v10 = vpop.permute.xlu0 %5155 }
0x1b82   :  { %13055 = vmatpush3.xpose.msk.msra.mxu1 %vm1049_vm8, %v5156_v10 }
0x1b83   :  { %13064 = vmatprep.subr.mxu1 %v14932_v26 }
0x1b85   :  { %v5322_v3 = vpop.permute.xlu1 %5321  ;;  %13057 = vmatmul.mubr.msk.f32.vlgmr.msra.gmra.mrb[60].mxu1 %vm1049_vm8, %v5154_v2 }
0x1b86   :  { %13065 = vmatpush3.xpose.msk.msra.mxu1 %vm1049_vm8, %v5322_v3  ;;  %13066 = vmatprep.mubr.msk.f32.mxu1 %vm14933_vm3, %v14932_v26  ;;  %v5487_v11 = vpop.permute.xlu0 %5486 }
0x1b87   :  { %13074 = vmatprep.subr.mxu1 %v14932_v26 }
0x1b89   :  { %v5320_v4 = vpop.permute.xlu1 %5319 }
0x1b8a   :  { %13067 = vmatmul.mubr.msk.f32.vlgmr.msra.gmra.mrb[62].mxu1 %vm1049_vm8, %v5320_v4  ;;  %v5827_v7 = vpop.permute.xlu0 %5826 }
0x1b8b   :  { %13075 = vmatpush3.xpose.msk.msra.mxu1 %vm1049_vm8, %v5487_v11  ;;  %13076 = vmatprep.mubr.msk.f32.mxu1 %vm14933_vm3, %v14932_v26 }
0x1b8c   :  { %13084 = vmatprep.subr.mxu1 %v14932_v26 }
0x1b8d   :  { %v5485_v61 = vpop.permute.xlu1 %5484 }
0x1b8e   :  { %13077 = vmatmul.mubr.msk.f32.vlgmr.msra.gmra.mrb[64].mxu1 %vm1049_vm8, %v5485_v61  ;;  %v5993_v15 = vpop.permute.xlu0 %5992 }
0x1b8f   :  { %13085 = vmatpush3.xpose.msk.msra.mxu1 %vm1049_vm8, %v4931_v60  ;;  %13086 = vmatprep.mubr.msk.f32.mxu1 %vm14933_vm3, %v14932_v26 }
0x1b90   :  { %13094 = vmatprep.subr.mxu1 %v14932_v26 }
0x1b91   :  { %v5825_v8 = vpop.permute.xlu1 %5824 }
0x1b92   :  { %13087 = vmatmul.mubr.msk.f32.vlgmr.msra.gmra.mrb[66].mxu1 %vm1049_vm8, %v4872_v59  ;;  %v6158_v13 = vpop.permute.xlu0 %6157 }
0x1b93   :  { %13095 = vmatpush3.xpose.msk.msra.mxu1 %vm1049_vm8, %v5827_v7  ;;  %13096 = vmatprep.mubr.msk.f32.mxu1 %vm14933_vm3, %v14932_v26 }
0x1b94   :  { %13104 = vmatprep.subr.mxu1 %v14932_v26 }
0x1b95   :  { %v5991_v9 = vpop.permute.xlu1 %5990 }
0x1b96   :  { %13097 = vmatmul.mubr.msk.f32.vlgmr.msra.gmra.mrb[68].mxu1 %vm1049_vm8, %v5825_v8 }
0x1b97   :  { %13105 = vmatpush3.xpose.msk.msra.mxu1 %vm1049_vm8, %v5993_v15  ;;  %13106 = vmatprep.mubr.msk.f32.mxu1 %vm14933_vm3, %v14932_v26 }
0x1b98   :  { %13114 = vmatprep.subr.mxu1 %v14932_v26 }
0x1b99   :  { %v6156_v14 = vpop.permute.xlu1 %6155 }
0x1b9a   :  { %13107 = vmatmul.mubr.msk.f32.vlgmr.msra.gmra.mrb[70].mxu1 %vm1049_vm8, %v5991_v9 }
0x1b9b   :  { %13115 = vmatpush3.xpose.msk.msra.mxu1 %vm1049_vm8, %v6158_v13  ;;  %13116 = vmatprep.mubr.msk.f32.mxu1 %vm14933_vm3, %v14932_v26 }
0x1b9c   :  { %13124 = vmatprep.subr.bf16.mxu1 %v14932_v26 }
0x1b9e   :  { %13117 = vmatmul.mubr.msk.f32.vlgmr.msra.gmra.mrb[72].mxu1 %vm1049_vm8, %v6156_v14 }
0x1b9f   :  { %13128 = vmatprep.mubr.msk.bf16.mxu1 %vm14933_vm3, %v14932_v26 }
0x1be6   :  { %v5065_v17 = vpop.f32.mrb[46].mxu1 }
0x1be7   :  { %v5066_v18 = vadd.f32 %v5065_v17, %v679_v16  ;;  %v13048_v19 = vpop.f32.mrb[47].mxu1 }
0x1be9   :  { %v5069_v20 = vsel %vm1049_vm8, %v5066_v18, -inf }
0x1bea   :  { %5070 = vmax.xlane.f32.xlu0 %v5069_v20 }
0x1c58   :  { %v5227_v21 = vpop.f32.mrb[60].mxu1 }
0x1c59   :  { %v5228_v22 = vadd.f32 %v5227_v21, %v679_v16  ;;  %v13058_v23 = vpop.f32.mrb[61].mxu1 }
0x1c5b   :  { %v5231_v24 = vsel %vm1049_vm8, %v5228_v22, -inf }
0x1c5c   :  { %5232 = vmax.xlane.f32.xlu1 %v5231_v24 }
0x1c5d   :  { %v5393_v25 = vpop.f32.mrb[62].mxu1 }
0x1c5e   :  { %v5394_v27 = vadd.f32 %v5393_v25, %v679_v16  ;;  %v13068_v28 = vpop.f32.mrb[63].mxu1 }
0x1c60   :  { %v5397_v58 = vsel %vm1049_vm8, %v5394_v27, -inf }
0x1c61   :  { %5398 = vmax.xlane.f32.xlu0 %v5397_v58  ;;  %v5558_v29 = vpop.f32.mrb[64].mxu1 }
0x1c62   :  { %v16128_v30 = vadd.f32 %v5558_v29, %v679_v16  ;;  %v13078_v31 = vpop.f32.mrb[65].mxu1 }
0x1c64   :  { %v5562_v33 = vsel %vm1049_vm8, %v16128_v30, -inf }
0x1c65   :  { %5563 = vmax.xlane.f32.xlu0 %v5562_v33  ;;  %v5736_v34 = vpop.f32.mrb[66].mxu1 }
0x1c66   :  { %v5737_v35 = vadd.f32 %v5736_v34, %v680_v32  ;;  %v13088_v36 = vpop.f32.mrb[67].mxu1 }
0x1c68   :  { %v5740_v37 = vsel %vm1049_vm8, %v5737_v35, -inf }
0x1c69   :  { %5741 = vmax.xlane.f32.xlu0 %v5740_v37  ;;  %v5898_v38 = vpop.f32.mrb[68].mxu1 }
0x1c6a   :  { %v5899_v39 = vadd.f32 %v5898_v38, %v680_v32  ;;  %v13098_v40 = vpop.f32.mrb[69].mxu1 }
0x1c6c   :  { %v5902_v41 = vsel %vm1049_vm8, %v5899_v39, -inf }
0x1c6d   :  { %5903 = vmax.xlane.f32.xlu1 %v5902_v41  ;;  %v6064_v42 = vpop.f32.mrb[70].mxu1 }
0x1c6e   :  { %v6065_v43 = vadd.f32 %v6064_v42, %v680_v32  ;;  %v13108_v45 = vpop.f32.mrb[71].mxu1 }
0x1c70   :  { %v6068_v46 = vsel %vm1049_vm8, %v6065_v43, -inf }
0x1c71   :  { %6069 = vmax.xlane.f32.xlu0 %v6068_v46  ;;  %v6229_v48 = vpop.f32.mrb[72].mxu1 }
0x1c72   :  { %v6230_v49 = vadd.f32 %v6229_v48, %v680_v32  ;;  %v13118_v51 = vpop.f32.mrb[73].mxu1 }
0x1c74   :  { %v6233_v52 = vsel %vm1049_vm8, %v6230_v49, -inf }
0x1c75   :  { %6234 = vmax.xlane.f32.xlu1 %v6233_v52 }
0x1c77   :  { %v5071_v54 = vpop.xlane.xlu0 %5070 }
0x1c78   :  { %v5072_v1 = vsub.f32 %v5066_v18, %v5071_v54 }
0x1c7a   :  { %v5073_v55 = vmul.f32 1.442695, %v5072_v1 }
0x1c7c   :  { %13886 = vpow2.f32 %v5073_v55 }
0x1c86   :  { %v13887_v56 = vpop.eup %13886 }
0x1c87   :  { %v5075_v57 = vsel %vm1049_vm8, %v13887_v56, 0.0 }
0x1c88   :  { %5076 = vadd.xlane.f32.xlu0 %v5075_v57 }
0x1ce9   :  { %v5233_v60 = vpop.xlane.xlu1 %5232 }
0x1cea   :  { %v5234_v12 = vsub.f32 %v5228_v22, %v5233_v60 }
0x1cec   :  { %v5235_v0 = vmul.f32 1.442695, %v5234_v12 }
0x1cee   :  { %13888 = vpow2.f32 %v5235_v0  ;;  %v5399_v59 = vpop.xlane.xlu0 %5398 }
0x1cef   :  { %v5400_v2 = vsub.f32 %v5394_v27, %v5399_v59 }
0x1cf1   :  { %v5401_v10 = vmul.f32 1.442695, %v5400_v2 }
0x1cf2   :  { %v5564_v7 = vpop.xlane.xlu0 %5563 }
0x1cf3   :  { %13890 = vpow2.f32 %v5401_v10  ;;  %v5565_v16 = vsub.f32 %v16128_v30, %v5564_v7 }
0x1cf5   :  { %v5566_v21 = vmul.f32 1.442695, %v5565_v16  ;;  %v13742_v16 = vld [vmem:[%s16990_s12] sm:$0xff]  }
0x1cf6   :  { %v5742_v8 = vpop.xlane.xlu0 %5741  ;;  %13125 = vmatpush3.bf16.msra.mxu1 %v13742_v16 }
0x1cf7   :  { %v5743_v13 = vsub.f32 %v5737_v35, %v5742_v8  ;;  %13126 = vmatprep.subr.bf16.mxu1 %v14932_v26 }
0x1cf8   :  { %v13889_v3 = vpop.eup %13888 }
0x1cf9   :  { %v5237_v11 = vsel %vm1049_vm8, %v13889_v3, 0.0  ;;  %v5744_v18 = vmul.f32 1.442695, %v5743_v13 }
0x1cfa   :  { %5238 = vadd.xlane.f32.xlu1 %v5237_v11  ;;  %v5904_v19 = vpop.xlane.xlu1 %5903 }
0x1cfb   :  { %v5905_v22 = vsub.f32 %v5899_v39, %v5904_v19  ;;  %v13743_v19 = vld [vmem:[%s16990_s12 + $0x8] sm:$0xff]  }
0x1cfc   :  { %13127 = vmatpush3.bf16.msra.mxu1 %v13743_v19 }
0x1cfd   :  { %v16139_v4 = vpop.eup %13890  ;;  %13140 = vmatprep.subr.bf16.mxu1 %v14932_v26 }
0x1cfe   :  { %v5403_v61 = vsel %vm1049_vm8, %v16139_v4, 0.0  ;;  %v6070_v15 = vpop.xlane.xlu0 %6069 }
0x1cff   :  { %5404 = vadd.xlane.f32.xlu0 %v5403_v61  ;;  %v6071_v20 = vsub.f32 %v6065_v43, %v6070_v15 }
0x1d01   :  { %v6072_v23 = vmul.f32 1.442695, %v6071_v20 }
0x1d02   :  { %v6235_v24 = vpop.xlane.xlu1 %6234 }
0x1d03   :  { %v6236_v25 = vsub.f32 %v6230_v49, %v6235_v24 }
0x1d05   :  { %v6237_v27 = vmul.f32 1.442695, %v6236_v25 }
0x1d0b   :  { %5408 = vrot.lane.b32.xlu1 %v16075_v50, %s14935_s29 }
0x1d0f   :  { %5573 = vrot.lane.b32.xlu1 %v16075_v50, %s14936_s4 }
0x1d13   :  { %5914 = vrot.lane.b32.xlu1 %v16077_v63, %s14934_s23 }
0x1d15   :  { %v5077_v9 = vpop.xlane.xlu0 %5076  ;;  %5243 = vrot.lane.b32.xlu0 %v16075_v50, %s14934_s23  ;;  %v5906_v50 = vmul.f32 1.442695, %v5905_v22 }
0x1d16   :  { %13892 = vrcp.f32 %v5077_v9 }
0x1d17   :  { %13894 = vpow2.f32 %v5744_v18 }
0x1d18   :  { %13896 = vpow2.f32 %v5566_v21 }
0x1d19   :  { %13898 = vpow2.f32 %v6072_v23 }
0x1d1a   :  { %13900 = vpow2.f32 %v5906_v50 }
0x1d1b   :  { %13902 = vpow2.f32 %v6237_v27 }
0x1d20   :  { %v13893_v14 = vpop.eup %13892 }
0x1d21   :  { %v5079_v17 = vmul.f32 %v13893_v14, %v13887_v56  ;;  %v13895_v28 = vpop.eup %13894 }
0x1d22   :  { %v13897_v58 = vpop.eup %13896  ;;  %v5746_v29 = vsel %vm1049_vm8, %v13895_v28, 0.0 }
0x1d23   :  { %13052 = vmatmul.mubr.msk.f32.vlgmr.msra.gmra.mrb[62].mxu0 %vm1049_vm8, %v5079_v17  ;;  %v16156_v30 = vpop.eup %13898  ;;  %v5568_v31 = vsel %vm1049_vm8, %v13897_v58, 0.0 }
0x1d24   :  { %13061 = vmatprep.mubr.msk.f32.mxu0 %vm14933_vm3, %v14932_v26  ;;  %v13901_v32 = vpop.eup %13900  ;;  %v6074_v33 = vsel %vm1049_vm8, %v16156_v30, 0.0 }
0x1d25   :  { %v5908_v34 = vsel %vm1049_vm8, %v13901_v32, 0.0  ;;  %v16162_v35 = vpop.eup %13902 }
0x1d26   :  { %v6239_v36 = vsel %vm1049_vm8, %v16162_v35, 0.0 }
0x1d34   :  { %5747 = vadd.xlane.f32.xlu0 %v5746_v29 }
0x1d37   :  { %5569 = vadd.xlane.f32.xlu1 %v5568_v31 }
0x1d38   :  { %6075 = vadd.xlane.f32.xlu0 %v6074_v33 }
0x1d3b   :  { %5909 = vadd.xlane.f32.xlu1 %v5908_v34 }
0x1d3f   :  { %6240 = vadd.xlane.f32.xlu1 %v6239_v36 }
0x1d4e   :  { %6079 = vrot.lane.b32.xlu0 %v16077_v63, %s14935_s29 }
0x1d50   :  { %6244 = vrot.lane.b32.xlu1 %v16077_v63, %s14936_s4 }
0x1d87   :  { %v5239_v37 = vpop.xlane.xlu1 %5238 }
0x1d88   :  { %13904 = vrcp.f32 %v5239_v37 }
0x1d8b   :  { %v5409_v42 = vpop.permute.xlu1 %5408 }
0x1d8c   :  { %v5405_v38 = vpop.xlane.xlu0 %5404 }
0x1d8d   :  { %13906 = vrcp.f32 %v5405_v38 }
0x1d8f   :  { %v5574_v46 = vpop.permute.xlu1 %5573 }
0x1d90   :  { %v5244_v39 = vpop.permute.xlu0 %5243 }
0x1d91   :  { %13060 = vmatpush3.msra.mxu0 %v5244_v39 }
0x1d92   :  { %v13905_v40 = vpop.eup %13904  ;;  %13069 = vmatprep.subr.mxu0 %v14932_v26 }
0x1d93   :  { %v5241_v41 = vmul.f32 %v13905_v40, %v13889_v3  ;;  %v5915_v48 = vpop.permute.xlu1 %5914 }
0x1d95   :  { %13062 = vmatmul.mubr.msk.f32.vlgmr.msra.gmra.mrb[72].mxu0 %vm1049_vm8, %v5241_v41 }
0x1d96   :  { %13070 = vmatpush3.msra.mxu0 %v5409_v42  ;;  %13071 = vmatprep.mubr.msk.f32.mxu0 %vm14933_vm3, %v14932_v26 }
0x1d97   :  { %v13907_v43 = vpop.eup %13906  ;;  %13079 = vmatprep.subr.mxu0 %v14932_v26 }
0x1d98   :  { %v5407_v45 = vmul.f32 %v13907_v43, %v16139_v4 }
0x1d9a   :  { %13072 = vmatmul.mubr.msk.f32.vlgmr.msra.gmra.mrb[74].mxu0 %vm1049_vm8, %v5407_v45 }
0x1d9b   :  { %13080 = vmatpush3.msra.mxu0 %v5574_v46  ;;  %13081 = vmatprep.mubr.msk.f32.mxu0 %vm14933_vm3, %v14932_v26 }
0x1d9c   :  { %13089 = vmatprep.subr.mxu0 %v14932_v26 }
0x1dc1   :  { %v5748_v49 = vpop.xlane.xlu0 %5747 }
0x1dc4   :  { %v5570_v51 = vpop.xlane.xlu1 %5569 }
0x1dc5   :  { %13908 = vrcp.f32 %v5570_v51  ;;  %v6076_v54 = vpop.xlane.xlu0 %6075 }
0x1dc6   :  { %13910 = vrcp.f32 %v5748_v49 }
0x1dc8   :  { %v5910_v52 = vpop.xlane.xlu1 %5909 }
0x1dc9   :  { %13912 = vrcp.f32 %v5910_v52  ;;  %v6080_v2 = vpop.permute.xlu0 %6079 }
0x1dca   :  { %13914 = vrcp.f32 %v6076_v54 }
0x1dcc   :  { %v6241_v55 = vpop.xlane.xlu1 %6240 }
0x1dcd   :  { %13916 = vrcp.f32 %v6241_v55 }
0x1dcf   :  { %v13909_v1 = vpop.eup %13908 }
0x1dd0   :  { %v5572_v56 = vmul.f32 %v13909_v1, %v13897_v58  ;;  %v13911_v57 = vpop.eup %13910  ;;  %v6245_v3 = vpop.permute.xlu1 %6244  ;;  %v12199_v58 = vld [vmem:[#allocation16 + $0x1] ss:$0 sm:$0xff] }
0x1dd1   :  { %v5750_v60 = vmul.f32 %v13911_v57, %v13895_v28  ;;  %v4571_v29 = vadd.f32 %v12199_v58, %v16051_v6 }
0x1dd2   :  { %13082 = vmatmul.mubr.msk.f32.vlgmr.msra.gmra.mrb[76].mxu0 %vm1049_vm8, %v5572_v56  ;;  %v12249_v56 = vld [vmem:[#allocation28] ss:$0 sm:$0xff] }
0x1dd3   :  { %13090 = vmatpush3.msra.mxu0 %v16077_v63  ;;  %13091 = vmatprep.mubr.msk.f32.mxu0 %vm14933_vm3, %v14932_v26  ;;  %v13913_v12 = vpop.eup %13912  ;;  %v4575_v31 = vadd.f32 %v4571_v29, %v15993_v47 }
0x1dd4   :  { %13099 = vmatprep.subr.mxu0 %v14932_v26  ;;  %v5912_v0 = vmul.f32 %v13913_v12, %v13901_v32  ;;  %v13915_v59 = vpop.eup %13914 }
0x1dd5   :  { %v6078_v63 = vmul.f32 %v13915_v59, %v16156_v30  ;;  %v4568_v30 = vadd.f32 %v12199_v58, %v16049_v5  ;;  %v4581_v33 = vsel %vm783_vm2, %v4575_v31, 0.0 }
0x1dd6   :  { %13092 = vmatmul.mubr.msk.f32.vlgmr.msra.gmra.mrb[78].mxu0 %vm1049_vm8, %v5750_v60 }
0x1dd7   :  { %13100 = vmatpush3.msra.mxu0 %v5915_v48  ;;  %13101 = vmatprep.mubr.msk.f32.mxu0 %vm14933_vm3, %v14932_v26  ;;  %v13917_v10 = vpop.eup %13916  ;;  %v4574_v32 = vadd.f32 %v4568_v30, %v15990_v44 }
0x1dd8   :  { %13109 = vmatprep.subr.mxu0 %v14932_v26  ;;  %v6243_v11 = vmul.f32 %v13917_v10, %v16162_v35 }
0x1dd9   :  { %v4578_v34 = vsel %vm783_vm2, %v4574_v32, 0.0 }
0x1dda   :  { %13102 = vmatmul.mubr.msk.f32.vlgmr.msra.gmra.mrb[80].mxu0 %vm1049_vm8, %v5912_v0 }
0x1ddb   :  { %13110 = vmatpush3.msra.mxu0 %v6080_v2  ;;  %13111 = vmatprep.mubr.msk.f32.mxu0 %vm14933_vm3, %v14932_v26 }
0x1ddc   :  { %13119 = vmatprep.subr.mxu0 %v14932_v26 }
0x1dde   :  { %13112 = vmatmul.mubr.msk.f32.vlgmr.msra.gmra.mrb[82].mxu0 %vm1049_vm8, %v6078_v63 }
0x1ddf   :  { %13120 = vmatpush3.msra.mxu0 %v6245_v3  ;;  %13121 = vmatprep.mubr.msk.f32.mxu0 %vm14933_vm3, %v14932_v26 }
0x1de0   :  { %13132 = vmatprep.subr.bf16.mxu0 %v14932_v26 }
0x1de2   :  { %13122 = vmatmul.mubr.msk.f32.vlgmr.msra.gmra.mrb[84].mxu0 %vm1049_vm8, %v6243_v11 }
0x1de3   :  { %13136 = vmatprep.mubr.msk.bf16.mxu0 %vm14933_vm3, %v14932_v26 }
0x1df6   :  { %v5149_v4 = vpop.f32.mrb[62].mxu0 }
0x1df7   :  { %v13053_v61 = vpop.f32.mrb[63].mxu0 }
0x1e68   :  { %v5315_v7 = vpop.f32.mrb[72].mxu0 }
0x1e69   :  { %v13063_v8 = vpop.f32.mrb[73].mxu0 }
0x1e6d   :  { %v5480_v15 = vpop.f32.mrb[74].mxu0 }
0x1e6e   :  { %v13073_v9 = vpop.f32.mrb[75].mxu0 }
0x1ea5   :  { %v5645_v13 = vpop.f32.mrb[76].mxu0 }
0x1ea6   :  { %v13083_v14 = vpop.f32.mrb[77].mxu0 }
0x1ea9   :  { %v5820_v17 = vpop.f32.mrb[78].mxu0 }
0x1eaa   :  { %v13093_v18 = vpop.f32.mrb[79].mxu0 }
0x1ead   :  { %v5986_v20 = vpop.f32.mrb[80].mxu0 }
0x1eae   :  { %v13648_v21 = vpack.i.bf16 %v5986_v20, %v5315_v7  ;;  %v13103_v22 = vpop.f32.mrb[81].mxu0 }
0x1eb0   :  { %13649 = vrot.lane.b32.xlu0 %v13648_v21, %s14937_s13 }
0x1eb1   :  { %v6151_v23 = vpop.f32.mrb[82].mxu0 }
0x1eb2   :  { %v13653_v24 = vpack.i.bf16 %v6151_v23, %v5480_v15  ;;  %v13113_v50 = vpop.f32.mrb[83].mxu0  ;;  %v13745_v15 = vld [vmem:[%s16991_s16 + $0x8] sm:$0xff]  }
0x1eb4   :  { %13654 = vrot.lane.b32.xlu1 %v13653_v24, %s14897_s26 }
0x1eb5   :  { %v6316_v25 = vpop.f32.mrb[84].mxu0 }
0x1eb6   :  { %v13658_v27 = vpack.i.bf16 %v6316_v25, %v5645_v13  ;;  %v13123_v28 = vpop.f32.mrb[85].mxu0 }
0x1eb8   :  { %13659 = vrot.lane.b32.xlu0 %v13658_v27, %s14938_s9 }
0x1ed7   :  { %4582 = vadd.xlane.f32.xlu0 %v4581_v33 }
0x1ed8   :  { %4579 = vadd.xlane.f32.xlu1 %v4578_v34 }
0x1f22   :  { %v13650_v35 = vpop.permute.xlu0 %13649 }
0x1f23   :  { %v13652_v37 = vunpack.i.h.bf16 %v13650_v35  ;;  %v13651_v38 = vunpack.i.l.bf16 %v13650_v35 }
0x1f25   :  { %v6332_v6 = vsel %vm1049_vm8, %v5820_v17, %v13652_v37  ;;  %v5661_v5 = vsel %vm1049_vm8, %v5149_v4, %v13651_v38  ;;  %v12205_v37 = vld [vmem:[#allocation18] ss:$0 sm:$0xff] }
0x1f26   :  { %v13655_v36 = vpop.permute.xlu1 %13654 }
0x1f27   :  { %v13657_v39 = vunpack.i.h.bf16 %v13655_v36  ;;  %v13656_v40 = vunpack.i.l.bf16 %v13655_v36 }
0x1f29   :  { %v6333_v44 = vsel %vm1719_vm9, %v6332_v6, %v13657_v39  ;;  %v5662_v43 = vsel %vm1719_vm9, %v5661_v5, %v13656_v40  ;;  %v12206_v5 = vld [vmem:[#allocation19] ss:$0 sm:$0xff] }
0x1f2a   :  { %v13660_v41 = vpop.permute.xlu0 %13659 }
0x1f2b   :  { %v13662_v47 = vunpack.i.h.bf16 %v13660_v41  ;;  %v13661_v42 = vunpack.i.l.bf16 %v13660_v41 }
0x1f2d   :  { %v5663_v45 = vsel %vm1721_vm10, %v5662_v43, %v13661_v42  ;;  %v6334_v46 = vsel %vm1721_vm10, %v6333_v44, %v13662_v47 }
0x1f2e   :  { %v6335_v48 = vpack.c.bf16 %v6334_v46, %v5663_v45  ;;  %v13746_v45 = vld [vmem:[%s16992_s8] sm:$0xff]   ;;  %v13747_v46 = vld [vmem:[%s16992_s8 + $0x8] sm:$0xff]  }
0x1f2f   :  { %13133 = vmatpush3.bf16.msra.mxu0 %v13746_v45 }
0x1f30   :  { %13129 = vmatmul.mubr.msk.bf16.vlgmr.msra.gmra.mrb[76].mxu1 %vm783_vm2, %v6335_v48  ;;  %13134 = vmatprep.subr.bf16.mxu0 %v14932_v26 }
0x1f31   :  { %13144 = vmatprep.mubr.msk.bf16.mxu1 %vm14933_vm3, %v14932_v26 }
0x1f33   :  { %13135 = vmatpush3.bf16.msra.mxu0 %v13747_v46 }
0x1f34   :  { %13148 = vmatprep.subr.bf16.mxu0 %v14932_v26 }
0x1f64   :  { %v4583_v55 = vpop.xlane.xlu0 %4582 }
0x1f65   :  { %v4580_v49 = vpop.xlane.xlu1 %4579  ;;  %v4585_v60 = vmul.f32 0.03125, %v4583_v55 }
0x1f66   :  { %v4584_v51 = vmul.f32 0.03125, %v4580_v49 }
0x1f67   :  { %v4587_v3 = vsub.f32 %v4575_v31, %v4585_v60 }
0x1f68   :  { %v16224_v52 = vsub.f32 %v4574_v32, %v4584_v51 }
0x1f69   :  { %v4589_v7 = vmul.f32 %v4587_v3, %v4587_v3  ;;  %v4605_v40 = vmul.f32 %v12205_v37, %v4587_v3 }
0x1f6a   :  { %v4588_v54 = vmul.f32 %v16224_v52, %v16224_v52  ;;  %v4604_v39 = vmul.f32 %v12205_v37, %v16224_v52 }
0x1f6b   :  { %v4593_v8 = vsel %vm783_vm2, %v4589_v7, 0.0 }
0x1f6c   :  { %v4590_v1 = vsel %vm783_vm2, %v4588_v54, 0.0 }
0x1f6d   :  { %4591 = vadd.xlane.f32.xlu1 %v4590_v1 }
0x2003   :  { %v6391_v57 = vpop.f32.mrb[76].mxu1 }
0x2004   :  { %v6392_v12 = vadd.f32 %v12249_v56, %v6391_v57  ;;  %v13130_v0 = vpop.f32.mrb[77].mxu1 }
0x2005   :  { %v6394_v59 = vpop.f32.mrb[78].mxu1 }
0x2006   :  { %v16230_v2 = vadd.f32 %v6392_v12, %v16031_v53  ;;  %v6395_v63 = vadd.f32 %v12249_v56, %v6394_v59  ;;  %v13131_v10 = vpop.f32.mrb[79].mxu1  ;;  %v13744_v53 = vld [vmem:[%s16991_s16] sm:$0xff]  }
0x2007   :  { %13141 = vmatpush3.bf16.msra.mxu1 %v13744_v53 }
0x2008   :  { %v16233_v11 = vadd.f32 %v6395_v63, %v16029_v62  ;;  %v6402_v4 = vsel %vm783_vm2, %v16230_v2, 0.0  ;;  %13142 = vmatprep.subr.bf16.mxu1 %v14932_v26  ;;  %v4592_v62 = vpop.xlane.xlu1 %4591 }
0x2009   :  { %6403 = vadd.xlane.f32.xlu0 %v6402_v4  ;;  %v4596_v9 = vmul.f32 0.032258064, %v4592_v62  ;;  %v12253_v4 = vld [vmem:[#allocation30] ss:$0 sm:$0xff]  ;;  %v12254_v62 = vld [vmem:[#allocation31] ss:$0 sm:$0xff] }
0x200a   :  { %v6405_v61 = vsel %vm783_vm2, %v16233_v11, 0.0 }
0x200b   :  { %13143 = vmatpush3.bf16.msra.mxu1 %v13745_v15  ;;  %13918 = vrsqrt.f32 %v4596_v9  ;;  %vm4608_vm6 = vcmp.eq.f32.partialorder %v4596_v9, inf  ;;  %v4611_v58 = vand.u32 2147483648, %v4596_v9  ;;  %vm4610_vm7 = vcmp.eq.f32.partialorder %v4596_v9, 0.0 }
0x200c   :  { %13156 = vmatprep.subr.mxu1 %v14932_v26 }
0x200d   :  { %6406 = vadd.xlane.f32.xlu0 %v6405_v61 }
0x2011   :  { %4594 = vadd.xlane.f32.xlu0 %v4593_v8 }
0x2015   :  { %v13919_v20 = vpop.eup %13918 }
0x2016   :  { %v4607_v25 = vmul.f32 %v13919_v20, %v4596_v9 }
0x2018   :  { %v4609_v28 = vsel %vm4608_vm6, %v4596_v9, %v4607_v25  ;;  %v12255_v25 = vld [vmem:[#allocation33] ss:$0 sm:$0xff] }
0x2019   :  { %v4612_v29 = vsel %vm4610_vm7, %v4611_v58, %v4609_v28 }
0x201a   :  { %v4620_v30 = vadd.f32 1e-06, %v4612_v29 }
0x2096   :  { %v6404_v13 = vpop.xlane.xlu0 %6403 }
0x2097   :  { %v6408_v14 = vmul.f32 0.03125, %v6404_v13 }
0x2099   :  { %v16245_v16 = vsub.f32 %v16230_v2, %v6408_v14 }
0x209a   :  { %v6407_v17 = vpop.xlane.xlu0 %6406 }
0x209b   :  { %v6409_v18 = vmul.f32 0.03125, %v6407_v17  ;;  %v6412_v19 = vmul.f32 %v16245_v16, %v16245_v16  ;;  %v6428_v7 = vmul.f32 %v12253_v4, %v16245_v16  ;;  %v13748_v17 = vld [vmem:[#allocation36] sm:$0xff]   ;;  %v12259_v16 = vld [vmem:[#allocation34] ss:$0 sm:$0xff] }
0x209d   :  { %v16250_v21 = vsub.f32 %v16233_v11, %v6409_v18  ;;  %v6414_v22 = vsel %vm783_vm2, %v6412_v19, 0.0  ;;  %v13749_v19 = vld [vmem:[#allocation36 + $0x8] sm:$0xff]  }
0x209e   :  { %6415 = vadd.xlane.f32.xlu1 %v6414_v22  ;;  %v4595_v23 = vpop.xlane.xlu0 %4594 }
0x209f   :  { %v4597_v24 = vmul.f32 0.032258064, %v4595_v23  ;;  %v6413_v50 = vmul.f32 %v16250_v21, %v16250_v21  ;;  %v6429_v8 = vmul.f32 %v12253_v4, %v16250_v21 }
0x20a1   :  { %13920 = vrsqrt.f32 %v4597_v24  ;;  %v6417_v27 = vsel %vm783_vm2, %v6413_v50, 0.0  ;;  %vm4615_vm11 = vcmp.eq.f32.partialorder %v4597_v24, inf  ;;  %v4618_v33 = vand.u32 2147483648, %v4597_v24 }
0x20a2   :  { %6418 = vadd.xlane.f32.xlu0 %v6417_v27  ;;  %13922 = vrcp.f32 %v4620_v30  ;;  %vm4617_vm12 = vcmp.eq.f32.partialorder %v4597_v24, 0.0 }
0x20ab   :  { %v13921_v31 = vpop.eup %13920 }
0x20ac   :  { %v4614_v32 = vmul.f32 %v13921_v31, %v4597_v24  ;;  %v13923_v38 = vpop.eup %13922 }
0x20ad   :  { %v4623_v41 = vmul.f32 %v13923_v38, %v4604_v39 }
0x20ae   :  { %v4616_v34 = vsel %vm4615_vm11, %v4597_v24, %v4614_v32  ;;  %v12263_v32 = vld [vmem:[#allocation37] ss:$0 sm:$0xff] }
0x20af   :  { %v4619_v35 = vsel %vm4617_vm12, %v4618_v33, %v4616_v34  ;;  %v4632_v42 = vadd.f32 %v12206_v5, %v4623_v41 }
0x20b0   :  { %v4621_v36 = vadd.f32 1e-06, %v4619_v35 }
0x20b2   :  { %13924 = vrcp.f32 %v4621_v36 }
0x20bc   :  { %v13925_v6 = vpop.eup %13924 }
0x20bd   :  { %v4625_v47 = vmul.f32 %v13925_v6, %v4605_v40 }
0x20bf   :  { %v4633_v44 = vadd.f32 %v12206_v5, %v4625_v47 }
0x20c1   :  { %v16257_v43 = vpack.c.bf16 %v4633_v44, %v4632_v42 }
0x20c3   :  { %13145 = vmatmul.mubr.msk.bf16.vlgmr.msra.gmra.mrb[80].mxu1 %vm783_vm2, %v16257_v43 }
0x20c4   :  { %13158 = vmatprep.mubr.msk.f32.mxu1 %vm14933_vm3, %v14932_v26 }
0x212b   :  { %v6416_v48 = vpop.xlane.xlu1 %6415 }
0x212c   :  { %v6420_v49 = vmul.f32 0.032258064, %v6416_v48 }
0x212e   :  { %13926 = vrsqrt.f32 %v6420_v49  ;;  %vm6432_vm13 = vcmp.eq.f32.partialorder %v6420_v49, inf  ;;  %v6435_v55 = vand.u32 2147483648, %v6420_v49  ;;  %vm6434_vm14 = vcmp.eq.f32.partialorder %v6420_v49, 0.0 }
0x212f   :  { %v6419_v51 = vpop.xlane.xlu0 %6418 }
0x2130   :  { %v6421_v52 = vmul.f32 0.032258064, %v6419_v51 }
0x2132   :  { %13928 = vrsqrt.f32 %v6421_v52  ;;  %vm6439_vm0 = vcmp.eq.f32.partialorder %v6421_v52, inf  ;;  %v6442_v59 = vand.u32 2147483648, %v6421_v52  ;;  %vm6441_vm1 = vcmp.eq.f32.partialorder %v6421_v52, 0.0 }
0x2138   :  { %v13927_v54 = vpop.eup %13926 }
0x2139   :  { %v6431_v1 = vmul.f32 %v13927_v54, %v6420_v49 }
0x213b   :  { %v6433_v56 = vsel %vm6432_vm13, %v6420_v49, %v6431_v1 }
0x213c   :  { %v6436_v57 = vsel %vm6434_vm14, %v6435_v55, %v6433_v56  ;;  %v13929_v60 = vpop.eup %13928 }
0x213d   :  { %v6444_v12 = vadd.f32 1e-06, %v6436_v57  ;;  %v6438_v0 = vmul.f32 %v13929_v60, %v6421_v52 }
0x213f   :  { %13930 = vrcp.f32 %v6444_v12  ;;  %v6440_v63 = vsel %vm6439_vm0, %v6421_v52, %v6438_v0  ;;  %v14071_v52 = vld [vmem:[%s16978_s1] ss:$0 sm:$0xff] }
0x2140   :  { %v6443_v10 = vsel %vm6441_vm1, %v6442_v59, %v6440_v63 }
0x2141   :  { %v6445_v3 = vadd.f32 1e-06, %v6443_v10 }
0x2143   :  { %13932 = vrcp.f32 %v6445_v3 }
0x2149   :  { %v13931_v61 = vpop.eup %13930 }
0x214a   :  { %v6447_v53 = vmul.f32 %v13931_v61, %v6428_v7 }
0x214c   :  { %v6456_v13 = vadd.f32 %v12254_v62, %v6447_v53  ;;  %v14072_v53 = vld [vmem:[%s16978_s1 + $0x1] ss:$0 sm:$0xff] }
0x214d   :  { %v13933_v15 = vpop.eup %13932 }
0x214e   :  { %v6449_v9 = vmul.f32 %v13933_v15, %v6429_v8 }
0x2150   :  { %v6457_v14 = vadd.f32 %v12254_v62, %v6449_v9 }
0x2152   :  { %v6478_v18 = vpack.c.bf16 %v6457_v14, %v6456_v13 }
0x2154   :  { %13137 = vmatmul.mubr.msk.bf16.vlgmr.msra.gmra.mrb[88].mxu0 %vm783_vm2, %v6478_v18 }
0x2155   :  { %13149 = vmatpush3.bf16.msra.mxu0 %v13748_v17  ;;  %13152 = vmatprep.mubr.msk.bf16.mxu0 %vm14933_vm3, %v14932_v26 }
0x2156   :  { %13150 = vmatprep.subr.bf16.mxu0 %v14932_v26 }
0x2159   :  { %13151 = vmatpush3.bf16.msra.mxu0 %v13749_v19 }
0x215a   :  { %13161 = vmatprep.subr.mxu0 %v14932_v26 }
0x215c   :  { %13153 = vmatmul.mubr.msk.bf16.vlgmr.msra.gmra.mrb[92].mxu0 %vm783_vm2, %v16257_v43 }
0x215d   :  { %13163 = vmatprep.mubr.msk.f32.mxu0 %vm14933_vm3, %v14932_v26 }
0x2196   :  { %v6597_v20 = vpop.f32.mrb[80].mxu1 }
0x2197   :  { %v6598_v21 = vadd.f32 %v12259_v16, %v6597_v20  ;;  %v13146_v22 = vpop.f32.mrb[81].mxu1 }
0x2198   :  { %v6600_v23 = vpop.f32.mrb[82].mxu1 }
0x2199   :  { %v6601_v24 = vadd.f32 %v12259_v16, %v6600_v23  ;;  %6825 = vrot.lane.b32.xlu1 %v6598_v21, %s14934_s23  ;;  %v13147_v50 = vpop.f32.mrb[83].mxu1  ;;  %13157 = vmatpush3.xpose.msk.msra.mxu1 %vm1049_vm8, %v6598_v21 }
0x219a   :  { %13166 = vmatprep.subr.mxu1 %v14932_v26 }
0x219d   :  { %6991 = vrot.lane.b32.xlu1 %v6598_v21, %s14935_s29 }
0x220b   :  { %v6826_v31 = vpop.permute.xlu1 %6825 }
0x220f   :  { %v6992_v40 = vpop.permute.xlu1 %6991 }
0x2227   :  { %v6534_v27 = vpop.f32.mrb[88].mxu0 }
0x2228   :  { %v6535_v28 = vadd.f32 %v12255_v25, %v6534_v27  ;;  %v13138_v58 = vpop.f32.mrb[89].mxu0 }
0x2229   :  { %v6537_v29 = vpop.f32.mrb[90].mxu0 }
0x222a   :  { %6823 = vrot.lane.b32.xlu0 %v6535_v28, %s14934_s23  ;;  %v13139_v30 = vpop.f32.mrb[91].mxu0  ;;  %6989 = vrot.lane.b32.xlu1 %v6535_v28, %s14935_s29  ;;  %v6538_v34 = vadd.f32 %v12255_v25, %v6537_v29 }
0x222b   :  { %13159 = vmatmul.mubr.msk.f32.vlgmr.msra.gmra.mrb[74].mxu1 %vm1049_vm8, %v6535_v28 }
0x222c   :  { %13167 = vmatpush3.xpose.msk.msra.mxu1 %vm1049_vm8, %v6826_v31  ;;  %13168 = vmatprep.mubr.msk.f32.mxu1 %vm14933_vm3, %v14932_v26 }
0x222d   :  { %13176 = vmatprep.subr.mxu1 %v14932_v26 }
0x222e   :  { %7154 = vrot.lane.b32.xlu0 %v6535_v28, %s14936_s4  ;;  %7156 = vrot.lane.b32.xlu1 %v6598_v21, %s14936_s4 }
0x222f   :  { %v6656_v33 = vpop.f32.mrb[92].mxu0 }
0x2230   :  { %v16291_v35 = vadd.f32 %v12263_v32, %v6656_v33  ;;  %v13154_v36 = vpop.f32.mrb[93].mxu0 }
0x2231   :  { %v6659_v37 = vpop.f32.mrb[94].mxu0 }
0x2232   :  { %v16293_v38 = vadd.f32 %v12263_v32, %v6659_v37  ;;  %7494 = vrot.lane.b32.xlu0 %v6538_v34, %s14934_s23  ;;  %v13155_v39 = vpop.f32.mrb[95].mxu0  ;;  %13162 = vmatpush3.msra.mxu0 %v16291_v35 }
0x2233   :  { %7496 = vrot.lane.b32.xlu1 %v6601_v24, %s14934_s23  ;;  %13171 = vmatprep.subr.mxu0 %v14932_v26 }
0x2236   :  { %7660 = vrot.lane.b32.xlu0 %v6538_v34, %s14935_s29 }
0x2237   :  { %7662 = vrot.lane.b32.xlu1 %v6601_v24, %s14935_s29 }
0x223a   :  { %7825 = vrot.lane.b32.xlu0 %v6538_v34, %s14936_s4 }
0x223b   :  { %7827 = vrot.lane.b32.xlu1 %v6601_v24, %s14936_s4 }
0x229c   :  { %v6824_v41 = vpop.permute.xlu0 %6823  ;;  %v6990_v6 = vpop.permute.xlu1 %6989 }
0x229d   :  { %13169 = vmatmul.mubr.msk.f32.vlgmr.msra.gmra.mrb[84].mxu1 %vm1049_vm8, %v6824_v41 }
0x229e   :  { %13177 = vmatpush3.xpose.msk.msra.mxu1 %vm1049_vm8, %v6992_v40  ;;  %13178 = vmatprep.mubr.msk.f32.mxu1 %vm14933_vm3, %v14932_v26 }
0x229f   :  { %13186 = vmatprep.subr.mxu1 %v14932_v26 }
0x22a0   :  { %v7157_v5 = vpop.permute.xlu1 %7156  ;;  %v7155_v47 = vpop.permute.xlu0 %7154 }
0x22a1   :  { %13179 = vmatmul.mubr.msk.f32.vlgmr.msra.gmra.mrb[86].mxu1 %vm1049_vm8, %v6990_v6 }
0x22a2   :  { %13187 = vmatpush3.xpose.msk.msra.mxu1 %vm1049_vm8, %v7157_v5  ;;  %13188 = vmatprep.mubr.msk.f32.mxu1 %vm14933_vm3, %v14932_v26 }
0x22a3   :  { %13196 = vmatprep.subr.mxu1 %v14932_v26 }
0x22a4   :  { %v7495_v44 = vpop.permute.xlu0 %7494 }
0x22a5   :  { %v7497_v42 = vpop.permute.xlu1 %7496  ;;  %13189 = vmatmul.mubr.msk.f32.vlgmr.msra.gmra.mrb[88].mxu1 %vm1049_vm8, %v7155_v47 }
0x22a6   :  { %13197 = vmatpush3.xpose.msk.msra.mxu1 %vm1049_vm8, %v6601_v24  ;;  %13198 = vmatprep.mubr.msk.f32.mxu1 %vm14933_vm3, %v14932_v26 }
0x22a7   :  { %13206 = vmatprep.subr.mxu1 %v14932_v26 }
0x22a8   :  { %v7661_v46 = vpop.permute.xlu0 %7660 }
0x22a9   :  { %13199 = vmatmul.mubr.msk.f32.vlgmr.msra.gmra.mrb[90].mxu1 %vm1049_vm8, %v6538_v34  ;;  %v7663_v45 = vpop.permute.xlu1 %7662 }
0x22aa   :  { %13207 = vmatpush3.xpose.msk.msra.mxu1 %vm1049_vm8, %v7497_v42  ;;  %13208 = vmatprep.mubr.msk.f32.mxu1 %vm14933_vm3, %v14932_v26 }
0x22ab   :  { %13216 = vmatprep.subr.mxu1 %v14932_v26 }
0x22ac   :  { %v7826_v49 = vpop.permute.xlu0 %7825 }
0x22ad   :  { %13209 = vmatmul.mubr.msk.f32.vlgmr.msra.gmra.mrb[92].mxu1 %vm1049_vm8, %v7495_v44  ;;  %v7828_v48 = vpop.permute.xlu1 %7827 }
0x22ae   :  { %13217 = vmatpush3.xpose.msk.msra.mxu1 %vm1049_vm8, %v7663_v45  ;;  %13218 = vmatprep.mubr.msk.f32.mxu1 %vm14933_vm3, %v14932_v26 }
0x22af   :  { %13226 = vmatprep.subr.mxu1 %v14932_v26 }
0x22b1   :  { %13219 = vmatmul.mubr.msk.f32.vlgmr.msra.gmra.mrb[94].mxu1 %vm1049_vm8, %v7661_v46 }
0x22b2   :  { %13227 = vmatpush3.xpose.msk.msra.mxu1 %vm1049_vm8, %v7828_v48  ;;  %13228 = vmatprep.mubr.msk.f32.mxu1 %vm14933_vm3, %v14932_v26 }
0x22b3   :  { %13236 = vmatprep.subr.bf16.mxu1 %v14932_v26 }
0x22b5   :  { %13229 = vmatmul.mubr.msk.f32.vlgmr.msra.gmra.mrb[96].mxu1 %vm1049_vm8, %v7826_v49 }
0x22b6   :  { %13240 = vmatprep.mubr.msk.bf16.mxu1 %vm14933_vm3, %v14932_v26 }
0x22fe   :  { %v6735_v51 = vpop.f32.mrb[74].mxu1 }
0x22ff   :  { %v6736_v54 = vadd.f32 %v14071_v52, %v6735_v51  ;;  %v13160_v1 = vpop.f32.mrb[75].mxu1 }
0x2301   :  { %v6739_v55 = vsel %vm1049_vm8, %v6736_v54, -inf }
0x2302   :  { %6740 = vmax.xlane.f32.xlu1 %v6739_v55 }
0x2370   :  { %v6897_v56 = vpop.f32.mrb[84].mxu1 }
0x2371   :  { %v6898_v57 = vadd.f32 %v14071_v52, %v6897_v56  ;;  %v13170_v60 = vpop.f32.mrb[85].mxu1 }
0x2373   :  { %v6901_v12 = vsel %vm1049_vm8, %v6898_v57, -inf }
0x2374   :  { %6902 = vmax.xlane.f32.xlu0 %v6901_v12  ;;  %v7063_v0 = vpop.f32.mrb[86].mxu1 }
0x2375   :  { %v7064_v59 = vadd.f32 %v14071_v52, %v7063_v0  ;;  %v13180_v63 = vpop.f32.mrb[87].mxu1 }
0x2377   :  { %v7067_v10 = vsel %vm1049_vm8, %v7064_v59, -inf }
0x2378   :  { %7068 = vmax.xlane.f32.xlu0 %v7067_v10  ;;  %v7228_v3 = vpop.f32.mrb[88].mxu1 }
0x2379   :  { %v7229_v4 = vadd.f32 %v14071_v52, %v7228_v3  ;;  %v13190_v61 = vpop.f32.mrb[89].mxu1 }
0x237b   :  { %v7232_v7 = vsel %vm1049_vm8, %v7229_v4, -inf }
0x237c   :  { %7233 = vmax.xlane.f32.xlu0 %v7232_v7  ;;  %v7406_v8 = vpop.f32.mrb[90].mxu1 }
0x237d   :  { %v7407_v15 = vadd.f32 %v14072_v53, %v7406_v8  ;;  %v13200_v62 = vpop.f32.mrb[91].mxu1 }
0x237f   :  { %v7410_v9 = vsel %vm1049_vm8, %v7407_v15, -inf }
0x2380   :  { %7411 = vmax.xlane.f32.xlu1 %v7410_v9  ;;  %v7568_v13 = vpop.f32.mrb[92].mxu1 }
0x2381   :  { %v7569_v14 = vadd.f32 %v14072_v53, %v7568_v13  ;;  %v13210_v17 = vpop.f32.mrb[93].mxu1 }
0x2383   :  { %v7572_v18 = vsel %vm1049_vm8, %v7569_v14, -inf }
0x2384   :  { %7573 = vmax.xlane.f32.xlu0 %v7572_v18  ;;  %v7734_v19 = vpop.f32.mrb[94].mxu1 }
0x2385   :  { %v7735_v16 = vadd.f32 %v14072_v53, %v7734_v19  ;;  %v13220_v20 = vpop.f32.mrb[95].mxu1 }
0x2387   :  { %v7738_v21 = vsel %vm1049_vm8, %v7735_v16, -inf }
0x2388   :  { %7739 = vmax.xlane.f32.xlu1 %v7738_v21  ;;  %v7899_v22 = vpop.f32.mrb[96].mxu1 }
0x2389   :  { %v7900_v23 = vadd.f32 %v14072_v53, %v7899_v22  ;;  %v13230_v24 = vpop.f32.mrb[97].mxu1 }
0x238b   :  { %v7903_v50 = vsel %vm1049_vm8, %v7900_v23, -inf }
0x238c   :  { %7904 = vmax.xlane.f32.xlu0 %v7903_v50 }
0x238f   :  { %v6741_v25 = vpop.xlane.xlu1 %6740 }
0x2390   :  { %v6742_v27 = vsub.f32 %v6736_v54, %v6741_v25 }
0x2392   :  { %v6743_v28 = vmul.f32 1.442695, %v6742_v27 }
0x2394   :  { %13934 = vpow2.f32 %v6743_v28 }
0x2399   :  { %6913 = vrot.lane.b32.xlu1 %v16291_v35, %s14934_s23 }
0x239e   :  { %v13935_v58 = vpop.eup %13934 }
0x239f   :  { %v6745_v29 = vsel %vm1049_vm8, %v13935_v58, 0.0 }
0x23bd   :  { %6746 = vadd.xlane.f32.xlu1 %v6745_v29 }
0x2401   :  { %v6903_v30 = vpop.xlane.xlu0 %6902 }
0x2402   :  { %v6904_v31 = vsub.f32 %v6898_v57, %v6903_v30 }
0x2404   :  { %v6905_v32 = vmul.f32 1.442695, %v6904_v31 }
0x2405   :  { %v7069_v33 = vpop.xlane.xlu0 %7068 }
0x2406   :  { %13936 = vpow2.f32 %v6905_v32  ;;  %v7070_v34 = vsub.f32 %v7064_v59, %v7069_v33 }
0x2408   :  { %v7071_v36 = vmul.f32 1.442695, %v7070_v34 }
0x2409   :  { %v7234_v37 = vpop.xlane.xlu0 %7233 }
0x240a   :  { %13938 = vpow2.f32 %v7071_v36  ;;  %v7235_v39 = vsub.f32 %v7229_v4, %v7234_v37 }
0x240c   :  { %v7236_v40 = vmul.f32 1.442695, %v7235_v39 }
0x240d   :  { %v7412_v45 = vpop.xlane.xlu1 %7411 }
0x240e   :  { %13940 = vpow2.f32 %v7236_v40  ;;  %v7413_v48 = vsub.f32 %v7407_v15, %v7412_v45 }
0x2410   :  { %v13937_v41 = vpop.eup %13936  ;;  %v7414_v54 = vmul.f32 1.442695, %v7413_v48  ;;  %v13751_v48 = vld [vmem:[#allocation39 + $0x8] sm:$0xff]  }
0x2411   :  { %v6907_v6 = vsel %vm1049_vm8, %v13937_v41, 0.0  ;;  %v7574_v46 = vpop.xlane.xlu0 %7573 }
0x2412   :  { %6908 = vadd.xlane.f32.xlu0 %v6907_v6  ;;  %v7575_v49 = vsub.f32 %v7569_v14, %v7574_v46  ;;  %13942 = vpow2.f32 %v7414_v54 }
0x2414   :  { %v13939_v5 = vpop.eup %13938  ;;  %v7576_v55 = vmul.f32 1.442695, %v7575_v49 }
0x2415   :  { %v7073_v47 = vsel %vm1049_vm8, %v13939_v5, 0.0  ;;  %v7740_v51 = vpop.xlane.xlu1 %7739 }
0x2416   :  { %7074 = vadd.xlane.f32.xlu1 %v7073_v47  ;;  %v7741_v1 = vsub.f32 %v7735_v16, %v7740_v51  ;;  %13944 = vpow2.f32 %v7576_v55 }
0x2418   :  { %v16351_v42 = vpop.eup %13940  ;;  %v7742_v57 = vmul.f32 1.442695, %v7741_v1 }
0x2419   :  { %v7238_v44 = vsel %vm1049_vm8, %v16351_v42, 0.0  ;;  %v7905_v52 = vpop.xlane.xlu0 %7904  ;;  %v6914_v12 = vpop.permute.xlu1 %6913 }
0x241a   :  { %7239 = vadd.xlane.f32.xlu0 %v7238_v44  ;;  %v7906_v56 = vsub.f32 %v7900_v23, %v7905_v52  ;;  %13946 = vpow2.f32 %v7742_v57  ;;  %v13750_v44 = vld [vmem:[#allocation39] sm:$0xff]  }
0x241b   :  { %13237 = vmatpush3.bf16.msra.mxu1 %v13750_v44 }
0x241c   :  { %v7907_v60 = vmul.f32 1.442695, %v7906_v56  ;;  %v13943_v0 = vpop.eup %13942  ;;  %13238 = vmatprep.subr.bf16.mxu1 %v14932_v26 }
0x241d   :  { %v7416_v10 = vsel %vm1049_vm8, %v13943_v0, 0.0 }
0x241e   :  { %13948 = vpow2.f32 %v7907_v60 }
0x241f   :  { %13239 = vmatpush3.bf16.msra.mxu1 %v13751_v48 }
0x2420   :  { %13252 = vmatprep.subr.bf16.mxu1 %v14932_v26 }
0x2427   :  { %7243 = vrot.lane.b32.xlu1 %v16291_v35, %s14936_s4 }
0x242b   :  { %7584 = vrot.lane.b32.xlu1 %v16293_v38, %s14934_s23 }
0x2430   :  { %7078 = vrot.lane.b32.xlu0 %v16291_v35, %s14935_s29  ;;  %v13945_v35 = vpop.eup %13944 }
0x2431   :  { %v16361_v63 = vpop.eup %13946  ;;  %v7578_v3 = vsel %vm1049_vm8, %v13945_v35, 0.0 }
0x2432   :  { %v16365_v4 = vpop.eup %13948  ;;  %v7744_v61 = vsel %vm1049_vm8, %v16361_v63, 0.0 }
0x2433   :  { %v7909_v7 = vsel %vm1049_vm8, %v16365_v4, 0.0 }
0x244a   :  { %v6747_v59 = vpop.xlane.xlu1 %6746 }
0x244b   :  { %13950 = vrcp.f32 %v6747_v59 }
0x244f   :  { %7417 = vadd.xlane.f32.xlu1 %v7416_v10  ;;  %7579 = vadd.xlane.f32.xlu0 %v7578_v3 }
0x2453   :  { %7745 = vadd.xlane.f32.xlu1 %v7744_v61  ;;  %7910 = vadd.xlane.f32.xlu0 %v7909_v7 }
0x2455   :  { %v13951_v8 = vpop.eup %13950 }
0x2456   :  { %v6749_v53 = vmul.f32 %v13951_v8, %v13935_v58 }
0x2458   :  { %13164 = vmatmul.mubr.msk.f32.vlgmr.msra.gmra.mrb[86].mxu0 %vm1049_vm8, %v6749_v53 }
0x2459   :  { %13172 = vmatpush3.msra.mxu0 %v6914_v12  ;;  %13173 = vmatprep.mubr.msk.f32.mxu0 %vm14933_vm3, %v14932_v26 }
0x245a   :  { %13181 = vmatprep.subr.mxu0 %v14932_v26 }
0x2464   :  { %7749 = vrot.lane.b32.xlu1 %v16293_v38, %s14935_s29 }
0x2469   :  { %7914 = vrot.lane.b32.xlu0 %v16293_v38, %s14936_s4 }
0x249f   :  { %v6909_v15 = vpop.xlane.xlu0 %6908 }
0x24a0   :  { %13952 = vrcp.f32 %v6909_v15 }
0x24a3   :  { %v7075_v62 = vpop.xlane.xlu1 %7074 }
0x24a4   :  { %13954 = vrcp.f32 %v7075_v62 }
0x24a7   :  { %v7240_v9 = vpop.xlane.xlu0 %7239  ;;  %v7244_v16 = vpop.permute.xlu1 %7243 }
0x24a8   :  { %13956 = vrcp.f32 %v7240_v9 }
0x24aa   :  { %v13953_v13 = vpop.eup %13952 }
0x24ab   :  { %v7079_v14 = vpop.permute.xlu0 %7078  ;;  %v6911_v17 = vmul.f32 %v13953_v13, %v13937_v41  ;;  %v7585_v22 = vpop.permute.xlu1 %7584  ;;  %v12291_v13 = vld [vmem:[#allocation40] ss:$0 sm:$0xff] }
0x24ad   :  { %13174 = vmatmul.mubr.msk.f32.vlgmr.msra.gmra.mrb[96].mxu0 %vm1049_vm8, %v6911_v17 }
0x24ae   :  { %v13955_v18 = vpop.eup %13954  ;;  %13182 = vmatpush3.msra.mxu0 %v7079_v14  ;;  %13183 = vmatprep.mubr.msk.f32.mxu0 %vm14933_vm3, %v14932_v26 }
0x24af   :  { %13191 = vmatprep.subr.mxu0 %v14932_v26  ;;  %v7077_v19 = vmul.f32 %v13955_v18, %v13939_v5 }
0x24b1   :  { %13184 = vmatmul.mubr.msk.f32.vlgmr.msra.gmra.mrb[98].mxu0 %vm1049_vm8, %v7077_v19 }
0x24b2   :  { %v13957_v20 = vpop.eup %13956  ;;  %13192 = vmatpush3.msra.mxu0 %v7244_v16  ;;  %13193 = vmatprep.mubr.msk.f32.mxu0 %vm14933_vm3, %v14932_v26 }
0x24b3   :  { %13201 = vmatprep.subr.mxu0 %v14932_v26  ;;  %v7242_v21 = vmul.f32 %v13957_v20, %v16351_v42 }
0x24b5   :  { %13194 = vmatmul.mubr.msk.f32.vlgmr.msra.gmra.mrb[100].mxu0 %vm1049_vm8, %v7242_v21 }
0x24b6   :  { %13202 = vmatpush3.msra.mxu0 %v16293_v38  ;;  %13203 = vmatprep.mubr.msk.f32.mxu0 %vm14933_vm3, %v14932_v26 }
0x24b7   :  { %13211 = vmatprep.subr.mxu0 %v14932_v26 }
0x24dc   :  { %v7418_v23 = vpop.xlane.xlu1 %7417  ;;  %v7580_v24 = vpop.xlane.xlu0 %7579 }
0x24dd   :  { %13958 = vrcp.f32 %v7418_v23 }
0x24de   :  { %13960 = vrcp.f32 %v7580_v24 }
0x24e0   :  { %v7746_v50 = vpop.xlane.xlu1 %7745  ;;  %v7911_v25 = vpop.xlane.xlu0 %7910 }
0x24e1   :  { %13962 = vrcp.f32 %v7746_v50 }
0x24e2   :  { %13964 = vrcp.f32 %v7911_v25 }
0x24e4   :  { %v7750_v30 = vpop.permute.xlu1 %7749  ;;  %v7915_v33 = vpop.permute.xlu0 %7914 }
0x24e7   :  { %v13959_v27 = vpop.eup %13958 }
0x24e8   :  { %v7420_v28 = vmul.f32 %v13959_v27, %v13943_v0  ;;  %v13961_v58 = vpop.eup %13960 }
0x24e9   :  { %v7582_v38 = vmul.f32 %v13961_v58, %v13945_v35 }
0x24ea   :  { %13204 = vmatmul.mubr.msk.f32.vlgmr.msra.gmra.mrb[102].mxu0 %vm1049_vm8, %v7420_v28 }
0x24eb   :  { %13212 = vmatpush3.msra.mxu0 %v7585_v22  ;;  %13213 = vmatprep.mubr.msk.f32.mxu0 %vm14933_vm3, %v14932_v26  ;;  %v13963_v29 = vpop.eup %13962 }
0x24ec   :  { %13221 = vmatprep.subr.mxu0 %v14932_v26  ;;  %v7748_v31 = vmul.f32 %v13963_v29, %v16361_v63  ;;  %v13965_v32 = vpop.eup %13964 }
0x24ed   :  { %v7913_v34 = vmul.f32 %v13965_v32, %v16365_v4  ;;  %v13753_v32 = vld [vmem:[#allocation45 + $0x8] sm:$0xff]  }
0x24ee   :  { %13214 = vmatmul.mubr.msk.f32.vlgmr.msra.gmra.mrb[104].mxu0 %vm1049_vm8, %v7582_v38 }
0x24ef   :  { %13222 = vmatpush3.msra.mxu0 %v7750_v30  ;;  %13223 = vmatprep.mubr.msk.f32.mxu0 %vm14933_vm3, %v14932_v26 }
0x24f0   :  { %13231 = vmatprep.subr.mxu0 %v14932_v26 }
0x24f2   :  { %13224 = vmatmul.mubr.msk.f32.vlgmr.msra.gmra.mrb[106].mxu0 %vm1049_vm8, %v7748_v31  ;;  %v13752_v31 = vld [vmem:[#allocation45] sm:$0xff]  }
0x24f3   :  { %13232 = vmatpush3.msra.mxu0 %v7915_v33  ;;  %13233 = vmatprep.mubr.msk.f32.mxu0 %vm14933_vm3, %v14932_v26  ;;  %v13754_v33 = vld [vmem:[%s16993_s6] sm:$0xff]  }
0x24f4   :  { %13244 = vmatprep.subr.bf16.mxu0 %v14932_v26 }
0x24f6   :  { %13234 = vmatmul.mubr.msk.f32.vlgmr.msra.gmra.mrb[108].mxu0 %vm1049_vm8, %v7913_v34  ;;  %v13755_v34 = vld [vmem:[%s16993_s6 + $0x8] sm:$0xff]  }
0x24f7   :  { %13248 = vmatprep.mubr.msk.bf16.mxu0 %vm14933_vm3, %v14932_v26  ;;  %13245 = vmatpush3.bf16.msra.mxu0 %v13752_v31 }
0x24f8   :  { %13246 = vmatprep.subr.bf16.mxu0 %v14932_v26 }
0x24fb   :  { %13247 = vmatpush3.bf16.msra.mxu0 %v13753_v32 }
0x24fc   :  { %13264 = vmatprep.subr.bf16.mxu0 %v14932_v26 }
0x252b   :  { %v6819_v36 = vpop.f32.mrb[86].mxu0 }
0x252c   :  { %v13165_v37 = vpop.f32.mrb[87].mxu0 }
0x2580   :  { %v6985_v39 = vpop.f32.mrb[96].mxu0 }
0x2581   :  { %v13175_v40 = vpop.f32.mrb[97].mxu0 }
0x2584   :  { %v7150_v41 = vpop.f32.mrb[98].mxu0 }
0x2585   :  { %v13185_v6 = vpop.f32.mrb[99].mxu0 }
0x2588   :  { %v7315_v5 = vpop.f32.mrb[100].mxu0 }
0x2589   :  { %v13195_v47 = vpop.f32.mrb[101].mxu0 }
0x25bd   :  { %v7490_v42 = vpop.f32.mrb[102].mxu0 }
0x25be   :  { %v13205_v45 = vpop.f32.mrb[103].mxu0 }
0x25c1   :  { %v7656_v46 = vpop.f32.mrb[104].mxu0 }
0x25c2   :  { %v13663_v49 = vpack.i.bf16 %v7656_v46, %v6985_v39  ;;  %v13215_v51 = vpop.f32.mrb[105].mxu0 }
0x25c4   :  { %13664 = vrot.lane.b32.xlu1 %v13663_v49, %s14937_s13 }
0x25c5   :  { %v7821_v52 = vpop.f32.mrb[106].mxu0 }
0x25c6   :  { %v13668_v54 = vpack.i.bf16 %v7821_v52, %v7150_v41  ;;  %v13225_v1 = vpop.f32.mrb[107].mxu0 }
0x25c8   :  { %13669 = vrot.lane.b32.xlu0 %v13668_v54, %s14897_s26  ;;  %v12295_v54 = vld [vmem:[#allocation42] ss:$0 sm:$0xff] }
0x25c9   :  { %v7986_v55 = vpop.f32.mrb[108].mxu0 }
0x25ca   :  { %v13673_v56 = vpack.i.bf16 %v7986_v55, %v7315_v5  ;;  %v13235_v57 = vpop.f32.mrb[109].mxu0 }
0x25cc   :  { %13674 = vrot.lane.b32.xlu1 %v13673_v56, %s14938_s9 }
0x2636   :  { %v13665_v60 = vpop.permute.xlu1 %13664 }
0x2637   :  { %v13667_v0 = vunpack.i.h.bf16 %v13665_v60  ;;  %v13666_v59 = vunpack.i.l.bf16 %v13665_v60 }
0x2639   :  { %v8002_v3 = vsel %vm1049_vm8, %v7490_v42, %v13667_v0  ;;  %v7331_v4 = vsel %vm1049_vm8, %v6819_v36, %v13666_v59 }
0x263a   :  { %v13670_v12 = vpop.permute.xlu0 %13669 }
0x263b   :  { %v13672_v35 = vunpack.i.h.bf16 %v13670_v12  ;;  %v13671_v63 = vunpack.i.l.bf16 %v13670_v12  ;;  %v12296_v12 = vld [vmem:[#allocation43] ss:$0 sm:$0xff] }
0x263d   :  { %v8003_v8 = vsel %vm1719_vm9, %v8002_v3, %v13672_v35  ;;  %v7332_v53 = vsel %vm1719_vm9, %v7331_v4, %v13671_v63  ;;  %v13757_v3 = vld [vmem:[%s16993_s6 + $0x18] sm:$0xff]   ;;  %v12297_v4 = vld [vmem:[#allocation46] ss:$0 sm:$0xff] }
0x263e   :  { %v13675_v10 = vpop.permute.xlu1 %13674 }
0x263f   :  { %v13677_v61 = vunpack.i.h.bf16 %v13675_v10  ;;  %v13676_v7 = vunpack.i.l.bf16 %v13675_v10  ;;  %v13756_v10 = vld [vmem:[%s16993_s6 + $0x10] sm:$0xff]  }
0x2641   :  { %v7333_v15 = vsel %vm1721_vm10, %v7332_v53, %v13676_v7  ;;  %v8004_v62 = vsel %vm1721_vm10, %v8003_v8, %v13677_v61 }
0x2642   :  { %v8005_v9 = vpack.c.bf16 %v8004_v62, %v7333_v15 }
0x2644   :  { %13241 = vmatmul.mubr.msk.bf16.vlgmr.msra.gmra.mrb[100].mxu1 %vm783_vm2, %v8005_v9 }
0x2645   :  { %13260 = vmatprep.mubr.msk.bf16.mxu1 %vm14933_vm3, %v14932_v26  ;;  %13253 = vmatpush3.bf16.msra.mxu1 %v13754_v33  ;;  %v13758_v33 = vld [vmem:[%s16986_s17 + $0x10] sm:$0xff]  }
0x2646   :  { %13254 = vmatprep.subr.bf16.mxu1 %v14932_v26 }
0x2649   :  { %13255 = vmatpush3.bf16.msra.mxu1 %v13755_v34  ;;  %v13759_v34 = vld [vmem:[%s16988_s15 + $0x10] sm:$0xff]  }
0x264a   :  { %13256 = vmatprep.subr.bf16.mxu1 %v14932_v26 }
0x264d   :  { %13257 = vmatpush3.bf16.msra.mxu1 %v13756_v10 }
0x264e   :  { %13258 = vmatprep.subr.bf16.mxu1 %v14932_v26 }
0x2651   :  { %13259 = vmatpush3.bf16.msra.mxu1 %v13757_v3  ;;  %v13762_v3 = vld [vmem:[%s16987_s0 + $0x10] sm:$0xff]  }
0x2652   :  { %13280 = vmatprep.subr.bf16.mxu1 %v14932_v26 }
0x2717   :  { %v8061_v14 = vpop.f32.mrb[100].mxu1 }
0x2718   :  { %v8062_v17 = vadd.f32 %v12291_v13, %v8061_v14  ;;  %v13242_v18 = vpop.f32.mrb[101].mxu1 }
0x2719   :  { %v8064_v19 = vpop.f32.mrb[102].mxu1 }
0x271a   :  { %v16425_v16 = vadd.f32 %v8062_v17, %v16230_v2  ;;  %v8065_v20 = vadd.f32 %v12291_v13, %v8064_v19  ;;  %v13243_v21 = vpop.f32.mrb[103].mxu1  ;;  %v12301_v17 = vld [vmem:[#allocation48] ss:$0 sm:$0xff] }
0x271c   :  { %v16428_v22 = vadd.f32 %v8065_v20, %v16233_v11  ;;  %v8072_v23 = vsel %vm783_vm2, %v16425_v16, 0.0 }
0x271d   :  { %8073 = vadd.xlane.f32.xlu0 %v8072_v23 }
0x271e   :  { %v8075_v24 = vsel %vm783_vm2, %v16428_v22, 0.0 }
0x271f   :  { %8076 = vadd.xlane.f32.xlu1 %v8075_v24 }
0x27aa   :  { %v8074_v50 = vpop.xlane.xlu0 %8073 }
0x27ab   :  { %v8078_v25 = vmul.f32 0.03125, %v8074_v50 }
0x27ac   :  { %v8077_v27 = vpop.xlane.xlu1 %8076 }
0x27ad   :  { %v8080_v2 = vsub.f32 %v16425_v16, %v8078_v25  ;;  %v8079_v28 = vmul.f32 0.03125, %v8077_v27 }
0x27af   :  { %v8081_v58 = vsub.f32 %v16428_v22, %v8079_v28  ;;  %v8082_v11 = vmul.f32 %v8080_v2, %v8080_v2  ;;  %v8098_v55 = vmul.f32 %v12295_v54, %v8080_v2 }
0x27b1   :  { %v8084_v38 = vsel %vm783_vm2, %v8082_v11, 0.0  ;;  %v8083_v29 = vmul.f32 %v8081_v58, %v8081_v58  ;;  %v8099_v56 = vmul.f32 %v12295_v54, %v8081_v58 }
0x27b2   :  { %8085 = vadd.xlane.f32.xlu0 %v8084_v38 }
0x27b3   :  { %v8087_v30 = vsel %vm783_vm2, %v8083_v29, 0.0 }
0x27b6   :  { %8088 = vadd.xlane.f32.xlu0 %v8087_v30 }
0x283f   :  { %v8086_v36 = vpop.xlane.xlu0 %8085 }
0x2840   :  { %v8090_v37 = vmul.f32 0.032258064, %v8086_v36  ;;  %v13760_v36 = vld [vmem:[%s16986_s17 + $0x18] sm:$0xff]  }
0x2842   :  { %13966 = vrsqrt.f32 %v8090_v37  ;;  %vm8102_vm4 = vcmp.eq.f32.partialorder %v8090_v37, inf  ;;  %v8105_v5 = vand.u32 2147483648, %v8090_v37  ;;  %vm8104_vm5 = vcmp.eq.f32.partialorder %v8090_v37, 0.0 }
0x2843   :  { %v8089_v39 = vpop.xlane.xlu0 %8088 }
0x2844   :  { %v8091_v40 = vmul.f32 0.032258064, %v8089_v39 }
0x2846   :  { %13968 = vrsqrt.f32 %v8091_v40  ;;  %vm8109_vm6 = vcmp.eq.f32.partialorder %v8091_v40, inf  ;;  %v8112_v48 = vand.u32 2147483648, %v8091_v40  ;;  %vm8111_vm7 = vcmp.eq.f32.partialorder %v8091_v40, 0.0 }
0x284c   :  { %v13967_v41 = vpop.eup %13966 }
0x284d   :  { %v8101_v6 = vmul.f32 %v13967_v41, %v8090_v37 }
0x284f   :  { %v8103_v47 = vsel %vm8102_vm4, %v8090_v37, %v8101_v6  ;;  %v13761_v37 = vld [vmem:[%s16988_s15 + $0x18] sm:$0xff]  }
0x2850   :  { %v13969_v42 = vpop.eup %13968  ;;  %v8106_v44 = vsel %vm8104_vm5, %v8105_v5, %v8103_v47 }
0x2851   :  { %v8114_v45 = vadd.f32 1e-06, %v8106_v44  ;;  %v8108_v46 = vmul.f32 %v13969_v42, %v8091_v40 }
0x2853   :  { %13970 = vrcp.f32 %v8114_v45  ;;  %v8110_v49 = vsel %vm8109_vm6, %v8091_v40, %v8108_v46 }
0x2854   :  { %v8113_v51 = vsel %vm8111_vm7, %v8112_v48, %v8110_v49 }
0x2855   :  { %v8115_v52 = vadd.f32 1e-06, %v8113_v51 }
0x2857   :  { %13972 = vrcp.f32 %v8115_v52 }
0x285d   :  { %v13971_v1 = vpop.eup %13970 }
0x285e   :  { %v8117_v57 = vmul.f32 %v13971_v1, %v8098_v55  ;;  %v12307_v55 = vld [vmem:[#allocation21 + $0x1] ss:$0 sm:$0xff] }
0x2860   :  { %v8126_v59 = vadd.f32 %v12296_v12, %v8117_v57 }
0x2861   :  { %v13973_v60 = vpop.eup %13972 }
0x2862   :  { %v8119_v0 = vmul.f32 %v13973_v60, %v8099_v56 }
0x2864   :  { %v8127_v35 = vadd.f32 %v12296_v12, %v8119_v0 }
0x2866   :  { %v8142_v63 = vpack.c.bf16 %v8127_v35, %v8126_v59  ;;  %v12308_v59 = vld [vmem:[#allocation22 + $0x1] ss:$0 sm:$0xff] }
0x2868   :  { %13249 = vmatmul.mubr.msk.bf16.vlgmr.msra.gmra.mrb[112].mxu0 %vm783_vm2, %v8142_v63 }
0x2869   :  { %13268 = vmatprep.mubr.msk.bf16.mxu0 %vm14933_vm3, %v14932_v26  ;;  %13265 = vmatpush3.bf16.msra.mxu0 %v13758_v33 }
0x286a   :  { %13266 = vmatprep.subr.bf16.mxu0 %v14932_v26 }
0x286d   :  { %13267 = vmatpush3.bf16.msra.mxu0 %v13760_v36 }
0x286e   :  { %13272 = vmatprep.subr.bf16.mxu0 %v14932_v26 }
0x293b   :  { %v8198_v61 = vpop.f32.mrb[112].mxu0 }
0x293c   :  { %v8199_v7 = vadd.f32 %v12297_v4, %v8198_v61  ;;  %v13250_v8 = vpop.f32.mrb[113].mxu0  ;;  %v13763_v61 = vld [vmem:[%s16987_s0 + $0x18] sm:$0xff]  }
0x293d   :  { %v8201_v53 = vpop.f32.mrb[114].mxu0 }
0x293e   :  { %v8202_v15 = vadd.f32 %v12297_v4, %v8201_v53  ;;  %v13251_v62 = vpop.f32.mrb[115].mxu0  ;;  %v8205_v9 = vmax.f32 %v8199_v7, 0.0  ;;  %v12325_v7 = vld [vmem:[#allocation24 + $0x1] ss:$0 sm:$0xff] }
0x2940   :  { %v8206_v13 = vmax.f32 %v8202_v15, 0.0 }
0x2942   :  { %v8207_v14 = vpack.c.bf16 %v8206_v13, %v8205_v9  ;;  %v12333_v13 = vld [vmem:[#allocation27 + $0x1] ss:$0 sm:$0xff] }
0x2944   :  { %13261 = vmatmul.mubr.msk.bf16.vlgmr.msra.gmra.mrb[104].mxu1 %vm2633_vm15, %v8207_v14 }
0x2945   :  { %13284 = vmatprep.mubr.msk.bf16.mxu1 %vm14933_vm3, %v14932_v26  ;;  %13281 = vmatpush3.bf16.msra.mxu1 %v13759_v34 }
0x2946   :  { %13282 = vmatprep.subr.bf16.mxu1 %v14932_v26 }
0x2949   :  { %13283 = vmatpush3.bf16.msra.mxu1 %v13761_v37 }
0x294a   :  { %13298 = vmatprep.subr.mxu1 %v14932_v26 }
0x2a17   :  { %v8275_v18 = vpop.f32.mrb[104].mxu1 }
0x2a18   :  { %v8276_v19 = vadd.f32 %v12301_v17, %v8275_v18  ;;  %v13262_v20 = vpop.f32.mrb[105].mxu1 }
0x2a19   :  { %v8278_v21 = vpop.f32.mrb[106].mxu1 }
0x2a1a   :  { %v16455_v23 = vadd.f32 %v8276_v19, %v16425_v16  ;;  %v8279_v24 = vadd.f32 %v12301_v17, %v8278_v21  ;;  %v13263_v50 = vpop.f32.mrb[107].mxu1  ;;  %v12329_v21 = vld [vmem:[#allocation25 + $0x1] ss:$0 sm:$0xff] }
0x2a1c   :  { %v16458_v25 = vadd.f32 %v8279_v24, %v16428_v22  ;;  %v8288_v27 = vsel %vm783_vm2, %v16455_v23, 0.0 }
0x2a1d   :  { %8289 = vadd.xlane.f32.xlu0 %v8288_v27 }
0x2a1e   :  { %v8291_v2 = vsel %vm783_vm2, %v16458_v25, 0.0 }
0x2a1f   :  { %8292 = vadd.xlane.f32.xlu1 %v8291_v2 }
0x2aaa   :  { %v8290_v28 = vpop.xlane.xlu0 %8289 }
0x2aab   :  { %v8294_v58 = vmul.f32 0.03125, %v8290_v28 }
0x2aac   :  { %v8293_v16 = vpop.xlane.xlu1 %8292 }
0x2aad   :  { %v8296_v11 = vsub.f32 %v16455_v23, %v8294_v58  ;;  %v8295_v38 = vmul.f32 0.03125, %v8293_v16 }
0x2aaf   :  { %v8297_v22 = vsub.f32 %v16458_v25, %v8295_v38  ;;  %v8298_v29 = vmul.f32 %v8296_v11, %v8296_v11  ;;  %v8314_v57 = vmul.f32 %v12307_v55, %v8296_v11 }
0x2ab1   :  { %v8300_v30 = vsel %vm783_vm2, %v8298_v29, 0.0  ;;  %v8299_v31 = vmul.f32 %v8297_v22, %v8297_v22  ;;  %v8315_v60 = vmul.f32 %v12307_v55, %v8297_v22 }
0x2ab2   :  { %8301 = vadd.xlane.f32.xlu0 %v8300_v30 }
0x2ab3   :  { %v8303_v32 = vsel %vm783_vm2, %v8299_v31, 0.0 }
0x2ab4   :  { %8304 = vadd.xlane.f32.xlu1 %v8303_v32 }
0x2b3f   :  { %v8302_v39 = vpop.xlane.xlu0 %8301 }
0x2b40   :  { %v8306_v40 = vmul.f32 0.032258064, %v8302_v39 }
0x2b41   :  { %v8305_v41 = vpop.xlane.xlu1 %8304 }
0x2b42   :  { %13974 = vrsqrt.f32 %v8306_v40  ;;  %v8307_v6 = vmul.f32 0.032258064, %v8305_v41  ;;  %vm8318_vm11 = vcmp.eq.f32.partialorder %v8306_v40, inf  ;;  %v8321_v42 = vand.u32 2147483648, %v8306_v40 }
0x2b43   :  { %vm8320_vm12 = vcmp.eq.f32.partialorder %v8306_v40, 0.0 }
0x2b44   :  { %13976 = vrsqrt.f32 %v8307_v6  ;;  %vm8325_vm13 = vcmp.eq.f32.partialorder %v8307_v6, inf  ;;  %v8328_v51 = vand.u32 2147483648, %v8307_v6  ;;  %vm8327_vm14 = vcmp.eq.f32.partialorder %v8307_v6, 0.0 }
0x2b4c   :  { %v13975_v5 = vpop.eup %13974 }
0x2b4d   :  { %v8317_v47 = vmul.f32 %v13975_v5, %v8306_v40 }
0x2b4e   :  { %v13977_v44 = vpop.eup %13976 }
0x2b4f   :  { %v8319_v45 = vsel %vm8318_vm11, %v8306_v40, %v8317_v47  ;;  %v8324_v48 = vmul.f32 %v13977_v44, %v8307_v6 }
0x2b50   :  { %v8322_v46 = vsel %vm8320_vm12, %v8321_v42, %v8319_v45 }
0x2b51   :  { %v8330_v49 = vadd.f32 1e-06, %v8322_v46  ;;  %v8326_v52 = vsel %vm8325_vm13, %v8307_v6, %v8324_v48  ;;  %v14073_v6 = vld [vmem:[%s16989_s20] sm:$0xff] }
0x2b52   :  { %v8329_v54 = vsel %vm8327_vm14, %v8328_v51, %v8326_v52 }
0x2b53   :  { %13978 = vrcp.f32 %v8330_v49  ;;  %v8331_v1 = vadd.f32 1e-06, %v8329_v54 }
0x2b55   :  { %13980 = vrcp.f32 %v8331_v1 }
0x2b5d   :  { %v13979_v56 = vpop.eup %13978 }
0x2b5e   :  { %v8333_v12 = vmul.f32 %v13979_v56, %v8314_v57 }
0x2b5f   :  { %v13981_v0 = vpop.eup %13980 }
0x2b60   :  { %v8335_v35 = vmul.f32 %v13981_v0, %v8315_v60  ;;  %v8342_v63 = vadd.f32 %v12308_v59, %v8333_v12  ;;  %v14074_v12 = vld [vmem:[%s16989_s20 + $0x8] sm:$0xff] }
0x2b62   :  { %v8343_v10 = vadd.f32 %v12308_v59, %v8335_v35 }
0x2b64   :  { %v8372_v4 = vpack.c.bf16 %v8343_v10, %v8342_v63 }
0x2b66   :  { %13269 = vmatmul.mubr.msk.bf16.vlgmr.msra.gmra.mrb[116].mxu0 %vm783_vm2, %v8372_v4  ;;  %13285 = vmatmul.mubr.msk.bf16.vlgmr.msra.gmra.mrb[108].mxu1 %vm783_vm2, %v8372_v4 }
0x2b67   :  { %13273 = vmatpush3.bf16.msra.mxu0 %v13762_v3  ;;  %13276 = vmatprep.mubr.msk.bf16.mxu0 %vm14933_vm3, %v14932_v26 }
0x2b68   :  { %13274 = vmatprep.subr.bf16.mxu0 %v14932_v26  ;;  %13300 = vmatprep.mubr.msk.f32.mxu1 %vm14933_vm3, %v14932_v26 }
0x2b6b   :  { %13275 = vmatpush3.bf16.msra.mxu0 %v13763_v61 }
0x2b6c   :  { %13288 = vmatprep.subr.mxu0 %v14932_v26 }
0x2b6e   :  { %13277 = vmatmul.mubr.msk.bf16.vlgmr.msra.gmra.mrb[120].mxu0 %vm783_vm2, %v8372_v4 }
0x2b6f   :  { %13290 = vmatprep.mubr.msk.f32.mxu0 %vm14933_vm3, %v14932_v26 }
0x2c39   :  { %v8428_v8 = vpop.f32.mrb[116].mxu0  ;;  %v8546_v53 = vpop.f32.mrb[108].mxu1 }
0x2c3a   :  { %v8429_v15 = vadd.f32 %v12325_v7, %v8428_v8  ;;  %v13270_v62 = vpop.f32.mrb[117].mxu0  ;;  %v13286_v9 = vpop.f32.mrb[109].mxu1  ;;  %v16496_v58 = vadd.f32 %v12333_v13, %v8546_v53 }
0x2c3b   :  { %v8431_v14 = vpop.f32.mrb[118].mxu0  ;;  %v8549_v17 = vpop.f32.mrb[110].mxu1 }
0x2c3c   :  { %v16489_v18 = vadd.f32 %v12333_v13, %v8549_v17  ;;  %8713 = vrot.lane.b32.xlu1 %v8429_v15, %s14934_s23  ;;  %v13271_v19 = vpop.f32.mrb[119].mxu0  ;;  %v13287_v20 = vpop.f32.mrb[111].mxu1  ;;  %v8432_v11 = vadd.f32 %v12325_v7, %v8431_v14 }
0x2c41   :  { %v8487_v24 = vpop.f32.mrb[120].mxu0 }
0x2c42   :  { %v8488_v50 = vadd.f32 %v12329_v21, %v8487_v24  ;;  %v13278_v27 = vpop.f32.mrb[121].mxu0 }
0x2c43   :  { %v8490_v2 = vpop.f32.mrb[122].mxu0 }
0x2c44   :  { %8881 = vrot.lane.b32.xlu1 %v8488_v50, %s14935_s29  ;;  %8715 = vrot.lane.b32.xlu0 %v8488_v50, %s14934_s23  ;;  %v13279_v28 = vpop.f32.mrb[123].mxu0  ;;  %v8491_v16 = vadd.f32 %v12329_v21, %v8490_v2 }
0x2c45   :  { %13289 = vmatpush3.xpose.msk.msra.mxu0 %vm1049_vm8, %v8488_v50 }
0x2c46   :  { %13293 = vmatprep.subr.mxu0 %v14932_v26 }
0x2c48   :  { %13291 = vmatmul.mubr.msk.f32.vlgmr.msra.gmra.mrb[110].mxu0 %vm1049_vm8, %v8429_v15  ;;  %8879 = vrot.lane.b32.xlu1 %v8429_v15, %s14935_s29 }
0x2c49   :  { %9046 = vrot.lane.b32.xlu0 %v8488_v50, %s14936_s4  ;;  %13294 = vmatpush3.msra.mxu0 %v16496_v58 }
0x2c4a   :  { %13295 = vmatprep.mubr.msk.f32.mxu0 %vm14933_vm3, %v14932_v26  ;;  %13303 = vmatprep.subr.mxu0 %v14932_v26 }
0x2c4c   :  { %9044 = vrot.lane.b32.xlu1 %v8429_v15, %s14936_s4 }
0x2c4d   :  { %9386 = vrot.lane.b32.xlu0 %v8491_v16, %s14934_s23 }
0x2c50   :  { %9384 = vrot.lane.b32.xlu1 %v8432_v11, %s14934_s23 }
0x2c51   :  { %9552 = vrot.lane.b32.xlu0 %v8491_v16, %s14935_s29 }
0x2c54   :  { %9550 = vrot.lane.b32.xlu1 %v8432_v11, %s14935_s29 }
0x2c55   :  { %9717 = vrot.lane.b32.xlu0 %v8491_v16, %s14936_s4 }
0x2c58   :  { %9715 = vrot.lane.b32.xlu1 %v8432_v11, %s14936_s4 }
0x2cae   :  { %v8714_v38 = vpop.permute.xlu1 %8713 }
0x2cb6   :  { %v8882_v22 = vpop.permute.xlu1 %8881  ;;  %v8716_v29 = vpop.permute.xlu0 %8715 }
0x2cb7   :  { %13299 = vmatpush3.xpose.msk.msra.mxu1 %vm1049_vm8, %v8716_v29 }
0x2cb8   :  { %13308 = vmatprep.subr.mxu1 %v14932_v26 }
0x2cba   :  { %v8880_v30 = vpop.permute.xlu1 %8879  ;;  %13301 = vmatmul.mubr.msk.f32.vlgmr.msra.gmra.mrb[98].mxu1 %vm1049_vm8, %v8714_v38 }
0x2cbb   :  { %13309 = vmatpush3.xpose.msk.msra.mxu1 %vm1049_vm8, %v8882_v22  ;;  %13310 = vmatprep.mubr.msk.f32.mxu1 %vm14933_vm3, %v14932_v26  ;;  %v9047_v31 = vpop.permute.xlu0 %9046 }
0x2cbc   :  { %13318 = vmatprep.subr.mxu1 %v14932_v26 }
0x2cbe   :  { %13311 = vmatmul.mubr.msk.f32.vlgmr.msra.gmra.mrb[112].mxu1 %vm1049_vm8, %v8880_v30  ;;  %v9045_v32 = vpop.permute.xlu1 %9044 }
0x2cbf   :  { %13319 = vmatpush3.xpose.msk.msra.mxu1 %vm1049_vm8, %v9047_v31  ;;  %13320 = vmatprep.mubr.msk.f32.mxu1 %vm14933_vm3, %v14932_v26  ;;  %v9387_v33 = vpop.permute.xlu0 %9386 }
0x2cc0   :  { %13328 = vmatprep.subr.mxu1 %v14932_v26 }
0x2cc2   :  { %13321 = vmatmul.mubr.msk.f32.vlgmr.msra.gmra.mrb[114].mxu1 %vm1049_vm8, %v9045_v32  ;;  %v9385_v34 = vpop.permute.xlu1 %9384 }
0x2cc3   :  { %13329 = vmatpush3.xpose.msk.msra.mxu1 %vm1049_vm8, %v8491_v16  ;;  %13330 = vmatprep.mubr.msk.f32.mxu1 %vm14933_vm3, %v14932_v26  ;;  %v9553_v36 = vpop.permute.xlu0 %9552 }
0x2cc4   :  { %13338 = vmatprep.subr.mxu1 %v14932_v26 }
0x2cc6   :  { %13331 = vmatmul.mubr.msk.f32.vlgmr.msra.gmra.mrb[116].mxu1 %vm1049_vm8, %v8432_v11  ;;  %v9551_v37 = vpop.permute.xlu1 %9550 }
0x2cc7   :  { %13339 = vmatpush3.xpose.msk.msra.mxu1 %vm1049_vm8, %v9387_v33  ;;  %13340 = vmatprep.mubr.msk.f32.mxu1 %vm14933_vm3, %v14932_v26  ;;  %v9718_v39 = vpop.permute.xlu0 %9717 }
0x2cc8   :  { %13348 = vmatprep.subr.mxu1 %v14932_v26 }
0x2cca   :  { %13341 = vmatmul.mubr.msk.f32.vlgmr.msra.gmra.mrb[118].mxu1 %vm1049_vm8, %v9385_v34  ;;  %v9716_v40 = vpop.permute.xlu1 %9715 }
0x2ccb   :  { %13349 = vmatpush3.xpose.msk.msra.mxu1 %vm1049_vm8, %v9553_v36  ;;  %13350 = vmatprep.mubr.msk.f32.mxu1 %vm14933_vm3, %v14932_v26 }
0x2ccc   :  { %13358 = vmatprep.subr.mxu1 %v14932_v26 }
0x2cce   :  { %13351 = vmatmul.mubr.msk.f32.vlgmr.msra.gmra.mrb[120].mxu1 %vm1049_vm8, %v9551_v37 }
0x2ccf   :  { %13359 = vmatpush3.xpose.msk.msra.mxu1 %vm1049_vm8, %v9718_v39  ;;  %13360 = vmatprep.mubr.msk.f32.mxu1 %vm14933_vm3, %v14932_v26 }
0x2cd0   :  { %13368 = vmatprep.subr.bf16.mxu1 %v14932_v26 }
0x2cd2   :  { %13361 = vmatmul.mubr.msk.f32.vlgmr.msra.gmra.mrb[122].mxu1 %vm1049_vm8, %v9716_v40 }
0x2cd3   :  { %13372 = vmatprep.mubr.msk.bf16.mxu1 %vm14933_vm3, %v14932_v26 }
0x2d1b   :  { %v8625_v41 = vpop.f32.mrb[110].mxu0 }
0x2d1c   :  { %v8626_v5 = vadd.f32 %v14073_v6, %v8625_v41  ;;  %v13292_v47 = vpop.f32.mrb[111].mxu0 }
0x2d1e   :  { %v8629_v42 = vsel %vm1049_vm8, %v8626_v5, -inf }
0x2d1f   :  { %8630 = vmax.xlane.f32.xlu0 %v8629_v42 }
0x2d8d   :  { %v8787_v44 = vpop.f32.mrb[98].mxu1 }
0x2d8e   :  { %v8788_v45 = vadd.f32 %v14073_v6, %v8787_v44  ;;  %v13302_v46 = vpop.f32.mrb[99].mxu1 }
0x2d90   :  { %v8791_v48 = vsel %vm1049_vm8, %v8788_v45, -inf }
0x2d91   :  { %8792 = vmax.xlane.f32.xlu1 %v8791_v48  ;;  %v8953_v49 = vpop.f32.mrb[112].mxu1 }
0x2d92   :  { %v8954_v51 = vadd.f32 %v14073_v6, %v8953_v49  ;;  %v13312_v52 = vpop.f32.mrb[113].mxu1 }
0x2d94   :  { %v8957_v54 = vsel %vm1049_vm8, %v8954_v51, -inf }
0x2d95   :  { %8958 = vmax.xlane.f32.xlu0 %v8957_v54  ;;  %v9118_v1 = vpop.f32.mrb[114].mxu1 }
0x2d96   :  { %v16551_v55 = vadd.f32 %v14073_v6, %v9118_v1  ;;  %v13322_v56 = vpop.f32.mrb[115].mxu1 }
0x2d98   :  { %v9122_v57 = vsel %vm1049_vm8, %v16551_v55, -inf }
0x2d99   :  { %9123 = vmax.xlane.f32.xlu0 %v9122_v57  ;;  %v9296_v60 = vpop.f32.mrb[116].mxu1 }
0x2d9a   :  { %v9297_v0 = vadd.f32 %v14074_v12, %v9296_v60  ;;  %v13332_v59 = vpop.f32.mrb[117].mxu1 }
0x2d9c   :  { %v9300_v35 = vsel %vm1049_vm8, %v9297_v0, -inf }
0x2d9d   :  { %9301 = vmax.xlane.f32.xlu0 %v9300_v35  ;;  %v9458_v63 = vpop.f32.mrb[118].mxu1 }
0x2d9e   :  { %v9459_v10 = vadd.f32 %v14074_v12, %v9458_v63  ;;  %v13342_v3 = vpop.f32.mrb[119].mxu1 }
0x2da0   :  { %v9462_v4 = vsel %vm1049_vm8, %v9459_v10, -inf }
0x2da1   :  { %9463 = vmax.xlane.f32.xlu1 %v9462_v4  ;;  %v9624_v61 = vpop.f32.mrb[120].mxu1 }
0x2da2   :  { %v9625_v7 = vadd.f32 %v14074_v12, %v9624_v61  ;;  %v13352_v8 = vpop.f32.mrb[121].mxu1 }
0x2da4   :  { %v9628_v53 = vsel %vm1049_vm8, %v9625_v7, -inf }
0x2da5   :  { %9629 = vmax.xlane.f32.xlu0 %v9628_v53  ;;  %v9789_v15 = vpop.f32.mrb[122].mxu1 }
0x2da6   :  { %v9790_v62 = vadd.f32 %v14074_v12, %v9789_v15  ;;  %v13362_v9 = vpop.f32.mrb[123].mxu1 }
0x2da8   :  { %v9793_v13 = vsel %vm1049_vm8, %v9790_v62, -inf }
0x2da9   :  { %9794 = vmax.xlane.f32.xlu1 %v9793_v13 }
0x2dac   :  { %v8631_v14 = vpop.xlane.xlu0 %8630 }
0x2dad   :  { %v8632_v17 = vsub.f32 %v8626_v5, %v8631_v14 }
0x2daf   :  { %v8633_v19 = vmul.f32 1.442695, %v8632_v17 }
0x2db1   :  { %13982 = vpow2.f32 %v8633_v19 }
0x2dbb   :  { %v13983_v20 = vpop.eup %13982 }
0x2dbc   :  { %v8635_v21 = vsel %vm1049_vm8, %v13983_v20, 0.0 }
0x2dbd   :  { %8636 = vadd.xlane.f32.xlu0 %v8635_v21 }
0x2e1e   :  { %v8793_v24 = vpop.xlane.xlu1 %8792 }
0x2e1f   :  { %v8794_v50 = vsub.f32 %v8788_v45, %v8793_v24 }
0x2e21   :  { %v8795_v27 = vmul.f32 1.442695, %v8794_v50 }
0x2e22   :  { %v8959_v2 = vpop.xlane.xlu0 %8958 }
0x2e23   :  { %13984 = vpow2.f32 %v8795_v27  ;;  %v8960_v28 = vsub.f32 %v8954_v51, %v8959_v2 }
0x2e25   :  { %v8961_v16 = vmul.f32 1.442695, %v8960_v28 }
0x2e26   :  { %v9124_v30 = vpop.xlane.xlu0 %9123 }
0x2e27   :  { %13986 = vpow2.f32 %v8961_v16  ;;  %v9125_v37 = vsub.f32 %v16551_v55, %v9124_v30 }
0x2e29   :  { %v9126_v5 = vmul.f32 1.442695, %v9125_v37  ;;  %v13765_v37 = vld [vmem:[%s16990_s12 + $0x18] sm:$0xff]  }
0x2e2a   :  { %v9302_v31 = vpop.xlane.xlu0 %9301 }
0x2e2b   :  { %v9303_v34 = vsub.f32 %v9297_v0, %v9302_v31 }
0x2e2d   :  { %v13985_v11 = vpop.eup %13984  ;;  %v9304_v39 = vmul.f32 1.442695, %v9303_v34 }
0x2e2e   :  { %v8797_v38 = vsel %vm1049_vm8, %v13985_v11, 0.0  ;;  %v9464_v6 = vpop.xlane.xlu1 %9463 }
0x2e2f   :  { %8798 = vadd.xlane.f32.xlu1 %v8797_v38  ;;  %v9465_v47 = vsub.f32 %v9459_v10, %v9464_v6 }
0x2e31   :  { %v16562_v22 = vpop.eup %13986  ;;  %v9466_v44 = vmul.f32 1.442695, %v9465_v47 }
0x2e32   :  { %v8963_v29 = vsel %vm1049_vm8, %v16562_v22, 0.0  ;;  %v9630_v32 = vpop.xlane.xlu0 %9629 }
0x2e33   :  { %8964 = vadd.xlane.f32.xlu0 %v8963_v29  ;;  %v9631_v40 = vsub.f32 %v9625_v7, %v9630_v32 }
0x2e35   :  { %v9632_v42 = vmul.f32 1.442695, %v9631_v40 }
0x2e40   :  { %8968 = vrot.lane.b32.xlu1 %v16496_v58, %s14935_s29 }
0x2e44   :  { %9133 = vrot.lane.b32.xlu1 %v16496_v58, %s14936_s4 }
0x2e48   :  { %9474 = vrot.lane.b32.xlu1 %v16489_v18, %s14934_s23 }
0x2e49   :  { %8803 = vrot.lane.b32.xlu0 %v16496_v58, %s14934_s23  ;;  %v9795_v58 = vpop.xlane.xlu1 %9794 }
0x2e4a   :  { %v8637_v33 = vpop.xlane.xlu0 %8636  ;;  %v9796_v45 = vsub.f32 %v9790_v62, %v9795_v58 }
0x2e4b   :  { %13988 = vrcp.f32 %v8637_v33  ;;  %v13764_v33 = vld [vmem:[%s16990_s12 + $0x10] sm:$0xff]  }
0x2e4c   :  { %13990 = vpow2.f32 %v9304_v39  ;;  %v9797_v46 = vmul.f32 1.442695, %v9796_v45  ;;  %13369 = vmatpush3.bf16.msra.mxu1 %v13764_v33 }
0x2e4d   :  { %13992 = vpow2.f32 %v9126_v5  ;;  %13370 = vmatprep.subr.bf16.mxu1 %v14932_v26 }
0x2e4e   :  { %13994 = vpow2.f32 %v9632_v42 }
0x2e4f   :  { %13996 = vpow2.f32 %v9466_v44 }
0x2e50   :  { %13998 = vpow2.f32 %v9797_v46  ;;  %13371 = vmatpush3.bf16.msra.mxu1 %v13765_v37 }
0x2e51   :  { %13384 = vmatprep.subr.bf16.mxu1 %v14932_v26 }
0x2e55   :  { %v13989_v36 = vpop.eup %13988 }
0x2e56   :  { %v8639_v41 = vmul.f32 %v13989_v36, %v13983_v20  ;;  %v13991_v48 = vpop.eup %13990 }
0x2e57   :  { %v13993_v49 = vpop.eup %13992  ;;  %v9306_v51 = vsel %vm1049_vm8, %v13991_v48, 0.0 }
0x2e58   :  { %13296 = vmatmul.mubr.msk.f32.vlgmr.msra.gmra.mrb[124].mxu0 %vm1049_vm8, %v8639_v41  ;;  %v16579_v52 = vpop.eup %13994  ;;  %v9128_v1 = vsel %vm1049_vm8, %v13993_v49, 0.0 }
0x2e59   :  { %13305 = vmatprep.mubr.msk.f32.mxu0 %vm14933_vm3, %v14932_v26  ;;  %v9634_v54 = vsel %vm1049_vm8, %v16579_v52, 0.0  ;;  %v13997_v55 = vpop.eup %13996 }
0x2e5a   :  { %v9468_v56 = vsel %vm1049_vm8, %v13997_v55, 0.0  ;;  %v16585_v57 = vpop.eup %13998 }
0x2e5b   :  { %v9799_v60 = vsel %vm1049_vm8, %v16585_v57, 0.0 }
0x2e68   :  { %9307 = vadd.xlane.f32.xlu0 %v9306_v51 }
0x2e6c   :  { %9635 = vadd.xlane.f32.xlu0 %v9634_v54  ;;  %9129 = vadd.xlane.f32.xlu1 %v9128_v1 }
0x2e70   :  { %9469 = vadd.xlane.f32.xlu1 %v9468_v56 }
0x2e74   :  { %9800 = vadd.xlane.f32.xlu1 %v9799_v60 }
0x2e82   :  { %9639 = vrot.lane.b32.xlu0 %v16489_v18, %s14935_s29 }
0x2e85   :  { %9804 = vrot.lane.b32.xlu1 %v16489_v18, %s14936_s4 }
0x2ebc   :  { %v8799_v12 = vpop.xlane.xlu1 %8798 }
0x2ebd   :  { %14000 = vrcp.f32 %v8799_v12 }
0x2ec0   :  { %v8965_v0 = vpop.xlane.xlu0 %8964  ;;  %v8969_v10 = vpop.permute.xlu1 %8968 }
0x2ec1   :  { %14002 = vrcp.f32 %v8965_v0 }
0x2ec4   :  { %v8804_v59 = vpop.permute.xlu0 %8803  ;;  %v9134_v61 = vpop.permute.xlu1 %9133 }
0x2ec5   :  { %13304 = vmatpush3.msra.mxu0 %v8804_v59 }
0x2ec6   :  { %13313 = vmatprep.subr.mxu0 %v14932_v26 }
0x2ec7   :  { %v14001_v35 = vpop.eup %14000 }
0x2ec8   :  { %v8801_v63 = vmul.f32 %v14001_v35, %v13985_v11  ;;  %v9475_v7 = vpop.permute.xlu1 %9474  ;;  %v13766_v35 = vld [vmem:[%s16991_s16 + $0x10] sm:$0xff]  }
0x2eca   :  { %13306 = vmatmul.mubr.msk.f32.vlgmr.msra.gmra.mrb[126].mxu0 %vm1049_vm8, %v8801_v63 }
0x2ecb   :  { %v14003_v3 = vpop.eup %14002  ;;  %13314 = vmatpush3.msra.mxu0 %v8969_v10  ;;  %13315 = vmatprep.mubr.msk.f32.mxu0 %vm14933_vm3, %v14932_v26  ;;  %v13767_v10 = vld [vmem:[%s16991_s16 + $0x18] sm:$0xff]  }
0x2ecc   :  { %v8967_v4 = vmul.f32 %v14003_v3, %v16562_v22  ;;  %13323 = vmatprep.subr.mxu0 %v14932_v26  ;;  %v12361_v3 = vld [vmem:[#allocation28 + $0x1] ss:$0 sm:$0xff] }
0x2ece   :  { %13316 = vmatmul.mubr.msk.f32.vlgmr.msra.gmra.mrb[128].mxu0 %vm1049_vm8, %v8967_v4 }
0x2ecf   :  { %13324 = vmatpush3.msra.mxu0 %v9134_v61  ;;  %13325 = vmatprep.mubr.msk.f32.mxu0 %vm14933_vm3, %v14932_v26 }
0x2ed0   :  { %13333 = vmatprep.subr.mxu0 %v14932_v26 }
0x2ef5   :  { %v9308_v53 = vpop.xlane.xlu0 %9307 }
0x2ef9   :  { %v9130_v8 = vpop.xlane.xlu1 %9129  ;;  %v9636_v62 = vpop.xlane.xlu0 %9635 }
0x2efa   :  { %14004 = vrcp.f32 %v9130_v8 }
0x2efb   :  { %14006 = vrcp.f32 %v9308_v53 }
0x2efd   :  { %v9470_v15 = vpop.xlane.xlu1 %9469  ;;  %v9640_v50 = vpop.permute.xlu0 %9639 }
0x2efe   :  { %14008 = vrcp.f32 %v9470_v15 }
0x2eff   :  { %14010 = vrcp.f32 %v9636_v62 }
0x2f01   :  { %v9801_v14 = vpop.xlane.xlu1 %9800 }
0x2f02   :  { %14012 = vrcp.f32 %v9801_v14  ;;  %v12379_v14 = vld [vmem:[#allocation34 + $0x1] ss:$0 sm:$0xff] }
0x2f04   :  { %v14005_v9 = vpop.eup %14004 }
0x2f05   :  { %v9132_v13 = vmul.f32 %v14005_v9, %v13993_v49  ;;  %v14007_v17 = vpop.eup %14006  ;;  %v9805_v2 = vpop.permute.xlu1 %9804 }
0x2f06   :  { %v9310_v19 = vmul.f32 %v14007_v17, %v13991_v48 }
0x2f07   :  { %13326 = vmatmul.mubr.msk.f32.vlgmr.msra.gmra.mrb[130].mxu0 %vm1049_vm8, %v9132_v13 }
0x2f08   :  { %13334 = vmatpush3.msra.mxu0 %v16489_v18  ;;  %13335 = vmatprep.mubr.msk.f32.mxu0 %vm14933_vm3, %v14932_v26  ;;  %v14009_v20 = vpop.eup %14008 }
0x2f09   :  { %13343 = vmatprep.subr.mxu0 %v14932_v26  ;;  %v9472_v21 = vmul.f32 %v14009_v20, %v13997_v55  ;;  %v14011_v24 = vpop.eup %14010 }
0x2f0a   :  { %v9638_v18 = vmul.f32 %v14011_v24, %v16579_v52 }
0x2f0b   :  { %13336 = vmatmul.mubr.msk.f32.vlgmr.msra.gmra.mrb[132].mxu0 %vm1049_vm8, %v9310_v19 }
0x2f0c   :  { %13344 = vmatpush3.msra.mxu0 %v9475_v7  ;;  %13345 = vmatprep.mubr.msk.f32.mxu0 %vm14933_vm3, %v14932_v26  ;;  %v14013_v27 = vpop.eup %14012 }
0x2f0d   :  { %13353 = vmatprep.subr.mxu0 %v14932_v26  ;;  %v9803_v28 = vmul.f32 %v14013_v27, %v16585_v57 }
0x2f0f   :  { %13346 = vmatmul.mubr.msk.f32.vlgmr.msra.gmra.mrb[134].mxu0 %vm1049_vm8, %v9472_v21 }
0x2f10   :  { %13354 = vmatpush3.msra.mxu0 %v9640_v50  ;;  %13355 = vmatprep.mubr.msk.f32.mxu0 %vm14933_vm3, %v14932_v26 }
0x2f11   :  { %13363 = vmatprep.subr.mxu0 %v14932_v26 }
0x2f13   :  { %13356 = vmatmul.mubr.msk.f32.vlgmr.msra.gmra.mrb[136].mxu0 %vm1049_vm8, %v9638_v18 }
0x2f14   :  { %13364 = vmatpush3.msra.mxu0 %v9805_v2  ;;  %13365 = vmatprep.mubr.msk.f32.mxu0 %vm14933_vm3, %v14932_v26 }
0x2f15   :  { %13376 = vmatprep.subr.bf16.mxu0 %v14932_v26 }
0x2f17   :  { %13366 = vmatmul.mubr.msk.f32.vlgmr.msra.gmra.mrb[138].mxu0 %vm1049_vm8, %v9803_v28 }
0x2f18   :  { %13380 = vmatprep.mubr.msk.bf16.mxu0 %vm14933_vm3, %v14932_v26 }
0x2f2b   :  { %v8709_v16 = vpop.f32.mrb[124].mxu0 }
0x2f2c   :  { %v13297_v11 = vpop.f32.mrb[125].mxu0 }
0x2f9d   :  { %v8875_v38 = vpop.f32.mrb[126].mxu0 }
0x2f9e   :  { %v13307_v22 = vpop.f32.mrb[127].mxu0 }
0x2fa1   :  { %v9040_v29 = vpop.f32.mrb[128].mxu0 }
0x2fa2   :  { %v13317_v30 = vpop.f32.mrb[129].mxu0 }
0x2fa3   :  { %v13768_v30 = vld [vmem:[%s16992_s8 + $0x10] sm:$0xff]  }
0x2fa4   :  { %13377 = vmatpush3.bf16.msra.mxu0 %v13768_v30 }
0x2fa5   :  { %13378 = vmatprep.subr.bf16.mxu0 %v14932_v26 }
0x2fda   :  { %v9205_v31 = vpop.f32.mrb[130].mxu0 }
0x2fdb   :  { %v13327_v32 = vpop.f32.mrb[131].mxu0 }
0x2fde   :  { %v9380_v34 = vpop.f32.mrb[132].mxu0 }
0x2fdf   :  { %v13337_v36 = vpop.f32.mrb[133].mxu0 }
0x2fe2   :  { %v9546_v39 = vpop.f32.mrb[134].mxu0 }
0x2fe3   :  { %v13678_v40 = vpack.i.bf16 %v9546_v39, %v8875_v38  ;;  %v13347_v41 = vpop.f32.mrb[135].mxu0 }
0x2fe5   :  { %13679 = vrot.lane.b32.xlu0 %v13678_v40, %s14937_s13 }
0x2fe6   :  { %v9711_v6 = vpop.f32.mrb[136].mxu0 }
0x2fe7   :  { %v13683_v5 = vpack.i.bf16 %v9711_v6, %v9040_v29  ;;  %v13357_v47 = vpop.f32.mrb[137].mxu0 }
0x2fe9   :  { %13684 = vrot.lane.b32.xlu1 %v13683_v5, %s14897_s26 }
0x2fea   :  { %v9876_v42 = vpop.f32.mrb[138].mxu0 }
0x2feb   :  { %v13688_v58 = vpack.i.bf16 %v9876_v42, %v9205_v31  ;;  %v13367_v44 = vpop.f32.mrb[139].mxu0  ;;  %v13769_v31 = vld [vmem:[%s16992_s8 + $0x18] sm:$0xff]  }
0x2fec   :  { %13379 = vmatpush3.bf16.msra.mxu0 %v13769_v31 }
0x2fed   :  { %13689 = vrot.lane.b32.xlu0 %v13688_v58, %s14938_s9  ;;  %13392 = vmatprep.subr.bf16.mxu0 %v14932_v26 }
0x3057   :  { %v13680_v45 = vpop.permute.xlu0 %13679 }
0x3058   :  { %v13682_v48 = vunpack.i.h.bf16 %v13680_v45  ;;  %v13681_v49 = vunpack.i.l.bf16 %v13680_v45 }
0x305a   :  { %v9892_v1 = vsel %vm1049_vm8, %v9380_v34, %v13682_v48  ;;  %v9221_v55 = vsel %vm1049_vm8, %v8709_v16, %v13681_v49  ;;  %v12365_v48 = vld [vmem:[#allocation30 + $0x1] ss:$0 sm:$0xff] }
0x305b   :  { %v13685_v46 = vpop.permute.xlu1 %13684 }
0x305c   :  { %v13687_v51 = vunpack.i.h.bf16 %v13685_v46  ;;  %v13686_v52 = vunpack.i.l.bf16 %v13685_v46 }
0x305e   :  { %v9893_v60 = vsel %vm1719_vm9, %v9892_v1, %v13687_v51  ;;  %v9222_v12 = vsel %vm1719_vm9, %v9221_v55, %v13686_v52  ;;  %v12366_v55 = vld [vmem:[#allocation31 + $0x1] ss:$0 sm:$0xff] }
0x305f   :  { %v13690_v54 = vpop.permute.xlu0 %13689 }
0x3060   :  { %v13692_v56 = vunpack.i.h.bf16 %v13690_v54  ;;  %v13691_v57 = vunpack.i.l.bf16 %v13690_v54 }
0x3062   :  { %v9223_v0 = vsel %vm1721_vm10, %v9222_v12, %v13691_v57  ;;  %v9894_v59 = vsel %vm1721_vm10, %v9893_v60, %v13692_v56  ;;  %v13770_v12 = vld [vmem:[#allocation36 + $0x10] sm:$0xff]  }
0x3063   :  { %v9895_v63 = vpack.c.bf16 %v9894_v59, %v9223_v0  ;;  %v13771_v59 = vld [vmem:[#allocation36 + $0x18] sm:$0xff]  }
0x3065   :  { %13373 = vmatmul.mubr.msk.bf16.vlgmr.msra.gmra.mrb[124].mxu1 %vm783_vm2, %v9895_v63 }
0x3066   :  { %13385 = vmatpush3.bf16.msra.mxu1 %v13766_v35  ;;  %13388 = vmatprep.mubr.msk.bf16.mxu1 %vm14933_vm3, %v14932_v26  ;;  %v12375_v35 = vld [vmem:[#allocation33 + $0x1] ss:$0 sm:$0xff] }
0x3067   :  { %13386 = vmatprep.subr.bf16.mxu1 %v14932_v26 }
0x306a   :  { %13387 = vmatpush3.bf16.msra.mxu1 %v13767_v10 }
0x306b   :  { %13400 = vmatprep.subr.mxu1 %v14932_v26 }
0x306d   :  { %13389 = vmatmul.mubr.msk.bf16.vlgmr.msra.gmra.mrb[128].mxu1 %vm783_vm2, %v16257_v43 }
0x306e   :  { %13402 = vmatprep.mubr.msk.f32.mxu1 %vm14933_vm3, %v14932_v26 }
0x3138   :  { %v9951_v4 = vpop.f32.mrb[124].mxu1 }
0x3139   :  { %v9952_v61 = vadd.f32 %v12361_v3, %v9951_v4  ;;  %v13374_v7 = vpop.f32.mrb[125].mxu1 }
0x313a   :  { %v9954_v8 = vpop.f32.mrb[126].mxu1 }
0x313b   :  { %v16650_v53 = vadd.f32 %v9952_v61, %v16455_v23  ;;  %v9955_v15 = vadd.f32 %v12361_v3, %v9954_v8  ;;  %v13375_v62 = vpop.f32.mrb[127].mxu1 }
0x313d   :  { %v16653_v9 = vadd.f32 %v9955_v15, %v16458_v25  ;;  %v9964_v13 = vsel %vm783_vm2, %v16650_v53, 0.0 }
0x313e   :  { %9965 = vadd.xlane.f32.xlu1 %v9964_v13 }
0x313f   :  { %v9967_v17 = vsel %vm783_vm2, %v16653_v9, 0.0 }
0x3140   :  { %9968 = vadd.xlane.f32.xlu0 %v9967_v17  ;;  %v10163_v19 = vpop.f32.mrb[128].mxu1 }
0x3141   :  { %v16659_v20 = vadd.f32 %v12379_v14, %v10163_v19  ;;  %v13390_v21 = vpop.f32.mrb[129].mxu1 }
0x3142   :  { %v10166_v23 = vpop.f32.mrb[130].mxu1 }
0x3143   :  { %v16661_v24 = vadd.f32 %v12379_v14, %v10166_v23  ;;  %v13391_v50 = vpop.f32.mrb[131].mxu1  ;;  %13401 = vmatpush3.xpose.msk.msra.mxu1 %vm1049_vm8, %v16659_v20 }
0x3144   :  { %13410 = vmatprep.subr.mxu1 %v14932_v26 }
0x314f   :  { %10391 = vrot.lane.b32.xlu1 %v16659_v20, %s14934_s23 }
0x3153   :  { %10557 = vrot.lane.b32.xlu1 %v16659_v20, %s14935_s29 }
0x31cb   :  { %v9966_v25 = vpop.xlane.xlu1 %9965 }
0x31cc   :  { %v9970_v18 = vmul.f32 0.03125, %v9966_v25 }
0x31cd   :  { %v9969_v27 = vpop.xlane.xlu0 %9968 }
0x31ce   :  { %v9972_v2 = vsub.f32 %v16650_v53, %v9970_v18  ;;  %v9971_v28 = vmul.f32 0.03125, %v9969_v27 }
0x31cf   :  { %v10392_v7 = vpop.permute.xlu1 %10391 }
0x31d0   :  { %v9973_v16 = vsub.f32 %v16653_v9, %v9971_v28  ;;  %v9974_v11 = vmul.f32 %v9972_v2, %v9972_v2  ;;  %v9990_v51 = vmul.f32 %v12365_v48, %v9972_v2 }
0x31d2   :  { %v9976_v38 = vsel %vm783_vm2, %v9974_v11, 0.0  ;;  %v9975_v22 = vmul.f32 %v9973_v16, %v9973_v16  ;;  %v9991_v52 = vmul.f32 %v12365_v48, %v9973_v16 }
0x31d3   :  { %9977 = vadd.xlane.f32.xlu0 %v9976_v38  ;;  %v14075_v38 = vld [vmem:[%s16978_s1] ss:$0 sm:$0xff] }
0x31d4   :  { %v9979_v29 = vsel %vm783_vm2, %v9975_v22, 0.0 }
0x31d7   :  { %9980 = vadd.xlane.f32.xlu0 %v9979_v29 }
0x3260   :  { %v9978_v32 = vpop.xlane.xlu0 %9977 }
0x3261   :  { %v9982_v33 = vmul.f32 0.032258064, %v9978_v32 }
0x3263   :  { %14014 = vrsqrt.f32 %v9982_v33  ;;  %vm9994_vm0 = vcmp.eq.f32.partialorder %v9982_v33, inf  ;;  %v9997_v40 = vand.u32 2147483648, %v9982_v33  ;;  %vm9996_vm1 = vcmp.eq.f32.partialorder %v9982_v33, 0.0 }
0x3264   :  { %v9981_v34 = vpop.xlane.xlu0 %9980 }
0x3265   :  { %v9983_v36 = vmul.f32 0.032258064, %v9981_v34 }
0x3267   :  { %14016 = vrsqrt.f32 %v9983_v36  ;;  %vm10001_vm4 = vcmp.eq.f32.partialorder %v9983_v36, inf  ;;  %v10004_v58 = vand.u32 2147483648, %v9983_v36  ;;  %vm10003_vm5 = vcmp.eq.f32.partialorder %v9983_v36, 0.0 }
0x326d   :  { %v14015_v37 = vpop.eup %14014 }
0x326e   :  { %v9993_v39 = vmul.f32 %v14015_v37, %v9982_v33 }
0x3270   :  { %v9995_v41 = vsel %vm9994_vm0, %v9982_v33, %v9993_v39 }
0x3271   :  { %v14017_v6 = vpop.eup %14016  ;;  %v9998_v5 = vsel %vm9996_vm1, %v9997_v40, %v9995_v41 }
0x3272   :  { %v10006_v47 = vadd.f32 1e-06, %v9998_v5  ;;  %v10000_v42 = vmul.f32 %v14017_v6, %v9983_v36 }
0x3274   :  { %14018 = vrcp.f32 %v10006_v47  ;;  %v10002_v44 = vsel %vm10001_vm4, %v9983_v36, %v10000_v42 }
0x3275   :  { %v10005_v45 = vsel %vm10003_vm5, %v10004_v58, %v10002_v44  ;;  %v14076_v58 = vld [vmem:[%s16978_s1 + $0x1] ss:$0 sm:$0xff] }
0x3276   :  { %v10007_v46 = vadd.f32 1e-06, %v10005_v45 }
0x3278   :  { %14020 = vrcp.f32 %v10007_v46 }
0x327e   :  { %v14019_v49 = vpop.eup %14018 }
0x327f   :  { %v10009_v54 = vmul.f32 %v14019_v49, %v9990_v51 }
0x3281   :  { %v10018_v57 = vadd.f32 %v12366_v55, %v10009_v54 }
0x3282   :  { %v14021_v1 = vpop.eup %14020 }
0x3283   :  { %v10011_v56 = vmul.f32 %v14021_v1, %v9991_v52 }
0x3285   :  { %v10019_v60 = vadd.f32 %v12366_v55, %v10011_v56 }
0x3287   :  { %v10048_v0 = vpack.c.bf16 %v10019_v60, %v10018_v57 }
0x3289   :  { %13381 = vmatmul.mubr.msk.bf16.vlgmr.msra.gmra.mrb[140].mxu0 %vm783_vm2, %v10048_v0 }
0x328a   :  { %13393 = vmatpush3.bf16.msra.mxu0 %v13770_v12  ;;  %13396 = vmatprep.mubr.msk.bf16.mxu0 %vm14933_vm3, %v14932_v26 }
0x328b   :  { %13394 = vmatprep.subr.bf16.mxu0 %v14932_v26 }
0x328e   :  { %13395 = vmatpush3.bf16.msra.mxu0 %v13771_v59 }
0x328f   :  { %13405 = vmatprep.subr.mxu0 %v14932_v26 }
0x3291   :  { %13397 = vmatmul.mubr.msk.bf16.vlgmr.msra.gmra.mrb[144].mxu0 %vm783_vm2, %v16257_v43  ;;  %v12383_v43 = vld [vmem:[#allocation37 + $0x1] ss:$0 sm:$0xff] }
0x3292   :  { %13407 = vmatprep.mubr.msk.f32.mxu0 %vm14933_vm3, %v14932_v26 }
0x335c   :  { %v10104_v63 = vpop.f32.mrb[140].mxu0 }
0x335d   :  { %v10105_v10 = vadd.f32 %v12375_v35, %v10104_v63  ;;  %v13382_v3 = vpop.f32.mrb[141].mxu0 }
0x335e   :  { %v10107_v4 = vpop.f32.mrb[142].mxu0 }
0x335f   :  { %10389 = vrot.lane.b32.xlu0 %v10105_v10, %s14934_s23  ;;  %v13383_v61 = vpop.f32.mrb[143].mxu0  ;;  %10555 = vrot.lane.b32.xlu1 %v10105_v10, %s14935_s29  ;;  %v10108_v15 = vadd.f32 %v12375_v35, %v10107_v4 }
0x3360   :  { %13403 = vmatmul.mubr.msk.f32.vlgmr.msra.gmra.mrb[132].mxu1 %vm1049_vm8, %v10105_v10 }
0x3361   :  { %13411 = vmatpush3.xpose.msk.msra.mxu1 %vm1049_vm8, %v10392_v7  ;;  %13412 = vmatprep.mubr.msk.f32.mxu1 %vm14933_vm3, %v14932_v26 }
0x3362   :  { %13420 = vmatprep.subr.mxu1 %v14932_v26 }
0x3363   :  { %10720 = vrot.lane.b32.xlu0 %v10105_v10, %s14936_s4  ;;  %10722 = vrot.lane.b32.xlu1 %v16659_v20, %s14936_s4  ;;  %v10558_v20 = vpop.permute.xlu1 %10557 }
0x3364   :  { %v10222_v8 = vpop.f32.mrb[144].mxu0 }
0x3365   :  { %v16697_v62 = vadd.f32 %v12383_v43, %v10222_v8  ;;  %v13398_v13 = vpop.f32.mrb[145].mxu0 }
0x3366   :  { %v10225_v14 = vpop.f32.mrb[146].mxu0 }
0x3367   :  { %v16699_v17 = vadd.f32 %v12383_v43, %v10225_v14  ;;  %11060 = vrot.lane.b32.xlu0 %v10108_v15, %s14934_s23  ;;  %v13399_v19 = vpop.f32.mrb[147].mxu0  ;;  %13406 = vmatpush3.msra.mxu0 %v16697_v62 }
0x3368   :  { %11062 = vrot.lane.b32.xlu1 %v16661_v24, %s14934_s23  ;;  %13415 = vmatprep.subr.mxu0 %v14932_v26 }
0x336b   :  { %11226 = vrot.lane.b32.xlu0 %v10108_v15, %s14935_s29 }
0x336c   :  { %11228 = vrot.lane.b32.xlu1 %v16661_v24, %s14935_s29 }
0x336f   :  { %11391 = vrot.lane.b32.xlu0 %v10108_v15, %s14936_s4 }
0x3370   :  { %11393 = vrot.lane.b32.xlu1 %v16661_v24, %s14936_s4 }
0x33d1   :  { %v10390_v21 = vpop.permute.xlu0 %10389  ;;  %v10556_v23 = vpop.permute.xlu1 %10555 }
0x33d2   :  { %13413 = vmatmul.mubr.msk.f32.vlgmr.msra.gmra.mrb[134].mxu1 %vm1049_vm8, %v10390_v21 }
0x33d3   :  { %13421 = vmatpush3.xpose.msk.msra.mxu1 %vm1049_vm8, %v10558_v20  ;;  %13422 = vmatprep.mubr.msk.f32.mxu1 %vm14933_vm3, %v14932_v26 }
0x33d4   :  { %13430 = vmatprep.subr.mxu1 %v14932_v26 }
0x33d5   :  { %v10723_v50 = vpop.permute.xlu1 %10722  ;;  %v10721_v25 = vpop.permute.xlu0 %10720 }
0x33d6   :  { %13423 = vmatmul.mubr.msk.f32.vlgmr.msra.gmra.mrb[136].mxu1 %vm1049_vm8, %v10556_v23 }
0x33d7   :  { %13431 = vmatpush3.xpose.msk.msra.mxu1 %vm1049_vm8, %v10723_v50  ;;  %13432 = vmatprep.mubr.msk.f32.mxu1 %vm14933_vm3, %v14932_v26 }
0x33d8   :  { %13440 = vmatprep.subr.mxu1 %v14932_v26 }
0x33d9   :  { %v11061_v27 = vpop.permute.xlu0 %11060 }
0x33da   :  { %v11063_v18 = vpop.permute.xlu1 %11062  ;;  %13433 = vmatmul.mubr.msk.f32.vlgmr.msra.gmra.mrb[138].mxu1 %vm1049_vm8, %v10721_v25 }
0x33db   :  { %13441 = vmatpush3.xpose.msk.msra.mxu1 %vm1049_vm8, %v16661_v24  ;;  %13442 = vmatprep.mubr.msk.f32.mxu1 %vm14933_vm3, %v14932_v26 }
0x33dc   :  { %13450 = vmatprep.subr.mxu1 %v14932_v26 }
0x33dd   :  { %v11227_v24 = vpop.permute.xlu0 %11226 }
0x33de   :  { %13443 = vmatmul.mubr.msk.f32.vlgmr.msra.gmra.mrb[140].mxu1 %vm1049_vm8, %v10108_v15  ;;  %v11229_v2 = vpop.permute.xlu1 %11228 }
0x33df   :  { %13451 = vmatpush3.xpose.msk.msra.mxu1 %vm1049_vm8, %v11063_v18  ;;  %13452 = vmatprep.mubr.msk.f32.mxu1 %vm14933_vm3, %v14932_v26 }
0x33e0   :  { %13460 = vmatprep.subr.mxu1 %v14932_v26 }
0x33e1   :  { %v11392_v16 = vpop.permute.xlu0 %11391 }
0x33e2   :  { %13453 = vmatmul.mubr.msk.f32.vlgmr.msra.gmra.mrb[142].mxu1 %vm1049_vm8, %v11061_v27  ;;  %v11394_v28 = vpop.permute.xlu1 %11393 }
0x33e3   :  { %13461 = vmatpush3.xpose.msk.msra.mxu1 %vm1049_vm8, %v11229_v2  ;;  %13462 = vmatprep.mubr.msk.f32.mxu1 %vm14933_vm3, %v14932_v26 }
0x33e4   :  { %13470 = vmatprep.subr.mxu1 %v14932_v26 }
0x33e6   :  { %13463 = vmatmul.mubr.msk.f32.vlgmr.msra.gmra.mrb[144].mxu1 %vm1049_vm8, %v11227_v24 }
0x33e7   :  { %13471 = vmatpush3.xpose.msk.msra.mxu1 %vm1049_vm8, %v11394_v28  ;;  %13472 = vmatprep.mubr.msk.f32.mxu1 %vm14933_vm3, %v14932_v26 }
0x33e8   :  { %13480 = vmatprep.subr.bf16.mxu1 %v14932_v26 }
0x33ea   :  { %13473 = vmatmul.mubr.msk.f32.vlgmr.msra.gmra.mrb[146].mxu1 %vm1049_vm8, %v11392_v16 }
0x33eb   :  { %13484 = vmatprep.mubr.msk.bf16.mxu1 %vm14933_vm3, %v14932_v26 }
0x3433   :  { %v10301_v11 = vpop.f32.mrb[132].mxu1 }
0x3434   :  { %v10302_v22 = vadd.f32 %v14075_v38, %v10301_v11  ;;  %v13404_v29 = vpop.f32.mrb[133].mxu1 }
0x3436   :  { %v10305_v30 = vsel %vm1049_vm8, %v10302_v22, -inf }
0x3437   :  { %10306 = vmax.xlane.f32.xlu1 %v10305_v30 }
0x34a5   :  { %v10463_v31 = vpop.f32.mrb[134].mxu1 }
0x34a6   :  { %v10464_v32 = vadd.f32 %v14075_v38, %v10463_v31  ;;  %v13414_v33 = vpop.f32.mrb[135].mxu1 }
0x34a8   :  { %v10467_v34 = vsel %vm1049_vm8, %v10464_v32, -inf }
0x34a9   :  { %10468 = vmax.xlane.f32.xlu0 %v10467_v34  ;;  %v10629_v36 = vpop.f32.mrb[136].mxu1 }
0x34aa   :  { %v10630_v37 = vadd.f32 %v14075_v38, %v10629_v36  ;;  %v13424_v39 = vpop.f32.mrb[137].mxu1 }
0x34ac   :  { %v10633_v40 = vsel %vm1049_vm8, %v10630_v37, -inf }
0x34ad   :  { %10634 = vmax.xlane.f32.xlu0 %v10633_v40  ;;  %v10794_v41 = vpop.f32.mrb[138].mxu1 }
0x34ae   :  { %v10795_v6 = vadd.f32 %v14075_v38, %v10794_v41  ;;  %v13434_v5 = vpop.f32.mrb[139].mxu1 }
0x34b0   :  { %v10798_v47 = vsel %vm1049_vm8, %v10795_v6, -inf }
0x34b1   :  { %10799 = vmax.xlane.f32.xlu0 %v10798_v47  ;;  %v10972_v42 = vpop.f32.mrb[140].mxu1 }
0x34b2   :  { %v10973_v44 = vadd.f32 %v14076_v58, %v10972_v42  ;;  %v13444_v45 = vpop.f32.mrb[141].mxu1 }
0x34b4   :  { %v10976_v46 = vsel %vm1049_vm8, %v10973_v44, -inf }
0x34b5   :  { %10977 = vmax.xlane.f32.xlu1 %v10976_v46  ;;  %v11134_v48 = vpop.f32.mrb[142].mxu1 }
0x34b6   :  { %v11135_v49 = vadd.f32 %v14076_v58, %v11134_v48  ;;  %v13454_v51 = vpop.f32.mrb[143].mxu1 }
0x34b8   :  { %v11138_v52 = vsel %vm1049_vm8, %v11135_v49, -inf }
0x34b9   :  { %11139 = vmax.xlane.f32.xlu0 %v11138_v52  ;;  %v11300_v54 = vpop.f32.mrb[144].mxu1 }
0x34ba   :  { %v11301_v1 = vadd.f32 %v14076_v58, %v11300_v54  ;;  %v13464_v55 = vpop.f32.mrb[145].mxu1 }
0x34bc   :  { %v11304_v56 = vsel %vm1049_vm8, %v11301_v1, -inf }
0x34bd   :  { %11305 = vmax.xlane.f32.xlu1 %v11304_v56  ;;  %v11465_v57 = vpop.f32.mrb[146].mxu1 }
0x34be   :  { %v11466_v60 = vadd.f32 %v14076_v58, %v11465_v57  ;;  %v13474_v12 = vpop.f32.mrb[147].mxu1 }
0x34c0   :  { %v11469_v0 = vsel %vm1049_vm8, %v11466_v60, -inf }
0x34c1   :  { %11470 = vmax.xlane.f32.xlu0 %v11469_v0 }
0x34c4   :  { %v10307_v59 = vpop.xlane.xlu1 %10306 }
0x34c5   :  { %v10308_v35 = vsub.f32 %v10302_v22, %v10307_v59 }
0x34c7   :  { %v10309_v63 = vmul.f32 1.442695, %v10308_v35 }
0x34c9   :  { %14022 = vpow2.f32 %v10309_v63 }
0x34ce   :  { %10479 = vrot.lane.b32.xlu1 %v16697_v62, %s14934_s23 }
0x34d3   :  { %v14023_v10 = vpop.eup %14022 }
0x34d4   :  { %v10311_v3 = vsel %vm1049_vm8, %v14023_v10, 0.0 }
0x34f2   :  { %10312 = vadd.xlane.f32.xlu1 %v10311_v3 }
0x3536   :  { %v10469_v4 = vpop.xlane.xlu0 %10468 }
0x3537   :  { %v10470_v61 = vsub.f32 %v10464_v32, %v10469_v4 }
0x3539   :  { %v10471_v7 = vmul.f32 1.442695, %v10470_v61 }
0x353a   :  { %v10635_v43 = vpop.xlane.xlu0 %10634 }
0x353b   :  { %14024 = vpow2.f32 %v10471_v7  ;;  %v10636_v8 = vsub.f32 %v10630_v37, %v10635_v43 }
0x353d   :  { %v10637_v15 = vmul.f32 1.442695, %v10636_v8 }
0x353e   :  { %v10800_v13 = vpop.xlane.xlu0 %10799 }
0x353f   :  { %14026 = vpow2.f32 %v10637_v15  ;;  %v10801_v14 = vsub.f32 %v10795_v6, %v10800_v13 }
0x3541   :  { %v10802_v19 = vmul.f32 1.442695, %v10801_v14 }
0x3542   :  { %v10978_v27 = vpop.xlane.xlu1 %10977 }
0x3543   :  { %14028 = vpow2.f32 %v10802_v19  ;;  %v10979_v24 = vsub.f32 %v10973_v44, %v10978_v27 }
0x3545   :  { %v14025_v20 = vpop.eup %14024  ;;  %v10980_v38 = vmul.f32 1.442695, %v10979_v24 }
0x3546   :  { %v10473_v21 = vsel %vm1049_vm8, %v14025_v20, 0.0  ;;  %v11140_v2 = vpop.xlane.xlu0 %11139 }
0x3547   :  { %10474 = vadd.xlane.f32.xlu0 %v10473_v21  ;;  %v11141_v28 = vsub.f32 %v11135_v49, %v11140_v2  ;;  %14030 = vpow2.f32 %v10980_v38  ;;  %v13773_v2 = vld [vmem:[#allocation39 + $0x18] sm:$0xff]  }
0x3549   :  { %v14027_v23 = vpop.eup %14026  ;;  %v11142_v29 = vmul.f32 1.442695, %v11141_v28 }
0x354a   :  { %v10639_v50 = vsel %vm1049_vm8, %v14027_v23, 0.0  ;;  %v11306_v16 = vpop.xlane.xlu1 %11305 }
0x354b   :  { %10640 = vadd.xlane.f32.xlu1 %v10639_v50  ;;  %v11307_v22 = vsub.f32 %v11301_v1, %v11306_v16  ;;  %14032 = vpow2.f32 %v11142_v29 }
0x354d   :  { %v16761_v25 = vpop.eup %14028  ;;  %v11308_v31 = vmul.f32 1.442695, %v11307_v22 }
0x354e   :  { %v10804_v18 = vsel %vm1049_vm8, %v16761_v25, 0.0  ;;  %v11471_v11 = vpop.xlane.xlu0 %11470  ;;  %v10480_v33 = vpop.permute.xlu1 %10479 }
0x354f   :  { %10805 = vadd.xlane.f32.xlu0 %v10804_v18  ;;  %v11472_v30 = vsub.f32 %v11466_v60, %v11471_v11  ;;  %14034 = vpow2.f32 %v11308_v31 }
0x3551   :  { %v11473_v32 = vmul.f32 1.442695, %v11472_v30  ;;  %v14031_v34 = vpop.eup %14030 }
0x3552   :  { %v10982_v39 = vsel %vm1049_vm8, %v14031_v34, 0.0 }
0x3553   :  { %14036 = vpow2.f32 %v11473_v32 }
0x355c   :  { %10809 = vrot.lane.b32.xlu1 %v16697_v62, %s14936_s4 }
0x3560   :  { %11150 = vrot.lane.b32.xlu1 %v16699_v17, %s14934_s23 }
0x3565   :  { %10644 = vrot.lane.b32.xlu0 %v16697_v62, %s14935_s29  ;;  %v14033_v62 = vpop.eup %14032 }
0x3566   :  { %v16771_v37 = vpop.eup %14034  ;;  %v11144_v40 = vsel %vm1049_vm8, %v14033_v62, 0.0 }
0x3567   :  { %v16775_v41 = vpop.eup %14036  ;;  %v11310_v6 = vsel %vm1049_vm8, %v16771_v37, 0.0 }
0x3568   :  { %v11475_v5 = vsel %vm1049_vm8, %v16775_v41, 0.0 }
0x357f   :  { %v10313_v36 = vpop.xlane.xlu1 %10312 }
0x3580   :  { %14038 = vrcp.f32 %v10313_v36 }
0x3584   :  { %10983 = vadd.xlane.f32.xlu1 %v10982_v39  ;;  %11145 = vadd.xlane.f32.xlu0 %v11144_v40 }
0x3588   :  { %11311 = vadd.xlane.f32.xlu1 %v11310_v6  ;;  %11476 = vadd.xlane.f32.xlu0 %v11475_v5 }
0x358a   :  { %v14039_v47 = vpop.eup %14038 }
0x358b   :  { %v10315_v42 = vmul.f32 %v14039_v47, %v14023_v10 }
0x358d   :  { %13408 = vmatmul.mubr.msk.f32.vlgmr.msra.gmra.mrb[148].mxu0 %vm1049_vm8, %v10315_v42 }
0x358e   :  { %13416 = vmatpush3.msra.mxu0 %v10480_v33  ;;  %13417 = vmatprep.mubr.msk.f32.mxu0 %vm14933_vm3, %v14932_v26 }
0x358f   :  { %13425 = vmatprep.subr.mxu0 %v14932_v26 }
0x3599   :  { %11315 = vrot.lane.b32.xlu1 %v16699_v17, %s14935_s29 }
0x359e   :  { %11480 = vrot.lane.b32.xlu0 %v16699_v17, %s14936_s4 }
0x35d4   :  { %v10475_v58 = vpop.xlane.xlu0 %10474 }
0x35d5   :  { %14040 = vrcp.f32 %v10475_v58 }
0x35d8   :  { %v10641_v44 = vpop.xlane.xlu1 %10640 }
0x35d9   :  { %14042 = vrcp.f32 %v10641_v44 }
0x35dc   :  { %v10806_v45 = vpop.xlane.xlu0 %10805  ;;  %v10810_v54 = vpop.permute.xlu1 %10809 }
0x35dd   :  { %14044 = vrcp.f32 %v10806_v45  ;;  %v12411_v45 = vld [vmem:[#allocation40 + $0x1] ss:$0 sm:$0xff] }
0x35df   :  { %v14041_v46 = vpop.eup %14040 }
0x35e0   :  { %v10477_v48 = vmul.f32 %v14041_v46, %v14025_v20  ;;  %v10645_v49 = vpop.permute.xlu0 %10644  ;;  %v11151_v56 = vpop.permute.xlu1 %11150 }
0x35e2   :  { %13418 = vmatmul.mubr.msk.f32.vlgmr.msra.gmra.mrb[150].mxu0 %vm1049_vm8, %v10477_v48 }
0x35e3   :  { %v14043_v51 = vpop.eup %14042  ;;  %13426 = vmatpush3.msra.mxu0 %v10645_v49  ;;  %13427 = vmatprep.mubr.msk.f32.mxu0 %vm14933_vm3, %v14932_v26 }
0x35e4   :  { %v10643_v52 = vmul.f32 %v14043_v51, %v14027_v23  ;;  %13435 = vmatprep.subr.mxu0 %v14932_v26 }
0x35e6   :  { %13428 = vmatmul.mubr.msk.f32.vlgmr.msra.gmra.mrb[152].mxu0 %vm1049_vm8, %v10643_v52 }
0x35e7   :  { %v14045_v1 = vpop.eup %14044  ;;  %13436 = vmatpush3.msra.mxu0 %v10810_v54  ;;  %13437 = vmatprep.mubr.msk.f32.mxu0 %vm14933_vm3, %v14932_v26 }
0x35e8   :  { %v10808_v55 = vmul.f32 %v14045_v1, %v16761_v25  ;;  %13445 = vmatprep.subr.mxu0 %v14932_v26  ;;  %v13772_v25 = vld [vmem:[#allocation39 + $0x10] sm:$0xff]  }
0x35e9   :  { %13481 = vmatpush3.bf16.msra.mxu1 %v13772_v25 }
0x35ea   :  { %13438 = vmatmul.mubr.msk.f32.vlgmr.msra.gmra.mrb[154].mxu0 %vm1049_vm8, %v10808_v55  ;;  %13482 = vmatprep.subr.bf16.mxu1 %v14932_v26 }
0x35eb   :  { %13446 = vmatpush3.msra.mxu0 %v16699_v17  ;;  %13447 = vmatprep.mubr.msk.f32.mxu0 %vm14933_vm3, %v14932_v26 }
0x35ec   :  { %13455 = vmatprep.subr.mxu0 %v14932_v26 }
0x35ed   :  { %13483 = vmatpush3.bf16.msra.mxu1 %v13773_v2 }
0x35ee   :  { %13496 = vmatprep.subr.bf16.mxu1 %v14932_v26 }
0x3611   :  { %v10984_v57 = vpop.xlane.xlu1 %10983  ;;  %v11146_v60 = vpop.xlane.xlu0 %11145 }
0x3612   :  { %14046 = vrcp.f32 %v10984_v57 }
0x3613   :  { %14048 = vrcp.f32 %v11146_v60 }
0x3615   :  { %v11312_v12 = vpop.xlane.xlu1 %11311  ;;  %v11477_v0 = vpop.xlane.xlu0 %11476 }
0x3616   :  { %14050 = vrcp.f32 %v11312_v12 }
0x3617   :  { %14052 = vrcp.f32 %v11477_v0 }
0x3619   :  { %v11316_v3 = vpop.permute.xlu1 %11315  ;;  %v11481_v7 = vpop.permute.xlu0 %11480 }
0x361c   :  { %v14047_v59 = vpop.eup %14046 }
0x361d   :  { %v10986_v35 = vmul.f32 %v14047_v59, %v14031_v34  ;;  %v14049_v63 = vpop.eup %14048 }
0x361e   :  { %v11148_v17 = vmul.f32 %v14049_v63, %v14033_v62 }
0x361f   :  { %13448 = vmatmul.mubr.msk.f32.vlgmr.msra.gmra.mrb[156].mxu0 %vm1049_vm8, %v10986_v35 }
0x3620   :  { %13456 = vmatpush3.msra.mxu0 %v11151_v56  ;;  %13457 = vmatprep.mubr.msk.f32.mxu0 %vm14933_vm3, %v14932_v26  ;;  %v14051_v10 = vpop.eup %14050 }
0x3621   :  { %13465 = vmatprep.subr.mxu0 %v14932_v26  ;;  %v11314_v4 = vmul.f32 %v14051_v10, %v16771_v37  ;;  %v14053_v61 = vpop.eup %14052 }
0x3622   :  { %v11479_v43 = vmul.f32 %v14053_v61, %v16775_v41  ;;  %v13776_v61 = vld [vmem:[%s16993_s6 + $0x20] sm:$0xff]  }
0x3623   :  { %13458 = vmatmul.mubr.msk.f32.vlgmr.msra.gmra.mrb[158].mxu0 %vm1049_vm8, %v11148_v17 }
0x3624   :  { %13466 = vmatpush3.msra.mxu0 %v11316_v3  ;;  %13467 = vmatprep.mubr.msk.f32.mxu0 %vm14933_vm3, %v14932_v26  ;;  %v13774_v3 = vld [vmem:[#allocation45 + $0x10] sm:$0xff]  }
0x3625   :  { %13475 = vmatprep.subr.mxu0 %v14932_v26 }
0x3627   :  { %13468 = vmatmul.mubr.msk.f32.vlgmr.msra.gmra.mrb[160].mxu0 %vm1049_vm8, %v11314_v4  ;;  %v13775_v4 = vld [vmem:[#allocation45 + $0x18] sm:$0xff]  }
0x3628   :  { %13476 = vmatpush3.msra.mxu0 %v11481_v7  ;;  %13477 = vmatprep.mubr.msk.f32.mxu0 %vm14933_vm3, %v14932_v26  ;;  %v13777_v7 = vld [vmem:[%s16993_s6 + $0x28] sm:$0xff]  }
0x3629   :  { %13488 = vmatprep.subr.bf16.mxu0 %v14932_v26 }
0x362b   :  { %13478 = vmatmul.mubr.msk.f32.vlgmr.msra.gmra.mrb[162].mxu0 %vm1049_vm8, %v11479_v43 }
0x362c   :  { %13492 = vmatprep.mubr.msk.bf16.mxu0 %vm14933_vm3, %v14932_v26  ;;  %13489 = vmatpush3.bf16.msra.mxu0 %v13774_v3 }
0x362d   :  { %13490 = vmatprep.subr.bf16.mxu0 %v14932_v26 }
0x3630   :  { %13491 = vmatpush3.bf16.msra.mxu0 %v13775_v4  ;;  %v13780_v4 = vld [vmem:[%s15227_s5] sm:$0xff]  }
0x3631   :  { %13508 = vmatprep.subr.bf16.mxu0 %v14932_v26 }
0x3660   :  { %v10385_v8 = vpop.f32.mrb[148].mxu0 }
0x3661   :  { %v13409_v15 = vpop.f32.mrb[149].mxu0 }
0x36b5   :  { %v10551_v13 = vpop.f32.mrb[150].mxu0 }
0x36b6   :  { %v13419_v14 = vpop.f32.mrb[151].mxu0 }
0x36b9   :  { %v10716_v19 = vpop.f32.mrb[152].mxu0 }
0x36ba   :  { %v13429_v20 = vpop.f32.mrb[153].mxu0 }
0x36bd   :  { %v10881_v21 = vpop.f32.mrb[154].mxu0 }
0x36be   :  { %v13439_v23 = vpop.f32.mrb[155].mxu0 }
0x36f2   :  { %v11056_v50 = vpop.f32.mrb[156].mxu0 }
0x36f3   :  { %v13449_v18 = vpop.f32.mrb[157].mxu0 }
0x36f6   :  { %v11222_v27 = vpop.f32.mrb[158].mxu0 }
0x36f7   :  { %v13693_v24 = vpack.i.bf16 %v11222_v27, %v10551_v13  ;;  %v13459_v28 = vpop.f32.mrb[159].mxu0 }
0x36f9   :  { %13694 = vrot.lane.b32.xlu1 %v13693_v24, %s14937_s13 }
0x36fa   :  { %v11387_v16 = vpop.f32.mrb[160].mxu0 }
0x36fb   :  { %v13698_v11 = vpack.i.bf16 %v11387_v16, %v10716_v19  ;;  %v13469_v38 = vpop.f32.mrb[161].mxu0  ;;  %v12415_v16 = vld [vmem:[#allocation42 + $0x1] ss:$0 sm:$0xff] }
0x36fd   :  { %13699 = vrot.lane.b32.xlu0 %v13698_v11, %s14897_s26 }
0x36fe   :  { %v11552_v22 = vpop.f32.mrb[162].mxu0 }
0x36ff   :  { %v13703_v29 = vpack.i.bf16 %v11552_v22, %v10881_v21  ;;  %v13479_v30 = vpop.f32.mrb[163].mxu0 }
0x3701   :  { %13704 = vrot.lane.b32.xlu1 %v13703_v29, %s14938_s9 }
0x376b   :  { %v13695_v31 = vpop.permute.xlu1 %13694 }
0x376c   :  { %v13697_v33 = vunpack.i.h.bf16 %v13695_v31  ;;  %v13696_v34 = vunpack.i.l.bf16 %v13695_v31  ;;  %v12416_v31 = vld [vmem:[#allocation43 + $0x1] ss:$0 sm:$0xff] }
0x376e   :  { %v11568_v39 = vsel %vm1049_vm8, %v11056_v50, %v13697_v33  ;;  %v10897_v40 = vsel %vm1049_vm8, %v10385_v8, %v13696_v34 }
0x376f   :  { %v13700_v32 = vpop.permute.xlu0 %13699 }
0x3770   :  { %v13702_v36 = vunpack.i.h.bf16 %v13700_v32  ;;  %v13701_v62 = vunpack.i.l.bf16 %v13700_v32 }
0x3772   :  { %v11569_v5 = vsel %vm1719_vm9, %v11568_v39, %v13702_v36  ;;  %v10898_v47 = vsel %vm1719_vm9, %v10897_v40, %v13701_v62  ;;  %v13778_v62 = vld [vmem:[%s16993_s6 + $0x30] sm:$0xff]  }
0x3773   :  { %v13705_v37 = vpop.permute.xlu1 %13704  ;;  %v12425_v39 = vld [vmem:[#allocation46 + $0x1] ss:$0 sm:$0xff] }
0x3774   :  { %v13707_v41 = vunpack.i.h.bf16 %v13705_v37  ;;  %v13706_v6 = vunpack.i.l.bf16 %v13705_v37  ;;  %v13779_v37 = vld [vmem:[%s16993_s6 + $0x38] sm:$0xff]  }
0x3776   :  { %v10899_v42 = vsel %vm1721_vm10, %v10898_v47, %v13706_v6  ;;  %v11570_v58 = vsel %vm1721_vm10, %v11569_v5, %v13707_v41 }
0x3777   :  { %v11571_v44 = vpack.c.bf16 %v11570_v58, %v10899_v42 }
0x3779   :  { %13485 = vmatmul.mubr.msk.bf16.vlgmr.msra.gmra.mrb[148].mxu1 %vm783_vm2, %v11571_v44 }
0x377a   :  { %13504 = vmatprep.mubr.msk.bf16.mxu1 %vm14933_vm3, %v14932_v26  ;;  %13497 = vmatpush3.bf16.msra.mxu1 %v13776_v61  ;;  %v13781_v61 = vld [vmem:[%s15227_s5 + $0x8] sm:$0xff]  }
0x377b   :  { %13498 = vmatprep.subr.bf16.mxu1 %v14932_v26 }
0x377e   :  { %13499 = vmatpush3.bf16.msra.mxu1 %v13777_v7 }
0x377f   :  { %13500 = vmatprep.subr.bf16.mxu1 %v14932_v26 }
0x3782   :  { %13501 = vmatpush3.bf16.msra.mxu1 %v13778_v62 }
0x3783   :  { %13502 = vmatprep.subr.bf16.mxu1 %v14932_v26 }
0x3786   :  { %13503 = vmatpush3.bf16.msra.mxu1 %v13779_v37 }
0x384c   :  { %v11627_v46 = vpop.f32.mrb[148].mxu1 }
0x384d   :  { %v11628_v48 = vadd.f32 %v12411_v45, %v11627_v46  ;;  %v13486_v49 = vpop.f32.mrb[149].mxu1  ;;  %v12429_v46 = vld [vmem:[#allocation48 + $0x1] ss:$0 sm:$0xff] }
0x384e   :  { %v11630_v51 = vpop.f32.mrb[150].mxu1 }
0x384f   :  { %v16835_v52 = vadd.f32 %v11628_v48, %v16650_v53  ;;  %v11631_v54 = vadd.f32 %v12411_v45, %v11630_v51  ;;  %v13487_v1 = vpop.f32.mrb[151].mxu1 }
0x3851   :  { %v16838_v55 = vadd.f32 %v11631_v54, %v16653_v9  ;;  %v11640_v56 = vsel %vm783_vm2, %v16835_v52, 0.0 }
0x3852   :  { %11641 = vadd.xlane.f32.xlu0 %v11640_v56 }
0x3853   :  { %v11643_v57 = vsel %vm783_vm2, %v16838_v55, 0.0 }
0x3854   :  { %11644 = vadd.xlane.f32.xlu1 %v11643_v57 }
0x38df   :  { %v11642_v60 = vpop.xlane.xlu0 %11641 }
0x38e0   :  { %v11646_v12 = vmul.f32 0.03125, %v11642_v60 }
0x38e1   :  { %v11645_v0 = vpop.xlane.xlu1 %11644 }
0x38e2   :  { %v11648_v53 = vsub.f32 %v16835_v52, %v11646_v12  ;;  %v11647_v59 = vmul.f32 0.03125, %v11645_v0 }
0x38e4   :  { %v11649_v35 = vsub.f32 %v16838_v55, %v11647_v59  ;;  %v11650_v9 = vmul.f32 %v11648_v53, %v11648_v53  ;;  %v11666_v38 = vmul.f32 %v12415_v16, %v11648_v53 }
0x38e6   :  { %v11652_v63 = vsel %vm783_vm2, %v11650_v9, 0.0  ;;  %v11651_v17 = vmul.f32 %v11649_v35, %v11649_v35  ;;  %v11667_v22 = vmul.f32 %v12415_v16, %v11649_v35 }
0x38e7   :  { %11653 = vadd.xlane.f32.xlu0 %v11652_v63 }
0x38e8   :  { %v11655_v10 = vsel %vm783_vm2, %v11651_v17, 0.0 }
0x38eb   :  { %11656 = vadd.xlane.f32.xlu0 %v11655_v10 }
0x3974   :  { %v11654_v43 = vpop.xlane.xlu0 %11653 }
0x3975   :  { %v11658_v8 = vmul.f32 0.032258064, %v11654_v43 }
0x3977   :  { %14054 = vrsqrt.f32 %v11658_v8  ;;  %vm11670_vm8 = vcmp.eq.f32.partialorder %v11658_v8, inf  ;;  %v11673_v20 = vand.u32 2147483648, %v11658_v8  ;;  %vm11672_vm9 = vcmp.eq.f32.partialorder %v11658_v8, 0.0 }
0x3978   :  { %v11657_v15 = vpop.xlane.xlu0 %11656 }
0x3979   :  { %v11659_v13 = vmul.f32 0.032258064, %v11657_v15 }
0x397b   :  { %14056 = vrsqrt.f32 %v11659_v13  ;;  %vm11677_vm10 = vcmp.eq.f32.partialorder %v11659_v13, inf  ;;  %v11680_v27 = vand.u32 2147483648, %v11659_v13  ;;  %vm11679_vm6 = vcmp.eq.f32.partialorder %v11659_v13, 0.0 }
0x3981   :  { %v14055_v14 = vpop.eup %14054 }
0x3982   :  { %v11669_v19 = vmul.f32 %v14055_v14, %v11658_v8 }
0x3984   :  { %v11671_v21 = vsel %vm11670_vm8, %v11658_v8, %v11669_v19 }
0x3985   :  { %v14057_v23 = vpop.eup %14056  ;;  %v11674_v50 = vsel %vm11672_vm9, %v11673_v20, %v11671_v21 }
0x3986   :  { %v11682_v25 = vadd.f32 1e-06, %v11674_v50  ;;  %v11676_v18 = vmul.f32 %v14057_v23, %v11659_v13 }
0x3988   :  { %14058 = vrcp.f32 %v11682_v25  ;;  %v11678_v2 = vsel %vm11677_vm10, %v11659_v13, %v11676_v18 }
0x3989   :  { %v11681_v24 = vsel %vm11679_vm6, %v11680_v27, %v11678_v2 }
0x398a   :  { %v11683_v28 = vadd.f32 1e-06, %v11681_v24  ;;  %v12435_v24 = vld [vmem:[#allocation49] ss:$0 sm:$0xff] }
0x398c   :  { %14060 = vrcp.f32 %v11683_v28 }
0x3992   :  { %v14059_v11 = vpop.eup %14058 }
0x3993   :  { %v11685_v29 = vmul.f32 %v14059_v11, %v11666_v38 }
0x3995   :  { %v11694_v33 = vadd.f32 %v12416_v31, %v11685_v29  ;;  %v12436_v29 = vld [vmem:[#allocation51] ss:$0 sm:$0xff] }
0x3996   :  { %v14061_v30 = vpop.eup %14060 }
0x3997   :  { %v11687_v32 = vmul.f32 %v14061_v30, %v11667_v22 }
0x3999   :  { %v11695_v34 = vadd.f32 %v12416_v31, %v11687_v32 }
0x399b   :  { %v11714_v36 = vpack.c.bf16 %v11695_v34, %v11694_v33  ;;  %v12437_v34 = vld [vmem:[%s15232_s19] ss:$0 sm:$0xff] }
0x399d   :  { %13493 = vmatmul.mubr.msk.bf16.vlgmr.msra.gmra.mrb[164].mxu0 %vm783_vm2, %v11714_v36 }
0x399e   :  { %13512 = vmatprep.mubr.msk.bf16.mxu0 %vm14933_vm3, %v14932_v26  ;;  %13509 = vmatpush3.bf16.msra.mxu0 %v13780_v4 }
0x399f   :  { %13510 = vmatprep.subr.bf16.mxu0 %v14932_v26 }
0x39a2   :  { %13511 = vmatpush3.bf16.msra.mxu0 %v13781_v61 }
0x3a70   :  { %v11770_v40 = vpop.f32.mrb[164].mxu0 }
0x3a71   :  { %v11771_v41 = vadd.f32 %v12425_v39, %v11770_v40  ;;  %v13494_v6 = vpop.f32.mrb[165].mxu0 }
0x3a72   :  { %v11773_v5 = vpop.f32.mrb[166].mxu0 }
0x3a73   :  { %v11774_v47 = vadd.f32 %v12425_v39, %v11773_v5  ;;  %v13495_v42 = vpop.f32.mrb[167].mxu0  ;;  %v11777_v58 = vmax.f32 %v11771_v41, 0.0 }
0x3a75   :  { %v11778_v44 = vmax.f32 %v11774_v47, 0.0 }
0x3a77   :  { %v11779_v45 = vpack.c.bf16 %v11778_v44, %v11777_v58 }
0x3a79   :  { %13505 = vmatmul.mubr.msk.bf16.vlgmr.msra.gmra.mrb[152].mxu1 %vm2633_vm15, %v11779_v45 }
0x3b4c   :  { %v11847_v48 = vpop.f32.mrb[152].mxu1 }
0x3b4d   :  { %v11848_v49 = vadd.f32 %v12429_v46, %v11847_v48  ;;  %v13506_v51 = vpop.f32.mrb[153].mxu1 }
0x3b4e   :  { %v11850_v54 = vpop.f32.mrb[154].mxu1 }
0x3b4f   :  { %v11854_v1 = vadd.f32 %v11848_v49, %v16835_v52  ;;  %v11851_v56 = vadd.f32 %v12429_v46, %v11850_v54  ;;  %v13507_v57 = vpop.f32.mrb[155].mxu1 }
0x3b51   :  { %v11855_v60 = vadd.f32 %v11851_v56, %v16838_v55  ;;  %v11858_v12 = vsel %vm783_vm2, %v11854_v1, 0.0 }
0x3b52   :  { %11859 = vadd.xlane.f32.xlu0 %v11858_v12 }
0x3b53   :  { %v11861_v0 = vsel %vm783_vm2, %v11855_v60, 0.0 }
0x3b54   :  { %11862 = vadd.xlane.f32.xlu1 %v11861_v0 }
0x3bdf   :  { %v11860_v53 = vpop.xlane.xlu0 %11859 }
0x3be0   :  { %v11864_v59 = vmul.f32 0.03125, %v11860_v53 }
0x3be1   :  { %v11863_v35 = vpop.xlane.xlu1 %11862 }
0x3be2   :  { %v11866_v9 = vsub.f32 %v11854_v1, %v11864_v59  ;;  %v11865_v63 = vmul.f32 0.03125, %v11863_v35 }
0x3be4   :  { %v11867_v17 = vsub.f32 %v11855_v60, %v11865_v63  ;;  %v11868_v10 = vmul.f32 %v11866_v9, %v11866_v9  ;;  %v11884_v16 = vmul.f32 %v12435_v24, %v11866_v9 }
0x3be6   :  { %v11870_v52 = vsel %vm783_vm2, %v11868_v10, 0.0  ;;  %v11869_v3 = vmul.f32 %v11867_v17, %v11867_v17  ;;  %v11885_v11 = vmul.f32 %v12435_v24, %v11867_v17 }
0x3be7   :  { %11871 = vadd.xlane.f32.xlu0 %v11870_v52 }
0x3be8   :  { %v11873_v55 = vsel %vm783_vm2, %v11869_v3, 0.0 }
0x3be9   :  { %11874 = vadd.xlane.f32.xlu1 %v11873_v55 }
0x3c74   :  { %v11872_v7 = vpop.xlane.xlu0 %11871 }
0x3c75   :  { %v11876_v43 = vmul.f32 0.032258064, %v11872_v7 }
0x3c76   :  { %v11875_v8 = vpop.xlane.xlu1 %11874 }
0x3c77   :  { %14062 = vrsqrt.f32 %v11876_v43  ;;  %v11877_v15 = vmul.f32 0.032258064, %v11875_v8  ;;  %vm11888_vm3 = vcmp.eq.f32.partialorder %v11876_v43, inf  ;;  %v11891_v19 = vand.u32 2147483648, %v11876_v43 }
0x3c78   :  { %vm11890_vm15 = vcmp.eq.f32.partialorder %v11876_v43, 0.0 }
0x3c79   :  { %14064 = vrsqrt.f32 %v11877_v15  ;;  %vm11895_vm7 = vcmp.eq.f32.partialorder %v11877_v15, inf  ;;  %v11898_v18 = vand.u32 2147483648, %v11877_v15  ;;  %vm11897_vm11 = vcmp.eq.f32.partialorder %v11877_v15, 0.0 }
0x3c81   :  { %v14063_v13 = vpop.eup %14062 }
0x3c82   :  { %v11887_v14 = vmul.f32 %v14063_v13, %v11876_v43 }
0x3c83   :  { %v14065_v20 = vpop.eup %14064 }
0x3c84   :  { %v11889_v21 = vsel %vm11888_vm3, %v11876_v43, %v11887_v14  ;;  %v11894_v50 = vmul.f32 %v14065_v20, %v11877_v15 }
0x3c85   :  { %v11892_v23 = vsel %vm11890_vm15, %v11891_v19, %v11889_v21 }
0x3c86   :  { %v11900_v25 = vadd.f32 1e-06, %v11892_v23  ;;  %v11896_v26 = vsel %vm11895_vm7, %v11877_v15, %v11894_v50 }
0x3c87   :  { %v11899_v27 = vsel %vm11897_vm11, %v11898_v18, %v11896_v26 }
0x3c88   :  { %14066 = vrcp.f32 %v11900_v25  ;;  %v11901_v2 = vadd.f32 1e-06, %v11899_v27 }
0x3c8a   :  { %14068 = vrcp.f32 %v11901_v2 }
0x3c92   :  { %v14067_v28 = vpop.eup %14066 }
0x3c93   :  { %v11903_v38 = vmul.f32 %v14067_v28, %v11884_v16 }
0x3c94   :  { %v14069_v22 = vpop.eup %14068 }
0x3c95   :  { %v11905_v30 = vmul.f32 %v14069_v22, %v11885_v11  ;;  %v11912_v31 = vadd.f32 %v12436_v29, %v11903_v38 }
0x3c97   :  { %v11913_v32 = vadd.f32 %v12436_v29, %v11905_v30 }
0x3c99   :  { %v11918_v33 = vpack.c.bf16 %v11913_v32, %v11912_v31 }
0x3c9b   :  { %13513 = vmatmul.mubr.msk.bf16.vlgmr.msra.gmra.mrb[168].mxu0 %vm783_vm2, %v11918_v33 }
0x3d6e   :  { %v11975_v36 = vpop.f32.mrb[168].mxu0 }
0x3d6f   :  { %v11976_v62 = vadd.f32 %v12437_v34, %v11975_v36  ;;  %v13514_v37 = vpop.f32.mrb[169].mxu0 }
0x3d70   :  { %v11978_v39 = vpop.f32.mrb[170].mxu0 }
0x3d71   :  { %11982 = vst [vmem:[%s15237_s21] sm:$0xff] %v11976_v62  ;;  %v11979_v40 = vadd.f32 %v12437_v34, %v11978_v39  ;;  %v13515_v41 = vpop.f32.mrb[171].mxu0 }
0x3d73   :  { %11983 = vst [vmem:[%s15237_s21 + $0x8] sm:$0xff] %v11979_v40 }
0x3d74   :  { %11988 = vsyncpa [#allocation3], 1 }
0x3d75   :  { %11989 = vsyncpa [#allocation5], 1 }
0x3d76   :  { %11990 = vsyncpa [#allocation8], 1 }
0x3d77   :  { %11991 = vsyncpa [#allocation11], 1 }
0x3d78   :  { %11992 = vsyncpa [#allocation14], 1 }
0x3d79   :  { %11993 = vsyncpa [#allocation17], 1 }
0x3d7a   :  { %11994 = vsyncpa [#allocation20], 1 }
0x3d7b   :  { %11995 = vsyncpa [#allocation23], 1 }
0x3d7c   :  { %11996 = vsyncpa [#allocation26], 1 }
0x3d7d   :  { %11997 = vsyncpa [#allocation29], 1 }
0x3d7e   :  { %11998 = vsyncpa [#allocation32], 1 }
0x3d7f   :  { %11999 = vsyncpa [#allocation35], 1 }
0x3d80   :  { %12000 = vsyncpa [#allocation38], 1 }
0x3d81   :  { %12001 = vsyncpa [#allocation41], 1 }
0x3d82   :  { %12002 = vsyncpa [#allocation44], 1 }
0x3d83   :  { %12003 = vsyncpa [#allocation47], 1 }
0x3d84   :  { %12004 = vsyncpa [#allocation50], 1 }

</bundles_post_ra>
